<compile_context>
chip_gen: v7x
topology: tpu7x:2x2x1
jax: 0.10.0
libtpu: 0.0.40
codegen_flags: <defaults>
</compile_context>

<pallas_src>
import functools

import jax
import jax.numpy as jnp
from jax import lax
from jax.experimental import pallas as pl
from jax.experimental.pallas import tpu as pltpu

NUM_ERR_JOINTS = 14  # len(ERR_JOINTS)
ROWS = 8             # padded sublane rows per time block: fwd dir rows 0:4, bwd dir rows 4:8


# ----------------------------------------------------------------------------
# Fully fused forward kernel
# ----------------------------------------------------------------------------
def fused_kernel(x_ref, ex_ref,
                 ew1_ref, eb1_ref, ew2_ref, eb2_ref,
                 wih1_ref, b1_ref, whh1_ref,
                 b2_ref, we1_ref, be1_ref, we2_ref, be2_ref, whe_ref, bh_ref,
                 wih2_hbm, whh2_hbm, whg_hbm,
                 out_ref,
                 gx1_scr, gx2_scr, h1_scr,
                 wih2_buf, whh2_buf, whg_buf, dma_sem,
                 *, T, B, H):
    f32, bf16 = jnp.float32, jnp.bfloat16

    # ---- stream late-use weights (layer-2 + head) behind encoder / layer-1 work ----
    cp_wih2 = pltpu.make_async_copy(wih2_hbm, wih2_buf, dma_sem.at[0])
    cp_whh2 = pltpu.make_async_copy(whh2_hbm, whh2_buf, dma_sem.at[1])
    cp_whg = pltpu.make_async_copy(whg_hbm, whg_buf, dma_sem.at[2])
    cp_wih2.start()
    cp_whh2.start()
    cp_whg.start()

    # ---- frame encoder (k=3 conv on a length-1 sequence == centre-tap linear) ----
    x = x_ref[...].astype(bf16)                                            # (T*8, in_dim)
    e = jnp.maximum(
        jnp.dot(x, ew1_ref[...], preferred_element_type=f32) + eb1_ref[...], 0.0)
    feats = jnp.maximum(
        jnp.dot(e.astype(bf16), ew2_ref[...], preferred_element_type=f32)
        + eb2_ref[...], 0.0)                                               # (T*8, 512)

    # ---- layer-1 hoisted input projection (both directions + folded bias at once) ----
    gx1_scr[...] = (jnp.dot(feats.astype(bf16), wih1_ref[...],
                            preferred_element_type=f32) + b1_ref[...])     # (T*8, 8H)

    # constant masks, hoisted out of the unrolled recurrences
    mask_g = lax.broadcasted_iota(jnp.int32, (ROWS, 4 * H), 0) < 4
    mask_h = lax.broadcasted_iota(jnp.int32, (ROWS, H), 0) < 4

    def lstm_bidir(gx_scr, whh_ref, emit):
        """Both directions of one bi-LSTM layer, merged into one recurrent matmul/step.

        Step s advances the forward cell at time s (rows 0:4) and the backward cell
        at time T-1-s (rows 4:8) simultaneously:
          LHS  = [[h_f, 0], [0, h_b]]            (8, 2H)   block-diagonal
          Whh  = [whh_f; whh_b] stacked on K      (2H, 4H)
        so LHS @ Whh gives each direction its own recurrent term in one MXU pass.
        """
        hh = jnp.zeros((ROWS, H), f32)
        cc = jnp.zeros((ROWS, H), f32)
        for s in range(T):  # T small & static -> fully unrolled (LLO visibility)
            blk_f = gx_scr[s * 8:(s + 1) * 8, 0:4 * H]                     # fwd gates, time s
            blk_b = gx_scr[(T - 1 - s) * 8:(T - s) * 8, 4 * H:8 * H]       # bwd gates, time T-1-s
            # rows 0:4 <- fwd, rows 4:8 <- bwd (roll is off the serial critical path)
            gxs = jnp.where(mask_g, blk_f, pltpu.roll(blk_b, shift=4, axis=0))
            hb = hh.astype(bf16)
            lhs = jnp.concatenate(
                [jnp.where(mask_h, hb, 0.0), jnp.where(mask_h, 0.0, hb)], axis=1)
            g = gxs + jnp.dot(lhs, whh_ref[...], preferred_element_type=f32)   # (8, 4H)
            i_g = jax.nn.sigmoid(g[:, 0:H])          # PyTorch gate order (i, f, g, o)
            f_g = jax.nn.sigmoid(g[:, H:2 * H])
            g_g = jnp.tanh(g[:, 2 * H:3 * H])
            o_g = jax.nn.sigmoid(g[:, 3 * H:4 * H])
            cc = f_g * cc + i_g * g_g                # f32 gate math / accumulators
            hh = o_g * jnp.tanh(cc)
            emit(s, hh)

    # layer-1: per-time [h_f | h_b] rows go to VMEM scratch as full aligned 8-row tiles
    def emit_layer1(s, hv):
        h1_scr[s * 8:(s + 1) * 8, 0:H] = hv                                   # h_f(s)
        h1_scr[(T - 1 - s) * 8:(T - s) * 8, H:2 * H] = pltpu.roll(hv, shift=4, axis=0)  # h_b(T-1-s)

    lstm_bidir(gx1_scr, whh1_ref, emit_layer1)

    # ---- layer-2 hoisted projection (streamed weight), then merged recurrence ----
    cp_wih2.wait()
    gx2_scr[...] = (jnp.dot(h1_scr[...].astype(bf16), wih2_buf[...],
                            preferred_element_type=f32) + b2_ref[...])        # (T*8, 8H)

    cp_whh2.wait()
    acc = [jnp.zeros((ROWS, H), f32)]

    def emit_layer2(s, hv):  # temporal mean accumulated on the fly, no (B,T,2H) intermediate
        acc[0] = acc[0] + hv

    lstm_bidir(gx2_scr, whh2_buf, emit_layer2)

    # rows 0:B = [sum_t h_f(t) | sum_t h_b(t)]; scale by 1/T for the temporal mean
    g_fb = jnp.concatenate(
        [acc[0], pltpu.roll(acc[0], shift=4, axis=0)], axis=1) * (1.0 / T)    # (8, 2H)

    # ---- exercise-embedding MLP (rows padded to 8 in the wrapper) ----
    e1 = jnp.maximum(
        jnp.dot(ex_ref[...].astype(bf16), we1_ref[...],
                preferred_element_type=f32) + be1_ref[...], 0.0)
    ex_e = jnp.dot(e1.astype(bf16), we2_ref[...],
                   preferred_element_type=f32) + be2_ref[...]                 # (8, ex_emb)

    # ---- fused heads: cat([g, ex_e]) @ W == g @ Wg + ex_e @ We ; cols = [cls|err|ex|pad] ----
    cp_whg.wait()
    out_ref[...] = (jnp.dot(g_fb.astype(bf16), whg_buf[...], preferred_element_type=f32)
                    + jnp.dot(ex_e.astype(bf16), whe_ref[...], preferred_element_type=f32)
                    + bh_ref[...])                                            # (8, HD_PAD)


# ----------------------------------------------------------------------------
# Wrapper: one jitted function, one pallas_call for the whole forward pass
# ----------------------------------------------------------------------------
@jax.jit
def pose_quality_net_kp(kp, seq, ex_1h):
    B, T, in_dim = seq.shape
    H = kp["whh1"].shape[0] // 2
    num_ex = ex_1h.shape[1]
    HD = 2 + NUM_ERR_JOINTS + num_ex
    HD_PAD = kp["bh"].shape[1]
    assert B <= 4, "merged bi-directional layout packs fwd/bwd into 4+4 sublane rows"
    assert H % 128 == 0, "hidden must be a multiple of 128 (lane-aligned gate slices)"

    # padded time-major frames: block t = [seq[:, t]; zeros]  -> (T*8, in_dim)
    x_tm = jnp.transpose(seq, (1, 0, 2))
    x_pad = jnp.concatenate([x_tm, jnp.zeros((T, ROWS - B, in_dim), seq.dtype)], axis=1)
    x_pad = x_pad.reshape(T * ROWS, in_dim)
    ex_pad = jnp.concatenate([ex_1h, jnp.zeros((ROWS - B, num_ex), ex_1h.dtype)], axis=0)

    args = (x_pad, ex_pad,
            kp["enc_w1"], kp["enc_b1"], kp["enc_w2"], kp["enc_b2"],
            kp["wih1"], kp["b1"], kp["whh1"],
            kp["b2"], kp["we1"], kp["be1"], kp["we2"], kp["be2"], kp["wh_e"], kp["bh"],
            kp["wih2"], kp["whh2"], kp["wh_g"])          # last 3 are streamed from HBM
    n_streamed = 3

    out = pl.pallas_call(
        functools.partial(fused_kernel, T=T, B=B, H=H),
        out_shape=jax.ShapeDtypeStruct((ROWS, HD_PAD), jnp.float32),
        in_specs=([pl.BlockSpec(memory_space=pltpu.MemorySpace.VMEM)] * (len(args) - n_streamed)
                  + [pl.BlockSpec(memory_space=pl.ANY)] * n_streamed),
        out_specs=pl.BlockSpec(memory_space=pltpu.MemorySpace.VMEM),
        scratch_shapes=[
            pltpu.VMEM((T * ROWS, 8 * H), jnp.float32),    # layer-1 hoisted gates
            pltpu.VMEM((T * ROWS, 8 * H), jnp.float32),    # layer-2 hoisted gates
            pltpu.VMEM((T * ROWS, 2 * H), jnp.float32),    # layer-1 bi-dir output
            pltpu.VMEM((2 * H, 8 * H), jnp.bfloat16),      # streamed wih2
            pltpu.VMEM((2 * H, 4 * H), jnp.bfloat16),      # streamed whh2 (stacked dirs)
            pltpu.VMEM((2 * H, HD_PAD), jnp.bfloat16),     # streamed head wh_g
            pltpu.SemaphoreType.DMA((3,)),
        ],
    )(*args)

    return (out[:B, :2],
            out[:B, 2:2 + NUM_ERR_JOINTS],
            out[:B, 2 + NUM_ERR_JOINTS:HD])


# ----------------------------------------------------------------------------
# One-time conversion of f32 reference params into the kernel layout
# ----------------------------------------------------------------------------
def prepare_kernel_params(p):
    """bf16 weight storage, stacked recurrent weights, lane-padded fused heads."""
    bf16 = jnp.bfloat16
    hd = p["bh"].shape[1]
    hd_pad = ((hd + 127) // 128) * 128

    def pad_cols(a):
        if a.shape[1] == hd_pad:
            return a
        return jnp.concatenate([a, jnp.zeros((a.shape[0], hd_pad - a.shape[1]), a.dtype)], axis=1)

    return {
        "enc_w1": p["enc_w1"].astype(bf16), "enc_b1": p["enc_b1"],
        "enc_w2": p["enc_w2"].astype(bf16), "enc_b2": p["enc_b2"],
        "wih1": p["wih1"].astype(bf16), "b1": p["b1"],
        "whh1": jnp.concatenate([p["whh1_f"], p["whh1_b"]], axis=0).astype(bf16),
        "wih2": p["wih2"].astype(bf16), "b2": p["b2"],
        "whh2": jnp.concatenate([p["whh2_f"], p["whh2_b"]], axis=0).astype(bf16),
        "we1": p["we1"].astype(bf16), "be1": p["be1"],
        "we2": p["we2"].astype(bf16), "be2": p["be2"],
        # fused head columns = [cls(2) | err(14) | ex(num_ex)], zero-padded to a lane-dense
        # width.  NOTE: wh_e must keep an exactly-zero ex block (ex_head only sees g);
        # init_params enforces this, a PyTorch weight importer must do the same.
        "wh_g": pad_cols(p["wh_g"]).astype(bf16),
        "wh_e": pad_cols(p["wh_e"]).astype(bf16),
        "bh": pad_cols(p["bh"]),
    }


# ----------------------------------------------------------------------------
# Pure-JAX reference (same math, f32, no Pallas) for a correctness check
# ----------------------------------------------------------------------------
def reference_forward(p, seq, ex_1h):
    B, T, in_dim = seq.shape
    H = p["whh1_f"].shape[0]

    x = seq.reshape(B * T, in_dim)
    h = jax.nn.relu(x @ p["enc_w1"] + p["enc_b1"])
    feats = jax.nn.relu(h @ p["enc_w2"] + p["enc_b2"]).reshape(B, T, -1)

    def cell(hh, cc, gx, whh):
        g = gx + hh @ whh
        i = jax.nn.sigmoid(g[:, :H])
        f = jax.nn.sigmoid(g[:, H:2 * H])
        gg = jnp.tanh(g[:, 2 * H:3 * H])
        o = jax.nn.sigmoid(g[:, 3 * H:])
        cc = f * cc + i * gg
        hh = o * jnp.tanh(cc)
        return hh, cc

    def layer(x_btd, wih, b, whh_f, whh_b):
        gx = jnp.einsum("btd,dk->btk", x_btd, wih) + b          # (B, T, 8H)
        hf = [None] * T
        hb = [None] * T
        hh = cc = jnp.zeros((B, H), jnp.float32)
        for t in range(T):
            hh, cc = cell(hh, cc, gx[:, t, :4 * H], whh_f)
            hf[t] = hh
        hh = cc = jnp.zeros((B, H), jnp.float32)
        for t in range(T - 1, -1, -1):
            hh, cc = cell(hh, cc, gx[:, t, 4 * H:], whh_b)
            hb[t] = hh
        return jnp.stack([jnp.concatenate([hf[t], hb[t]], -1) for t in range(T)], axis=1)

    o1 = layer(feats, p["wih1"], p["b1"], p["whh1_f"], p["whh1_b"])
    o2 = layer(o1, p["wih2"], p["b2"], p["whh2_f"], p["whh2_b"])
    g = o2.mean(axis=1)
    ex_e = jax.nn.relu(ex_1h @ p["we1"] + p["be1"]) @ p["we2"] + p["be2"]
    out = g @ p["wh_g"] + ex_e @ p["wh_e"] + p["bh"]
    return out[:, :2], out[:, 2:2 + NUM_ERR_JOINTS], out[:, 2 + NUM_ERR_JOINTS:]


# ----------------------------------------------------------------------------
# Deterministic synthetic parameter init (shapes follow the module __init__).
# ----------------------------------------------------------------------------
def init_params(key, in_dim, num_ex, hidden, ex_emb_dim, embed=512):
    keys = iter(jax.random.split(key, 64))

    def w(shape, scale):
        return jax.random.uniform(next(keys), shape, jnp.float32, -1.0, 1.0) * scale

    H = hidden
    p = {}
    # KeypointEncoder (centre taps of the k=3 conv weights act as linear layers)
    p["enc_w1"] = w((in_dim, 128), (in_dim * 3) ** -0.5)
    p["enc_b1"] = w((1, 128), (in_dim * 3) ** -0.5)
    p["enc_w2"] = w((128, embed), (128 * 3) ** -0.5)
    p["enc_b2"] = w((1, embed), (128 * 3) ** -0.5)

    # LSTM: 2 layers x 2 directions, gate order (i, f, g, o); b = b_ih + b_hh folded.
    # Both directions' input-to-hidden weights concatenated: wih = [Wih_f | Wih_b].
    s_h = H ** -0.5
    d_in = embed
    for layer_id in (1, 2):
        p[f"wih{layer_id}"] = w((d_in, 8 * H), s_h)
        p[f"b{layer_id}"] = w((1, 8 * H), s_h)
        p[f"whh{layer_id}_f"] = w((H, 4 * H), s_h)
        p[f"whh{layer_id}_b"] = w((H, 4 * H), s_h)
        d_in = 2 * H

    feat_dim = 2 * H
    s_cat = (feat_dim + ex_emb_dim) ** -0.5
    # ex_emb: Linear(num_ex, ex_emb) -> ReLU -> Linear(ex_emb, ex_emb)
    p["we1"] = w((num_ex, ex_emb_dim), num_ex ** -0.5)
    p["be1"] = w((1, ex_emb_dim), num_ex ** -0.5)
    p["we2"] = w((ex_emb_dim, ex_emb_dim), ex_emb_dim ** -0.5)
    p["be2"] = w((1, ex_emb_dim), ex_emb_dim ** -0.5)

    # Heads merged column-wise into one matmul: columns = [cls(2) | err(14) | ex(num_ex)],
    # split into the g-part and the ex_e-part (ex_head sees only g -> zero block for ex_e).
    wq_g = w((feat_dim, 2), s_cat)
    wq_e = w((ex_emb_dim, 2), s_cat)
    bq = w((1, 2), s_cat)
    werr_g = w((feat_dim, NUM_ERR_JOINTS), s_cat)
    werr_e = w((ex_emb_dim, NUM_ERR_JOINTS), s_cat)
    berr = w((1, NUM_ERR_JOINTS), s_cat)
    wex = w((feat_dim, num_ex), feat_dim ** -0.5)
    bex = w((1, num_ex), feat_dim ** -0.5)
    p["wh_g"] = jnp.concatenate([wq_g, werr_g, wex], axis=1)
    p["wh_e"] = jnp.concatenate(
        [wq_e, werr_e, jnp.zeros((ex_emb_dim, num_ex), jnp.float32)], axis=1)
    p["bh"] = jnp.concatenate([bq, berr, bex], axis=1)
    return p


if __name__ == "__main__":
    # small but module-consistent shapes
    B, T = 2, 8
    in_dim = 34          # e.g. 17 keypoints x 2 coords
    num_ex = 5
    hidden = 128         # PoseQualityNetKP(..., hidden=128); keep a multiple of 128
    ex_emb_dim = 64
    embed = 512          # fixed inside KeypointEncoder / LSTM input size

    key = jax.random.PRNGKey(0)
    k_seq, k_par = jax.random.split(key)
    seq = jax.random.normal(k_seq, (B, T, in_dim), jnp.float32)
    ex_1h = jax.nn.one_hot(jnp.array([1, 3]), num_ex, dtype=jnp.float32)

    params = init_params(k_par, in_dim, num_ex, hidden, ex_emb_dim, embed)
    kparams = prepare_kernel_params(params)   # one-time bf16 / packed / padded layout

    logits_q, err_hat, logits_ex = pose_quality_net_kp(kparams, seq, ex_1h)
    jax.block_until_ready((logits_q, err_hat, logits_ex))

    assert logits_q.shape == (B, 2)
    assert err_hat.shape == (B, NUM_ERR_JOINTS)
    assert logits_ex.shape == (B, num_ex)
    assert all(bool(jnp.isfinite(a).all()) for a in (logits_q, err_hat, logits_ex))

    # correctness vs. a pure-JAX f32 reference (loose tol: bf16 weight storage + MXU precision)
    q_ref, err_ref, ex_ref = reference_forward(params, seq, ex_1h)
    for got, ref in ((logits_q, q_ref), (err_hat, err_ref), (logits_ex, ex_ref)):
        assert bool(jnp.allclose(got, ref, rtol=5e-2, atol=5e-2))

    print("KERNEL_OK")
</pallas_src>

<mosaic_0001>
module attributes {stable_mosaic.version = 11 : i64} {
  func.func @fused_kernel(%arg0: memref<64x34xf32, #tpu.memory_space<vmem>>, %arg1: memref<8x5xf32, #tpu.memory_space<vmem>>, %arg2: memref<34x128xbf16, #tpu.memory_space<vmem>>, %arg3: memref<1x128xf32, #tpu.memory_space<vmem>>, %arg4: memref<128x512xbf16, #tpu.memory_space<vmem>>, %arg5: memref<1x512xf32, #tpu.memory_space<vmem>>, %arg6: memref<512x1024xbf16, #tpu.memory_space<vmem>>, %arg7: memref<1x1024xf32, #tpu.memory_space<vmem>>, %arg8: memref<256x512xbf16, #tpu.memory_space<vmem>>, %arg9: memref<1x1024xf32, #tpu.memory_space<vmem>>, %arg10: memref<5x64xbf16, #tpu.memory_space<vmem>>, %arg11: memref<1x64xf32, #tpu.memory_space<vmem>>, %arg12: memref<64x64xbf16, #tpu.memory_space<vmem>>, %arg13: memref<1x64xf32, #tpu.memory_space<vmem>>, %arg14: memref<64x128xbf16, #tpu.memory_space<vmem>>, %arg15: memref<1x128xf32, #tpu.memory_space<vmem>>, %arg16: memref<256x1024xbf16, #tpu.memory_space<any>>, %arg17: memref<256x512xbf16, #tpu.memory_space<any>>, %arg18: memref<256x128xbf16, #tpu.memory_space<any>>, %arg19: memref<8x128xf32, #tpu.memory_space<vmem>>, %arg20: memref<64x1024xf32, #tpu.memory_space<vmem>>, %arg21: memref<64x1024xf32, #tpu.memory_space<vmem>>, %arg22: memref<64x256xf32, #tpu.memory_space<vmem>>, %arg23: memref<256x1024xbf16, #tpu.memory_space<vmem>>, %arg24: memref<256x512xbf16, #tpu.memory_space<vmem>>, %arg25: memref<256x128xbf16, #tpu.memory_space<vmem>>, %arg26: memref<3x!tpu.dma_semaphore, #tpu.memory_space<semaphore_mem>>) attributes {dimension_semantics = [], scalar_prefetch = 0 : i64, scratch_operands = 7 : i64, tpu.core_type = #tpu.core_type<tc>} {
    %c0_i32 = arith.constant 0 : i32
    %0 = tpu.memref_slice %arg26[%c0_i32] : memref<3x!tpu.dma_semaphore, #tpu.memory_space<semaphore_mem>> -> memref<1x!tpu.dma_semaphore, #tpu.memory_space<semaphore_mem>>
    %1 = tpu.memref_squeeze %0 : memref<1x!tpu.dma_semaphore, #tpu.memory_space<semaphore_mem>> -> memref<!tpu.dma_semaphore, #tpu.memory_space<semaphore_mem>>
    tpu.enqueue_dma source(%arg16 : memref<256x1024xbf16, #tpu.memory_space<any>>) target(%arg23 : memref<256x1024xbf16, #tpu.memory_space<vmem>>) target_semaphore(%1 : memref<!tpu.dma_semaphore, #tpu.memory_space<semaphore_mem>>)
    %c1_i32 = arith.constant 1 : i32
    %2 = tpu.memref_slice %arg26[%c1_i32] : memref<3x!tpu.dma_semaphore, #tpu.memory_space<semaphore_mem>> -> memref<1x!tpu.dma_semaphore, #tpu.memory_space<semaphore_mem>>
    %3 = tpu.memref_squeeze %2 : memref<1x!tpu.dma_semaphore, #tpu.memory_space<semaphore_mem>> -> memref<!tpu.dma_semaphore, #tpu.memory_space<semaphore_mem>>
    tpu.enqueue_dma source(%arg17 : memref<256x512xbf16, #tpu.memory_space<any>>) target(%arg24 : memref<256x512xbf16, #tpu.memory_space<vmem>>) target_semaphore(%3 : memref<!tpu.dma_semaphore, #tpu.memory_space<semaphore_mem>>)
    %c2_i32 = arith.constant 2 : i32
    %4 = tpu.memref_slice %arg26[%c2_i32] : memref<3x!tpu.dma_semaphore, #tpu.memory_space<semaphore_mem>> -> memref<1x!tpu.dma_semaphore, #tpu.memory_space<semaphore_mem>>
    %5 = tpu.memref_squeeze %4 : memref<1x!tpu.dma_semaphore, #tpu.memory_space<semaphore_mem>> -> memref<!tpu.dma_semaphore, #tpu.memory_space<semaphore_mem>>
    tpu.enqueue_dma source(%arg18 : memref<256x128xbf16, #tpu.memory_space<any>>) target(%arg25 : memref<256x128xbf16, #tpu.memory_space<vmem>>) target_semaphore(%5 : memref<!tpu.dma_semaphore, #tpu.memory_space<semaphore_mem>>)
    %c0 = arith.constant 0 : index
    %c0_0 = arith.constant 0 : index
    %6 = vector.load %arg0[%c0, %c0_0] : memref<64x34xf32, #tpu.memory_space<vmem>>, vector<64x34xf32>
    %7 = arith.truncf %6 : vector<64x34xf32> to vector<64x34xbf16>
    %c0_1 = arith.constant 0 : index
    %c0_2 = arith.constant 0 : index
    %8 = vector.load %arg2[%c0_1, %c0_2] : memref<34x128xbf16, #tpu.memory_space<vmem>>, vector<34x128xbf16>
    %cst = arith.constant dense<0.000000e+00> : vector<64x128xf32>
    %9 = tpu.matmul %7, %8, %cst {dimension_numbers = #tpu.dot_dimension_numbers<[1], [0], [0], [1], [0, 0, 1, 1], [], []>} : vector<64x34xbf16>, vector<34x128xbf16>, vector<64x128xf32> -> vector<64x128xf32>
    %c0_3 = arith.constant 0 : index
    %c0_4 = arith.constant 0 : index
    %10 = vector.load %arg3[%c0_3, %c0_4] : memref<1x128xf32, #tpu.memory_space<vmem>>, vector<1x128xf32>
    %11 = vector.broadcast %10 : vector<1x128xf32> to vector<64x128xf32>
    %12 = arith.addf %9, %11 : vector<64x128xf32>
    %cst_5 = arith.constant 0.000000e+00 : f32
    %13 = vector.broadcast %cst_5 : f32 to vector<64x128xf32>
    %14 = arith.maximumf %12, %13 : vector<64x128xf32>
    %15 = arith.truncf %14 : vector<64x128xf32> to vector<64x128xbf16>
    %c0_6 = arith.constant 0 : index
    %c0_7 = arith.constant 0 : index
    %16 = vector.load %arg4[%c0_6, %c0_7] : memref<128x512xbf16, #tpu.memory_space<vmem>>, vector<128x512xbf16>
    %cst_8 = arith.constant dense<0.000000e+00> : vector<64x512xf32>
    %17 = tpu.matmul %15, %16, %cst_8 {dimension_numbers = #tpu.dot_dimension_numbers<[1], [0], [0], [1], [0, 0, 1, 1], [], []>} : vector<64x128xbf16>, vector<128x512xbf16>, vector<64x512xf32> -> vector<64x512xf32>
    %c0_9 = arith.constant 0 : index
    %c0_10 = arith.constant 0 : index
    %18 = vector.load %arg5[%c0_9, %c0_10] : memref<1x512xf32, #tpu.memory_space<vmem>>, vector<1x512xf32>
    %19 = vector.broadcast %18 : vector<1x512xf32> to vector<64x512xf32>
    %20 = arith.addf %17, %19 : vector<64x512xf32>
    %cst_11 = arith.constant 0.000000e+00 : f32
    %21 = vector.broadcast %cst_11 : f32 to vector<64x512xf32>
    %22 = arith.maximumf %20, %21 : vector<64x512xf32>
    %23 = arith.truncf %22 : vector<64x512xf32> to vector<64x512xbf16>
    %c0_12 = arith.constant 0 : index
    %c0_13 = arith.constant 0 : index
    %24 = vector.load %arg6[%c0_12, %c0_13] : memref<512x1024xbf16, #tpu.memory_space<vmem>>, vector<512x1024xbf16>
    %cst_14 = arith.constant dense<0.000000e+00> : vector<64x1024xf32>
    %25 = tpu.matmul %23, %24, %cst_14 {dimension_numbers = #tpu.dot_dimension_numbers<[1], [0], [0], [1], [0, 0, 1, 1], [], []>} : vector<64x512xbf16>, vector<512x1024xbf16>, vector<64x1024xf32> -> vector<64x1024xf32>
    %c0_15 = arith.constant 0 : index
    %c0_16 = arith.constant 0 : index
    %26 = vector.load %arg7[%c0_15, %c0_16] : memref<1x1024xf32, #tpu.memory_space<vmem>>, vector<1x1024xf32>
    %27 = vector.broadcast %26 : vector<1x1024xf32> to vector<64x1024xf32>
    %28 = arith.addf %25, %27 : vector<64x1024xf32>
    %c0_17 = arith.constant 0 : index
    %c0_18 = arith.constant 0 : index
    %29 = vector.load %arg20[%c0_17, %c0_18] : memref<64x1024xf32, #tpu.memory_space<vmem>>, vector<64x1024xf32>
    tpu.vector_store %arg20[%c0_17, %c0_18], %28 {strides = array<i32>} : memref<64x1024xf32, #tpu.memory_space<vmem>>, vector<64x1024xf32>,
    %30 = tpu.iota {dimensions = array<i32: 0>} : vector<8x512xi32>
    %c4_i32 = arith.constant 4 : i32
    %31 = vector.broadcast %c4_i32 : i32 to vector<8x512xi32>
    %32 = arith.cmpi slt, %30, %31 : vector<8x512xi32>
    %33 = tpu.iota {dimensions = array<i32: 0>} : vector<8x128xi32>
    %c4_i32_19 = arith.constant 4 : i32
    %34 = vector.broadcast %c4_i32_19 : i32 to vector<8x128xi32>
    %35 = arith.cmpi slt, %33, %34 : vector<8x128xi32>
    %cst_20 = arith.constant 0.000000e+00 : f32
    %36 = vector.broadcast %cst_20 : f32 to vector<8x128xf32>
    %cst_21 = arith.constant 0.000000e+00 : f32
    %37 = vector.broadcast %cst_21 : f32 to vector<8x128xf32>
    %c0_22 = arith.constant 0 : index
    %c0_23 = arith.constant 0 : index
    %38 = vector.load %arg20[%c0_22, %c0_23] : memref<64x1024xf32, #tpu.memory_space<vmem>>, vector<8x512xf32>
    %c56 = arith.constant 56 : index
    %c512 = arith.constant 512 : index
    %39 = vector.load %arg20[%c56, %c512] : memref<64x1024xf32, #tpu.memory_space<vmem>>, vector<8x512xf32>
    %c4_i32_24 = arith.constant 4 : i32
    %40 = tpu.dynamic_rotate %39 by %c4_i32_24 dim 0 : vector<8x512xf32>, i32 -> vector<8x512xf32>
    %41 = arith.select %32, %38, %40 : vector<8x512xi1>, vector<8x512xf32>
    %42 = arith.truncf %36 : vector<8x128xf32> to vector<8x128xbf16>
    %cst_25 = arith.constant 0.000000e+00 : f32
    %43 = arith.truncf %cst_25 : f32 to bf16
    %44 = vector.broadcast %43 : bf16 to vector<8x128xbf16>
    %45 = arith.select %35, %42, %44 : vector<8x128xi1>, vector<8x128xbf16>
    %cst_26 = arith.constant 0.000000e+00 : f32
    %46 = arith.truncf %cst_26 : f32 to bf16
    %47 = vector.broadcast %46 : bf16 to vector<8x128xbf16>
    %48 = arith.select %35, %47, %42 : vector<8x128xi1>, vector<8x128xbf16>
    %49 = tpu.concatenate %45, %48 in 1 : vector<8x128xbf16>, vector<8x128xbf16> -> vector<8x256xbf16>
    %c0_27 = arith.constant 0 : index
    %c0_28 = arith.constant 0 : index
    %50 = vector.load %arg8[%c0_27, %c0_28] : memref<256x512xbf16, #tpu.memory_space<vmem>>, vector<256x512xbf16>
    %cst_29 = arith.constant dense<0.000000e+00> : vector<8x512xf32>
    %51 = tpu.matmul %49, %50, %cst_29 {dimension_numbers = #tpu.dot_dimension_numbers<[1], [0], [0], [1], [0, 0, 1, 1], [], []>} : vector<8x256xbf16>, vector<256x512xbf16>, vector<8x512xf32> -> vector<8x512xf32>
    %52 = arith.addf %41, %51 : vector<8x512xf32>
    %53 = vector.extract_strided_slice %52 {offsets = [0, 0], sizes = [8, 128], strides = [1, 1]} : vector<8x512xf32> to vector<8x128xf32>
    %54 = arith.negf %53 : vector<8x128xf32>
    %55 = math.exp %54 : vector<8x128xf32>
    %cst_30 = arith.constant 1.000000e+00 : f32
    %56 = vector.broadcast %cst_30 : f32 to vector<8x128xf32>
    %57 = arith.addf %56, %55 : vector<8x128xf32>
    %58 = arith.divf %56, %57 : vector<8x128xf32>
    %59 = vector.extract_strided_slice %52 {offsets = [0, 128], sizes = [8, 128], strides = [1, 1]} : vector<8x512xf32> to vector<8x128xf32>
    %60 = arith.negf %59 : vector<8x128xf32>
    %61 = math.exp %60 : vector<8x128xf32>
    %cst_31 = arith.constant 1.000000e+00 : f32
    %62 = vector.broadcast %cst_31 : f32 to vector<8x128xf32>
    %63 = arith.addf %62, %61 : vector<8x128xf32>
    %64 = arith.divf %62, %63 : vector<8x128xf32>
    %65 = vector.extract_strided_slice %52 {offsets = [0, 256], sizes = [8, 128], strides = [1, 1]} : vector<8x512xf32> to vector<8x128xf32>
    %66 = math.tanh %65 : vector<8x128xf32>
    %67 = vector.extract_strided_slice %52 {offsets = [0, 384], sizes = [8, 128], strides = [1, 1]} : vector<8x512xf32> to vector<8x128xf32>
    %68 = arith.negf %67 : vector<8x128xf32>
    %69 = math.exp %68 : vector<8x128xf32>
    %cst_32 = arith.constant 1.000000e+00 : f32
    %70 = vector.broadcast %cst_32 : f32 to vector<8x128xf32>
    %71 = arith.addf %70, %69 : vector<8x128xf32>
    %72 = arith.divf %70, %71 : vector<8x128xf32>
    %73 = arith.mulf %64, %37 : vector<8x128xf32>
    %74 = arith.mulf %58, %66 : vector<8x128xf32>
    %75 = arith.addf %73, %74 : vector<8x128xf32>
    %76 = math.tanh %75 : vector<8x128xf32>
    %77 = arith.mulf %72, %76 : vector<8x128xf32>
    %c0_33 = arith.constant 0 : index
    %c0_34 = arith.constant 0 : index
    %78 = vector.load %arg22[%c0_33, %c0_34] : memref<64x256xf32, #tpu.memory_space<vmem>>, vector<8x128xf32>
    tpu.vector_store %arg22[%c0_33, %c0_34], %77 {strides = array<i32>} : memref<64x256xf32, #tpu.memory_space<vmem>>, vector<8x128xf32>,
    %c4_i32_35 = arith.constant 4 : i32
    %79 = tpu.dynamic_rotate %77 by %c4_i32_35 dim 0 : vector<8x128xf32>, i32 -> vector<8x128xf32>
    %c56_36 = arith.constant 56 : index
    %c128 = arith.constant 128 : index
    %80 = vector.load %arg22[%c56_36, %c128] : memref<64x256xf32, #tpu.memory_space<vmem>>, vector<8x128xf32>
    tpu.vector_store %arg22[%c56_36, %c128], %79 {strides = array<i32>} : memref<64x256xf32, #tpu.memory_space<vmem>>, vector<8x128xf32>,
    %c8 = arith.constant 8 : index
    %c0_37 = arith.constant 0 : index
    %81 = vector.load %arg20[%c8, %c0_37] : memref<64x1024xf32, #tpu.memory_space<vmem>>, vector<8x512xf32>
    %c48 = arith.constant 48 : index
    %c512_38 = arith.constant 512 : index
    %82 = vector.load %arg20[%c48, %c512_38] : memref<64x1024xf32, #tpu.memory_space<vmem>>, vector<8x512xf32>
    %c4_i32_39 = arith.constant 4 : i32
    %83 = tpu.dynamic_rotate %82 by %c4_i32_39 dim 0 : vector<8x512xf32>, i32 -> vector<8x512xf32>
    %84 = arith.select %32, %81, %83 : vector<8x512xi1>, vector<8x512xf32>
    %85 = arith.truncf %77 : vector<8x128xf32> to vector<8x128xbf16>
    %cst_40 = arith.constant 0.000000e+00 : f32
    %86 = arith.truncf %cst_40 : f32 to bf16
    %87 = vector.broadcast %86 : bf16 to vector<8x128xbf16>
    %88 = arith.select %35, %85, %87 : vector<8x128xi1>, vector<8x128xbf16>
    %cst_41 = arith.constant 0.000000e+00 : f32
    %89 = arith.truncf %cst_41 : f32 to bf16
    %90 = vector.broadcast %89 : bf16 to vector<8x128xbf16>
    %91 = arith.select %35, %90, %85 : vector<8x128xi1>, vector<8x128xbf16>
    %92 = tpu.concatenate %88, %91 in 1 : vector<8x128xbf16>, vector<8x128xbf16> -> vector<8x256xbf16>
    %c0_42 = arith.constant 0 : index
    %c0_43 = arith.constant 0 : index
    %93 = vector.load %arg8[%c0_42, %c0_43] : memref<256x512xbf16, #tpu.memory_space<vmem>>, vector<256x512xbf16>
    %cst_44 = arith.constant dense<0.000000e+00> : vector<8x512xf32>
    %94 = tpu.matmul %92, %93, %cst_44 {dimension_numbers = #tpu.dot_dimension_numbers<[1], [0], [0], [1], [0, 0, 1, 1], [], []>} : vector<8x256xbf16>, vector<256x512xbf16>, vector<8x512xf32> -> vector<8x512xf32>
    %95 = arith.addf %84, %94 : vector<8x512xf32>
    %96 = vector.extract_strided_slice %95 {offsets = [0, 0], sizes = [8, 128], strides = [1, 1]} : vector<8x512xf32> to vector<8x128xf32>
    %97 = arith.negf %96 : vector<8x128xf32>
    %98 = math.exp %97 : vector<8x128xf32>
    %cst_45 = arith.constant 1.000000e+00 : f32
    %99 = vector.broadcast %cst_45 : f32 to vector<8x128xf32>
    %100 = arith.addf %99, %98 : vector<8x128xf32>
    %101 = arith.divf %99, %100 : vector<8x128xf32>
    %102 = vector.extract_strided_slice %95 {offsets = [0, 128], sizes = [8, 128], strides = [1, 1]} : vector<8x512xf32> to vector<8x128xf32>
    %103 = arith.negf %102 : vector<8x128xf32>
    %104 = math.exp %103 : vector<8x128xf32>
    %cst_46 = arith.constant 1.000000e+00 : f32
    %105 = vector.broadcast %cst_46 : f32 to vector<8x128xf32>
    %106 = arith.addf %105, %104 : vector<8x128xf32>
    %107 = arith.divf %105, %106 : vector<8x128xf32>
    %108 = vector.extract_strided_slice %95 {offsets = [0, 256], sizes = [8, 128], strides = [1, 1]} : vector<8x512xf32> to vector<8x128xf32>
    %109 = math.tanh %108 : vector<8x128xf32>
    %110 = vector.extract_strided_slice %95 {offsets = [0, 384], sizes = [8, 128], strides = [1, 1]} : vector<8x512xf32> to vector<8x128xf32>
    %111 = arith.negf %110 : vector<8x128xf32>
    %112 = math.exp %111 : vector<8x128xf32>
    %cst_47 = arith.constant 1.000000e+00 : f32
    %113 = vector.broadcast %cst_47 : f32 to vector<8x128xf32>
    %114 = arith.addf %113, %112 : vector<8x128xf32>
    %115 = arith.divf %113, %114 : vector<8x128xf32>
    %116 = arith.mulf %107, %75 : vector<8x128xf32>
    %117 = arith.mulf %101, %109 : vector<8x128xf32>
    %118 = arith.addf %116, %117 : vector<8x128xf32>
    %119 = math.tanh %118 : vector<8x128xf32>
    %120 = arith.mulf %115, %119 : vector<8x128xf32>
    %c8_48 = arith.constant 8 : index
    %c0_49 = arith.constant 0 : index
    %121 = vector.load %arg22[%c8_48, %c0_49] : memref<64x256xf32, #tpu.memory_space<vmem>>, vector<8x128xf32>
    tpu.vector_store %arg22[%c8_48, %c0_49], %120 {strides = array<i32>} : memref<64x256xf32, #tpu.memory_space<vmem>>, vector<8x128xf32>,
    %c4_i32_50 = arith.constant 4 : i32
    %122 = tpu.dynamic_rotate %120 by %c4_i32_50 dim 0 : vector<8x128xf32>, i32 -> vector<8x128xf32>
    %c48_51 = arith.constant 48 : index
    %c128_52 = arith.constant 128 : index
    %123 = vector.load %arg22[%c48_51, %c128_52] : memref<64x256xf32, #tpu.memory_space<vmem>>, vector<8x128xf32>
    tpu.vector_store %arg22[%c48_51, %c128_52], %122 {strides = array<i32>} : memref<64x256xf32, #tpu.memory_space<vmem>>, vector<8x128xf32>,
    %c16 = arith.constant 16 : index
    %c0_53 = arith.constant 0 : index
    %124 = vector.load %arg20[%c16, %c0_53] : memref<64x1024xf32, #tpu.memory_space<vmem>>, vector<8x512xf32>
    %c40 = arith.constant 40 : index
    %c512_54 = arith.constant 512 : index
    %125 = vector.load %arg20[%c40, %c512_54] : memref<64x1024xf32, #tpu.memory_space<vmem>>, vector<8x512xf32>
    %c4_i32_55 = arith.constant 4 : i32
    %126 = tpu.dynamic_rotate %125 by %c4_i32_55 dim 0 : vector<8x512xf32>, i32 -> vector<8x512xf32>
    %127 = arith.select %32, %124, %126 : vector<8x512xi1>, vector<8x512xf32>
    %128 = arith.truncf %120 : vector<8x128xf32> to vector<8x128xbf16>
    %cst_56 = arith.constant 0.000000e+00 : f32
    %129 = arith.truncf %cst_56 : f32 to bf16
    %130 = vector.broadcast %129 : bf16 to vector<8x128xbf16>
    %131 = arith.select %35, %128, %130 : vector<8x128xi1>, vector<8x128xbf16>
    %cst_57 = arith.constant 0.000000e+00 : f32
    %132 = arith.truncf %cst_57 : f32 to bf16
    %133 = vector.broadcast %132 : bf16 to vector<8x128xbf16>
    %134 = arith.select %35, %133, %128 : vector<8x128xi1>, vector<8x128xbf16>
    %135 = tpu.concatenate %131, %134 in 1 : vector<8x128xbf16>, vector<8x128xbf16> -> vector<8x256xbf16>
    %c0_58 = arith.constant 0 : index
    %c0_59 = arith.constant 0 : index
    %136 = vector.load %arg8[%c0_58, %c0_59] : memref<256x512xbf16, #tpu.memory_space<vmem>>, vector<256x512xbf16>
    %cst_60 = arith.constant dense<0.000000e+00> : vector<8x512xf32>
    %137 = tpu.matmul %135, %136, %cst_60 {dimension_numbers = #tpu.dot_dimension_numbers<[1], [0], [0], [1], [0, 0, 1, 1], [], []>} : vector<8x256xbf16>, vector<256x512xbf16>, vector<8x512xf32> -> vector<8x512xf32>
    %138 = arith.addf %127, %137 : vector<8x512xf32>
    %139 = vector.extract_strided_slice %138 {offsets = [0, 0], sizes = [8, 128], strides = [1, 1]} : vector<8x512xf32> to vector<8x128xf32>
    %140 = arith.negf %139 : vector<8x128xf32>
    %141 = math.exp %140 : vector<8x128xf32>
    %cst_61 = arith.constant 1.000000e+00 : f32
    %142 = vector.broadcast %cst_61 : f32 to vector<8x128xf32>
    %143 = arith.addf %142, %141 : vector<8x128xf32>
    %144 = arith.divf %142, %143 : vector<8x128xf32>
    %145 = vector.extract_strided_slice %138 {offsets = [0, 128], sizes = [8, 128], strides = [1, 1]} : vector<8x512xf32> to vector<8x128xf32>
    %146 = arith.negf %145 : vector<8x128xf32>
    %147 = math.exp %146 : vector<8x128xf32>
    %cst_62 = arith.constant 1.000000e+00 : f32
    %148 = vector.broadcast %cst_62 : f32 to vector<8x128xf32>
    %149 = arith.addf %148, %147 : vector<8x128xf32>
    %150 = arith.divf %148, %149 : vector<8x128xf32>
    %151 = vector.extract_strided_slice %138 {offsets = [0, 256], sizes = [8, 128], strides = [1, 1]} : vector<8x512xf32> to vector<8x128xf32>
    %152 = math.tanh %151 : vector<8x128xf32>
    %153 = vector.extract_strided_slice %138 {offsets = [0, 384], sizes = [8, 128], strides = [1, 1]} : vector<8x512xf32> to vector<8x128xf32>
    %154 = arith.negf %153 : vector<8x128xf32>
    %155 = math.exp %154 : vector<8x128xf32>
    %cst_63 = arith.constant 1.000000e+00 : f32
    %156 = vector.broadcast %cst_63 : f32 to vector<8x128xf32>
    %157 = arith.addf %156, %155 : vector<8x128xf32>
    %158 = arith.divf %156, %157 : vector<8x128xf32>
    %159 = arith.mulf %150, %118 : vector<8x128xf32>
    %160 = arith.mulf %144, %152 : vector<8x128xf32>
    %161 = arith.addf %159, %160 : vector<8x128xf32>
    %162 = math.tanh %161 : vector<8x128xf32>
    %163 = arith.mulf %158, %162 : vector<8x128xf32>
    %c16_64 = arith.constant 16 : index
    %c0_65 = arith.constant 0 : index
    %164 = vector.load %arg22[%c16_64, %c0_65] : memref<64x256xf32, #tpu.memory_space<vmem>>, vector<8x128xf32>
    tpu.vector_store %arg22[%c16_64, %c0_65], %163 {strides = array<i32>} : memref<64x256xf32, #tpu.memory_space<vmem>>, vector<8x128xf32>,
    %c4_i32_66 = arith.constant 4 : i32
    %165 = tpu.dynamic_rotate %163 by %c4_i32_66 dim 0 : vector<8x128xf32>, i32 -> vector<8x128xf32>
    %c40_67 = arith.constant 40 : index
    %c128_68 = arith.constant 128 : index
    %166 = vector.load %arg22[%c40_67, %c128_68] : memref<64x256xf32, #tpu.memory_space<vmem>>, vector<8x128xf32>
    tpu.vector_store %arg22[%c40_67, %c128_68], %165 {strides = array<i32>} : memref<64x256xf32, #tpu.memory_space<vmem>>, vector<8x128xf32>,
    %c24 = arith.constant 24 : index
    %c0_69 = arith.constant 0 : index
    %167 = vector.load %arg20[%c24, %c0_69] : memref<64x1024xf32, #tpu.memory_space<vmem>>, vector<8x512xf32>
    %c32 = arith.constant 32 : index
    %c512_70 = arith.constant 512 : index
    %168 = vector.load %arg20[%c32, %c512_70] : memref<64x1024xf32, #tpu.memory_space<vmem>>, vector<8x512xf32>
    %c4_i32_71 = arith.constant 4 : i32
    %169 = tpu.dynamic_rotate %168 by %c4_i32_71 dim 0 : vector<8x512xf32>, i32 -> vector<8x512xf32>
    %170 = arith.select %32, %167, %169 : vector<8x512xi1>, vector<8x512xf32>
    %171 = arith.truncf %163 : vector<8x128xf32> to vector<8x128xbf16>
    %cst_72 = arith.constant 0.000000e+00 : f32
    %172 = arith.truncf %cst_72 : f32 to bf16
    %173 = vector.broadcast %172 : bf16 to vector<8x128xbf16>
    %174 = arith.select %35, %171, %173 : vector<8x128xi1>, vector<8x128xbf16>
    %cst_73 = arith.constant 0.000000e+00 : f32
    %175 = arith.truncf %cst_73 : f32 to bf16
    %176 = vector.broadcast %175 : bf16 to vector<8x128xbf16>
    %177 = arith.select %35, %176, %171 : vector<8x128xi1>, vector<8x128xbf16>
    %178 = tpu.concatenate %174, %177 in 1 : vector<8x128xbf16>, vector<8x128xbf16> -> vector<8x256xbf16>
    %c0_74 = arith.constant 0 : index
    %c0_75 = arith.constant 0 : index
    %179 = vector.load %arg8[%c0_74, %c0_75] : memref<256x512xbf16, #tpu.memory_space<vmem>>, vector<256x512xbf16>
    %cst_76 = arith.constant dense<0.000000e+00> : vector<8x512xf32>
    %180 = tpu.matmul %178, %179, %cst_76 {dimension_numbers = #tpu.dot_dimension_numbers<[1], [0], [0], [1], [0, 0, 1, 1], [], []>} : vector<8x256xbf16>, vector<256x512xbf16>, vector<8x512xf32> -> vector<8x512xf32>
    %181 = arith.addf %170, %180 : vector<8x512xf32>
    %182 = vector.extract_strided_slice %181 {offsets = [0, 0], sizes = [8, 128], strides = [1, 1]} : vector<8x512xf32> to vector<8x128xf32>
    %183 = arith.negf %182 : vector<8x128xf32>
    %184 = math.exp %183 : vector<8x128xf32>
    %cst_77 = arith.constant 1.000000e+00 : f32
    %185 = vector.broadcast %cst_77 : f32 to vector<8x128xf32>
    %186 = arith.addf %185, %184 : vector<8x128xf32>
    %187 = arith.divf %185, %186 : vector<8x128xf32>
    %188 = vector.extract_strided_slice %181 {offsets = [0, 128], sizes = [8, 128], strides = [1, 1]} : vector<8x512xf32> to vector<8x128xf32>
    %189 = arith.negf %188 : vector<8x128xf32>
    %190 = math.exp %189 : vector<8x128xf32>
    %cst_78 = arith.constant 1.000000e+00 : f32
    %191 = vector.broadcast %cst_78 : f32 to vector<8x128xf32>
    %192 = arith.addf %191, %190 : vector<8x128xf32>
    %193 = arith.divf %191, %192 : vector<8x128xf32>
    %194 = vector.extract_strided_slice %181 {offsets = [0, 256], sizes = [8, 128], strides = [1, 1]} : vector<8x512xf32> to vector<8x128xf32>
    %195 = math.tanh %194 : vector<8x128xf32>
    %196 = vector.extract_strided_slice %181 {offsets = [0, 384], sizes = [8, 128], strides = [1, 1]} : vector<8x512xf32> to vector<8x128xf32>
    %197 = arith.negf %196 : vector<8x128xf32>
    %198 = math.exp %197 : vector<8x128xf32>
    %cst_79 = arith.constant 1.000000e+00 : f32
    %199 = vector.broadcast %cst_79 : f32 to vector<8x128xf32>
    %200 = arith.addf %199, %198 : vector<8x128xf32>
    %201 = arith.divf %199, %200 : vector<8x128xf32>
    %202 = arith.mulf %193, %161 : vector<8x128xf32>
    %203 = arith.mulf %187, %195 : vector<8x128xf32>
    %204 = arith.addf %202, %203 : vector<8x128xf32>
    %205 = math.tanh %204 : vector<8x128xf32>
    %206 = arith.mulf %201, %205 : vector<8x128xf32>
    %c24_80 = arith.constant 24 : index
    %c0_81 = arith.constant 0 : index
    %207 = vector.load %arg22[%c24_80, %c0_81] : memref<64x256xf32, #tpu.memory_space<vmem>>, vector<8x128xf32>
    tpu.vector_store %arg22[%c24_80, %c0_81], %206 {strides = array<i32>} : memref<64x256xf32, #tpu.memory_space<vmem>>, vector<8x128xf32>,
    %c4_i32_82 = arith.constant 4 : i32
    %208 = tpu.dynamic_rotate %206 by %c4_i32_82 dim 0 : vector<8x128xf32>, i32 -> vector<8x128xf32>
    %c32_83 = arith.constant 32 : index
    %c128_84 = arith.constant 128 : index
    %209 = vector.load %arg22[%c32_83, %c128_84] : memref<64x256xf32, #tpu.memory_space<vmem>>, vector<8x128xf32>
    tpu.vector_store %arg22[%c32_83, %c128_84], %208 {strides = array<i32>} : memref<64x256xf32, #tpu.memory_space<vmem>>, vector<8x128xf32>,
    %c32_85 = arith.constant 32 : index
    %c0_86 = arith.constant 0 : index
    %210 = vector.load %arg20[%c32_85, %c0_86] : memref<64x1024xf32, #tpu.memory_space<vmem>>, vector<8x512xf32>
    %c24_87 = arith.constant 24 : index
    %c512_88 = arith.constant 512 : index
    %211 = vector.load %arg20[%c24_87, %c512_88] : memref<64x1024xf32, #tpu.memory_space<vmem>>, vector<8x512xf32>
    %c4_i32_89 = arith.constant 4 : i32
    %212 = tpu.dynamic_rotate %211 by %c4_i32_89 dim 0 : vector<8x512xf32>, i32 -> vector<8x512xf32>
    %213 = arith.select %32, %210, %212 : vector<8x512xi1>, vector<8x512xf32>
    %214 = arith.truncf %206 : vector<8x128xf32> to vector<8x128xbf16>
    %cst_90 = arith.constant 0.000000e+00 : f32
    %215 = arith.truncf %cst_90 : f32 to bf16
    %216 = vector.broadcast %215 : bf16 to vector<8x128xbf16>
    %217 = arith.select %35, %214, %216 : vector<8x128xi1>, vector<8x128xbf16>
    %cst_91 = arith.constant 0.000000e+00 : f32
    %218 = arith.truncf %cst_91 : f32 to bf16
    %219 = vector.broadcast %218 : bf16 to vector<8x128xbf16>
    %220 = arith.select %35, %219, %214 : vector<8x128xi1>, vector<8x128xbf16>
    %221 = tpu.concatenate %217, %220 in 1 : vector<8x128xbf16>, vector<8x128xbf16> -> vector<8x256xbf16>
    %c0_92 = arith.constant 0 : index
    %c0_93 = arith.constant 0 : index
    %222 = vector.load %arg8[%c0_92, %c0_93] : memref<256x512xbf16, #tpu.memory_space<vmem>>, vector<256x512xbf16>
    %cst_94 = arith.constant dense<0.000000e+00> : vector<8x512xf32>
    %223 = tpu.matmul %221, %222, %cst_94 {dimension_numbers = #tpu.dot_dimension_numbers<[1], [0], [0], [1], [0, 0, 1, 1], [], []>} : vector<8x256xbf16>, vector<256x512xbf16>, vector<8x512xf32> -> vector<8x512xf32>
    %224 = arith.addf %213, %223 : vector<8x512xf32>
    %225 = vector.extract_strided_slice %224 {offsets = [0, 0], sizes = [8, 128], strides = [1, 1]} : vector<8x512xf32> to vector<8x128xf32>
    %226 = arith.negf %225 : vector<8x128xf32>
    %227 = math.exp %226 : vector<8x128xf32>
    %cst_95 = arith.constant 1.000000e+00 : f32
    %228 = vector.broadcast %cst_95 : f32 to vector<8x128xf32>
    %229 = arith.addf %228, %227 : vector<8x128xf32>
    %230 = arith.divf %228, %229 : vector<8x128xf32>
    %231 = vector.extract_strided_slice %224 {offsets = [0, 128], sizes = [8, 128], strides = [1, 1]} : vector<8x512xf32> to vector<8x128xf32>
    %232 = arith.negf %231 : vector<8x128xf32>
    %233 = math.exp %232 : vector<8x128xf32>
    %cst_96 = arith.constant 1.000000e+00 : f32
    %234 = vector.broadcast %cst_96 : f32 to vector<8x128xf32>
    %235 = arith.addf %234, %233 : vector<8x128xf32>
    %236 = arith.divf %234, %235 : vector<8x128xf32>
    %237 = vector.extract_strided_slice %224 {offsets = [0, 256], sizes = [8, 128], strides = [1, 1]} : vector<8x512xf32> to vector<8x128xf32>
    %238 = math.tanh %237 : vector<8x128xf32>
    %239 = vector.extract_strided_slice %224 {offsets = [0, 384], sizes = [8, 128], strides = [1, 1]} : vector<8x512xf32> to vector<8x128xf32>
    %240 = arith.negf %239 : vector<8x128xf32>
    %241 = math.exp %240 : vector<8x128xf32>
    %cst_97 = arith.constant 1.000000e+00 : f32
    %242 = vector.broadcast %cst_97 : f32 to vector<8x128xf32>
    %243 = arith.addf %242, %241 : vector<8x128xf32>
    %244 = arith.divf %242, %243 : vector<8x128xf32>
    %245 = arith.mulf %236, %204 : vector<8x128xf32>
    %246 = arith.mulf %230, %238 : vector<8x128xf32>
    %247 = arith.addf %245, %246 : vector<8x128xf32>
    %248 = math.tanh %247 : vector<8x128xf32>
    %249 = arith.mulf %244, %248 : vector<8x128xf32>
    %c32_98 = arith.constant 32 : index
    %c0_99 = arith.constant 0 : index
    %250 = vector.load %arg22[%c32_98, %c0_99] : memref<64x256xf32, #tpu.memory_space<vmem>>, vector<8x128xf32>
    tpu.vector_store %arg22[%c32_98, %c0_99], %249 {strides = array<i32>} : memref<64x256xf32, #tpu.memory_space<vmem>>, vector<8x128xf32>,
    %c4_i32_100 = arith.constant 4 : i32
    %251 = tpu.dynamic_rotate %249 by %c4_i32_100 dim 0 : vector<8x128xf32>, i32 -> vector<8x128xf32>
    %c24_101 = arith.constant 24 : index
    %c128_102 = arith.constant 128 : index
    %252 = vector.load %arg22[%c24_101, %c128_102] : memref<64x256xf32, #tpu.memory_space<vmem>>, vector<8x128xf32>
    tpu.vector_store %arg22[%c24_101, %c128_102], %251 {strides = array<i32>} : memref<64x256xf32, #tpu.memory_space<vmem>>, vector<8x128xf32>,
    %c40_103 = arith.constant 40 : index
    %c0_104 = arith.constant 0 : index
    %253 = vector.load %arg20[%c40_103, %c0_104] : memref<64x1024xf32, #tpu.memory_space<vmem>>, vector<8x512xf32>
    %c16_105 = arith.constant 16 : index
    %c512_106 = arith.constant 512 : index
    %254 = vector.load %arg20[%c16_105, %c512_106] : memref<64x1024xf32, #tpu.memory_space<vmem>>, vector<8x512xf32>
    %c4_i32_107 = arith.constant 4 : i32
    %255 = tpu.dynamic_rotate %254 by %c4_i32_107 dim 0 : vector<8x512xf32>, i32 -> vector<8x512xf32>
    %256 = arith.select %32, %253, %255 : vector<8x512xi1>, vector<8x512xf32>
    %257 = arith.truncf %249 : vector<8x128xf32> to vector<8x128xbf16>
    %cst_108 = arith.constant 0.000000e+00 : f32
    %258 = arith.truncf %cst_108 : f32 to bf16
    %259 = vector.broadcast %258 : bf16 to vector<8x128xbf16>
    %260 = arith.select %35, %257, %259 : vector<8x128xi1>, vector<8x128xbf16>
    %cst_109 = arith.constant 0.000000e+00 : f32
    %261 = arith.truncf %cst_109 : f32 to bf16
    %262 = vector.broadcast %261 : bf16 to vector<8x128xbf16>
    %263 = arith.select %35, %262, %257 : vector<8x128xi1>, vector<8x128xbf16>
    %264 = tpu.concatenate %260, %263 in 1 : vector<8x128xbf16>, vector<8x128xbf16> -> vector<8x256xbf16>
    %c0_110 = arith.constant 0 : index
    %c0_111 = arith.constant 0 : index
    %265 = vector.load %arg8[%c0_110, %c0_111] : memref<256x512xbf16, #tpu.memory_space<vmem>>, vector<256x512xbf16>
    %cst_112 = arith.constant dense<0.000000e+00> : vector<8x512xf32>
    %266 = tpu.matmul %264, %265, %cst_112 {dimension_numbers = #tpu.dot_dimension_numbers<[1], [0], [0], [1], [0, 0, 1, 1], [], []>} : vector<8x256xbf16>, vector<256x512xbf16>, vector<8x512xf32> -> vector<8x512xf32>
    %267 = arith.addf %256, %266 : vector<8x512xf32>
    %268 = vector.extract_strided_slice %267 {offsets = [0, 0], sizes = [8, 128], strides = [1, 1]} : vector<8x512xf32> to vector<8x128xf32>
    %269 = arith.negf %268 : vector<8x128xf32>
    %270 = math.exp %269 : vector<8x128xf32>
    %cst_113 = arith.constant 1.000000e+00 : f32
    %271 = vector.broadcast %cst_113 : f32 to vector<8x128xf32>
    %272 = arith.addf %271, %270 : vector<8x128xf32>
    %273 = arith.divf %271, %272 : vector<8x128xf32>
    %274 = vector.extract_strided_slice %267 {offsets = [0, 128], sizes = [8, 128], strides = [1, 1]} : vector<8x512xf32> to vector<8x128xf32>
    %275 = arith.negf %274 : vector<8x128xf32>
    %276 = math.exp %275 : vector<8x128xf32>
    %cst_114 = arith.constant 1.000000e+00 : f32
    %277 = vector.broadcast %cst_114 : f32 to vector<8x128xf32>
    %278 = arith.addf %277, %276 : vector<8x128xf32>
    %279 = arith.divf %277, %278 : vector<8x128xf32>
    %280 = vector.extract_strided_slice %267 {offsets = [0, 256], sizes = [8, 128], strides = [1, 1]} : vector<8x512xf32> to vector<8x128xf32>
    %281 = math.tanh %280 : vector<8x128xf32>
    %282 = vector.extract_strided_slice %267 {offsets = [0, 384], sizes = [8, 128], strides = [1, 1]} : vector<8x512xf32> to vector<8x128xf32>
    %283 = arith.negf %282 : vector<8x128xf32>
    %284 = math.exp %283 : vector<8x128xf32>
    %cst_115 = arith.constant 1.000000e+00 : f32
    %285 = vector.broadcast %cst_115 : f32 to vector<8x128xf32>
    %286 = arith.addf %285, %284 : vector<8x128xf32>
    %287 = arith.divf %285, %286 : vector<8x128xf32>
    %288 = arith.mulf %279, %247 : vector<8x128xf32>
    %289 = arith.mulf %273, %281 : vector<8x128xf32>
    %290 = arith.addf %288, %289 : vector<8x128xf32>
    %291 = math.tanh %290 : vector<8x128xf32>
    %292 = arith.mulf %287, %291 : vector<8x128xf32>
    %c40_116 = arith.constant 40 : index
    %c0_117 = arith.constant 0 : index
    %293 = vector.load %arg22[%c40_116, %c0_117] : memref<64x256xf32, #tpu.memory_space<vmem>>, vector<8x128xf32>
    tpu.vector_store %arg22[%c40_116, %c0_117], %292 {strides = array<i32>} : memref<64x256xf32, #tpu.memory_space<vmem>>, vector<8x128xf32>,
    %c4_i32_118 = arith.constant 4 : i32
    %294 = tpu.dynamic_rotate %292 by %c4_i32_118 dim 0 : vector<8x128xf32>, i32 -> vector<8x128xf32>
    %c16_119 = arith.constant 16 : index
    %c128_120 = arith.constant 128 : index
    %295 = vector.load %arg22[%c16_119, %c128_120] : memref<64x256xf32, #tpu.memory_space<vmem>>, vector<8x128xf32>
    tpu.vector_store %arg22[%c16_119, %c128_120], %294 {strides = array<i32>} : memref<64x256xf32, #tpu.memory_space<vmem>>, vector<8x128xf32>,
    %c48_121 = arith.constant 48 : index
    %c0_122 = arith.constant 0 : index
    %296 = vector.load %arg20[%c48_121, %c0_122] : memref<64x1024xf32, #tpu.memory_space<vmem>>, vector<8x512xf32>
    %c8_123 = arith.constant 8 : index
    %c512_124 = arith.constant 512 : index
    %297 = vector.load %arg20[%c8_123, %c512_124] : memref<64x1024xf32, #tpu.memory_space<vmem>>, vector<8x512xf32>
    %c4_i32_125 = arith.constant 4 : i32
    %298 = tpu.dynamic_rotate %297 by %c4_i32_125 dim 0 : vector<8x512xf32>, i32 -> vector<8x512xf32>
    %299 = arith.select %32, %296, %298 : vector<8x512xi1>, vector<8x512xf32>
    %300 = arith.truncf %292 : vector<8x128xf32> to vector<8x128xbf16>
    %cst_126 = arith.constant 0.000000e+00 : f32
    %301 = arith.truncf %cst_126 : f32 to bf16
    %302 = vector.broadcast %301 : bf16 to vector<8x128xbf16>
    %303 = arith.select %35, %300, %302 : vector<8x128xi1>, vector<8x128xbf16>
    %cst_127 = arith.constant 0.000000e+00 : f32
    %304 = arith.truncf %cst_127 : f32 to bf16
    %305 = vector.broadcast %304 : bf16 to vector<8x128xbf16>
    %306 = arith.select %35, %305, %300 : vector<8x128xi1>, vector<8x128xbf16>
    %307 = tpu.concatenate %303, %306 in 1 : vector<8x128xbf16>, vector<8x128xbf16> -> vector<8x256xbf16>
    %c0_128 = arith.constant 0 : index
    %c0_129 = arith.constant 0 : index
    %308 = vector.load %arg8[%c0_128, %c0_129] : memref<256x512xbf16, #tpu.memory_space<vmem>>, vector<256x512xbf16>
    %cst_130 = arith.constant dense<0.000000e+00> : vector<8x512xf32>
    %309 = tpu.matmul %307, %308, %cst_130 {dimension_numbers = #tpu.dot_dimension_numbers<[1], [0], [0], [1], [0, 0, 1, 1], [], []>} : vector<8x256xbf16>, vector<256x512xbf16>, vector<8x512xf32> -> vector<8x512xf32>
    %310 = arith.addf %299, %309 : vector<8x512xf32>
    %311 = vector.extract_strided_slice %310 {offsets = [0, 0], sizes = [8, 128], strides = [1, 1]} : vector<8x512xf32> to vector<8x128xf32>
    %312 = arith.negf %311 : vector<8x128xf32>
    %313 = math.exp %312 : vector<8x128xf32>
    %cst_131 = arith.constant 1.000000e+00 : f32
    %314 = vector.broadcast %cst_131 : f32 to vector<8x128xf32>
    %315 = arith.addf %314, %313 : vector<8x128xf32>
    %316 = arith.divf %314, %315 : vector<8x128xf32>
    %317 = vector.extract_strided_slice %310 {offsets = [0, 128], sizes = [8, 128], strides = [1, 1]} : vector<8x512xf32> to vector<8x128xf32>
    %318 = arith.negf %317 : vector<8x128xf32>
    %319 = math.exp %318 : vector<8x128xf32>
    %cst_132 = arith.constant 1.000000e+00 : f32
    %320 = vector.broadcast %cst_132 : f32 to vector<8x128xf32>
    %321 = arith.addf %320, %319 : vector<8x128xf32>
    %322 = arith.divf %320, %321 : vector<8x128xf32>
    %323 = vector.extract_strided_slice %310 {offsets = [0, 256], sizes = [8, 128], strides = [1, 1]} : vector<8x512xf32> to vector<8x128xf32>
    %324 = math.tanh %323 : vector<8x128xf32>
    %325 = vector.extract_strided_slice %310 {offsets = [0, 384], sizes = [8, 128], strides = [1, 1]} : vector<8x512xf32> to vector<8x128xf32>
    %326 = arith.negf %325 : vector<8x128xf32>
    %327 = math.exp %326 : vector<8x128xf32>
    %cst_133 = arith.constant 1.000000e+00 : f32
    %328 = vector.broadcast %cst_133 : f32 to vector<8x128xf32>
    %329 = arith.addf %328, %327 : vector<8x128xf32>
    %330 = arith.divf %328, %329 : vector<8x128xf32>
    %331 = arith.mulf %322, %290 : vector<8x128xf32>
    %332 = arith.mulf %316, %324 : vector<8x128xf32>
    %333 = arith.addf %331, %332 : vector<8x128xf32>
    %334 = math.tanh %333 : vector<8x128xf32>
    %335 = arith.mulf %330, %334 : vector<8x128xf32>
    %c48_134 = arith.constant 48 : index
    %c0_135 = arith.constant 0 : index
    %336 = vector.load %arg22[%c48_134, %c0_135] : memref<64x256xf32, #tpu.memory_space<vmem>>, vector<8x128xf32>
    tpu.vector_store %arg22[%c48_134, %c0_135], %335 {strides = array<i32>} : memref<64x256xf32, #tpu.memory_space<vmem>>, vector<8x128xf32>,
    %c4_i32_136 = arith.constant 4 : i32
    %337 = tpu.dynamic_rotate %335 by %c4_i32_136 dim 0 : vector<8x128xf32>, i32 -> vector<8x128xf32>
    %c8_137 = arith.constant 8 : index
    %c128_138 = arith.constant 128 : index
    %338 = vector.load %arg22[%c8_137, %c128_138] : memref<64x256xf32, #tpu.memory_space<vmem>>, vector<8x128xf32>
    tpu.vector_store %arg22[%c8_137, %c128_138], %337 {strides = array<i32>} : memref<64x256xf32, #tpu.memory_space<vmem>>, vector<8x128xf32>,
    %c56_139 = arith.constant 56 : index
    %c0_140 = arith.constant 0 : index
    %339 = vector.load %arg20[%c56_139, %c0_140] : memref<64x1024xf32, #tpu.memory_space<vmem>>, vector<8x512xf32>
    %c0_141 = arith.constant 0 : index
    %c512_142 = arith.constant 512 : index
    %340 = vector.load %arg20[%c0_141, %c512_142] : memref<64x1024xf32, #tpu.memory_space<vmem>>, vector<8x512xf32>
    %c4_i32_143 = arith.constant 4 : i32
    %341 = tpu.dynamic_rotate %340 by %c4_i32_143 dim 0 : vector<8x512xf32>, i32 -> vector<8x512xf32>
    %342 = arith.select %32, %339, %341 : vector<8x512xi1>, vector<8x512xf32>
    %343 = arith.truncf %335 : vector<8x128xf32> to vector<8x128xbf16>
    %cst_144 = arith.constant 0.000000e+00 : f32
    %344 = arith.truncf %cst_144 : f32 to bf16
    %345 = vector.broadcast %344 : bf16 to vector<8x128xbf16>
    %346 = arith.select %35, %343, %345 : vector<8x128xi1>, vector<8x128xbf16>
    %cst_145 = arith.constant 0.000000e+00 : f32
    %347 = arith.truncf %cst_145 : f32 to bf16
    %348 = vector.broadcast %347 : bf16 to vector<8x128xbf16>
    %349 = arith.select %35, %348, %343 : vector<8x128xi1>, vector<8x128xbf16>
    %350 = tpu.concatenate %346, %349 in 1 : vector<8x128xbf16>, vector<8x128xbf16> -> vector<8x256xbf16>
    %c0_146 = arith.constant 0 : index
    %c0_147 = arith.constant 0 : index
    %351 = vector.load %arg8[%c0_146, %c0_147] : memref<256x512xbf16, #tpu.memory_space<vmem>>, vector<256x512xbf16>
    %cst_148 = arith.constant dense<0.000000e+00> : vector<8x512xf32>
    %352 = tpu.matmul %350, %351, %cst_148 {dimension_numbers = #tpu.dot_dimension_numbers<[1], [0], [0], [1], [0, 0, 1, 1], [], []>} : vector<8x256xbf16>, vector<256x512xbf16>, vector<8x512xf32> -> vector<8x512xf32>
    %353 = arith.addf %342, %352 : vector<8x512xf32>
    %354 = vector.extract_strided_slice %353 {offsets = [0, 0], sizes = [8, 128], strides = [1, 1]} : vector<8x512xf32> to vector<8x128xf32>
    %355 = arith.negf %354 : vector<8x128xf32>
    %356 = math.exp %355 : vector<8x128xf32>
    %cst_149 = arith.constant 1.000000e+00 : f32
    %357 = vector.broadcast %cst_149 : f32 to vector<8x128xf32>
    %358 = arith.addf %357, %356 : vector<8x128xf32>
    %359 = arith.divf %357, %358 : vector<8x128xf32>
    %360 = vector.extract_strided_slice %353 {offsets = [0, 128], sizes = [8, 128], strides = [1, 1]} : vector<8x512xf32> to vector<8x128xf32>
    %361 = arith.negf %360 : vector<8x128xf32>
    %362 = math.exp %361 : vector<8x128xf32>
    %cst_150 = arith.constant 1.000000e+00 : f32
    %363 = vector.broadcast %cst_150 : f32 to vector<8x128xf32>
    %364 = arith.addf %363, %362 : vector<8x128xf32>
    %365 = arith.divf %363, %364 : vector<8x128xf32>
    %366 = vector.extract_strided_slice %353 {offsets = [0, 256], sizes = [8, 128], strides = [1, 1]} : vector<8x512xf32> to vector<8x128xf32>
    %367 = math.tanh %366 : vector<8x128xf32>
    %368 = vector.extract_strided_slice %353 {offsets = [0, 384], sizes = [8, 128], strides = [1, 1]} : vector<8x512xf32> to vector<8x128xf32>
    %369 = arith.negf %368 : vector<8x128xf32>
    %370 = math.exp %369 : vector<8x128xf32>
    %cst_151 = arith.constant 1.000000e+00 : f32
    %371 = vector.broadcast %cst_151 : f32 to vector<8x128xf32>
    %372 = arith.addf %371, %370 : vector<8x128xf32>
    %373 = arith.divf %371, %372 : vector<8x128xf32>
    %374 = arith.mulf %365, %333 : vector<8x128xf32>
    %375 = arith.mulf %359, %367 : vector<8x128xf32>
    %376 = arith.addf %374, %375 : vector<8x128xf32>
    %377 = math.tanh %376 : vector<8x128xf32>
    %378 = arith.mulf %373, %377 : vector<8x128xf32>
    %c56_152 = arith.constant 56 : index
    %c0_153 = arith.constant 0 : index
    %379 = vector.load %arg22[%c56_152, %c0_153] : memref<64x256xf32, #tpu.memory_space<vmem>>, vector<8x128xf32>
    tpu.vector_store %arg22[%c56_152, %c0_153], %378 {strides = array<i32>} : memref<64x256xf32, #tpu.memory_space<vmem>>, vector<8x128xf32>,
    %c4_i32_154 = arith.constant 4 : i32
    %380 = tpu.dynamic_rotate %378 by %c4_i32_154 dim 0 : vector<8x128xf32>, i32 -> vector<8x128xf32>
    %c0_155 = arith.constant 0 : index
    %c128_156 = arith.constant 128 : index
    %381 = vector.load %arg22[%c0_155, %c128_156] : memref<64x256xf32, #tpu.memory_space<vmem>>, vector<8x128xf32>
    tpu.vector_store %arg22[%c0_155, %c128_156], %380 {strides = array<i32>} : memref<64x256xf32, #tpu.memory_space<vmem>>, vector<8x128xf32>,
    %c0_i32_157 = arith.constant 0 : i32
    %382 = tpu.memref_slice %arg26[%c0_i32_157] : memref<3x!tpu.dma_semaphore, #tpu.memory_space<semaphore_mem>> -> memref<1x!tpu.dma_semaphore, #tpu.memory_space<semaphore_mem>>
    %383 = tpu.memref_squeeze %382 : memref<1x!tpu.dma_semaphore, #tpu.memory_space<semaphore_mem>> -> memref<!tpu.dma_semaphore, #tpu.memory_space<semaphore_mem>>
    tpu.wait_dma2 semaphore(%383 : memref<!tpu.dma_semaphore, #tpu.memory_space<semaphore_mem>>) src(%arg16 : memref<256x1024xbf16, #tpu.memory_space<any>>) dst(%arg23 : memref<256x1024xbf16, #tpu.memory_space<vmem>>)
    %c0_158 = arith.constant 0 : index
    %c0_159 = arith.constant 0 : index
    %384 = vector.load %arg22[%c0_158, %c0_159] : memref<64x256xf32, #tpu.memory_space<vmem>>, vector<64x256xf32>
    %385 = arith.truncf %384 : vector<64x256xf32> to vector<64x256xbf16>
    %c0_160 = arith.constant 0 : index
    %c0_161 = arith.constant 0 : index
    %386 = vector.load %arg23[%c0_160, %c0_161] : memref<256x1024xbf16, #tpu.memory_space<vmem>>, vector<256x1024xbf16>
    %cst_162 = arith.constant dense<0.000000e+00> : vector<64x1024xf32>
    %387 = tpu.matmul %385, %386, %cst_162 {dimension_numbers = #tpu.dot_dimension_numbers<[1], [0], [0], [1], [0, 0, 1, 1], [], []>} : vector<64x256xbf16>, vector<256x1024xbf16>, vector<64x1024xf32> -> vector<64x1024xf32>
    %c0_163 = arith.constant 0 : index
    %c0_164 = arith.constant 0 : index
    %388 = vector.load %arg9[%c0_163, %c0_164] : memref<1x1024xf32, #tpu.memory_space<vmem>>, vector<1x1024xf32>
    %389 = vector.broadcast %388 : vector<1x1024xf32> to vector<64x1024xf32>
    %390 = arith.addf %387, %389 : vector<64x1024xf32>
    %c0_165 = arith.constant 0 : index
    %c0_166 = arith.constant 0 : index
    %391 = vector.load %arg21[%c0_165, %c0_166] : memref<64x1024xf32, #tpu.memory_space<vmem>>, vector<64x1024xf32>
    tpu.vector_store %arg21[%c0_165, %c0_166], %390 {strides = array<i32>} : memref<64x1024xf32, #tpu.memory_space<vmem>>, vector<64x1024xf32>,
    %c1_i32_167 = arith.constant 1 : i32
    %392 = tpu.memref_slice %arg26[%c1_i32_167] : memref<3x!tpu.dma_semaphore, #tpu.memory_space<semaphore_mem>> -> memref<1x!tpu.dma_semaphore, #tpu.memory_space<semaphore_mem>>
    %393 = tpu.memref_squeeze %392 : memref<1x!tpu.dma_semaphore, #tpu.memory_space<semaphore_mem>> -> memref<!tpu.dma_semaphore, #tpu.memory_space<semaphore_mem>>
    tpu.wait_dma2 semaphore(%393 : memref<!tpu.dma_semaphore, #tpu.memory_space<semaphore_mem>>) src(%arg17 : memref<256x512xbf16, #tpu.memory_space<any>>) dst(%arg24 : memref<256x512xbf16, #tpu.memory_space<vmem>>)
    %cst_168 = arith.constant 0.000000e+00 : f32
    %394 = vector.broadcast %cst_168 : f32 to vector<8x128xf32>
    %cst_169 = arith.constant 0.000000e+00 : f32
    %395 = vector.broadcast %cst_169 : f32 to vector<8x128xf32>
    %cst_170 = arith.constant 0.000000e+00 : f32
    %396 = vector.broadcast %cst_170 : f32 to vector<8x128xf32>
    %c0_171 = arith.constant 0 : index
    %c0_172 = arith.constant 0 : index
    %397 = vector.load %arg21[%c0_171, %c0_172] : memref<64x1024xf32, #tpu.memory_space<vmem>>, vector<8x512xf32>
    %c56_173 = arith.constant 56 : index
    %c512_174 = arith.constant 512 : index
    %398 = vector.load %arg21[%c56_173, %c512_174] : memref<64x1024xf32, #tpu.memory_space<vmem>>, vector<8x512xf32>
    %c4_i32_175 = arith.constant 4 : i32
    %399 = tpu.dynamic_rotate %398 by %c4_i32_175 dim 0 : vector<8x512xf32>, i32 -> vector<8x512xf32>
    %400 = arith.select %32, %397, %399 : vector<8x512xi1>, vector<8x512xf32>
    %401 = arith.truncf %395 : vector<8x128xf32> to vector<8x128xbf16>
    %cst_176 = arith.constant 0.000000e+00 : f32
    %402 = arith.truncf %cst_176 : f32 to bf16
    %403 = vector.broadcast %402 : bf16 to vector<8x128xbf16>
    %404 = arith.select %35, %401, %403 : vector<8x128xi1>, vector<8x128xbf16>
    %cst_177 = arith.constant 0.000000e+00 : f32
    %405 = arith.truncf %cst_177 : f32 to bf16
    %406 = vector.broadcast %405 : bf16 to vector<8x128xbf16>
    %407 = arith.select %35, %406, %401 : vector<8x128xi1>, vector<8x128xbf16>
    %408 = tpu.concatenate %404, %407 in 1 : vector<8x128xbf16>, vector<8x128xbf16> -> vector<8x256xbf16>
    %c0_178 = arith.constant 0 : index
    %c0_179 = arith.constant 0 : index
    %409 = vector.load %arg24[%c0_178, %c0_179] : memref<256x512xbf16, #tpu.memory_space<vmem>>, vector<256x512xbf16>
    %cst_180 = arith.constant dense<0.000000e+00> : vector<8x512xf32>
    %410 = tpu.matmul %408, %409, %cst_180 {dimension_numbers = #tpu.dot_dimension_numbers<[1], [0], [0], [1], [0, 0, 1, 1], [], []>} : vector<8x256xbf16>, vector<256x512xbf16>, vector<8x512xf32> -> vector<8x512xf32>
    %411 = arith.addf %400, %410 : vector<8x512xf32>
    %412 = vector.extract_strided_slice %411 {offsets = [0, 0], sizes = [8, 128], strides = [1, 1]} : vector<8x512xf32> to vector<8x128xf32>
    %413 = arith.negf %412 : vector<8x128xf32>
    %414 = math.exp %413 : vector<8x128xf32>
    %cst_181 = arith.constant 1.000000e+00 : f32
    %415 = vector.broadcast %cst_181 : f32 to vector<8x128xf32>
    %416 = arith.addf %415, %414 : vector<8x128xf32>
    %417 = arith.divf %415, %416 : vector<8x128xf32>
    %418 = vector.extract_strided_slice %411 {offsets = [0, 128], sizes = [8, 128], strides = [1, 1]} : vector<8x512xf32> to vector<8x128xf32>
    %419 = arith.negf %418 : vector<8x128xf32>
    %420 = math.exp %419 : vector<8x128xf32>
    %cst_182 = arith.constant 1.000000e+00 : f32
    %421 = vector.broadcast %cst_182 : f32 to vector<8x128xf32>
    %422 = arith.addf %421, %420 : vector<8x128xf32>
    %423 = arith.divf %421, %422 : vector<8x128xf32>
    %424 = vector.extract_strided_slice %411 {offsets = [0, 256], sizes = [8, 128], strides = [1, 1]} : vector<8x512xf32> to vector<8x128xf32>
    %425 = math.tanh %424 : vector<8x128xf32>
    %426 = vector.extract_strided_slice %411 {offsets = [0, 384], sizes = [8, 128], strides = [1, 1]} : vector<8x512xf32> to vector<8x128xf32>
    %427 = arith.negf %426 : vector<8x128xf32>
    %428 = math.exp %427 : vector<8x128xf32>
    %cst_183 = arith.constant 1.000000e+00 : f32
    %429 = vector.broadcast %cst_183 : f32 to vector<8x128xf32>
    %430 = arith.addf %429, %428 : vector<8x128xf32>
    %431 = arith.divf %429, %430 : vector<8x128xf32>
    %432 = arith.mulf %423, %396 : vector<8x128xf32>
    %433 = arith.mulf %417, %425 : vector<8x128xf32>
    %434 = arith.addf %432, %433 : vector<8x128xf32>
    %435 = math.tanh %434 : vector<8x128xf32>
    %436 = arith.mulf %431, %435 : vector<8x128xf32>
    %437 = arith.addf %394, %436 : vector<8x128xf32>
    %c8_184 = arith.constant 8 : index
    %c0_185 = arith.constant 0 : index
    %438 = vector.load %arg21[%c8_184, %c0_185] : memref<64x1024xf32, #tpu.memory_space<vmem>>, vector<8x512xf32>
    %c48_186 = arith.constant 48 : index
    %c512_187 = arith.constant 512 : index
    %439 = vector.load %arg21[%c48_186, %c512_187] : memref<64x1024xf32, #tpu.memory_space<vmem>>, vector<8x512xf32>
    %c4_i32_188 = arith.constant 4 : i32
    %440 = tpu.dynamic_rotate %439 by %c4_i32_188 dim 0 : vector<8x512xf32>, i32 -> vector<8x512xf32>
    %441 = arith.select %32, %438, %440 : vector<8x512xi1>, vector<8x512xf32>
    %442 = arith.truncf %436 : vector<8x128xf32> to vector<8x128xbf16>
    %cst_189 = arith.constant 0.000000e+00 : f32
    %443 = arith.truncf %cst_189 : f32 to bf16
    %444 = vector.broadcast %443 : bf16 to vector<8x128xbf16>
    %445 = arith.select %35, %442, %444 : vector<8x128xi1>, vector<8x128xbf16>
    %cst_190 = arith.constant 0.000000e+00 : f32
    %446 = arith.truncf %cst_190 : f32 to bf16
    %447 = vector.broadcast %446 : bf16 to vector<8x128xbf16>
    %448 = arith.select %35, %447, %442 : vector<8x128xi1>, vector<8x128xbf16>
    %449 = tpu.concatenate %445, %448 in 1 : vector<8x128xbf16>, vector<8x128xbf16> -> vector<8x256xbf16>
    %c0_191 = arith.constant 0 : index
    %c0_192 = arith.constant 0 : index
    %450 = vector.load %arg24[%c0_191, %c0_192] : memref<256x512xbf16, #tpu.memory_space<vmem>>, vector<256x512xbf16>
    %cst_193 = arith.constant dense<0.000000e+00> : vector<8x512xf32>
    %451 = tpu.matmul %449, %450, %cst_193 {dimension_numbers = #tpu.dot_dimension_numbers<[1], [0], [0], [1], [0, 0, 1, 1], [], []>} : vector<8x256xbf16>, vector<256x512xbf16>, vector<8x512xf32> -> vector<8x512xf32>
    %452 = arith.addf %441, %451 : vector<8x512xf32>
    %453 = vector.extract_strided_slice %452 {offsets = [0, 0], sizes = [8, 128], strides = [1, 1]} : vector<8x512xf32> to vector<8x128xf32>
    %454 = arith.negf %453 : vector<8x128xf32>
    %455 = math.exp %454 : vector<8x128xf32>
    %cst_194 = arith.constant 1.000000e+00 : f32
    %456 = vector.broadcast %cst_194 : f32 to vector<8x128xf32>
    %457 = arith.addf %456, %455 : vector<8x128xf32>
    %458 = arith.divf %456, %457 : vector<8x128xf32>
    %459 = vector.extract_strided_slice %452 {offsets = [0, 128], sizes = [8, 128], strides = [1, 1]} : vector<8x512xf32> to vector<8x128xf32>
    %460 = arith.negf %459 : vector<8x128xf32>
    %461 = math.exp %460 : vector<8x128xf32>
    %cst_195 = arith.constant 1.000000e+00 : f32
    %462 = vector.broadcast %cst_195 : f32 to vector<8x128xf32>
    %463 = arith.addf %462, %461 : vector<8x128xf32>
    %464 = arith.divf %462, %463 : vector<8x128xf32>
    %465 = vector.extract_strided_slice %452 {offsets = [0, 256], sizes = [8, 128], strides = [1, 1]} : vector<8x512xf32> to vector<8x128xf32>
    %466 = math.tanh %465 : vector<8x128xf32>
    %467 = vector.extract_strided_slice %452 {offsets = [0, 384], sizes = [8, 128], strides = [1, 1]} : vector<8x512xf32> to vector<8x128xf32>
    %468 = arith.negf %467 : vector<8x128xf32>
    %469 = math.exp %468 : vector<8x128xf32>
    %cst_196 = arith.constant 1.000000e+00 : f32
    %470 = vector.broadcast %cst_196 : f32 to vector<8x128xf32>
    %471 = arith.addf %470, %469 : vector<8x128xf32>
    %472 = arith.divf %470, %471 : vector<8x128xf32>
    %473 = arith.mulf %464, %434 : vector<8x128xf32>
    %474 = arith.mulf %458, %466 : vector<8x128xf32>
    %475 = arith.addf %473, %474 : vector<8x128xf32>
    %476 = math.tanh %475 : vector<8x128xf32>
    %477 = arith.mulf %472, %476 : vector<8x128xf32>
    %478 = arith.addf %437, %477 : vector<8x128xf32>
    %c16_197 = arith.constant 16 : index
    %c0_198 = arith.constant 0 : index
    %479 = vector.load %arg21[%c16_197, %c0_198] : memref<64x1024xf32, #tpu.memory_space<vmem>>, vector<8x512xf32>
    %c40_199 = arith.constant 40 : index
    %c512_200 = arith.constant 512 : index
    %480 = vector.load %arg21[%c40_199, %c512_200] : memref<64x1024xf32, #tpu.memory_space<vmem>>, vector<8x512xf32>
    %c4_i32_201 = arith.constant 4 : i32
    %481 = tpu.dynamic_rotate %480 by %c4_i32_201 dim 0 : vector<8x512xf32>, i32 -> vector<8x512xf32>
    %482 = arith.select %32, %479, %481 : vector<8x512xi1>, vector<8x512xf32>
    %483 = arith.truncf %477 : vector<8x128xf32> to vector<8x128xbf16>
    %cst_202 = arith.constant 0.000000e+00 : f32
    %484 = arith.truncf %cst_202 : f32 to bf16
    %485 = vector.broadcast %484 : bf16 to vector<8x128xbf16>
    %486 = arith.select %35, %483, %485 : vector<8x128xi1>, vector<8x128xbf16>
    %cst_203 = arith.constant 0.000000e+00 : f32
    %487 = arith.truncf %cst_203 : f32 to bf16
    %488 = vector.broadcast %487 : bf16 to vector<8x128xbf16>
    %489 = arith.select %35, %488, %483 : vector<8x128xi1>, vector<8x128xbf16>
    %490 = tpu.concatenate %486, %489 in 1 : vector<8x128xbf16>, vector<8x128xbf16> -> vector<8x256xbf16>
    %c0_204 = arith.constant 0 : index
    %c0_205 = arith.constant 0 : index
    %491 = vector.load %arg24[%c0_204, %c0_205] : memref<256x512xbf16, #tpu.memory_space<vmem>>, vector<256x512xbf16>
    %cst_206 = arith.constant dense<0.000000e+00> : vector<8x512xf32>
    %492 = tpu.matmul %490, %491, %cst_206 {dimension_numbers = #tpu.dot_dimension_numbers<[1], [0], [0], [1], [0, 0, 1, 1], [], []>} : vector<8x256xbf16>, vector<256x512xbf16>, vector<8x512xf32> -> vector<8x512xf32>
    %493 = arith.addf %482, %492 : vector<8x512xf32>
    %494 = vector.extract_strided_slice %493 {offsets = [0, 0], sizes = [8, 128], strides = [1, 1]} : vector<8x512xf32> to vector<8x128xf32>
    %495 = arith.negf %494 : vector<8x128xf32>
    %496 = math.exp %495 : vector<8x128xf32>
    %cst_207 = arith.constant 1.000000e+00 : f32
    %497 = vector.broadcast %cst_207 : f32 to vector<8x128xf32>
    %498 = arith.addf %497, %496 : vector<8x128xf32>
    %499 = arith.divf %497, %498 : vector<8x128xf32>
    %500 = vector.extract_strided_slice %493 {offsets = [0, 128], sizes = [8, 128], strides = [1, 1]} : vector<8x512xf32> to vector<8x128xf32>
    %501 = arith.negf %500 : vector<8x128xf32>
    %502 = math.exp %501 : vector<8x128xf32>
    %cst_208 = arith.constant 1.000000e+00 : f32
    %503 = vector.broadcast %cst_208 : f32 to vector<8x128xf32>
    %504 = arith.addf %503, %502 : vector<8x128xf32>
    %505 = arith.divf %503, %504 : vector<8x128xf32>
    %506 = vector.extract_strided_slice %493 {offsets = [0, 256], sizes = [8, 128], strides = [1, 1]} : vector<8x512xf32> to vector<8x128xf32>
    %507 = math.tanh %506 : vector<8x128xf32>
    %508 = vector.extract_strided_slice %493 {offsets = [0, 384], sizes = [8, 128], strides = [1, 1]} : vector<8x512xf32> to vector<8x128xf32>
    %509 = arith.negf %508 : vector<8x128xf32>
    %510 = math.exp %509 : vector<8x128xf32>
    %cst_209 = arith.constant 1.000000e+00 : f32
    %511 = vector.broadcast %cst_209 : f32 to vector<8x128xf32>
    %512 = arith.addf %511, %510 : vector<8x128xf32>
    %513 = arith.divf %511, %512 : vector<8x128xf32>
    %514 = arith.mulf %505, %475 : vector<8x128xf32>
    %515 = arith.mulf %499, %507 : vector<8x128xf32>
    %516 = arith.addf %514, %515 : vector<8x128xf32>
    %517 = math.tanh %516 : vector<8x128xf32>
    %518 = arith.mulf %513, %517 : vector<8x128xf32>
    %519 = arith.addf %478, %518 : vector<8x128xf32>
    %c24_210 = arith.constant 24 : index
    %c0_211 = arith.constant 0 : index
    %520 = vector.load %arg21[%c24_210, %c0_211] : memref<64x1024xf32, #tpu.memory_space<vmem>>, vector<8x512xf32>
    %c32_212 = arith.constant 32 : index
    %c512_213 = arith.constant 512 : index
    %521 = vector.load %arg21[%c32_212, %c512_213] : memref<64x1024xf32, #tpu.memory_space<vmem>>, vector<8x512xf32>
    %c4_i32_214 = arith.constant 4 : i32
    %522 = tpu.dynamic_rotate %521 by %c4_i32_214 dim 0 : vector<8x512xf32>, i32 -> vector<8x512xf32>
    %523 = arith.select %32, %520, %522 : vector<8x512xi1>, vector<8x512xf32>
    %524 = arith.truncf %518 : vector<8x128xf32> to vector<8x128xbf16>
    %cst_215 = arith.constant 0.000000e+00 : f32
    %525 = arith.truncf %cst_215 : f32 to bf16
    %526 = vector.broadcast %525 : bf16 to vector<8x128xbf16>
    %527 = arith.select %35, %524, %526 : vector<8x128xi1>, vector<8x128xbf16>
    %cst_216 = arith.constant 0.000000e+00 : f32
    %528 = arith.truncf %cst_216 : f32 to bf16
    %529 = vector.broadcast %528 : bf16 to vector<8x128xbf16>
    %530 = arith.select %35, %529, %524 : vector<8x128xi1>, vector<8x128xbf16>
    %531 = tpu.concatenate %527, %530 in 1 : vector<8x128xbf16>, vector<8x128xbf16> -> vector<8x256xbf16>
    %c0_217 = arith.constant 0 : index
    %c0_218 = arith.constant 0 : index
    %532 = vector.load %arg24[%c0_217, %c0_218] : memref<256x512xbf16, #tpu.memory_space<vmem>>, vector<256x512xbf16>
    %cst_219 = arith.constant dense<0.000000e+00> : vector<8x512xf32>
    %533 = tpu.matmul %531, %532, %cst_219 {dimension_numbers = #tpu.dot_dimension_numbers<[1], [0], [0], [1], [0, 0, 1, 1], [], []>} : vector<8x256xbf16>, vector<256x512xbf16>, vector<8x512xf32> -> vector<8x512xf32>
    %534 = arith.addf %523, %533 : vector<8x512xf32>
    %535 = vector.extract_strided_slice %534 {offsets = [0, 0], sizes = [8, 128], strides = [1, 1]} : vector<8x512xf32> to vector<8x128xf32>
    %536 = arith.negf %535 : vector<8x128xf32>
    %537 = math.exp %536 : vector<8x128xf32>
    %cst_220 = arith.constant 1.000000e+00 : f32
    %538 = vector.broadcast %cst_220 : f32 to vector<8x128xf32>
    %539 = arith.addf %538, %537 : vector<8x128xf32>
    %540 = arith.divf %538, %539 : vector<8x128xf32>
    %541 = vector.extract_strided_slice %534 {offsets = [0, 128], sizes = [8, 128], strides = [1, 1]} : vector<8x512xf32> to vector<8x128xf32>
    %542 = arith.negf %541 : vector<8x128xf32>
    %543 = math.exp %542 : vector<8x128xf32>
    %cst_221 = arith.constant 1.000000e+00 : f32
    %544 = vector.broadcast %cst_221 : f32 to vector<8x128xf32>
    %545 = arith.addf %544, %543 : vector<8x128xf32>
    %546 = arith.divf %544, %545 : vector<8x128xf32>
    %547 = vector.extract_strided_slice %534 {offsets = [0, 256], sizes = [8, 128], strides = [1, 1]} : vector<8x512xf32> to vector<8x128xf32>
    %548 = math.tanh %547 : vector<8x128xf32>
    %549 = vector.extract_strided_slice %534 {offsets = [0, 384], sizes = [8, 128], strides = [1, 1]} : vector<8x512xf32> to vector<8x128xf32>
    %550 = arith.negf %549 : vector<8x128xf32>
    %551 = math.exp %550 : vector<8x128xf32>
    %cst_222 = arith.constant 1.000000e+00 : f32
    %552 = vector.broadcast %cst_222 : f32 to vector<8x128xf32>
    %553 = arith.addf %552, %551 : vector<8x128xf32>
    %554 = arith.divf %552, %553 : vector<8x128xf32>
    %555 = arith.mulf %546, %516 : vector<8x128xf32>
    %556 = arith.mulf %540, %548 : vector<8x128xf32>
    %557 = arith.addf %555, %556 : vector<8x128xf32>
    %558 = math.tanh %557 : vector<8x128xf32>
    %559 = arith.mulf %554, %558 : vector<8x128xf32>
    %560 = arith.addf %519, %559 : vector<8x128xf32>
    %c32_223 = arith.constant 32 : index
    %c0_224 = arith.constant 0 : index
    %561 = vector.load %arg21[%c32_223, %c0_224] : memref<64x1024xf32, #tpu.memory_space<vmem>>, vector<8x512xf32>
    %c24_225 = arith.constant 24 : index
    %c512_226 = arith.constant 512 : index
    %562 = vector.load %arg21[%c24_225, %c512_226] : memref<64x1024xf32, #tpu.memory_space<vmem>>, vector<8x512xf32>
    %c4_i32_227 = arith.constant 4 : i32
    %563 = tpu.dynamic_rotate %562 by %c4_i32_227 dim 0 : vector<8x512xf32>, i32 -> vector<8x512xf32>
    %564 = arith.select %32, %561, %563 : vector<8x512xi1>, vector<8x512xf32>
    %565 = arith.truncf %559 : vector<8x128xf32> to vector<8x128xbf16>
    %cst_228 = arith.constant 0.000000e+00 : f32
    %566 = arith.truncf %cst_228 : f32 to bf16
    %567 = vector.broadcast %566 : bf16 to vector<8x128xbf16>
    %568 = arith.select %35, %565, %567 : vector<8x128xi1>, vector<8x128xbf16>
    %cst_229 = arith.constant 0.000000e+00 : f32
    %569 = arith.truncf %cst_229 : f32 to bf16
    %570 = vector.broadcast %569 : bf16 to vector<8x128xbf16>
    %571 = arith.select %35, %570, %565 : vector<8x128xi1>, vector<8x128xbf16>
    %572 = tpu.concatenate %568, %571 in 1 : vector<8x128xbf16>, vector<8x128xbf16> -> vector<8x256xbf16>
    %c0_230 = arith.constant 0 : index
    %c0_231 = arith.constant 0 : index
    %573 = vector.load %arg24[%c0_230, %c0_231] : memref<256x512xbf16, #tpu.memory_space<vmem>>, vector<256x512xbf16>
    %cst_232 = arith.constant dense<0.000000e+00> : vector<8x512xf32>
    %574 = tpu.matmul %572, %573, %cst_232 {dimension_numbers = #tpu.dot_dimension_numbers<[1], [0], [0], [1], [0, 0, 1, 1], [], []>} : vector<8x256xbf16>, vector<256x512xbf16>, vector<8x512xf32> -> vector<8x512xf32>
    %575 = arith.addf %564, %574 : vector<8x512xf32>
    %576 = vector.extract_strided_slice %575 {offsets = [0, 0], sizes = [8, 128], strides = [1, 1]} : vector<8x512xf32> to vector<8x128xf32>
    %577 = arith.negf %576 : vector<8x128xf32>
    %578 = math.exp %577 : vector<8x128xf32>
    %cst_233 = arith.constant 1.000000e+00 : f32
    %579 = vector.broadcast %cst_233 : f32 to vector<8x128xf32>
    %580 = arith.addf %579, %578 : vector<8x128xf32>
    %581 = arith.divf %579, %580 : vector<8x128xf32>
    %582 = vector.extract_strided_slice %575 {offsets = [0, 128], sizes = [8, 128], strides = [1, 1]} : vector<8x512xf32> to vector<8x128xf32>
    %583 = arith.negf %582 : vector<8x128xf32>
    %584 = math.exp %583 : vector<8x128xf32>
    %cst_234 = arith.constant 1.000000e+00 : f32
    %585 = vector.broadcast %cst_234 : f32 to vector<8x128xf32>
    %586 = arith.addf %585, %584 : vector<8x128xf32>
    %587 = arith.divf %585, %586 : vector<8x128xf32>
    %588 = vector.extract_strided_slice %575 {offsets = [0, 256], sizes = [8, 128], strides = [1, 1]} : vector<8x512xf32> to vector<8x128xf32>
    %589 = math.tanh %588 : vector<8x128xf32>
    %590 = vector.extract_strided_slice %575 {offsets = [0, 384], sizes = [8, 128], strides = [1, 1]} : vector<8x512xf32> to vector<8x128xf32>
    %591 = arith.negf %590 : vector<8x128xf32>
    %592 = math.exp %591 : vector<8x128xf32>
    %cst_235 = arith.constant 1.000000e+00 : f32
    %593 = vector.broadcast %cst_235 : f32 to vector<8x128xf32>
    %594 = arith.addf %593, %592 : vector<8x128xf32>
    %595 = arith.divf %593, %594 : vector<8x128xf32>
    %596 = arith.mulf %587, %557 : vector<8x128xf32>
    %597 = arith.mulf %581, %589 : vector<8x128xf32>
    %598 = arith.addf %596, %597 : vector<8x128xf32>
    %599 = math.tanh %598 : vector<8x128xf32>
    %600 = arith.mulf %595, %599 : vector<8x128xf32>
    %601 = arith.addf %560, %600 : vector<8x128xf32>
    %c40_236 = arith.constant 40 : index
    %c0_237 = arith.constant 0 : index
    %602 = vector.load %arg21[%c40_236, %c0_237] : memref<64x1024xf32, #tpu.memory_space<vmem>>, vector<8x512xf32>
    %c16_238 = arith.constant 16 : index
    %c512_239 = arith.constant 512 : index
    %603 = vector.load %arg21[%c16_238, %c512_239] : memref<64x1024xf32, #tpu.memory_space<vmem>>, vector<8x512xf32>
    %c4_i32_240 = arith.constant 4 : i32
    %604 = tpu.dynamic_rotate %603 by %c4_i32_240 dim 0 : vector<8x512xf32>, i32 -> vector<8x512xf32>
    %605 = arith.select %32, %602, %604 : vector<8x512xi1>, vector<8x512xf32>
    %606 = arith.truncf %600 : vector<8x128xf32> to vector<8x128xbf16>
    %cst_241 = arith.constant 0.000000e+00 : f32
    %607 = arith.truncf %cst_241 : f32 to bf16
    %608 = vector.broadcast %607 : bf16 to vector<8x128xbf16>
    %609 = arith.select %35, %606, %608 : vector<8x128xi1>, vector<8x128xbf16>
    %cst_242 = arith.constant 0.000000e+00 : f32
    %610 = arith.truncf %cst_242 : f32 to bf16
    %611 = vector.broadcast %610 : bf16 to vector<8x128xbf16>
    %612 = arith.select %35, %611, %606 : vector<8x128xi1>, vector<8x128xbf16>
    %613 = tpu.concatenate %609, %612 in 1 : vector<8x128xbf16>, vector<8x128xbf16> -> vector<8x256xbf16>
    %c0_243 = arith.constant 0 : index
    %c0_244 = arith.constant 0 : index
    %614 = vector.load %arg24[%c0_243, %c0_244] : memref<256x512xbf16, #tpu.memory_space<vmem>>, vector<256x512xbf16>
    %cst_245 = arith.constant dense<0.000000e+00> : vector<8x512xf32>
    %615 = tpu.matmul %613, %614, %cst_245 {dimension_numbers = #tpu.dot_dimension_numbers<[1], [0], [0], [1], [0, 0, 1, 1], [], []>} : vector<8x256xbf16>, vector<256x512xbf16>, vector<8x512xf32> -> vector<8x512xf32>
    %616 = arith.addf %605, %615 : vector<8x512xf32>
    %617 = vector.extract_strided_slice %616 {offsets = [0, 0], sizes = [8, 128], strides = [1, 1]} : vector<8x512xf32> to vector<8x128xf32>
    %618 = arith.negf %617 : vector<8x128xf32>
    %619 = math.exp %618 : vector<8x128xf32>
    %cst_246 = arith.constant 1.000000e+00 : f32
    %620 = vector.broadcast %cst_246 : f32 to vector<8x128xf32>
    %621 = arith.addf %620, %619 : vector<8x128xf32>
    %622 = arith.divf %620, %621 : vector<8x128xf32>
    %623 = vector.extract_strided_slice %616 {offsets = [0, 128], sizes = [8, 128], strides = [1, 1]} : vector<8x512xf32> to vector<8x128xf32>
    %624 = arith.negf %623 : vector<8x128xf32>
    %625 = math.exp %624 : vector<8x128xf32>
    %cst_247 = arith.constant 1.000000e+00 : f32
    %626 = vector.broadcast %cst_247 : f32 to vector<8x128xf32>
    %627 = arith.addf %626, %625 : vector<8x128xf32>
    %628 = arith.divf %626, %627 : vector<8x128xf32>
    %629 = vector.extract_strided_slice %616 {offsets = [0, 256], sizes = [8, 128], strides = [1, 1]} : vector<8x512xf32> to vector<8x128xf32>
    %630 = math.tanh %629 : vector<8x128xf32>
    %631 = vector.extract_strided_slice %616 {offsets = [0, 384], sizes = [8, 128], strides = [1, 1]} : vector<8x512xf32> to vector<8x128xf32>
    %632 = arith.negf %631 : vector<8x128xf32>
    %633 = math.exp %632 : vector<8x128xf32>
    %cst_248 = arith.constant 1.000000e+00 : f32
    %634 = vector.broadcast %cst_248 : f32 to vector<8x128xf32>
    %635 = arith.addf %634, %633 : vector<8x128xf32>
    %636 = arith.divf %634, %635 : vector<8x128xf32>
    %637 = arith.mulf %628, %598 : vector<8x128xf32>
    %638 = arith.mulf %622, %630 : vector<8x128xf32>
    %639 = arith.addf %637, %638 : vector<8x128xf32>
    %640 = math.tanh %639 : vector<8x128xf32>
    %641 = arith.mulf %636, %640 : vector<8x128xf32>
    %642 = arith.addf %601, %641 : vector<8x128xf32>
    %c48_249 = arith.constant 48 : index
    %c0_250 = arith.constant 0 : index
    %643 = vector.load %arg21[%c48_249, %c0_250] : memref<64x1024xf32, #tpu.memory_space<vmem>>, vector<8x512xf32>
    %c8_251 = arith.constant 8 : index
    %c512_252 = arith.constant 512 : index
    %644 = vector.load %arg21[%c8_251, %c512_252] : memref<64x1024xf32, #tpu.memory_space<vmem>>, vector<8x512xf32>
    %c4_i32_253 = arith.constant 4 : i32
    %645 = tpu.dynamic_rotate %644 by %c4_i32_253 dim 0 : vector<8x512xf32>, i32 -> vector<8x512xf32>
    %646 = arith.select %32, %643, %645 : vector<8x512xi1>, vector<8x512xf32>
    %647 = arith.truncf %641 : vector<8x128xf32> to vector<8x128xbf16>
    %cst_254 = arith.constant 0.000000e+00 : f32
    %648 = arith.truncf %cst_254 : f32 to bf16
    %649 = vector.broadcast %648 : bf16 to vector<8x128xbf16>
    %650 = arith.select %35, %647, %649 : vector<8x128xi1>, vector<8x128xbf16>
    %cst_255 = arith.constant 0.000000e+00 : f32
    %651 = arith.truncf %cst_255 : f32 to bf16
    %652 = vector.broadcast %651 : bf16 to vector<8x128xbf16>
    %653 = arith.select %35, %652, %647 : vector<8x128xi1>, vector<8x128xbf16>
    %654 = tpu.concatenate %650, %653 in 1 : vector<8x128xbf16>, vector<8x128xbf16> -> vector<8x256xbf16>
    %c0_256 = arith.constant 0 : index
    %c0_257 = arith.constant 0 : index
    %655 = vector.load %arg24[%c0_256, %c0_257] : memref<256x512xbf16, #tpu.memory_space<vmem>>, vector<256x512xbf16>
    %cst_258 = arith.constant dense<0.000000e+00> : vector<8x512xf32>
    %656 = tpu.matmul %654, %655, %cst_258 {dimension_numbers = #tpu.dot_dimension_numbers<[1], [0], [0], [1], [0, 0, 1, 1], [], []>} : vector<8x256xbf16>, vector<256x512xbf16>, vector<8x512xf32> -> vector<8x512xf32>
    %657 = arith.addf %646, %656 : vector<8x512xf32>
    %658 = vector.extract_strided_slice %657 {offsets = [0, 0], sizes = [8, 128], strides = [1, 1]} : vector<8x512xf32> to vector<8x128xf32>
    %659 = arith.negf %658 : vector<8x128xf32>
    %660 = math.exp %659 : vector<8x128xf32>
    %cst_259 = arith.constant 1.000000e+00 : f32
    %661 = vector.broadcast %cst_259 : f32 to vector<8x128xf32>
    %662 = arith.addf %661, %660 : vector<8x128xf32>
    %663 = arith.divf %661, %662 : vector<8x128xf32>
    %664 = vector.extract_strided_slice %657 {offsets = [0, 128], sizes = [8, 128], strides = [1, 1]} : vector<8x512xf32> to vector<8x128xf32>
    %665 = arith.negf %664 : vector<8x128xf32>
    %666 = math.exp %665 : vector<8x128xf32>
    %cst_260 = arith.constant 1.000000e+00 : f32
    %667 = vector.broadcast %cst_260 : f32 to vector<8x128xf32>
    %668 = arith.addf %667, %666 : vector<8x128xf32>
    %669 = arith.divf %667, %668 : vector<8x128xf32>
    %670 = vector.extract_strided_slice %657 {offsets = [0, 256], sizes = [8, 128], strides = [1, 1]} : vector<8x512xf32> to vector<8x128xf32>
    %671 = math.tanh %670 : vector<8x128xf32>
    %672 = vector.extract_strided_slice %657 {offsets = [0, 384], sizes = [8, 128], strides = [1, 1]} : vector<8x512xf32> to vector<8x128xf32>
    %673 = arith.negf %672 : vector<8x128xf32>
    %674 = math.exp %673 : vector<8x128xf32>
    %cst_261 = arith.constant 1.000000e+00 : f32
    %675 = vector.broadcast %cst_261 : f32 to vector<8x128xf32>
    %676 = arith.addf %675, %674 : vector<8x128xf32>
    %677 = arith.divf %675, %676 : vector<8x128xf32>
    %678 = arith.mulf %669, %639 : vector<8x128xf32>
    %679 = arith.mulf %663, %671 : vector<8x128xf32>
    %680 = arith.addf %678, %679 : vector<8x128xf32>
    %681 = math.tanh %680 : vector<8x128xf32>
    %682 = arith.mulf %677, %681 : vector<8x128xf32>
    %683 = arith.addf %642, %682 : vector<8x128xf32>
    %c56_262 = arith.constant 56 : index
    %c0_263 = arith.constant 0 : index
    %684 = vector.load %arg21[%c56_262, %c0_263] : memref<64x1024xf32, #tpu.memory_space<vmem>>, vector<8x512xf32>
    %c0_264 = arith.constant 0 : index
    %c512_265 = arith.constant 512 : index
    %685 = vector.load %arg21[%c0_264, %c512_265] : memref<64x1024xf32, #tpu.memory_space<vmem>>, vector<8x512xf32>
    %c4_i32_266 = arith.constant 4 : i32
    %686 = tpu.dynamic_rotate %685 by %c4_i32_266 dim 0 : vector<8x512xf32>, i32 -> vector<8x512xf32>
    %687 = arith.select %32, %684, %686 : vector<8x512xi1>, vector<8x512xf32>
    %688 = arith.truncf %682 : vector<8x128xf32> to vector<8x128xbf16>
    %cst_267 = arith.constant 0.000000e+00 : f32
    %689 = arith.truncf %cst_267 : f32 to bf16
    %690 = vector.broadcast %689 : bf16 to vector<8x128xbf16>
    %691 = arith.select %35, %688, %690 : vector<8x128xi1>, vector<8x128xbf16>
    %cst_268 = arith.constant 0.000000e+00 : f32
    %692 = arith.truncf %cst_268 : f32 to bf16
    %693 = vector.broadcast %692 : bf16 to vector<8x128xbf16>
    %694 = arith.select %35, %693, %688 : vector<8x128xi1>, vector<8x128xbf16>
    %695 = tpu.concatenate %691, %694 in 1 : vector<8x128xbf16>, vector<8x128xbf16> -> vector<8x256xbf16>
    %c0_269 = arith.constant 0 : index
    %c0_270 = arith.constant 0 : index
    %696 = vector.load %arg24[%c0_269, %c0_270] : memref<256x512xbf16, #tpu.memory_space<vmem>>, vector<256x512xbf16>
    %cst_271 = arith.constant dense<0.000000e+00> : vector<8x512xf32>
    %697 = tpu.matmul %695, %696, %cst_271 {dimension_numbers = #tpu.dot_dimension_numbers<[1], [0], [0], [1], [0, 0, 1, 1], [], []>} : vector<8x256xbf16>, vector<256x512xbf16>, vector<8x512xf32> -> vector<8x512xf32>
    %698 = arith.addf %687, %697 : vector<8x512xf32>
    %699 = vector.extract_strided_slice %698 {offsets = [0, 0], sizes = [8, 128], strides = [1, 1]} : vector<8x512xf32> to vector<8x128xf32>
    %700 = arith.negf %699 : vector<8x128xf32>
    %701 = math.exp %700 : vector<8x128xf32>
    %cst_272 = arith.constant 1.000000e+00 : f32
    %702 = vector.broadcast %cst_272 : f32 to vector<8x128xf32>
    %703 = arith.addf %702, %701 : vector<8x128xf32>
    %704 = arith.divf %702, %703 : vector<8x128xf32>
    %705 = vector.extract_strided_slice %698 {offsets = [0, 128], sizes = [8, 128], strides = [1, 1]} : vector<8x512xf32> to vector<8x128xf32>
    %706 = arith.negf %705 : vector<8x128xf32>
    %707 = math.exp %706 : vector<8x128xf32>
    %cst_273 = arith.constant 1.000000e+00 : f32
    %708 = vector.broadcast %cst_273 : f32 to vector<8x128xf32>
    %709 = arith.addf %708, %707 : vector<8x128xf32>
    %710 = arith.divf %708, %709 : vector<8x128xf32>
    %711 = vector.extract_strided_slice %698 {offsets = [0, 256], sizes = [8, 128], strides = [1, 1]} : vector<8x512xf32> to vector<8x128xf32>
    %712 = math.tanh %711 : vector<8x128xf32>
    %713 = vector.extract_strided_slice %698 {offsets = [0, 384], sizes = [8, 128], strides = [1, 1]} : vector<8x512xf32> to vector<8x128xf32>
    %714 = arith.negf %713 : vector<8x128xf32>
    %715 = math.exp %714 : vector<8x128xf32>
    %cst_274 = arith.constant 1.000000e+00 : f32
    %716 = vector.broadcast %cst_274 : f32 to vector<8x128xf32>
    %717 = arith.addf %716, %715 : vector<8x128xf32>
    %718 = arith.divf %716, %717 : vector<8x128xf32>
    %719 = arith.mulf %710, %680 : vector<8x128xf32>
    %720 = arith.mulf %704, %712 : vector<8x128xf32>
    %721 = arith.addf %719, %720 : vector<8x128xf32>
    %722 = math.tanh %721 : vector<8x128xf32>
    %723 = arith.mulf %718, %722 : vector<8x128xf32>
    %724 = arith.addf %683, %723 : vector<8x128xf32>
    %c4_i32_275 = arith.constant 4 : i32
    %725 = tpu.dynamic_rotate %724 by %c4_i32_275 dim 0 : vector<8x128xf32>, i32 -> vector<8x128xf32>
    %726 = tpu.concatenate %724, %725 in 1 : vector<8x128xf32>, vector<8x128xf32> -> vector<8x256xf32>
    %cst_276 = arith.constant 1.250000e-01 : f32
    %727 = vector.broadcast %cst_276 : f32 to vector<8x256xf32>
    %728 = arith.mulf %726, %727 : vector<8x256xf32>
    %c0_277 = arith.constant 0 : index
    %c0_278 = arith.constant 0 : index
    %729 = vector.load %arg1[%c0_277, %c0_278] : memref<8x5xf32, #tpu.memory_space<vmem>>, vector<8x5xf32>
    %730 = arith.truncf %729 : vector<8x5xf32> to vector<8x5xbf16>
    %c0_279 = arith.constant 0 : index
    %c0_280 = arith.constant 0 : index
    %731 = vector.load %arg10[%c0_279, %c0_280] : memref<5x64xbf16, #tpu.memory_space<vmem>>, vector<5x64xbf16>
    %cst_281 = arith.constant dense<0.000000e+00> : vector<8x64xf32>
    %732 = tpu.matmul %730, %731, %cst_281 {dimension_numbers = #tpu.dot_dimension_numbers<[1], [0], [0], [1], [0, 0, 1, 1], [], []>} : vector<8x5xbf16>, vector<5x64xbf16>, vector<8x64xf32> -> vector<8x64xf32>
    %c0_282 = arith.constant 0 : index
    %c0_283 = arith.constant 0 : index
    %733 = vector.load %arg11[%c0_282, %c0_283] : memref<1x64xf32, #tpu.memory_space<vmem>>, vector<1x64xf32>
    %734 = vector.broadcast %733 : vector<1x64xf32> to vector<8x64xf32>
    %735 = arith.addf %732, %734 : vector<8x64xf32>
    %cst_284 = arith.constant 0.000000e+00 : f32
    %736 = vector.broadcast %cst_284 : f32 to vector<8x64xf32>
    %737 = arith.maximumf %735, %736 : vector<8x64xf32>
    %738 = arith.truncf %737 : vector<8x64xf32> to vector<8x64xbf16>
    %c0_285 = arith.constant 0 : index
    %c0_286 = arith.constant 0 : index
    %739 = vector.load %arg12[%c0_285, %c0_286] : memref<64x64xbf16, #tpu.memory_space<vmem>>, vector<64x64xbf16>
    %cst_287 = arith.constant dense<0.000000e+00> : vector<8x64xf32>
    %740 = tpu.matmul %738, %739, %cst_287 {dimension_numbers = #tpu.dot_dimension_numbers<[1], [0], [0], [1], [0, 0, 1, 1], [], []>} : vector<8x64xbf16>, vector<64x64xbf16>, vector<8x64xf32> -> vector<8x64xf32>
    %c0_288 = arith.constant 0 : index
    %c0_289 = arith.constant 0 : index
    %741 = vector.load %arg13[%c0_288, %c0_289] : memref<1x64xf32, #tpu.memory_space<vmem>>, vector<1x64xf32>
    %742 = vector.broadcast %741 : vector<1x64xf32> to vector<8x64xf32>
    %743 = arith.addf %740, %742 : vector<8x64xf32>
    %c2_i32_290 = arith.constant 2 : i32
    %744 = tpu.memref_slice %arg26[%c2_i32_290] : memref<3x!tpu.dma_semaphore, #tpu.memory_space<semaphore_mem>> -> memref<1x!tpu.dma_semaphore, #tpu.memory_space<semaphore_mem>>
    %745 = tpu.memref_squeeze %744 : memref<1x!tpu.dma_semaphore, #tpu.memory_space<semaphore_mem>> -> memref<!tpu.dma_semaphore, #tpu.memory_space<semaphore_mem>>
    tpu.wait_dma2 semaphore(%745 : memref<!tpu.dma_semaphore, #tpu.memory_space<semaphore_mem>>) src(%arg18 : memref<256x128xbf16, #tpu.memory_space<any>>) dst(%arg25 : memref<256x128xbf16, #tpu.memory_space<vmem>>)
    %746 = arith.truncf %728 : vector<8x256xf32> to vector<8x256xbf16>
    %c0_291 = arith.constant 0 : index
    %c0_292 = arith.constant 0 : index
    %747 = vector.load %arg25[%c0_291, %c0_292] : memref<256x128xbf16, #tpu.memory_space<vmem>>, vector<256x128xbf16>
    %cst_293 = arith.constant dense<0.000000e+00> : vector<8x128xf32>
    %748 = tpu.matmul %746, %747, %cst_293 {dimension_numbers = #tpu.dot_dimension_numbers<[1], [0], [0], [1], [0, 0, 1, 1], [], []>} : vector<8x256xbf16>, vector<256x128xbf16>, vector<8x128xf32> -> vector<8x128xf32>
    %749 = arith.truncf %743 : vector<8x64xf32> to vector<8x64xbf16>
    %c0_294 = arith.constant 0 : index
    %c0_295 = arith.constant 0 : index
    %750 = vector.load %arg14[%c0_294, %c0_295] : memref<64x128xbf16, #tpu.memory_space<vmem>>, vector<64x128xbf16>
    %cst_296 = arith.constant dense<0.000000e+00> : vector<8x128xf32>
    %751 = tpu.matmul %749, %750, %cst_296 {dimension_numbers = #tpu.dot_dimension_numbers<[1], [0], [0], [1], [0, 0, 1, 1], [], []>} : vector<8x64xbf16>, vector<64x128xbf16>, vector<8x128xf32> -> vector<8x128xf32>
    %752 = arith.addf %748, %751 : vector<8x128xf32>
    %c0_297 = arith.constant 0 : index
    %c0_298 = arith.constant 0 : index
    %753 = vector.load %arg15[%c0_297, %c0_298] : memref<1x128xf32, #tpu.memory_space<vmem>>, vector<1x128xf32>
    %754 = vector.broadcast %753 : vector<1x128xf32> to vector<8x128xf32>
    %755 = arith.addf %752, %754 : vector<8x128xf32>
    %c0_299 = arith.constant 0 : index
    %c0_300 = arith.constant 0 : index
    %756 = vector.load %arg19[%c0_299, %c0_300] : memref<8x128xf32, #tpu.memory_space<vmem>>, vector<8x128xf32>
    tpu.vector_store %arg19[%c0_299, %c0_300], %755 {strides = array<i32>} : memref<8x128xf32, #tpu.memory_space<vmem>>, vector<8x128xf32>,
    return
  }
}

</mosaic_0001>

<bundles_post_ra>
// kernel: pose_quality_net_kp.1
= control target key start
LH: loop header
LB: loop body
LE: loop exit
PB: predicated region body
PF: predicated region fallthrough
CT: control target
= control target key end

     0   :  { %s14523_s0 = inlined_call_operand.vmem [shape: f32[64,34], index: 0, kind: input, shape index: {}]   ;;  %s14524_s1 = inlined_call_operand.vmem [shape: f32[8,5], index: 1, kind: input, shape index: {}]   ;;  %s14525_s2 = inlined_call_operand.vmem [shape: bf16[34,128], index: 2, kind: input, shape index: {}]   ;;  %s14526_s3 = inlined_call_operand.hbm [shape: f32[1,128], index: 3, kind: input, shape index: {}]   ;;  %s14527_s4 = inlined_call_operand.hbm [shape: bf16[128,512], index: 4, kind: input, shape index: {}]   ;;  %s14528_s5 = inlined_call_operand.hbm [shape: f32[1,512], index: 5, kind: input, shape index: {}]   ;;  %s14529_s6 = inlined_call_operand.hbm [shape: bf16[512,1024], index: 6, kind: input, shape index: {}]   ;;  %s14530_s7 = inlined_call_operand.vmem [shape: f32[1,1024], index: 7, kind: input, shape index: {}]   ;;  %s14531_s8 = inlined_call_operand.hbm [shape: bf16[256,512], index: 8, kind: input, shape index: {}]   ;;  %s14532_s9 = inlined_call_operand.vmem [shape: f32[1,1024], index: 9, kind: input, shape index: {}]   ;;  %s14533_s10 = inlined_call_operand.hbm [shape: bf16[5,64], index: 10, kind: input, shape index: {}]   ;;  %s14534_s11 = inlined_call_operand.vmem [shape: f32[1,64], index: 11, kind: input, shape index: {}]   ;;  %s14535_s12 = inlined_call_operand.hbm [shape: bf16[64,64], index: 12, kind: input, shape index: {}]   ;;  %s14536_s13 = inlined_call_operand.hbm [shape: f32[1,64], index: 13, kind: input, shape index: {}]   ;;  %s14537_s14 = inlined_call_operand.hbm [shape: bf16[64,128], index: 14, kind: input, shape index: {}]   ;;  %s14538_s15 = inlined_call_operand.hbm [shape: f32[1,128], index: 15, kind: input, shape index: {}]   ;;  %s14539_s16 = inlined_call_operand.hbm [shape: bf16[256,1024], index: 16, kind: input, shape index: {}]   ;;  %s14540_s17 = inlined_call_operand.hbm [shape: bf16[256,512], index: 17, kind: input, shape index: {}]   ;;  %s14541_s18 = inlined_call_operand.vmem [shape: bf16[256,128], index: 18, kind: input, shape index: {}]   ;;  %s14542_s19 = inlined_call_operand.vmem [shape: f32[8,128], index: 19, kind: output, shape index: {}]  }
   0x1   :  { %14763 = sst [smem:[#allocation145_spill]] %s14523_s0 }
   0x2   :  { %14764 = sst [smem:[#allocation146_spill]] %s14524_s1 }
   0x3   :  { %14765 = sst [smem:[#allocation147_spill]] %s14525_s2 }
   0x4   :  { %14766 = sst [smem:[#allocation148_spill]] %s14526_s3 }
   0x5   :  { %24 = vsyncpa [#allocation10], 0 }
   0x6   :  { %25 = vsyncpa [#allocation12], 0 }
   0x7   :  { %26 = vsyncpa [#allocation15], 0 }
   0x8   :  { %27 = vsyncpa [#allocation18], 0 }
   0x9   :  { %28 = vsyncpa [#allocation21], 0 }
   0xa   :  { %29 = vsyncpa [#allocation24], 0  ;;  %s11239_s0 = smov [#allocation11]   ;;  %s11001_s1 = scalar_lea.hbm %s14527_s4, 4096 }
   0xb   :  { %s51_s30 = sshll.u32 %s11239_s0, 4  ;;  %p11002_p0 = scmp.ne.s32.totalorder %s14527_s4, %s11001_s1  ;;  %s52_s30 = int_to_ptr.vmem [resolvable:$true] %s51_s30 }
   0xc   :  { %p11005_p1 = scmp.lt.u32.totalorder %s11001_s1, %s14527_s4 }
   0xe   :  { %p11007_p2 = pnand %p11005_p1, %p11002_p0 }
  0x10   :  { %11010 = shalt.err (!%p11007_p2)
}
  0x11   :  { %s11011_s25 = scalar_lea.vmem %s52_s30, 4096  ;;  %p11016_p4 = scmp.lt.s32.totalorder %s52_s30, %s52_s30 }
  0x12   :  { %p11012_p3 = scmp.ne.s32.totalorder %s52_s30, %s11011_s25  ;;  %p11017_p5 = scmp.lt.s32.totalorder %s11011_s25, %s11011_s25 }
  0x14   :  { %p11018_p6 = por %p11017_p5, %p11016_p4 }
  0x16   :  { %p11019_p7 = pnand %p11018_p6, %p11012_p3 }
  0x18   :  { %11022 = shalt.err (!%p11019_p7)
}
  0x19   :  { %s14546_s3 = smov 256   ;;  %s14548_s26 = smov 16  }
  0x1a   :  { %57 = dma.hbm_to_vmem [thread:$0]  %s14527_s4, 4096, %s52_s30, [#allocation12], %s14546_s3, %s14546_s3, %s14548_s26  }
  0x1b   :  { %s11242_s29 = smov [#allocation14]   ;;  %s11023_s1 = scalar_lea.hbm %s14529_s6, 32768 }
  0x1c   :  { %s73_s0 = sshll.u32 %s11242_s29, 4  ;;  %p11024_p8 = scmp.ne.s32.totalorder %s14529_s6, %s11023_s1  ;;  %s74_s0 = int_to_ptr.vmem [resolvable:$true] %s73_s0 }
  0x1d   :  { %p11027_p9 = scmp.lt.u32.totalorder %s11023_s1, %s14529_s6 }
  0x1f   :  { %p11029_p10 = pnand %p11027_p9, %p11024_p8 }
  0x21   :  { %11032 = shalt.err (!%p11029_p10)
}
  0x22   :  { %s11033_s25 = scalar_lea.vmem %s74_s0, 32768  ;;  %p11038_p12 = scmp.lt.s32.totalorder %s74_s0, %s74_s0 }
  0x23   :  { %p11034_p11 = scmp.ne.s32.totalorder %s74_s0, %s11033_s25  ;;  %p11039_p13 = scmp.lt.s32.totalorder %s11033_s25, %s11033_s25 }
  0x25   :  { %p11040_p0 = por %p11039_p13, %p11038_p12 }
  0x27   :  { %p11041_p1 = pnand %p11040_p0, %p11034_p11 }
  0x29   :  { %11044 = shalt.err (!%p11041_p1)
}
  0x2a   :  { %s11243_s4 = smov 512   ;;  %s11244_s30 = smov 32  }
  0x2b   :  { %79 = dma.hbm_to_vmem [thread:$0]  %s14529_s6, 32768, %s74_s0, [#allocation15], %s11243_s4, %s11243_s4, %s11244_s30  }
  0x2c   :  { %s11245_s29 = smov [#allocation17]   ;;  %s11246_s21 = smov [#allocation20]  }
  0x2d   :  { %s102_s20 = sshll.u32 %s11245_s29, 4  ;;  %s126_s1 = sshll.u32 %s11246_s21, 4  ;;  %s103_s20 = int_to_ptr.vmem [resolvable:$true] %s102_s20  ;;  %s127_s1 = int_to_ptr.vmem [resolvable:$true] %s126_s1 }
  0x2e   :  { %s11045_s23 = scalar_lea.hbm %s14533_s10, 64 }
  0x2f   :  { %p11046_p2 = scmp.ne.s32.totalorder %s14533_s10, %s11045_s23  ;;  %p11049_p3 = scmp.lt.u32.totalorder %s11045_s23, %s14533_s10 }
  0x31   :  { %p11051_p4 = pnand %p11049_p3, %p11046_p2 }
  0x33   :  { %11054 = shalt.err (!%p11051_p4)
}
  0x34   :  { %s11055_s6 = scalar_lea.vmem %s103_s20, 64  ;;  %p11060_p6 = scmp.lt.s32.totalorder %s103_s20, %s103_s20 }
  0x35   :  { %p11056_p5 = scmp.ne.s32.totalorder %s103_s20, %s11055_s6  ;;  %p11061_p7 = scmp.lt.s32.totalorder %s11055_s6, %s11055_s6 }
  0x37   :  { %p11062_p8 = por %p11061_p7, %p11060_p6 }
  0x39   :  { %p11063_p9 = pnand %p11062_p8, %p11056_p5 }
  0x3b   :  { %11066 = shalt.err (!%p11063_p9)
}
  0x3c   :  { %105 = dma.hbm_to_vmem [thread:$0]  %s14533_s10, 64, %s103_s20, [#allocation18]  }
  0x3d   :  { %s11067_s29 = scalar_lea.hbm %s14536_s13, 16 }
  0x3e   :  { %p11068_p10 = scmp.ne.s32.totalorder %s14536_s13, %s11067_s29  ;;  %p11071_p11 = scmp.lt.u32.totalorder %s11067_s29, %s14536_s13 }
  0x40   :  { %p11073_p12 = pnand %p11071_p11, %p11068_p10 }
  0x42   :  { %11076 = shalt.err (!%p11073_p12)
}
  0x43   :  { %s11077_s2 = scalar_lea.vmem %s127_s1, 16  ;;  %s11081_s23 = scalar_lea.vmem %s127_s1, 32 }
  0x44   :  { %p11078_p13 = scmp.ne.s32.totalorder %s127_s1, %s11077_s2  ;;  %p11082_p0 = scmp.lt.s32.totalorder %s127_s1, %s127_s1 }
  0x45   :  { %p11083_p1 = scmp.lt.s32.totalorder %s11081_s23, %s11077_s2 }
  0x47   :  { %p11084_p2 = por %p11083_p1, %p11082_p0 }
  0x49   :  { %p11085_p3 = pnand %p11084_p2, %p11078_p13 }
  0x4b   :  { %11088 = shalt.err (!%p11085_p3)
}
  0x4c   :  { %129 = dma.hbm_to_vmem [thread:$0]  %s14536_s13, 16, %s127_s1, [#allocation21]  }
  0x4d   :  { %s11247_s24 = smov [#allocation9]   ;;  %s11248_s6 = smov [#allocation13]  }
  0x4e   :  { %s42_s25 = sshll.u32 %s11247_s24, 4  ;;  %s64_s0 = sshll.u32 %s11248_s6, 4  ;;  %s43_s25 = int_to_ptr.vmem [resolvable:$true] %s42_s25  ;;  %s65_s0 = int_to_ptr.vmem [resolvable:$true] %s64_s0 }
  0x4f   :  { %s14767_s28 = sld [smem:[#allocation148_spill]] }
  0x55   :  { %s11089_s29 = scalar_lea.hbm %s14767_s28, 16 }
  0x56   :  { %p11090_p4 = scmp.ne.s32.totalorder %s14767_s28, %s11089_s29  ;;  %p11093_p5 = scmp.lt.u32.totalorder %s11089_s29, %s14767_s28 }
  0x58   :  { %p11095_p6 = pnand %p11093_p5, %p11090_p4 }
  0x5a   :  { %11098 = shalt.err (!%p11095_p6)
}
  0x5b   :  { %s11099_s13 = scalar_lea.vmem %s43_s25, 16  ;;  %s11103_s1 = scalar_lea.vmem %s43_s25, 32 }
  0x5c   :  { %p11100_p7 = scmp.ne.s32.totalorder %s43_s25, %s11099_s13  ;;  %p11104_p8 = scmp.lt.s32.totalorder %s43_s25, %s43_s25 }
  0x5d   :  { %p11105_p9 = scmp.lt.s32.totalorder %s11103_s1, %s11099_s13 }
  0x5f   :  { %p11106_p10 = por %p11105_p9, %p11104_p8 }
  0x61   :  { %p11107_p11 = pnand %p11106_p10, %p11100_p7 }
  0x63   :  { %11110 = shalt.err (!%p11107_p11)
}
  0x64   :  { %45 = dma.hbm_to_vmem [thread:$0]  %s14767_s28, 16, %s43_s25, [#allocation10]  }
  0x65   :  { %s11111_s24 = scalar_lea.hbm %s14528_s5, 64 }
  0x66   :  { %p11112_p12 = scmp.ne.s32.totalorder %s14528_s5, %s11111_s24  ;;  %p11115_p13 = scmp.lt.u32.totalorder %s11111_s24, %s14528_s5 }
  0x68   :  { %p11117_p0 = pnand %p11115_p13, %p11112_p12 }
  0x6a   :  { %11120 = shalt.err (!%p11117_p0)
}
  0x6b   :  { %s11121_s21 = scalar_lea.vmem %s65_s0, 64  ;;  %p11126_p2 = scmp.lt.s32.totalorder %s65_s0, %s65_s0 }
  0x6c   :  { %p11122_p1 = scmp.ne.s32.totalorder %s65_s0, %s11121_s21  ;;  %p11127_p3 = scmp.lt.s32.totalorder %s11121_s21, %s11121_s21 }
  0x6e   :  { %p11128_p4 = por %p11127_p3, %p11126_p2 }
  0x70   :  { %p11129_p5 = pnand %p11128_p4, %p11122_p1 }
  0x72   :  { %11132 = shalt.err (!%p11129_p5)
}
  0x73   :  { %67 = dma.hbm_to_vmem [thread:$0]  %s14528_s5, 64, %s65_s0, [#allocation12]  }
  0x74   :  { %s11249_s3 = smov [#allocation16]   ;;  %s11250_s22 = smov [#allocation19]  }
  0x75   :  { %s87_s26 = sshll.u32 %s11249_s3, 4  ;;  %s113_s13 = sshll.u32 %s11250_s22, 4  ;;  %s88_s26 = int_to_ptr.vmem [resolvable:$true] %s87_s26  ;;  %s11446_s13 = int_to_ptr.vmem [resolvable:$true] %s113_s13 }
  0x76   :  { %s11133_s23 = scalar_lea.hbm %s14531_s8, 8192 }
  0x77   :  { %p11134_p6 = scmp.ne.s32.totalorder %s14531_s8, %s11133_s23  ;;  %p11137_p7 = scmp.lt.u32.totalorder %s11133_s23, %s14531_s8 }
  0x79   :  { %p11139_p8 = pnand %p11137_p7, %p11134_p6 }
  0x7b   :  { %11142 = shalt.err (!%p11139_p8)
}
  0x7c   :  { %s11143_s5 = scalar_lea.vmem %s88_s26, 8192  ;;  %p11148_p10 = scmp.lt.s32.totalorder %s88_s26, %s88_s26 }
  0x7d   :  { %p11144_p9 = scmp.ne.s32.totalorder %s88_s26, %s11143_s5  ;;  %p11149_p11 = scmp.lt.s32.totalorder %s11143_s5, %s11143_s5 }
  0x7f   :  { %p11150_p12 = por %p11149_p11, %p11148_p10 }
  0x81   :  { %p11151_p13 = pnand %p11150_p12, %p11144_p9 }
  0x83   :  { %11154 = shalt.err (!%p11151_p13)
}
  0x84   :  { %s14768_s0 = smov 16   ;;  %s14769_s30 = smov 256  }
  0x85   :  { %93 = dma.hbm_to_vmem [thread:$0]  %s14531_s8, 8192, %s88_s26, [#allocation15], %s14769_s30, %s14769_s30, %s14768_s0  }
  0x86   :  { %s11155_s28 = scalar_lea.hbm %s14535_s12, 512 }
  0x87   :  { %p11156_p0 = scmp.ne.s32.totalorder %s14535_s12, %s11155_s28  ;;  %p11159_p1 = scmp.lt.u32.totalorder %s11155_s28, %s14535_s12 }
  0x89   :  { %p11161_p2 = pnand %p11159_p1, %p11156_p0 }
  0x8b   :  { %11164 = shalt.err (!%p11161_p2)
}
  0x8c   :  { %s11165_s23 = scalar_lea.vmem %s11446_s13, 512  ;;  %p11170_p4 = scmp.lt.s32.totalorder %s11446_s13, %s11446_s13 }
  0x8d   :  { %p11166_p3 = scmp.ne.s32.totalorder %s11446_s13, %s11165_s23  ;;  %p11171_p5 = scmp.lt.s32.totalorder %s11165_s23, %s11165_s23 }
  0x8f   :  { %p11172_p6 = por %p11171_p5, %p11170_p4 }
  0x91   :  { %p11173_p7 = pnand %p11172_p6, %p11166_p3 }
  0x93   :  { %11176 = shalt.err (!%p11173_p7)
}
  0x94   :  { %s11251_s8 = smov 64   ;;  %s11252_s26 = smov 4  }
  0x95   :  { %119 = dma.hbm_to_vmem [thread:$0]  %s14535_s12, 512, %s11446_s13, [#allocation18], %s11251_s8, %s11251_s8, %s11252_s26  }
  0x96   :  { %s11253_s24 = smov [#allocation22]   ;;  %s11254_s5 = smov [#allocation23]  }
  0x97   :  { %s135_s6 = sshll.u32 %s11253_s24, 4  ;;  %s148_s0 = sshll.u32 %s11254_s5, 4  ;;  %s136_s6 = int_to_ptr.vmem [resolvable:$true] %s135_s6  ;;  %s149_s0 = int_to_ptr.vmem [resolvable:$true] %s148_s0 }
  0x98   :  { %s11177_s21 = scalar_lea.hbm %s14537_s14, 512 }
  0x99   :  { %p11178_p8 = scmp.ne.s32.totalorder %s14537_s14, %s11177_s21  ;;  %p11181_p9 = scmp.lt.u32.totalorder %s11177_s21, %s14537_s14 }
  0x9b   :  { %p11183_p10 = pnand %p11181_p9, %p11178_p8 }
  0x9d   :  { %11186 = shalt.err (!%p11183_p10)
}
  0x9e   :  { %s11187_s12 = scalar_lea.vmem %s136_s6, 512  ;;  %p11192_p12 = scmp.lt.s32.totalorder %s136_s6, %s136_s6 }
  0x9f   :  { %p11188_p11 = scmp.ne.s32.totalorder %s136_s6, %s11187_s12  ;;  %p11193_p13 = scmp.lt.s32.totalorder %s11187_s12, %s11187_s12 }
  0xa1   :  { %p11194_p0 = por %p11193_p13, %p11192_p12 }
  0xa3   :  { %p11195_p1 = pnand %p11194_p0, %p11188_p11 }
  0xa5   :  { %11198 = shalt.err (!%p11195_p1)
}
  0xa6   :  { %141 = dma.hbm_to_vmem [thread:$0]  %s14537_s14, 512, %s136_s6, [#allocation21], %s11251_s8, %s11251_s8, %s11252_s26  }
  0xa7   :  { %s11199_s10 = scalar_lea.hbm %s14538_s15, 16 }
  0xa8   :  { %p11200_p2 = scmp.ne.s32.totalorder %s14538_s15, %s11199_s10  ;;  %p11203_p3 = scmp.lt.u32.totalorder %s11199_s10, %s14538_s15 }
  0xaa   :  { %p11205_p4 = pnand %p11203_p3, %p11200_p2 }
  0xac   :  { %11208 = shalt.err (!%p11205_p4)
}
  0xad   :  { %s11209_s29 = scalar_lea.vmem %s149_s0, 16  ;;  %s11213_s21 = scalar_lea.vmem %s149_s0, 32 }
  0xae   :  { %p11210_p5 = scmp.ne.s32.totalorder %s149_s0, %s11209_s29  ;;  %p11214_p6 = scmp.lt.s32.totalorder %s149_s0, %s149_s0 }
  0xaf   :  { %p11215_p7 = scmp.lt.s32.totalorder %s11213_s21, %s11209_s29 }
  0xb1   :  { %p11216_p8 = por %p11215_p7, %p11214_p6 }
  0xb3   :  { %p11217_p9 = pnand %p11216_p8, %p11210_p5 }
  0xb5   :  { %11220 = shalt.err (!%p11217_p9)
}
  0xb6   :  { %151 = dma.hbm_to_vmem [thread:$0]  %s14538_s15, 16, %s149_s0, [#allocation24]  }
  0xb7   :  { %11221 = dma.done.wait [#allocation10], 16  }
  0xb8   :  { %11222 = vsyncadd [#allocation10], 4294967280 }
  0xb9   :  { %11223 = dma.done.wait [#allocation12], 4160  }
  0xba   :  { %11224 = vsyncadd [#allocation12], 4294963136 }
  0xbb   :  { %11225 = dma.done.wait [#allocation15], 40960  }
  0xbc   :  { %11226 = vsyncadd [#allocation15], 4294926336 }
  0xbd   :  { %11227 = dma.done.wait [#allocation18], 576  }
  0xbe   :  { %11228 = vsyncadd [#allocation18], 4294966720 }
  0xbf   :  { %11229 = dma.done.wait [#allocation21], 528  }
  0xc0   :  { %11230 = vsyncadd [#allocation21], 4294966768 }
  0xc1   :  { %11231 = dma.done.wait [#allocation24], 16  }
  0xc2   :  { %11232 = vsyncadd [#allocation24], 4294967280  ;;  %s187_s25 = sld [smem:[#allocation0]]   ;;  %s11255_s28 = smov 1024  }
  0xc3   :  { %199 = sst [smem:[#allocation26]] %s11255_s28  ;;  %s11256_s3 = smov 8  }
  0xc4   :  { %201 = sst [smem:[#allocation26 + $0x1]] %s11255_s28  ;;  %s11257_s22 = smov [#allocation5]  }
  0xc5   :  { %203 = sst [smem:[#allocation26 + $0x2]] %s11256_s3  ;;  %s195_s15 = sshll.u32 %s11257_s22, 4  ;;  %s196_s15 = int_to_ptr.vmem [resolvable:$true] %s195_s15 }
  0xc6   :  { %205 = sst [smem:[#allocation26 + $0x3]] %s11251_s8  ;;  %s11258_s13 = smov 128  }
  0xc7   :  { %211 = sst [smem:[#allocation26 + $0x6]] %s11243_s4  ;;  %s11259_s1 = smov 2  }
  0xc8   :  { %213 = sst [smem:[#allocation26 + $0x7]] %s11251_s8  ;;  %s9213_s0 = sshll.u32 %s187_s25, 26 }
  0xc9   :  { %215 = sst [smem:[#allocation26 + $0x8]] %s11252_s26  ;;  %s9214_s12 = sadd.s32 134217728, %s9213_s0 }
  0xca   :  { %207 = sst [smem:[#allocation26 + $0x4]] %s11258_s13  ;;  %s11260_s2 = smov [#allocation8]  }
  0xcb   :  { %209 = sst [smem:[#allocation26 + $0x5]] %s11259_s1  ;;  %s11261_s23 = smov [#allocation25]  }
  0xcc   :  { %217 = dma.general %s14539_s16, 16384, %s196_s15, %s11260_s2, %s11261_s23, [#allocation26], %s9214_s12, 0  }
  0xcd   :  { %234 = sst [smem:[#allocation28]] %s11243_s4  ;;  %s11262_s24 = smov [#allocation6]  }
  0xce   :  { %236 = sst [smem:[#allocation28 + $0x1]] %s11243_s4  ;;  %s230_s5 = sshll.u32 %s11262_s24, 4  ;;  %s231_s5 = int_to_ptr.vmem [resolvable:$true] %s230_s5 }
  0xcf   :  { %238 = sst [smem:[#allocation28 + $0x2]] %s11252_s26  ;;  %s11263_s16 = smov [#allocation8 + $0x1]  }
  0xd0   :  { %240 = sst [smem:[#allocation28 + $0x3]] %s11251_s8  ;;  %s11264_s27 = smov [#allocation27]  }
  0xd1   :  { %242 = sst [smem:[#allocation28 + $0x4]] %s11258_s13 }
  0xd2   :  { %244 = sst [smem:[#allocation28 + $0x5]] %s11259_s1 }
  0xd3   :  { %246 = sst [smem:[#allocation28 + $0x6]] %s14769_s30 }
  0xd4   :  { %248 = sst [smem:[#allocation28 + $0x7]] %s11251_s8 }
  0xd5   :  { %250 = sst [smem:[#allocation28 + $0x8]] %s11252_s26 }
  0xd6   :  { %252 = dma.general %s14540_s17, 8192, %s231_s5, %s11263_s16, %s11264_s27, [#allocation28], %s9214_s12, 0  }
  0xd7   :  { %v11530_v0 = vld [vmem:[%s14541_s18] sm:$0xff]  ;;  %v11535_v1 = vld [vmem:[%s14541_s18 + $0x8] sm:$0xff]  ;;  %v11540_v2 = vld [vmem:[%s14541_s18 + $0x10] sm:$0xff] }
  0xd8   :  { %14770 = vst [vmem:[#allocation39_spill] sm:$0xff] %v11530_v0  ;;  %14771 = vst [vmem:[#allocation40_spill] sm:$0xff] %v11535_v1  ;;  %v11545_v3 = vld [vmem:[%s14541_s18 + $0x18] sm:$0xff]  ;;  %v11550_v4 = vld [vmem:[%s14541_s18 + $0x20] sm:$0xff] }
  0xd9   :  { %14772 = vst [vmem:[#allocation41_spill] sm:$0xff] %v11540_v2  ;;  %14773 = vst [vmem:[#allocation42_spill] sm:$0xff] %v11545_v3  ;;  %v11555_v5 = vld [vmem:[%s14541_s18 + $0x28] sm:$0xff]  ;;  %v11560_v6 = vld [vmem:[%s14541_s18 + $0x30] sm:$0xff] }
  0xda   :  { %14774 = vst [vmem:[#allocation43_spill] sm:$0xff] %v11550_v4  ;;  %14775 = vst [vmem:[#allocation44_spill] sm:$0xff] %v11555_v5  ;;  %v11565_v7 = vld [vmem:[%s14541_s18 + $0x38] sm:$0xff]  ;;  %v11570_v8 = vld [vmem:[%s14541_s18 + $0x40] sm:$0xff] }
  0xdb   :  { %14776 = vst [vmem:[#allocation45_spill] sm:$0xff] %v11560_v6  ;;  %14777 = vst [vmem:[#allocation46_spill] sm:$0xff] %v11565_v7  ;;  %v11575_v9 = vld [vmem:[%s14541_s18 + $0x48] sm:$0xff]  ;;  %v11580_v10 = vld [vmem:[%s14541_s18 + $0x50] sm:$0xff] }
  0xdc   :  { %14778 = vst [vmem:[#allocation47_spill] sm:$0xff] %v11570_v8  ;;  %14779 = vst [vmem:[#allocation48_spill] sm:$0xff] %v11575_v9  ;;  %v11585_v11 = vld [vmem:[%s14541_s18 + $0x58] sm:$0xff]  ;;  %v11590_v12 = vld [vmem:[%s14541_s18 + $0x60] sm:$0xff] }
  0xdd   :  { %14780 = vst [vmem:[#allocation49_spill] sm:$0xff] %v11580_v10  ;;  %14781 = vst [vmem:[#allocation50_spill] sm:$0xff] %v11585_v11  ;;  %v11595_v13 = vld [vmem:[%s14541_s18 + $0x68] sm:$0xff]  ;;  %v11600_v14 = vld [vmem:[%s14541_s18 + $0x70] sm:$0xff] }
  0xde   :  { %14782 = vst [vmem:[#allocation51_spill] sm:$0xff] %v11590_v12  ;;  %14783 = vst [vmem:[#allocation52_spill] sm:$0xff] %v11595_v13  ;;  %v11605_v15 = vld [vmem:[%s14541_s18 + $0x78] sm:$0xff] }
  0xdf   :  { %14784 = vst [vmem:[#allocation53_spill] sm:$0xff] %v11600_v14  ;;  %14785 = vst [vmem:[#allocation54_spill] sm:$0xff] %v11605_v15 }
  0xe0   :  { %325 = vsyncadd [#allocation8 + $0x2], 2048  ;;  %s14786_s17 = sld [smem:[#allocation147_spill]]  ;;  %s14787_s12 = sld [smem:[#allocation145_spill]]  ;;  %vm365_vm0 = vcmask 277504   ;;  %vm378_vm1 = vcmask 1040384  }
  0xe1   :  { %v10337_v24 = vld [vmem:[#allocation11 + $0x4] ss:$16 sps:$4 sm:$0xff]   ;;  %v10341_v27 = vld [vmem:[#allocation11 + $0xc] ss:$16 sps:$4 sm:$0xff]   ;;  %v10342_v28 = vld [vmem:[#allocation11] ss:$16 sps:$4 sm:$0xff]  }
  0xe2   :  { %673 = vmatprep.subr.bf16.mxu1 %v10337_v24  ;;  %v10343_v30 = vld [vmem:[#allocation11 + $0x24] ss:$16 sps:$4 sm:$0xff]   ;;  %v10348_v31 = vld [vmem:[#allocation11 + $0x20] ss:$16 sps:$4 sm:$0xff]   ;;  %v10339_v35 = vld [vmem:[#allocation11 + $0x8] ss:$16 sps:$4 sm:$0xff]  }
  0xe3   :  { %674 = vmatpush1.bf16.msra.mxu1 %v10342_v28  ;;  %v10349_v33 = vld [vmem:[#allocation11 + $0x44] ss:$16 sps:$4 sm:$0xff]   ;;  %v10347_v36 = vld [vmem:[#allocation11 + $0x2c] ss:$16 sps:$4 sm:$0xff]   ;;  %v10354_v38 = vld [vmem:[#allocation11 + $0x40] ss:$16 sps:$4 sm:$0xff]  }
  0xe4   :  { %675 = vmatprep.subr.bf16.mxu1 %v10343_v30  ;;  %v10355_v40 = vld [vmem:[#allocation11 + $0x64] ss:$16 sps:$4 sm:$0xff]   ;;  %v10345_v41 = vld [vmem:[#allocation11 + $0x28] ss:$16 sps:$4 sm:$0xff]   ;;  %v10353_v42 = vld [vmem:[#allocation11 + $0x4c] ss:$16 sps:$4 sm:$0xff]  }
  0xe5   :  { %v10351_v43 = vld [vmem:[#allocation11 + $0x48] ss:$16 sps:$4 sm:$0xff]   ;;  %v10360_v44 = vld [vmem:[#allocation11 + $0x60] ss:$16 sps:$4 sm:$0xff]   ;;  %v10361_v46 = vld [vmem:[#allocation11 + $0x84] ss:$16 sps:$4 sm:$0xff]  }
  0xe6   :  { %v10334_v16 = vld [vmem:[%s14786_s17] sm:$0xff]   ;;  %v10335_v17 = vld [vmem:[%s14786_s17 + $0x8] sm:$0xff]   ;;  %v10336_v21 = vld [vmem:[%s14786_s17 + $0x10] ss:$0 sps:$4 sm:$0x11]  }
  0xe7   :  { %10131 = vmatprep.subr.bf16.mxu0 %v10334_v16  ;;  %v326_v18 = vld [vmem:[%s14787_s12] sm:$0xff]  ;;  %v327_v19 = vld [vmem:[%s14787_s12 + $0x8] sm:$0xff]  ;;  %v328_v22 = vld [vmem:[%s14787_s12 + $0x10] sm:$0xff]  ;;  %v380_v29 = vsel %vm378_vm1, %v10336_v21, 0  ;;  %676 = vmatpush1.bf16.msra.mxu1 %v10348_v31 }
  0xe8   :  { %10132 = vmatpush3.bf16.msra.mxu0 %v10334_v16  ;;  %v334_v20 = vpack.c.bf16 %v327_v19, %v326_v18  ;;  %v329_v23 = vld [vmem:[%s14787_s12 + $0x18] sm:$0xff]  ;;  %v330_v25 = vld [vmem:[%s14787_s12 + $0x20] sm:$0xff]  ;;  %v331_v26 = vld [vmem:[%s14787_s12 + $0x28] sm:$0xff]  ;;  %677 = vmatprep.subr.bf16.mxu1 %v10349_v33  ;;  %v14549_v16 = vmov 0  }
  0xe9   :  { %10133 = vmatprep.subr.bf16.mxu0 %v10335_v17  ;;  %v335_v32 = vpack.c.bf16 %v329_v23, %v328_v22  ;;  %v336_v34 = vpack.c.bf16 %v331_v26, %v330_v25  ;;  %v332_v37 = vld [vmem:[%s14787_s12 + $0x30] sm:$0xff]  ;;  %v333_v39 = vld [vmem:[%s14787_s12 + $0x38] sm:$0xff]  ;;  %705 = vmatprep.mubr.bf16.mxu1 %v14549_v16  ;;  %v871_v18 = vld [vmem:[#allocation14 + $0x20] sm:$0xff] }
  0xea   :  { %10137 = vmatprep.mubr.msk.bf16.mxu0 %vm365_vm0, %v334_v20  ;;  %v337_v45 = vpack.c.bf16 %v333_v39, %v332_v37  ;;  %v10359_v47 = vld [vmem:[#allocation11 + $0x6c] ss:$16 sps:$4 sm:$0xff]   ;;  %v10366_v48 = vld [vmem:[#allocation11 + $0x80] ss:$16 sps:$4 sm:$0xff]   ;;  %v10367_v49 = vld [vmem:[#allocation11 + $0xa4] ss:$16 sps:$4 sm:$0xff]  }
  0xeb   :  { %678 = vmatpush1.bf16.msra.mxu1 %v10354_v38  ;;  %v10357_v50 = vld [vmem:[#allocation11 + $0x68] ss:$16 sps:$4 sm:$0xff]   ;;  %v10365_v51 = vld [vmem:[#allocation11 + $0x8c] ss:$16 sps:$4 sm:$0xff]   ;;  %v10372_v52 = vld [vmem:[#allocation11 + $0xa0] ss:$16 sps:$4 sm:$0xff]  }
  0xec   :  { %10134 = vmatpush3.bf16.msra.mxu0 %v10335_v17  ;;  %679 = vmatprep.subr.bf16.mxu1 %v10355_v40  ;;  %v10363_v53 = vld [vmem:[#allocation11 + $0x88] ss:$16 sps:$4 sm:$0xff]   ;;  %v10371_v54 = vld [vmem:[#allocation11 + $0xac] ss:$16 sps:$4 sm:$0xff]   ;;  %v10373_v56 = vld [vmem:[#allocation11 + $0xc4] ss:$16 sps:$4 sm:$0xff]  }
  0xed   :  { %10303 = vmatprep.subr.msk.bf16.mxu0 %vm378_vm1, %v10336_v21  ;;  %v10369_v55 = vld [vmem:[#allocation11 + $0xa8] ss:$16 sps:$4 sm:$0xff]   ;;  %v10377_v57 = vld [vmem:[#allocation11 + $0xcc] ss:$16 sps:$4 sm:$0xff]   ;;  %v10378_v59 = vld [vmem:[#allocation11 + $0xc0] ss:$16 sps:$4 sm:$0xff]  }
  0xee   :  { %v10375_v58 = vld [vmem:[#allocation11 + $0xc8] ss:$16 sps:$4 sm:$0xff]   ;;  %v10379_v60 = vld [vmem:[#allocation11 + $0xe4] ss:$16 sps:$4 sm:$0xff]   ;;  %v10383_v61 = vld [vmem:[#allocation11 + $0xec] ss:$16 sps:$4 sm:$0xff]  }
  0xef   :  { %680 = vmatpush1.bf16.msra.mxu1 %v10360_v44  ;;  %v10381_v62 = vld [vmem:[#allocation11 + $0xe8] ss:$16 sps:$4 sm:$0xff]   ;;  %v10384_v63 = vld [vmem:[#allocation11 + $0xe0] ss:$16 sps:$4 sm:$0xff]   ;;  %v9217_v25 = vld [vmem:[#allocation9] ss:$0 sm:$0xff] }
  0xf0   :  { %10136 = vmatpush3.bf16.msra.mxu0 %v380_v29  ;;  %681 = vmatprep.subr.bf16.mxu1 %v10361_v46  ;;  %v867_v17 = vld [vmem:[#allocation14] sm:$0xff]  ;;  %v868_v19 = vld [vmem:[#allocation14 + $0x8] sm:$0xff] }
  0xf1   :  { %746 = vmatprep.subr.bf16.mxu0 %v10341_v27  ;;  %v9257_v20 = vcombine.low %v867_v17, %v871_v18  ;;  %v9258_v21 = vcombine.high %v867_v17, %v871_v18  ;;  %v872_v22 = vld [vmem:[#allocation14 + $0x28] sm:$0xff]  ;;  %v879_v39 = vld [vmem:[#allocation14 + $0x60] sm:$0xff] }
  0xf2   :  { %v9259_v23 = vcombine.low %v868_v19, %v872_v22  ;;  %v9260_v24 = vcombine.high %v868_v19, %v872_v22  ;;  %v876_v40 = vld [vmem:[#allocation14 + $0x48] sm:$0xff]  ;;  %v891_v18 = vld [vmem:[#allocation14 + $0xc0] sm:$0xff] }
  0xf3   :  { %10138 = vmatmul.mubr.msk.bf16.vlgmr.msra.gmra.mrb[0].mxu0 %vm365_vm0, %v335_v32  ;;  %682 = vmatpush1.bf16.msra.mxu1 %v10366_v48  ;;  %v892_v22 = vld [vmem:[#allocation14 + $0xc8] sm:$0xff]  ;;  %v1051_v15 = vld [vmem:[#allocation14 + $0x5c0] sm:$0xff] }
  0xf4   :  { %10141 = vmatprep.mubr.msk.bf16.mxu0 %vm365_vm0, %v336_v34  ;;  %747 = vmatpush1.bf16.msra.mxu0 %v10339_v35  ;;  %v12034_v14 = vld [vmem:[#allocation16 + $0x16c] ss:$16 sps:$4 sm:$0xff]   ;;  %v12037_v5 = vld [vmem:[#allocation16 + $0x160] ss:$16 sps:$4 sm:$0xff]   ;;  %v12041_v13 = vld [vmem:[#allocation16 + $0x168] ss:$16 sps:$4 sm:$0xff]  }
  0xf5   :  { %748 = vmatprep.subr.bf16.mxu0 %v10347_v36  ;;  %683 = vmatprep.subr.bf16.mxu1 %v10367_v49  ;;  %v875_v36 = vld [vmem:[#allocation14 + $0x40] sm:$0xff]  ;;  %v12046_v12 = vld [vmem:[#allocation16 + $0x18c] ss:$16 sps:$4 sm:$0xff]   ;;  %v12053_v11 = vld [vmem:[#allocation16 + $0x188] ss:$16 sps:$4 sm:$0xff]  }
  0xf6   :  { %v883_v49 = vld [vmem:[#allocation14 + $0x80] sm:$0xff]  ;;  %14795 = vst [vmem:[#allocation61_spill] sm:$0xff] %v12053_v11  ;;  %v12058_v10 = vld [vmem:[#allocation16 + $0x1ac] ss:$16 sps:$4 sm:$0xff]   ;;  %v12065_v9 = vld [vmem:[#allocation16 + $0x1a8] ss:$16 sps:$4 sm:$0xff]  }
  0xf7   :  { %684 = vmatpush1.bf16.msra.mxu1 %v10372_v52  ;;  %v887_v52 = vld [vmem:[#allocation14 + $0xa0] sm:$0xff]  ;;  %14797 = vst [vmem:[#allocation63_spill] sm:$0xff] %v12058_v10  ;;  %v12070_v8 = vld [vmem:[#allocation16 + $0x1cc] ss:$16 sps:$4 sm:$0xff]  }
  0xf8   :  { %749 = vmatpush1.bf16.msra.mxu0 %v10345_v41  ;;  %685 = vmatprep.subr.bf16.mxu1 %v10373_v56  ;;  %v880_v41 = vld [vmem:[#allocation14 + $0x68] sm:$0xff]  ;;  %v12043_v4 = vld [vmem:[#allocation16 + $0x184] ss:$16 sps:$4 sm:$0xff]   ;;  %v12049_v3 = vld [vmem:[#allocation16 + $0x180] ss:$16 sps:$4 sm:$0xff]  }
  0xf9   :  { %750 = vmatprep.subr.bf16.mxu0 %v10353_v42  ;;  %v9268_v48 = vcombine.high %v876_v40, %v880_v41  ;;  %14794 = vst [vmem:[#allocation60_spill] sm:$0xff] %v12049_v3  ;;  %v12055_v2 = vld [vmem:[#allocation16 + $0x1a4] ss:$16 sps:$4 sm:$0xff]   ;;  %v12061_v1 = vld [vmem:[#allocation16 + $0x1a0] ss:$16 sps:$4 sm:$0xff]  }
  0xfa   :  { %14796 = vst [vmem:[#allocation62_spill] sm:$0xff] %v12055_v2  ;;  %14798 = vst [vmem:[#allocation64_spill] sm:$0xff] %v12061_v1  ;;  %v12067_v0 = vld [vmem:[#allocation16 + $0x1c4] ss:$16 sps:$4 sm:$0xff]  }
  0xfb   :  { %10142 = vmatmul.mubr.msk.bf16.gmra.mrb[4].mxu0 %vm365_vm0, %v337_v45  ;;  %686 = vmatpush1.bf16.msra.mxu1 %v10378_v59 }
  0xfc   :  { %751 = vmatpush1.bf16.msra.mxu0 %v10351_v43  ;;  %687 = vmatprep.subr.bf16.mxu1 %v10379_v60  ;;  %v9265_v60 = vcombine.low %v875_v36, %v879_v39 }
  0xfd   :  { %752 = vmatprep.subr.bf16.mxu0 %v10359_v47  ;;  %778 = vmatprep.mubr.bf16.mxu0 %v14549_v16  ;;  %v9266_v47 = vcombine.high %v875_v36, %v879_v39  ;;  %v908_v39 = vld [vmem:[#allocation14 + $0x148] sm:$0xff] }
  0xff   :  { %688 = vmatpush1.bf16.msra.mxu1 %v10384_v63  ;;  %v9274_v63 = vcombine.high %v883_v49, %v887_v52 }
 0x100   :  { %753 = vmatpush1.bf16.msra.mxu0 %v10357_v50  ;;  %2445 = vmatprep.subr.bf16.mxu1 %v9258_v21  ;;  %v895_v21 = vld [vmem:[#allocation14 + $0xe0] sm:$0xff] }
 0x101   :  { %754 = vmatprep.subr.bf16.mxu0 %v10365_v51 }
 0x104   :  { %755 = vmatpush1.bf16.msra.mxu0 %v10363_v53  ;;  %v884_v53 = vld [vmem:[#allocation14 + $0x88] sm:$0xff] }
 0x105   :  { %756 = vmatprep.subr.bf16.mxu0 %v10371_v54  ;;  %v888_v54 = vld [vmem:[#allocation14 + $0xa8] sm:$0xff] }
 0x106   :  { %v9276_v17 = vcombine.high %v884_v53, %v888_v54 }
 0x108   :  { %757 = vmatpush1.bf16.msra.mxu0 %v10369_v55 }
 0x109   :  { %758 = vmatprep.subr.bf16.mxu0 %v10377_v57 }
 0x10c   :  { %759 = vmatpush1.bf16.msra.mxu0 %v10375_v58 }
 0x10d   :  { %760 = vmatprep.subr.bf16.mxu0 %v10383_v61  ;;  %v9267_v61 = vcombine.low %v876_v40, %v880_v41  ;;  %v912_v40 = vld [vmem:[#allocation14 + $0x168] sm:$0xff] }
 0x110   :  { %761 = vmatpush1.bf16.msra.mxu0 %v10381_v62 }
 0x111   :  { %2591 = vmatprep.subr.bf16.mxu0 %v9260_v24  ;;  %v896_v24 = vld [vmem:[#allocation14 + $0xe8] sm:$0xff] }
 0x1c6   :  { %v10139_v26 = vpop.f32.mrb[0].mxu0 }
 0x1c7   :  { %v425_v27 = vadd.f32 %v10139_v26, %v9217_v25  ;;  %v416_v28 = vpop.f32.mrb[1].mxu0 }
 0x1c8   :  { %v417_v29 = vadd.f32 %v9217_v25, %v416_v28  ;;  %v10140_v30 = vpop.f32.mrb[2].mxu0  ;;  %v9284_v28 = vcombine.high %v892_v22, %v896_v24 }
 0x1c9   :  { %v428_v31 = vadd.f32 %v10140_v30, %v9217_v25  ;;  %v419_v32 = vpop.f32.mrb[3].mxu0  ;;  %v449_v34 = vmax.f32 %v425_v27, 0.0  ;;  %v903_v30 = vld [vmem:[#allocation14 + $0x120] sm:$0xff] }
 0x1ca   :  { %v420_v33 = vadd.f32 %v9217_v25, %v419_v32  ;;  %v447_v37 = vmax.f32 %v417_v29, 0.0  ;;  %v899_v29 = vld [vmem:[#allocation14 + $0x100] sm:$0xff]  ;;  %v904_v32 = vld [vmem:[#allocation14 + $0x128] sm:$0xff] }
 0x1cb   :  { %v450_v35 = vmax.f32 %v428_v31, 0.0  ;;  %v900_v31 = vld [vmem:[#allocation14 + $0x108] sm:$0xff]  ;;  %v9289_v41 = vcombine.low %v899_v29, %v903_v30 }
 0x1cc   :  { %v448_v38 = vmax.f32 %v420_v33, 0.0  ;;  %v9281_v33 = vcombine.low %v891_v18, %v895_v21  ;;  %v9292_v36 = vcombine.high %v900_v31, %v904_v32 }
 0x1cd   :  { %v456_v42 = vpack.c.bf16 %v450_v35, %v449_v34  ;;  %v9283_v34 = vcombine.low %v892_v22, %v896_v24  ;;  %v9290_v35 = vcombine.high %v899_v29, %v903_v30  ;;  %v939_v24 = vld [vmem:[#allocation14 + $0x240] sm:$0xff] }
 0x1ce   :  { %v455_v43 = vpack.c.bf16 %v448_v38, %v447_v37  ;;  %v10143_v44 = vpop.f32.mrb[4].mxu0  ;;  %v907_v37 = vld [vmem:[#allocation14 + $0x140] sm:$0xff] }
 0x1cf   :  { %v441_v45 = vadd.f32 %v10143_v44, %v9217_v25  ;;  %v432_v46 = vpop.f32.mrb[5].mxu0  ;;  %v911_v38 = vld [vmem:[#allocation14 + $0x160] sm:$0xff]  ;;  %v9300_v44 = vcombine.high %v908_v39, %v912_v40 }
 0x1d0   :  { %706 = vmatmul.mubr.bf16.vlgmr.msra.gmra.mrb[0].mxu1 %v455_v43  ;;  %779 = vmatmul.mubr.bf16.vlgmr.msra.gmra.mrb[8].mxu0 %v455_v43  ;;  %v433_v50 = vadd.f32 %v9217_v25, %v432_v46  ;;  %v10144_v51 = vpop.f32.mrb[6].mxu0  ;;  %v9298_v43 = vcombine.high %v907_v37, %v911_v38  ;;  %v919_v46 = vld [vmem:[#allocation14 + $0x1a0] sm:$0xff] }
 0x1d1   :  { %v453_v55 = vmax.f32 %v441_v45, 0.0  ;;  %715 = vmatprep.mubr.bf16.mxu1 %v14549_v16  ;;  %788 = vmatprep.mubr.bf16.mxu0 %v14549_v16  ;;  %v444_v56 = vadd.f32 %v10144_v51, %v9217_v25  ;;  %v435_v57 = vpop.f32.mrb[7].mxu0  ;;  %v915_v45 = vld [vmem:[#allocation14 + $0x180] sm:$0xff] }
 0x1d2   :  { %v451_v58 = vmax.f32 %v433_v50, 0.0  ;;  %v436_v59 = vadd.f32 %v9217_v25, %v435_v57  ;;  %2446 = vmatpush1.bf16.msra.mxu1 %v9257_v20  ;;  %2592 = vmatpush1.bf16.msra.mxu0 %v9259_v23  ;;  %v9273_v25 = vcombine.low %v883_v49, %v887_v52  ;;  %v9275_v20 = vcombine.low %v884_v53, %v888_v54  ;;  %v923_v53 = vld [vmem:[#allocation14 + $0x1c0] sm:$0xff] }
 0x1d3   :  { %v454_v62 = vmax.f32 %v444_v56, 0.0  ;;  %2447 = vmatprep.subr.bf16.mxu1 %v9266_v47  ;;  %2593 = vmatprep.subr.bf16.mxu0 %v9268_v48  ;;  %v9282_v23 = vcombine.high %v891_v18, %v895_v21  ;;  %v916_v47 = vld [vmem:[#allocation14 + $0x188] sm:$0xff]  ;;  %v9297_v49 = vcombine.low %v907_v37, %v911_v38  ;;  %v9299_v50 = vcombine.low %v908_v39, %v912_v40  ;;  %v927_v54 = vld [vmem:[#allocation14 + $0x1e0] sm:$0xff] }
 0x1d4   :  { %v452_v19 = vmax.f32 %v436_v59, 0.0  ;;  %v920_v48 = vld [vmem:[#allocation14 + $0x1a8] sm:$0xff]  ;;  %v9306_v51 = vcombine.high %v915_v45, %v919_v46  ;;  %v9305_v57 = vcombine.low %v915_v45, %v919_v46  ;;  %v9314_v59 = vcombine.high %v923_v53, %v927_v54  ;;  %v947_v30 = vld [vmem:[#allocation14 + $0x280] sm:$0xff] }
 0x1d5   :  { %v11648_v26 = vpack.c.bf16 %v454_v62, %v453_v55  ;;  %v9308_v52 = vcombine.high %v916_v47, %v920_v48  ;;  %v924_v55 = vld [vmem:[#allocation14 + $0x1c8] sm:$0xff]  ;;  %v935_v62 = vld [vmem:[#allocation14 + $0x220] sm:$0xff]  ;;  %v9313_v18 = vcombine.low %v923_v53, %v927_v54 }
 0x1d6   :  { %v457_v27 = vpack.c.bf16 %v452_v19, %v451_v58  ;;  %2448 = vmatpush1.bf16.msra.mxu1 %v9265_v60  ;;  %2594 = vmatpush1.bf16.msra.mxu0 %v9267_v61  ;;  %v928_v56 = vld [vmem:[#allocation14 + $0x1e8] sm:$0xff]  ;;  %v9307_v58 = vcombine.low %v916_v47, %v920_v48  ;;  %v931_v61 = vld [vmem:[#allocation14 + $0x200] sm:$0xff] }
 0x1d7   :  { %2449 = vmatprep.subr.bf16.mxu1 %v9274_v63  ;;  %2595 = vmatprep.subr.bf16.mxu0 %v9276_v17  ;;  %v9316_v60 = vcombine.high %v924_v55, %v928_v56  ;;  %v932_v63 = vld [vmem:[#allocation14 + $0x208] sm:$0xff]  ;;  %v9315_v19 = vcombine.low %v924_v55, %v928_v56  ;;  %v9322_v21 = vcombine.high %v931_v61, %v935_v62  ;;  %v955_v38 = vld [vmem:[#allocation14 + $0x2c0] sm:$0xff] }
 0x1d8   :  { %716 = vmatmul.mubr.bf16.gmra.mrb[4].mxu1 %v456_v42  ;;  %789 = vmatmul.mubr.bf16.gmra.mrb[12].mxu0 %v456_v42  ;;  %v9291_v42 = vcombine.low %v900_v31, %v904_v32  ;;  %v936_v17 = vld [vmem:[#allocation14 + $0x228] sm:$0xff]  ;;  %v951_v31 = vld [vmem:[#allocation14 + $0x2a0] sm:$0xff] }
 0x1d9   :  { %725 = vmatprep.mubr.bf16.mxu1 %v14549_v16  ;;  %798 = vmatprep.mubr.bf16.mxu0 %v14549_v16  ;;  %v9324_v22 = vcombine.high %v932_v63, %v936_v17  ;;  %v948_v32 = vld [vmem:[#allocation14 + $0x288] sm:$0xff]  ;;  %v959_v39 = vld [vmem:[#allocation14 + $0x2e0] sm:$0xff] }
 0x1da   :  { %2450 = vmatpush1.bf16.msra.mxu1 %v9273_v25  ;;  %2596 = vmatpush1.bf16.msra.mxu0 %v9275_v20  ;;  %v940_v25 = vld [vmem:[#allocation14 + $0x248] sm:$0xff]  ;;  %v963_v46 = vld [vmem:[#allocation14 + $0x300] sm:$0xff] }
 0x1db   :  { %2451 = vmatprep.subr.bf16.mxu1 %v9282_v23  ;;  %2597 = vmatprep.subr.bf16.mxu0 %v9284_v28  ;;  %v944_v20 = vld [vmem:[#allocation14 + $0x268] sm:$0xff]  ;;  %v9321_v23 = vcombine.low %v931_v61, %v935_v62  ;;  %v9323_v28 = vcombine.low %v932_v63, %v936_v17  ;;  %v967_v47 = vld [vmem:[#allocation14 + $0x320] sm:$0xff] }
 0x1dc   :  { %v9332_v29 = vcombine.high %v940_v25, %v944_v20  ;;  %v956_v40 = vld [vmem:[#allocation14 + $0x2c8] sm:$0xff]  ;;  %v971_v54 = vld [vmem:[#allocation14 + $0x340] sm:$0xff] }
 0x1dd   :  { %v964_v48 = vld [vmem:[#allocation14 + $0x308] sm:$0xff]  ;;  %v975_v55 = vld [vmem:[#allocation14 + $0x360] sm:$0xff] }
 0x1de   :  { %2452 = vmatpush1.bf16.msra.mxu1 %v9281_v33  ;;  %2598 = vmatpush1.bf16.msra.mxu0 %v9283_v34  ;;  %v952_v33 = vld [vmem:[#allocation14 + $0x2a8] sm:$0xff]  ;;  %v9361_v62 = vcombine.low %v971_v54, %v975_v55  ;;  %v979_v17 = vld [vmem:[#allocation14 + $0x380] sm:$0xff] }
 0x1df   :  { %2453 = vmatprep.subr.bf16.mxu1 %v9290_v35  ;;  %2599 = vmatprep.subr.bf16.mxu0 %v9292_v36  ;;  %v9331_v35 = vcombine.low %v940_v25, %v944_v20  ;;  %v9338_v36 = vcombine.high %v947_v30, %v951_v31  ;;  %v9340_v37 = vcombine.high %v948_v32, %v952_v33  ;;  %v972_v56 = vld [vmem:[#allocation14 + $0x348] sm:$0xff]  ;;  %v987_v20 = vld [vmem:[#allocation14 + $0x3c0] sm:$0xff] }
 0x1e0   :  { %726 = vmatmul.mubr.bf16.gmra.mrb[8].mxu1 %v457_v27  ;;  %799 = vmatmul.mubr.bf16.gmra.mrb[16].mxu0 %v457_v27  ;;  %v943_v27 = vld [vmem:[#allocation14 + $0x260] sm:$0xff] }
 0x1e1   :  { %735 = vmatprep.mubr.bf16.mxu1 %v14549_v16  ;;  %808 = vmatprep.mubr.bf16.mxu0 %v14549_v16  ;;  %v9329_v34 = vcombine.low %v939_v24, %v943_v27 }
 0x1e2   :  { %2454 = vmatpush1.bf16.msra.mxu1 %v9289_v41  ;;  %2600 = vmatpush1.bf16.msra.mxu0 %v9291_v42  ;;  %v960_v41 = vld [vmem:[#allocation14 + $0x2e8] sm:$0xff]  ;;  %v9337_v42 = vcombine.low %v947_v30, %v951_v31 }
 0x1e3   :  { %2455 = vmatprep.subr.bf16.mxu1 %v9298_v43  ;;  %2601 = vmatprep.subr.bf16.mxu0 %v9300_v44  ;;  %v9339_v43 = vcombine.low %v948_v32, %v952_v33  ;;  %v9346_v44 = vcombine.high %v955_v38, %v959_v39  ;;  %v9348_v45 = vcombine.high %v956_v40, %v960_v41  ;;  %v11656_v33 = vld [vmem:[#allocation14 + $0x400] sm:$0xff] }
 0x1e6   :  { %2456 = vmatpush1.bf16.msra.mxu1 %v9297_v49  ;;  %2602 = vmatpush1.bf16.msra.mxu0 %v9299_v50  ;;  %v968_v49 = vld [vmem:[#allocation14 + $0x328] sm:$0xff]  ;;  %v9345_v50 = vcombine.low %v955_v38, %v959_v39 }
 0x1e7   :  { %2457 = vmatprep.subr.bf16.mxu1 %v9306_v51  ;;  %2603 = vmatprep.subr.bf16.mxu0 %v9308_v52  ;;  %v9347_v51 = vcombine.low %v956_v40, %v960_v41  ;;  %v9354_v52 = vcombine.high %v963_v46, %v967_v47  ;;  %v9356_v53 = vcombine.high %v964_v48, %v968_v49  ;;  %v493_v41 = vlaneseq }
 0x1e8   :  { %736 = vmatmul.mubr.bf16.gmra.mrb[12].mxu1 %v11648_v26  ;;  %809 = vmatmul.mubr.bf16.gmra.mrb[20].mxu0 %v11648_v26  ;;  %v9330_v26 = vcombine.high %v939_v24, %v943_v27 }
 0x1ea   :  { %2458 = vmatpush1.bf16.msra.mxu1 %v9305_v57  ;;  %2604 = vmatpush1.bf16.msra.mxu0 %v9307_v58  ;;  %v976_v57 = vld [vmem:[#allocation14 + $0x368] sm:$0xff]  ;;  %v9353_v58 = vcombine.low %v963_v46, %v967_v47 }
 0x1eb   :  { %2459 = vmatprep.subr.bf16.mxu1 %v9314_v59  ;;  %2605 = vmatprep.subr.bf16.mxu0 %v9316_v60  ;;  %v9355_v59 = vcombine.low %v964_v48, %v968_v49  ;;  %v9362_v60 = vcombine.high %v971_v54, %v975_v55  ;;  %v9364_v61 = vcombine.high %v972_v56, %v976_v57 }
 0x1ec   :  { %v9363_v63 = vcombine.low %v972_v56, %v976_v57 }
 0x1ee   :  { %2460 = vmatpush1.bf16.msra.mxu1 %v9313_v18  ;;  %2606 = vmatpush1.bf16.msra.mxu0 %v9315_v19  ;;  %v983_v18 = vld [vmem:[#allocation14 + $0x3a0] sm:$0xff]  ;;  %v980_v19 = vld [vmem:[#allocation14 + $0x388] sm:$0xff] }
 0x1ef   :  { %2461 = vmatprep.subr.bf16.mxu1 %v9322_v21  ;;  %2607 = vmatprep.subr.bf16.mxu0 %v9324_v22  ;;  %v9370_v21 = vcombine.high %v979_v17, %v983_v18  ;;  %v984_v22 = vld [vmem:[#allocation14 + $0x3a8] sm:$0xff]  ;;  %v9369_v24 = vcombine.low %v979_v17, %v983_v18 }
 0x1f0   :  { %v9371_v27 = vcombine.low %v980_v19, %v984_v22  ;;  %v9372_v25 = vcombine.high %v980_v19, %v984_v22 }
 0x1f2   :  { %2462 = vmatpush1.bf16.msra.mxu1 %v9321_v23  ;;  %2608 = vmatpush1.bf16.msra.mxu0 %v9323_v28  ;;  %v991_v23 = vld [vmem:[#allocation14 + $0x3e0] sm:$0xff]  ;;  %v988_v28 = vld [vmem:[#allocation14 + $0x3c8] sm:$0xff] }
 0x1f3   :  { %2463 = vmatprep.subr.bf16.mxu1 %v9330_v26  ;;  %2609 = vmatprep.subr.bf16.mxu0 %v9332_v29  ;;  %v9378_v26 = vcombine.high %v987_v20, %v991_v23  ;;  %v992_v29 = vld [vmem:[#allocation14 + $0x3e8] sm:$0xff]  ;;  %v9377_v30 = vcombine.low %v987_v20, %v991_v23  ;;  %v11706_v20 = vld [vmem:[#allocation14 + $0x440] sm:$0xff] }
 0x1f4   :  { %v9379_v31 = vcombine.low %v988_v28, %v992_v29  ;;  %v9380_v32 = vcombine.high %v988_v28, %v992_v29  ;;  %v11708_v23 = vld [vmem:[#allocation14 + $0x460] sm:$0xff] }
 0x1f6   :  { %2464 = vmatpush1.bf16.msra.mxu1 %v9329_v34  ;;  %2610 = vmatpush1.bf16.msra.mxu0 %v9331_v35  ;;  %v11658_v34 = vld [vmem:[#allocation14 + $0x420] sm:$0xff]  ;;  %v11660_v35 = vld [vmem:[#allocation14 + $0x408] sm:$0xff] }
 0x1f7   :  { %2465 = vmatprep.subr.bf16.mxu1 %v9338_v36  ;;  %2611 = vmatprep.subr.bf16.mxu0 %v9340_v37  ;;  %v9386_v36 = vcombine.high %v11656_v33, %v11658_v34  ;;  %v11664_v37 = vld [vmem:[#allocation14 + $0x428] sm:$0xff]  ;;  %v9385_v38 = vcombine.low %v11656_v33, %v11658_v34 }
 0x1f8   :  { %v9387_v39 = vcombine.low %v11660_v35, %v11664_v37  ;;  %v9388_v40 = vcombine.high %v11660_v35, %v11664_v37  ;;  %v11760_v35 = vld [vmem:[#allocation14 + $0x4e8] sm:$0xff] }
 0x1fa   :  { %2466 = vmatpush1.bf16.msra.mxu1 %v9337_v42  ;;  %2612 = vmatpush1.bf16.msra.mxu0 %v9339_v43  ;;  %v11672_v42 = vshrl.u32 %v493_v41, 7  ;;  %v11714_v41 = vld [vmem:[#allocation14 + $0x480] sm:$0xff] }
 0x1fb   :  { %2467 = vmatprep.subr.bf16.mxu1 %v9346_v44  ;;  %2613 = vmatprep.subr.bf16.mxu0 %v9348_v45  ;;  %v491_v45 = vld [vmem:[#allocation13] sm:$0xf] }
 0x1fc   :  { %14788 = vst [vmem:[#allocation55_spill] sm:$0xff] %v11672_v42  ;;  %v11675_v43 = vsub.s32 0, %v11672_v42  ;;  %v11678_v44 = vsub.s32 2, %v11672_v42  ;;  %v11681_v46 = vsub.s32 1, %v11672_v42  ;;  %v11684_v47 = vsub.s32 3, %v11672_v42 }
 0x1fd   :  { %v12073_v42 = vld [vmem:[#allocation16 + $0x1c0] ss:$16 sps:$4 sm:$0xff]  }
 0x1fe   :  { %2468 = vmatpush1.bf16.msra.mxu1 %v9345_v50  ;;  %2614 = vmatpush1.bf16.msra.mxu0 %v9347_v51  ;;  %14789 = vst [vmem:[#allocation56_spill] sm:$0xff] %v11675_v43  ;;  %14790 = vst [vmem:[#allocation57_spill] sm:$0xff] %v11678_v44  ;;  %v11687_v48 = vrot.slane %v491_v45, %v11675_v43  ;;  %v11690_v49 = vrot.slane %v491_v45, %v11678_v44 }
 0x1ff   :  { %2469 = vmatprep.subr.bf16.mxu1 %v9354_v52  ;;  %2615 = vmatprep.subr.bf16.mxu0 %v9356_v53  ;;  %14791 = vst [vmem:[#allocation58_spill] sm:$0xff] %v11681_v46  ;;  %14792 = vst [vmem:[#allocation59_spill] sm:$0xff] %v11684_v47  ;;  %v11693_v50 = vrot.slane %v491_v45, %v11681_v46  ;;  %v11696_v51 = vrot.slane %v491_v45, %v11684_v47  ;;  %v11716_v45 = vld [vmem:[#allocation14 + $0x4a0] sm:$0xff] }
 0x202   :  { %2470 = vmatpush1.bf16.msra.mxu1 %v9353_v58  ;;  %2616 = vmatpush1.bf16.msra.mxu0 %v9355_v59 }
 0x203   :  { %2471 = vmatprep.subr.bf16.mxu1 %v9362_v60  ;;  %2617 = vmatprep.subr.bf16.mxu0 %v9364_v61 }
 0x206   :  { %2472 = vmatpush1.bf16.msra.mxu1 %v9361_v62  ;;  %2618 = vmatpush1.bf16.msra.mxu0 %v9363_v63 }
 0x207   :  { %2473 = vmatprep.subr.bf16.mxu1 %v9370_v21  ;;  %2619 = vmatprep.subr.bf16.mxu0 %v9372_v25 }
 0x20a   :  { %2474 = vmatpush1.bf16.msra.mxu1 %v9369_v24  ;;  %2620 = vmatpush1.bf16.msra.mxu0 %v9371_v27 }
 0x20b   :  { %2475 = vmatprep.subr.bf16.mxu1 %v9378_v26  ;;  %2621 = vmatprep.subr.bf16.mxu0 %v9380_v32  ;;  %v1008_v32 = vld [vmem:[#allocation14 + $0x468] sm:$0xff] }
 0x20e   :  { %2476 = vmatpush1.bf16.msra.mxu1 %v9377_v30  ;;  %2622 = vmatpush1.bf16.msra.mxu0 %v9379_v31  ;;  %v1004_v31 = vld [vmem:[#allocation14 + $0x448] sm:$0xff] }
 0x20f   :  { %2518 = vmatprep.subr.bf16.mxu1 %v9386_v36  ;;  %2664 = vmatprep.subr.bf16.mxu0 %v9388_v40 }
 0x2a3   :  { %v707_v52 = vpop.f32.mrb[0].mxu1  ;;  %v780_v53 = vpop.f32.mrb[8].mxu0 }
 0x2a4   :  { %v708_v54 = vadd.f32 %v707_v52, %v11687_v48  ;;  %v781_v55 = vadd.f32 %v780_v53, %v11690_v49  ;;  %v709_v56 = vpop.f32.mrb[1].mxu1  ;;  %v782_v57 = vpop.f32.mrb[9].mxu0 }
 0x2a5   :  { %v710_v58 = vadd.f32 %v709_v56, %v11693_v50  ;;  %v783_v59 = vadd.f32 %v782_v57, %v11696_v51  ;;  %v711_v60 = vpop.f32.mrb[2].mxu1  ;;  %v784_v61 = vpop.f32.mrb[10].mxu0  ;;  %v9393_v56 = vcombine.low %v11706_v20, %v11708_v23  ;;  %v9394_v57 = vcombine.high %v11706_v20, %v11708_v23 }
 0x2a6   :  { %v712_v62 = vadd.f32 %v711_v60, %v11687_v48  ;;  %v785_v63 = vadd.f32 %v784_v61, %v11690_v49  ;;  %v713_v17 = vpop.f32.mrb[3].mxu1  ;;  %v786_v18 = vpop.f32.mrb[11].mxu0  ;;  %v819_v22 = vmax.f32 %v708_v54, 0.0  ;;  %v821_v24 = vmax.f32 %v781_v55, 0.0 }
 0x2a7   :  { %v714_v19 = vadd.f32 %v713_v17, %v11693_v50  ;;  %v787_v21 = vadd.f32 %v786_v18, %v11696_v51  ;;  %v820_v28 = vmax.f32 %v710_v58, 0.0  ;;  %v822_v26 = vmax.f32 %v783_v59, 0.0  ;;  %v11728_v17 = vld [vmem:[#allocation14 + $0x488] sm:$0xff] }
 0x2a8   :  { %v823_v27 = vmax.f32 %v712_v62, 0.0  ;;  %v825_v25 = vmax.f32 %v785_v63, 0.0  ;;  %v9395_v62 = vcombine.low %v1004_v31, %v1008_v32  ;;  %v9396_v63 = vcombine.high %v1004_v31, %v1008_v32  ;;  %v11730_v18 = vld [vmem:[#allocation14 + $0x4a8] sm:$0xff]  ;;  %v11754_v32 = vld [vmem:[#allocation14 + $0x4c0] sm:$0xff] }
 0x2a9   :  { %v824_v29 = vmax.f32 %v714_v19, 0.0  ;;  %v826_v30 = vmax.f32 %v787_v21, 0.0  ;;  %v9404_v31 = vcombine.high %v11728_v17, %v11730_v18 }
 0x2aa   :  { %v11710_v36 = vpack.c.bf16 %v823_v27, %v819_v22  ;;  %v11712_v40 = vpack.c.bf16 %v825_v25, %v821_v24  ;;  %v9402_v27 = vcombine.high %v11714_v41, %v11716_v45 }
 0x2ab   :  { %v11718_v52 = vpack.c.bf16 %v824_v29, %v820_v28  ;;  %v11720_v53 = vpack.c.bf16 %v826_v30, %v822_v26  ;;  %v717_v54 = vpop.f32.mrb[4].mxu1  ;;  %v790_v55 = vpop.f32.mrb[12].mxu0  ;;  %v9401_v26 = vcombine.low %v11714_v41, %v11716_v45 }
 0x2ac   :  { %v718_v58 = vadd.f32 %v717_v54, %v11687_v48  ;;  %v791_v59 = vadd.f32 %v790_v55, %v11690_v49  ;;  %v719_v60 = vpop.f32.mrb[5].mxu1  ;;  %v792_v61 = vpop.f32.mrb[13].mxu0  ;;  %v11756_v54 = vld [vmem:[#allocation14 + $0x4e0] sm:$0xff] }
 0x2ad   :  { %v720_v19 = vadd.f32 %v719_v60, %v11693_v50  ;;  %v793_v21 = vadd.f32 %v792_v61, %v11696_v51  ;;  %v721_v22 = vpop.f32.mrb[6].mxu1  ;;  %v794_v24 = vpop.f32.mrb[14].mxu0  ;;  %2477 = vmatprep.mubr.bf16.mxu1 %v11718_v52  ;;  %2623 = vmatprep.mubr.bf16.mxu0 %v11718_v52 }
 0x2ae   :  { %v722_v25 = vadd.f32 %v721_v22, %v11687_v48  ;;  %v795_v20 = vadd.f32 %v794_v24, %v11690_v49  ;;  %v723_v23 = vpop.f32.mrb[7].mxu1  ;;  %v796_v28 = vpop.f32.mrb[15].mxu0  ;;  %2478 = vmatmul.mubr.bf16.vlgmr.msra.gmra.mrb[16].mxu1 %v11710_v36  ;;  %2624 = vmatmul.mubr.bf16.vlgmr.msra.gmra.mrb[24].mxu0 %v11710_v36  ;;  %v827_v41 = vmax.f32 %v718_v58, 0.0  ;;  %v829_v45 = vmax.f32 %v791_v59, 0.0  ;;  %v11758_v22 = vld [vmem:[#allocation14 + $0x4c8] sm:$0xff] }
 0x2af   :  { %v724_v29 = vadd.f32 %v723_v23, %v11693_v50  ;;  %v797_v30 = vadd.f32 %v796_v28, %v11696_v51  ;;  %2519 = vmatpush1.bf16.msra.mxu1 %v9385_v38  ;;  %2665 = vmatpush1.bf16.msra.mxu0 %v9387_v39  ;;  %v828_v61 = vmax.f32 %v720_v19, 0.0  ;;  %v830_v33 = vmax.f32 %v793_v21, 0.0 }
 0x2b0   :  { %v831_v55 = vmax.f32 %v722_v25, 0.0  ;;  %v833_v60 = vmax.f32 %v795_v20, 0.0  ;;  %2520 = vmatprep.subr.bf16.mxu1 %v9394_v57  ;;  %2666 = vmatprep.subr.bf16.mxu0 %v9396_v63  ;;  %v9403_v58 = vcombine.low %v11728_v17, %v11730_v18  ;;  %v9410_v59 = vcombine.high %v11754_v32, %v11756_v54  ;;  %v11779_v18 = vld [vmem:[#allocation14 + $0x500] sm:$0xff] }
 0x2b1   :  { %v832_v34 = vmax.f32 %v724_v29, 0.0  ;;  %v834_v38 = vmax.f32 %v797_v30, 0.0  ;;  %v9409_v21 = vcombine.low %v11754_v32, %v11756_v54  ;;  %v9412_v17 = vcombine.high %v11758_v22, %v11760_v35  ;;  %v11789_v30 = vld [vmem:[#allocation14 + $0x508] sm:$0xff] }
 0x2b2   :  { %v11762_v37 = vpack.c.bf16 %v831_v55, %v827_v41  ;;  %v11764_v39 = vpack.c.bf16 %v833_v60, %v829_v45  ;;  %v9411_v29 = vcombine.low %v11758_v22, %v11760_v35  ;;  %v11799_v22 = vld [vmem:[#allocation14 + $0x540] sm:$0xff] }
 0x2b3   :  { %v11770_v57 = vpack.c.bf16 %v832_v34, %v828_v61  ;;  %v11772_v63 = vpack.c.bf16 %v834_v38, %v830_v33  ;;  %2521 = vmatpush1.bf16.msra.mxu1 %v9393_v56  ;;  %2667 = vmatpush1.bf16.msra.mxu0 %v9395_v62  ;;  %v727_v19 = vpop.f32.mrb[8].mxu1  ;;  %v800_v24 = vpop.f32.mrb[16].mxu0  ;;  %v11801_v35 = vld [vmem:[#allocation14 + $0x560] sm:$0xff] }
 0x2b4   :  { %v728_v25 = vadd.f32 %v727_v19, %v11687_v48  ;;  %v729_v20 = vpop.f32.mrb[9].mxu1  ;;  %2522 = vmatprep.subr.bf16.mxu1 %v9402_v27  ;;  %2668 = vmatprep.subr.bf16.mxu0 %v9404_v31  ;;  %v801_v23 = vadd.f32 %v800_v24, %v11690_v49  ;;  %v802_v28 = vpop.f32.mrb[17].mxu0  ;;  %v11787_v27 = vld [vmem:[#allocation14 + $0x520] sm:$0xff]  ;;  %v11791_v31 = vld [vmem:[#allocation14 + $0x528] sm:$0xff] }
 0x2b5   :  { %v730_v56 = vadd.f32 %v729_v20, %v11693_v50  ;;  %v731_v62 = vpop.f32.mrb[10].mxu1  ;;  %2487 = vmatprep.mubr.bf16.mxu1 %v11770_v57  ;;  %2633 = vmatprep.mubr.bf16.mxu0 %v11770_v57  ;;  %v803_v32 = vadd.f32 %v802_v28, %v11696_v51  ;;  %v804_v54 = vpop.f32.mrb[18].mxu0  ;;  %v9418_v20 = vcombine.high %v11779_v18, %v11787_v27 }
 0x2b6   :  { %v835_v41 = vmax.f32 %v728_v25, 0.0  ;;  %v732_v45 = vadd.f32 %v731_v62, %v11687_v48  ;;  %v733_v55 = vpop.f32.mrb[11].mxu1  ;;  %2488 = vmatmul.mubr.bf16.gmra.mrb[20].mxu1 %v11762_v37  ;;  %2634 = vmatmul.mubr.bf16.gmra.mrb[28].mxu0 %v11762_v37  ;;  %v837_v60 = vmax.f32 %v801_v23, 0.0  ;;  %v805_v61 = vadd.f32 %v804_v54, %v11690_v49  ;;  %v806_v33 = vpop.f32.mrb[19].mxu0  ;;  %v1040_v62 = vld [vmem:[#allocation14 + $0x568] sm:$0xff] }
 0x2b7   :  { %v836_v34 = vmax.f32 %v730_v56, 0.0  ;;  %v734_v38 = vadd.f32 %v733_v55, %v11693_v50  ;;  %2523 = vmatpush1.bf16.msra.mxu1 %v9401_v26  ;;  %2669 = vmatpush1.bf16.msra.mxu0 %v9403_v58  ;;  %v838_v19 = vmax.f32 %v803_v32, 0.0  ;;  %v807_v24 = vadd.f32 %v806_v33, %v11696_v51  ;;  %v11810_v58 = vld [vmem:[#allocation14 + $0x548] sm:$0xff] }
 0x2b8   :  { %v839_v25 = vmax.f32 %v732_v45, 0.0  ;;  %2524 = vmatprep.subr.bf16.mxu1 %v9410_v59  ;;  %2670 = vmatprep.subr.bf16.mxu0 %v9412_v17  ;;  %v9420_v23 = vcombine.high %v11789_v30, %v11791_v31  ;;  %v841_v28 = vmax.f32 %v805_v61, 0.0  ;;  %v9417_v26 = vcombine.low %v11779_v18, %v11787_v27 }
 0x2b9   :  { %v840_v56 = vmax.f32 %v734_v38, 0.0  ;;  %v842_v32 = vmax.f32 %v807_v24, 0.0  ;;  %v9419_v59 = vcombine.low %v11789_v30, %v11791_v31  ;;  %v9426_v17 = vcombine.high %v11799_v22, %v11801_v35  ;;  %v1043_v31 = vld [vmem:[#allocation14 + $0x580] sm:$0xff]  ;;  %v1048_v24 = vld [vmem:[#allocation14 + $0x5a8] sm:$0xff] }
 0x2ba   :  { %v11812_v54 = vpack.c.bf16 %v839_v25, %v835_v41  ;;  %v11818_v45 = vpack.c.bf16 %v841_v28, %v837_v60  ;;  %v9425_v18 = vcombine.low %v11799_v22, %v11801_v35  ;;  %v9428_v30 = vcombine.high %v11810_v58, %v1040_v62  ;;  %v1047_v35 = vld [vmem:[#allocation14 + $0x5a0] sm:$0xff] }
 0x2bb   :  { %v11820_v55 = vpack.c.bf16 %v840_v56, %v836_v34  ;;  %2525 = vmatpush1.bf16.msra.mxu1 %v9409_v21  ;;  %2671 = vmatpush1.bf16.msra.mxu0 %v9411_v29  ;;  %v737_v61 = vpop.f32.mrb[12].mxu1  ;;  %v11824_v27 = vpack.c.bf16 %v842_v32, %v838_v19  ;;  %v810_v41 = vpop.f32.mrb[20].mxu0  ;;  %v9427_v22 = vcombine.low %v11810_v58, %v1040_v62  ;;  %v1044_v19 = vld [vmem:[#allocation14 + $0x588] sm:$0xff] }
 0x2bc   :  { %v738_v33 = vadd.f32 %v737_v61, %v11687_v48  ;;  %v739_v38 = vpop.f32.mrb[13].mxu1  ;;  %2526 = vmatprep.subr.bf16.mxu1 %v9418_v20  ;;  %2672 = vmatprep.subr.bf16.mxu0 %v9420_v23  ;;  %v811_v60 = vadd.f32 %v810_v41, %v11690_v49  ;;  %v812_v34 = vpop.f32.mrb[21].mxu0 }
 0x2bd   :  { %v740_v21 = vadd.f32 %v739_v38, %v11693_v50  ;;  %v741_v29 = vpop.f32.mrb[14].mxu1  ;;  %2497 = vmatprep.mubr.bf16.mxu1 %v11820_v55  ;;  %2643 = vmatprep.mubr.bf16.mxu0 %v11820_v55  ;;  %v813_v25 = vadd.f32 %v812_v34, %v11696_v51  ;;  %v814_v20 = vpop.f32.mrb[22].mxu0 }
 0x2be   :  { %v843_v23 = vmax.f32 %v738_v33, 0.0  ;;  %v742_v28 = vadd.f32 %v741_v29, %v11687_v48  ;;  %v743_v56 = vpop.f32.mrb[15].mxu1  ;;  %2498 = vmatmul.mubr.bf16.gmra.mrb[24].mxu1 %v11812_v54  ;;  %2644 = vmatmul.mubr.bf16.gmra.mrb[32].mxu0 %v11812_v54  ;;  %v845_v32 = vmax.f32 %v811_v60, 0.0  ;;  %v815_v61 = vadd.f32 %v814_v20, %v11690_v49  ;;  %v816_v41 = vpop.f32.mrb[23].mxu0  ;;  %v1052_v20 = vld [vmem:[#allocation14 + $0x5c8] sm:$0xff] }
 0x2bf   :  { %v844_v38 = vmax.f32 %v740_v21, 0.0  ;;  %v744_v58 = vadd.f32 %v743_v56, %v11693_v50  ;;  %2527 = vmatpush1.bf16.msra.mxu1 %v9417_v26  ;;  %2673 = vmatpush1.bf16.msra.mxu0 %v9419_v59  ;;  %v846_v62 = vmax.f32 %v813_v25, 0.0  ;;  %v817_v34 = vadd.f32 %v816_v41, %v11696_v51  ;;  %v1055_v21 = vld [vmem:[#allocation14 + $0x5e0] sm:$0xff]  ;;  %v1056_v50 = vld [vmem:[#allocation14 + $0x5e8] sm:$0xff] }
 0x2c0   :  { %v847_v33 = vmax.f32 %v742_v28, 0.0  ;;  %2528 = vmatprep.subr.bf16.mxu1 %v9426_v17  ;;  %2674 = vmatprep.subr.bf16.mxu0 %v9428_v30  ;;  %v9434_v48 = vcombine.high %v1043_v31, %v1047_v35  ;;  %v9436_v29 = vcombine.high %v1044_v19, %v1048_v24  ;;  %v849_v16 = vmax.f32 %v815_v61, 0.0  ;;  %v1059_v30 = vld [vmem:[#allocation14 + $0x600] sm:$0xff]  ;;  %v1068_v56 = vld [vmem:[#allocation14 + $0x648] sm:$0xff] }
 0x2c1   :  { %v848_v7 = vmax.f32 %v744_v58, 0.0  ;;  %v850_v60 = vmax.f32 %v817_v34, 0.0  ;;  %v9433_v49 = vcombine.low %v1043_v31, %v1047_v35  ;;  %v9435_v51 = vcombine.low %v1044_v19, %v1048_v24  ;;  %v1063_v25 = vld [vmem:[#allocation14 + $0x620] sm:$0xff]  ;;  %v1076_v34 = vld [vmem:[#allocation14 + $0x688] sm:$0xff] }
 0x2c2   :  { %v11840_v6 = vpack.c.bf16 %v847_v33, %v843_v23  ;;  %v11842_v26 = vpack.c.bf16 %v849_v16, %v845_v32  ;;  %v9442_v31 = vcombine.high %v1051_v15, %v1055_v21  ;;  %v9444_v35 = vcombine.high %v1052_v20, %v1056_v50  ;;  %v1060_v23 = vld [vmem:[#allocation14 + $0x608] sm:$0xff]  ;;  %v1067_v24 = vld [vmem:[#allocation14 + $0x640] sm:$0xff] }
 0x2c3   :  { %v11844_v59 = vpack.c.bf16 %v848_v7, %v844_v38  ;;  %2529 = vmatpush1.bf16.msra.mxu1 %v9425_v18  ;;  %2675 = vmatpush1.bf16.msra.mxu0 %v9427_v22  ;;  %v11846_v17 = vpack.c.bf16 %v850_v60, %v846_v62  ;;  %v1064_v16 = vld [vmem:[#allocation14 + $0x628] sm:$0xff]  ;;  %v9441_v7 = vcombine.low %v1051_v15, %v1055_v21  ;;  %v1071_v28 = vld [vmem:[#allocation14 + $0x660] sm:$0xff] }
 0x2c4   :  { %2530 = vmatprep.subr.bf16.mxu1 %v9434_v48  ;;  %2676 = vmatprep.subr.bf16.mxu0 %v9436_v29  ;;  %v9443_v18 = vcombine.low %v1052_v20, %v1056_v50  ;;  %v9450_v22 = vcombine.high %v1059_v30, %v1063_v25  ;;  %v9452_v19 = vcombine.high %v1060_v23, %v1064_v16  ;;  %v1072_v32 = vld [vmem:[#allocation14 + $0x668] sm:$0xff]  ;;  %v1075_v58 = vld [vmem:[#allocation14 + $0x680] sm:$0xff] }
 0x2c5   :  { %2507 = vmatprep.mubr.bf16.mxu1 %v11844_v59  ;;  %2653 = vmatprep.mubr.bf16.mxu0 %v11844_v59  ;;  %v9449_v61 = vcombine.low %v1059_v30, %v1063_v25  ;;  %v9451_v41 = vcombine.low %v1060_v23, %v1064_v16  ;;  %v9458_v15 = vcombine.high %v1067_v24, %v1071_v28  ;;  %v1079_v62 = vld [vmem:[#allocation14 + $0x6a0] sm:$0xff]  ;;  %v1080_v33 = vld [vmem:[#allocation14 + $0x6a8] sm:$0xff] }
 0x2c6   :  { %2508 = vmatmul.mubr.bf16.gmra.mrb[28].mxu1 %v11840_v6  ;;  %2654 = vmatmul.mubr.bf16.gmra.mrb[36].mxu0 %v11840_v6  ;;  %v9460_v38 = vcombine.high %v1068_v56, %v1072_v32  ;;  %v9457_v48 = vcombine.low %v1067_v24, %v1071_v28  ;;  %v9459_v29 = vcombine.low %v1068_v56, %v1072_v32  ;;  %v1083_v21 = vld [vmem:[#allocation14 + $0x6c0] sm:$0xff]  ;;  %v1084_v50 = vld [vmem:[#allocation14 + $0x6c8] sm:$0xff] }
 0x2c7   :  { %2531 = vmatpush1.bf16.msra.mxu1 %v9433_v49  ;;  %2677 = vmatpush1.bf16.msra.mxu0 %v9435_v51  ;;  %v9466_v60 = vcombine.high %v1075_v58, %v1079_v62  ;;  %v9468_v49 = vcombine.high %v1076_v34, %v1080_v33  ;;  %v1087_v20 = vld [vmem:[#allocation14 + $0x6e0] sm:$0xff]  ;;  %v1088_v51 = vld [vmem:[#allocation14 + $0x6e8] sm:$0xff]  ;;  %v9465_v30 = vcombine.low %v1075_v58, %v1079_v62 }
 0x2c8   :  { %2550 = vmatprep.mubr.bf16.mxu1 %v11720_v53  ;;  %2696 = vmatprep.mubr.bf16.mxu0 %v11720_v53  ;;  %v9476_v25 = vcombine.high %v1084_v50, %v1088_v51  ;;  %v1091_v23 = vld [vmem:[#allocation14 + $0x700] sm:$0xff] }
 0x2c9   :  { %2532 = vmatprep.subr.bf16.mxu1 %v9442_v31  ;;  %2678 = vmatprep.subr.bf16.mxu0 %v9444_v35  ;;  %v9467_v31 = vcombine.low %v1076_v34, %v1080_v33  ;;  %v9474_v35 = vcombine.high %v1083_v21, %v1087_v20  ;;  %v1095_v16 = vld [vmem:[#allocation14 + $0x720] sm:$0xff] }
 0x2ca   :  { %v9482_v24 = vcombine.high %v1091_v23, %v1095_v16  ;;  %v1099_v56 = vld [vmem:[#allocation14 + $0x740] sm:$0xff] }
 0x2cb   :  { %2533 = vmatpush1.bf16.msra.mxu1 %v9441_v7  ;;  %2679 = vmatpush1.bf16.msra.mxu0 %v9443_v18  ;;  %v1092_v7 = vld [vmem:[#allocation14 + $0x708] sm:$0xff]  ;;  %v1103_v32 = vld [vmem:[#allocation14 + $0x760] sm:$0xff] }
 0x2cc   :  { %2534 = vmatprep.subr.bf16.mxu1 %v9450_v22  ;;  %2680 = vmatprep.subr.bf16.mxu0 %v9452_v19  ;;  %v1096_v18 = vld [vmem:[#allocation14 + $0x728] sm:$0xff]  ;;  %v9473_v22 = vcombine.low %v1083_v21, %v1087_v20  ;;  %v9475_v19 = vcombine.low %v1084_v50, %v1088_v51  ;;  %v9490_v58 = vcombine.high %v1099_v56, %v1103_v32  ;;  %v1107_v34 = vld [vmem:[#allocation14 + $0x780] sm:$0xff] }
 0x2cd   :  { %v9484_v28 = vcombine.high %v1092_v7, %v1096_v18  ;;  %v1111_v33 = vld [vmem:[#allocation14 + $0x7a0] sm:$0xff] }
 0x2ce   :  { %v9498_v21 = vcombine.high %v1107_v34, %v1111_v33  ;;  %v1115_v50 = vld [vmem:[#allocation14 + $0x7c0] sm:$0xff] }
 0x2cf   :  { %2535 = vmatpush1.bf16.msra.mxu1 %v9449_v61  ;;  %2681 = vmatpush1.bf16.msra.mxu0 %v9451_v41  ;;  %v1100_v61 = vld [vmem:[#allocation14 + $0x748] sm:$0xff]  ;;  %v1119_v51 = vld [vmem:[#allocation14 + $0x7e0] sm:$0xff] }
 0x2d0   :  { %2536 = vmatprep.subr.bf16.mxu1 %v9458_v15  ;;  %2682 = vmatprep.subr.bf16.mxu0 %v9460_v38  ;;  %v1104_v41 = vld [vmem:[#allocation14 + $0x768] sm:$0xff]  ;;  %v9481_v15 = vcombine.low %v1091_v23, %v1095_v16  ;;  %v9483_v38 = vcombine.low %v1092_v7, %v1096_v18  ;;  %v9506_v23 = vcombine.high %v1115_v50, %v1119_v51  ;;  %v869_v7 = vld [vmem:[#allocation14 + $0x10] sm:$0xff] }
 0x2d1   :  { %v9492_v62 = vcombine.high %v1100_v61, %v1104_v41  ;;  %v873_v18 = vld [vmem:[#allocation14 + $0x30] sm:$0xff] }
 0x2d3   :  { %2537 = vmatpush1.bf16.msra.mxu1 %v9457_v48  ;;  %2683 = vmatpush1.bf16.msra.mxu0 %v9459_v29  ;;  %v1108_v48 = vld [vmem:[#allocation14 + $0x788] sm:$0xff] }
 0x2d4   :  { %2538 = vmatprep.subr.bf16.mxu1 %v9466_v60  ;;  %2684 = vmatprep.subr.bf16.mxu0 %v9468_v49  ;;  %v1112_v29 = vld [vmem:[#allocation14 + $0x7a8] sm:$0xff]  ;;  %v9489_v60 = vcombine.low %v1099_v56, %v1103_v32  ;;  %v9491_v49 = vcombine.low %v1100_v61, %v1104_v41  ;;  %v9262_v56 = vcombine.high %v869_v7, %v873_v18  ;;  %v877_v61 = vld [vmem:[#allocation14 + $0x50] sm:$0xff] }
 0x2d5   :  { %v9500_v20 = vcombine.high %v1108_v48, %v1112_v29  ;;  %v881_v41 = vld [vmem:[#allocation14 + $0x70] sm:$0xff] }
 0x2d7   :  { %2539 = vmatpush1.bf16.msra.mxu1 %v9465_v30  ;;  %2685 = vmatpush1.bf16.msra.mxu0 %v9467_v31  ;;  %v1116_v30 = vld [vmem:[#allocation14 + $0x7c8] sm:$0xff] }
 0x2d8   :  { %2540 = vmatprep.subr.bf16.mxu1 %v9474_v35  ;;  %2686 = vmatprep.subr.bf16.mxu0 %v9476_v25  ;;  %v1120_v31 = vld [vmem:[#allocation14 + $0x7e8] sm:$0xff]  ;;  %v9497_v35 = vcombine.low %v1107_v34, %v1111_v33  ;;  %v9499_v25 = vcombine.low %v1108_v48, %v1112_v29  ;;  %v9270_v34 = vcombine.high %v877_v61, %v881_v41  ;;  %v885_v48 = vld [vmem:[#allocation14 + $0x90] sm:$0xff] }
 0x2d9   :  { %v9508_v16 = vcombine.high %v1116_v30, %v1120_v31  ;;  %v889_v29 = vld [vmem:[#allocation14 + $0xb0] sm:$0xff] }
 0x2db   :  { %2541 = vmatpush1.bf16.msra.mxu1 %v9473_v22  ;;  %2687 = vmatpush1.bf16.msra.mxu0 %v9475_v19  ;;  %v870_v22 = vld [vmem:[#allocation14 + $0x18] sm:$0xff] }
 0x2dc   :  { %2542 = vmatprep.subr.bf16.mxu1 %v9482_v24  ;;  %2688 = vmatprep.subr.bf16.mxu0 %v9484_v28  ;;  %v874_v19 = vld [vmem:[#allocation14 + $0x38] sm:$0xff]  ;;  %v9505_v24 = vcombine.low %v1115_v50, %v1119_v51  ;;  %v9507_v28 = vcombine.low %v1116_v30, %v1120_v31  ;;  %v9278_v50 = vcombine.high %v885_v48, %v889_v29  ;;  %v893_v30 = vld [vmem:[#allocation14 + $0xd0] sm:$0xff] }
 0x2dd   :  { %v9264_v32 = vcombine.high %v870_v22, %v874_v19  ;;  %v897_v31 = vld [vmem:[#allocation14 + $0xf0] sm:$0xff] }
 0x2df   :  { %2543 = vmatpush1.bf16.msra.mxu1 %v9481_v15  ;;  %2689 = vmatpush1.bf16.msra.mxu0 %v9483_v38  ;;  %v878_v15 = vld [vmem:[#allocation14 + $0x58] sm:$0xff] }
 0x2e0   :  { %2544 = vmatprep.subr.bf16.mxu1 %v9490_v58  ;;  %2690 = vmatprep.subr.bf16.mxu0 %v9492_v62  ;;  %v882_v38 = vld [vmem:[#allocation14 + $0x78] sm:$0xff]  ;;  %v9261_v58 = vcombine.low %v869_v7, %v873_v18  ;;  %v9263_v62 = vcombine.low %v870_v22, %v874_v19  ;;  %v9286_v7 = vcombine.high %v893_v30, %v897_v31  ;;  %v901_v22 = vld [vmem:[#allocation14 + $0x110] sm:$0xff] }
 0x2e1   :  { %v9272_v33 = vcombine.high %v878_v15, %v882_v38  ;;  %v905_v19 = vld [vmem:[#allocation14 + $0x130] sm:$0xff] }
 0x2e3   :  { %2545 = vmatpush1.bf16.msra.mxu1 %v9489_v60  ;;  %2691 = vmatpush1.bf16.msra.mxu0 %v9491_v49  ;;  %v886_v60 = vld [vmem:[#allocation14 + $0x98] sm:$0xff] }
 0x2e4   :  { %2546 = vmatprep.subr.bf16.mxu1 %v9498_v21  ;;  %2692 = vmatprep.subr.bf16.mxu0 %v9500_v20  ;;  %v890_v49 = vld [vmem:[#allocation14 + $0xb8] sm:$0xff]  ;;  %v9269_v21 = vcombine.low %v877_v61, %v881_v41  ;;  %v9271_v20 = vcombine.low %v878_v15, %v882_v38  ;;  %v9294_v61 = vcombine.high %v901_v22, %v905_v19  ;;  %v909_v15 = vld [vmem:[#allocation14 + $0x150] sm:$0xff] }
 0x2e5   :  { %v9280_v51 = vcombine.high %v886_v60, %v890_v49  ;;  %v913_v38 = vld [vmem:[#allocation14 + $0x170] sm:$0xff] }
 0x2e7   :  { %2547 = vmatpush1.bf16.msra.mxu1 %v9497_v35  ;;  %2693 = vmatpush1.bf16.msra.mxu0 %v9499_v25  ;;  %v894_v35 = vld [vmem:[#allocation14 + $0xd8] sm:$0xff] }
 0x2e8   :  { %2548 = vmatprep.subr.bf16.mxu1 %v9506_v23  ;;  %2694 = vmatprep.subr.bf16.mxu0 %v9508_v16  ;;  %v898_v25 = vld [vmem:[#allocation14 + $0xf8] sm:$0xff]  ;;  %v9277_v23 = vcombine.low %v885_v48, %v889_v29  ;;  %v9279_v16 = vcombine.low %v886_v60, %v890_v49  ;;  %v9302_v48 = vcombine.high %v909_v15, %v913_v38  ;;  %v917_v60 = vld [vmem:[#allocation14 + $0x190] sm:$0xff] }
 0x2e9   :  { %v9288_v18 = vcombine.high %v894_v35, %v898_v25  ;;  %v921_v49 = vld [vmem:[#allocation14 + $0x1b0] sm:$0xff] }
 0x2eb   :  { %2549 = vmatpush1.bf16.msra.mxu1 %v9505_v24  ;;  %2695 = vmatpush1.bf16.msra.mxu0 %v9507_v28  ;;  %v902_v24 = vld [vmem:[#allocation14 + $0x118] sm:$0xff] }
 0x2ec   :  { %2737 = vmatprep.subr.bf16.mxu1 %v9262_v56  ;;  %2883 = vmatprep.subr.bf16.mxu0 %v9264_v32  ;;  %v906_v28 = vld [vmem:[#allocation14 + $0x138] sm:$0xff]  ;;  %v9285_v56 = vcombine.low %v893_v30, %v897_v31  ;;  %v9287_v32 = vcombine.low %v894_v35, %v898_v25  ;;  %v9310_v30 = vcombine.high %v917_v60, %v921_v49  ;;  %v925_v35 = vld [vmem:[#allocation14 + $0x1d0] sm:$0xff] }
 0x2ed   :  { %v9296_v41 = vcombine.high %v902_v24, %v906_v28  ;;  %v929_v25 = vld [vmem:[#allocation14 + $0x1f0] sm:$0xff] }
 0x2ee   :  { %2551 = vmatmul.mubr.bf16.vlgmr.msra.gmra.mrb[16].mxu1 %v11712_v40  ;;  %2697 = vmatmul.mubr.bf16.vlgmr.msra.gmra.mrb[24].mxu0 %v11712_v40 }
 0x2ef   :  { %2560 = vmatprep.mubr.bf16.mxu1 %v11772_v63  ;;  %2706 = vmatprep.mubr.bf16.mxu0 %v11772_v63 }
 0x2f0   :  { %2738 = vmatpush1.bf16.msra.mxu1 %v9261_v58  ;;  %2884 = vmatpush1.bf16.msra.mxu0 %v9263_v62  ;;  %v910_v58 = vld [vmem:[#allocation14 + $0x158] sm:$0xff] }
 0x2f1   :  { %2739 = vmatprep.subr.bf16.mxu1 %v9270_v34  ;;  %2885 = vmatprep.subr.bf16.mxu0 %v9272_v33  ;;  %v914_v62 = vld [vmem:[#allocation14 + $0x178] sm:$0xff]  ;;  %v9293_v34 = vcombine.low %v901_v22, %v905_v19  ;;  %v9295_v33 = vcombine.low %v902_v24, %v906_v28  ;;  %v9318_v22 = vcombine.high %v925_v35, %v929_v25  ;;  %v933_v24 = vld [vmem:[#allocation14 + $0x210] sm:$0xff] }
 0x2f2   :  { %v9304_v29 = vcombine.high %v910_v58, %v914_v62  ;;  %v937_v28 = vld [vmem:[#allocation14 + $0x230] sm:$0xff] }
 0x2f4   :  { %2740 = vmatpush1.bf16.msra.mxu1 %v9269_v21  ;;  %2886 = vmatpush1.bf16.msra.mxu0 %v9271_v20  ;;  %v918_v21 = vld [vmem:[#allocation14 + $0x198] sm:$0xff] }
 0x2f5   :  { %2741 = vmatprep.subr.bf16.mxu1 %v9278_v50  ;;  %2887 = vmatprep.subr.bf16.mxu0 %v9280_v51  ;;  %v922_v20 = vld [vmem:[#allocation14 + $0x1b8] sm:$0xff]  ;;  %v9301_v50 = vcombine.low %v909_v15, %v913_v38  ;;  %v9303_v51 = vcombine.low %v910_v58, %v914_v62  ;;  %v9326_v15 = vcombine.high %v933_v24, %v937_v28  ;;  %v941_v58 = vld [vmem:[#allocation14 + $0x250] sm:$0xff] }
 0x2f6   :  { %2561 = vmatmul.mubr.bf16.gmra.mrb[20].mxu1 %v11764_v39  ;;  %2707 = vmatmul.mubr.bf16.gmra.mrb[28].mxu0 %v11764_v39  ;;  %v9312_v31 = vcombine.high %v918_v21, %v922_v20  ;;  %v945_v62 = vld [vmem:[#allocation14 + $0x270] sm:$0xff] }
 0x2f7   :  { %2570 = vmatprep.mubr.bf16.mxu1 %v11824_v27  ;;  %2716 = vmatprep.mubr.bf16.mxu0 %v11824_v27 }
 0x2f8   :  { %2742 = vmatpush1.bf16.msra.mxu1 %v9277_v23  ;;  %2888 = vmatpush1.bf16.msra.mxu0 %v9279_v16  ;;  %v926_v23 = vld [vmem:[#allocation14 + $0x1d8] sm:$0xff] }
 0x2f9   :  { %2743 = vmatprep.subr.bf16.mxu1 %v9286_v7  ;;  %2889 = vmatprep.subr.bf16.mxu0 %v9288_v18  ;;  %v930_v16 = vld [vmem:[#allocation14 + $0x1f8] sm:$0xff]  ;;  %v9309_v7 = vcombine.low %v917_v60, %v921_v49  ;;  %v9311_v18 = vcombine.low %v918_v21, %v922_v20  ;;  %v9334_v60 = vcombine.high %v941_v58, %v945_v62  ;;  %v949_v49 = vld [vmem:[#allocation14 + $0x290] sm:$0xff] }
 0x2fa   :  { %v9320_v19 = vcombine.high %v926_v23, %v930_v16  ;;  %v953_v21 = vld [vmem:[#allocation14 + $0x2b0] sm:$0xff]  ;;  %v950_v20 = vld [vmem:[#allocation14 + $0x298] sm:$0xff] }
 0x2fc   :  { %2744 = vmatpush1.bf16.msra.mxu1 %v9285_v56  ;;  %2890 = vmatpush1.bf16.msra.mxu0 %v9287_v32  ;;  %v934_v56 = vld [vmem:[#allocation14 + $0x218] sm:$0xff] }
 0x2fd   :  { %2745 = vmatprep.subr.bf16.mxu1 %v9294_v61  ;;  %2891 = vmatprep.subr.bf16.mxu0 %v9296_v41  ;;  %v938_v32 = vld [vmem:[#allocation14 + $0x238] sm:$0xff]  ;;  %v9317_v61 = vcombine.low %v925_v35, %v929_v25  ;;  %v9319_v41 = vcombine.low %v926_v23, %v930_v16  ;;  %v957_v25 = vld [vmem:[#allocation14 + $0x2d0] sm:$0xff] }
 0x2fe   :  { %2571 = vmatmul.mubr.bf16.gmra.mrb[24].mxu1 %v11818_v45  ;;  %2717 = vmatmul.mubr.bf16.gmra.mrb[32].mxu0 %v11818_v45  ;;  %v9328_v38 = vcombine.high %v934_v56, %v938_v32  ;;  %v961_v23 = vld [vmem:[#allocation14 + $0x2f0] sm:$0xff]  ;;  %v958_v16 = vld [vmem:[#allocation14 + $0x2d8] sm:$0xff] }
 0x2ff   :  { %2580 = vmatprep.mubr.bf16.mxu1 %v11846_v17  ;;  %2726 = vmatprep.mubr.bf16.mxu0 %v11846_v17 }
 0x300   :  { %2746 = vmatpush1.bf16.msra.mxu1 %v9293_v34  ;;  %2892 = vmatpush1.bf16.msra.mxu0 %v9295_v33  ;;  %v942_v34 = vld [vmem:[#allocation14 + $0x258] sm:$0xff] }
 0x301   :  { %2747 = vmatprep.subr.bf16.mxu1 %v9302_v48  ;;  %2893 = vmatprep.subr.bf16.mxu0 %v9304_v29  ;;  %v946_v33 = vld [vmem:[#allocation14 + $0x278] sm:$0xff]  ;;  %v9325_v48 = vcombine.low %v933_v24, %v937_v28  ;;  %v9327_v29 = vcombine.low %v934_v56, %v938_v32  ;;  %v965_v28 = vld [vmem:[#allocation14 + $0x310] sm:$0xff] }
 0x302   :  { %v969_v56 = vld [vmem:[#allocation14 + $0x330] sm:$0xff]  ;;  %v966_v32 = vld [vmem:[#allocation14 + $0x318] sm:$0xff] }
 0x304   :  { %2748 = vmatpush1.bf16.msra.mxu1 %v9301_v50  ;;  %2894 = vmatpush1.bf16.msra.mxu0 %v9303_v51  ;;  %v954_v50 = vld [vmem:[#allocation14 + $0x2b8] sm:$0xff]  ;;  %v9333_v51 = vcombine.low %v941_v58, %v945_v62  ;;  %v973_v62 = vld [vmem:[#allocation14 + $0x350] sm:$0xff] }
 0x305   :  { %2749 = vmatprep.subr.bf16.mxu1 %v9310_v30  ;;  %2895 = vmatprep.subr.bf16.mxu0 %v9312_v31  ;;  %v9335_v30 = vcombine.low %v942_v34, %v946_v33  ;;  %v9342_v31 = vcombine.high %v949_v49, %v953_v21  ;;  %v9344_v35 = vcombine.high %v950_v20, %v954_v50 }
 0x306   :  { %2581 = vmatmul.mubr.bf16.gmra.mrb[28].mxu1 %v11842_v26  ;;  %2727 = vmatmul.mubr.bf16.gmra.mrb[36].mxu0 %v11842_v26 }
 0x307   :  { %2769 = vmatprep.mubr.bf16.mxu1 %v11718_v52  ;;  %2915 = vmatprep.mubr.bf16.mxu0 %v11718_v52  ;;  %v9336_v52 = vcombine.high %v942_v34, %v946_v33  ;;  %v977_v34 = vld [vmem:[#allocation14 + $0x370] sm:$0xff]  ;;  %v974_v33 = vld [vmem:[#allocation14 + $0x358] sm:$0xff] }
 0x308   :  { %2750 = vmatpush1.bf16.msra.mxu1 %v9309_v7  ;;  %2896 = vmatpush1.bf16.msra.mxu0 %v9311_v18  ;;  %v962_v7 = vld [vmem:[#allocation14 + $0x2f8] sm:$0xff]  ;;  %v9341_v18 = vcombine.low %v949_v49, %v953_v21  ;;  %v981_v21 = vld [vmem:[#allocation14 + $0x390] sm:$0xff] }
 0x309   :  { %2751 = vmatprep.subr.bf16.mxu1 %v9318_v22  ;;  %2897 = vmatprep.subr.bf16.mxu0 %v9320_v19  ;;  %v9343_v22 = vcombine.low %v950_v20, %v954_v50  ;;  %v9350_v19 = vcombine.high %v957_v25, %v961_v23  ;;  %v9352_v24 = vcombine.high %v958_v16, %v962_v7  ;;  %v985_v20 = vld [vmem:[#allocation14 + $0x3b0] sm:$0xff]  ;;  %v982_v50 = vld [vmem:[#allocation14 + $0x398] sm:$0xff] }
 0x30c   :  { %2752 = vmatpush1.bf16.msra.mxu1 %v9317_v61  ;;  %2898 = vmatpush1.bf16.msra.mxu0 %v9319_v41  ;;  %v970_v61 = vld [vmem:[#allocation14 + $0x338] sm:$0xff]  ;;  %v9349_v41 = vcombine.low %v957_v25, %v961_v23  ;;  %v989_v23 = vld [vmem:[#allocation14 + $0x3d0] sm:$0xff] }
 0x30d   :  { %2753 = vmatprep.subr.bf16.mxu1 %v9326_v15  ;;  %2899 = vmatprep.subr.bf16.mxu0 %v9328_v38  ;;  %v9351_v15 = vcombine.low %v958_v16, %v962_v7  ;;  %v9358_v38 = vcombine.high %v965_v28, %v969_v56  ;;  %v9360_v58 = vcombine.high %v966_v32, %v970_v61  ;;  %v993_v16 = vld [vmem:[#allocation14 + $0x3f0] sm:$0xff]  ;;  %v990_v7 = vld [vmem:[#allocation14 + $0x3d8] sm:$0xff] }
 0x310   :  { %2754 = vmatpush1.bf16.msra.mxu1 %v9325_v48  ;;  %2900 = vmatpush1.bf16.msra.mxu0 %v9327_v29  ;;  %v978_v48 = vld [vmem:[#allocation14 + $0x378] sm:$0xff]  ;;  %v9357_v29 = vcombine.low %v965_v28, %v969_v56  ;;  %v997_v56 = vld [vmem:[#allocation14 + $0x410] sm:$0xff] }
 0x311   :  { %2755 = vmatprep.subr.bf16.mxu1 %v9334_v60  ;;  %2901 = vmatprep.subr.bf16.mxu0 %v9336_v52  ;;  %v9359_v60 = vcombine.low %v966_v32, %v970_v61  ;;  %v9366_v52 = vcombine.high %v973_v62, %v977_v34  ;;  %v9368_v49 = vcombine.high %v974_v33, %v978_v48  ;;  %v1001_v32 = vld [vmem:[#allocation14 + $0x430] sm:$0xff]  ;;  %v998_v61 = vld [vmem:[#allocation14 + $0x418] sm:$0xff] }
 0x314   :  { %2756 = vmatpush1.bf16.msra.mxu1 %v9333_v51  ;;  %2902 = vmatpush1.bf16.msra.mxu0 %v9335_v30  ;;  %v986_v51 = vld [vmem:[#allocation14 + $0x3b8] sm:$0xff]  ;;  %v9365_v30 = vcombine.low %v973_v62, %v977_v34  ;;  %v1005_v34 = vld [vmem:[#allocation14 + $0x450] sm:$0xff] }
 0x315   :  { %2757 = vmatprep.subr.bf16.mxu1 %v9342_v31  ;;  %2903 = vmatprep.subr.bf16.mxu0 %v9344_v35  ;;  %v9367_v31 = vcombine.low %v974_v33, %v978_v48  ;;  %v9374_v35 = vcombine.high %v981_v21, %v985_v20  ;;  %v9376_v25 = vcombine.high %v982_v50, %v986_v51  ;;  %v1009_v33 = vld [vmem:[#allocation14 + $0x470] sm:$0xff]  ;;  %v1006_v48 = vld [vmem:[#allocation14 + $0x458] sm:$0xff] }
 0x318   :  { %2758 = vmatpush1.bf16.msra.mxu1 %v9341_v18  ;;  %2904 = vmatpush1.bf16.msra.mxu0 %v9343_v22  ;;  %v994_v18 = vld [vmem:[#allocation14 + $0x3f8] sm:$0xff]  ;;  %v9373_v22 = vcombine.low %v981_v21, %v985_v20  ;;  %v1013_v20 = vld [vmem:[#allocation14 + $0x490] sm:$0xff] }
 0x319   :  { %2759 = vmatprep.subr.bf16.mxu1 %v9350_v19  ;;  %2905 = vmatprep.subr.bf16.mxu0 %v9352_v24  ;;  %v9375_v19 = vcombine.low %v982_v50, %v986_v51  ;;  %v9382_v24 = vcombine.high %v989_v23, %v993_v16  ;;  %v9384_v28 = vcombine.high %v990_v7, %v994_v18  ;;  %v1017_v50 = vld [vmem:[#allocation14 + $0x4b0] sm:$0xff]  ;;  %v1014_v51 = vld [vmem:[#allocation14 + $0x498] sm:$0xff] }
 0x31c   :  { %2760 = vmatpush1.bf16.msra.mxu1 %v9349_v41  ;;  %2906 = vmatpush1.bf16.msra.mxu0 %v9351_v15  ;;  %v1002_v41 = vld [vmem:[#allocation14 + $0x438] sm:$0xff]  ;;  %v9381_v15 = vcombine.low %v989_v23, %v993_v16  ;;  %v1021_v16 = vld [vmem:[#allocation14 + $0x4d0] sm:$0xff] }
 0x31d   :  { %2761 = vmatprep.subr.bf16.mxu1 %v9358_v38  ;;  %2907 = vmatprep.subr.bf16.mxu0 %v9360_v58  ;;  %v9383_v38 = vcombine.low %v990_v7, %v994_v18  ;;  %v9390_v58 = vcombine.high %v997_v56, %v1001_v32  ;;  %v9392_v62 = vcombine.high %v998_v61, %v1002_v41  ;;  %v1025_v7 = vld [vmem:[#allocation14 + $0x4f0] sm:$0xff]  ;;  %v1022_v18 = vld [vmem:[#allocation14 + $0x4d8] sm:$0xff] }
 0x320   :  { %2762 = vmatpush1.bf16.msra.mxu1 %v9357_v29  ;;  %2908 = vmatpush1.bf16.msra.mxu0 %v9359_v60  ;;  %v1010_v29 = vld [vmem:[#allocation14 + $0x478] sm:$0xff]  ;;  %v9389_v60 = vcombine.low %v997_v56, %v1001_v32  ;;  %v1029_v56 = vld [vmem:[#allocation14 + $0x510] sm:$0xff] }
 0x321   :  { %2763 = vmatprep.subr.bf16.mxu1 %v9366_v52  ;;  %2909 = vmatprep.subr.bf16.mxu0 %v9368_v49  ;;  %v9391_v52 = vcombine.low %v998_v61, %v1002_v41  ;;  %v9398_v49 = vcombine.high %v1005_v34, %v1009_v33  ;;  %v9400_v21 = vcombine.high %v1006_v48, %v1010_v29  ;;  %v1030_v32 = vld [vmem:[#allocation14 + $0x518] sm:$0xff] }
 0x322   :  { %v1034_v61 = vld [vmem:[#allocation14 + $0x538] sm:$0xff]  ;;  %v9413_v41 = vcombine.low %v1021_v16, %v1025_v7 }
 0x324   :  { %2764 = vmatpush1.bf16.msra.mxu1 %v9365_v30  ;;  %2910 = vmatpush1.bf16.msra.mxu0 %v9367_v31  ;;  %v1018_v30 = vld [vmem:[#allocation14 + $0x4b8] sm:$0xff]  ;;  %v9397_v31 = vcombine.low %v1005_v34, %v1009_v33  ;;  %v1041_v34 = vld [vmem:[#allocation14 + $0x570] sm:$0xff] }
 0x325   :  { %2765 = vmatprep.subr.bf16.mxu1 %v9374_v35  ;;  %2911 = vmatprep.subr.bf16.mxu0 %v9376_v25  ;;  %v9399_v35 = vcombine.low %v1006_v48, %v1010_v29  ;;  %v9406_v25 = vcombine.high %v1013_v20, %v1017_v50  ;;  %v9408_v23 = vcombine.high %v1014_v51, %v1018_v30  ;;  %v1038_v33 = vld [vmem:[#allocation14 + $0x558] sm:$0xff] }
 0x326   :  { %v1042_v48 = vld [vmem:[#allocation14 + $0x578] sm:$0xff]  ;;  %v9423_v29 = vcombine.low %v1030_v32, %v1034_v61 }
 0x328   :  { %2766 = vmatpush1.bf16.msra.mxu1 %v9373_v22  ;;  %2912 = vmatpush1.bf16.msra.mxu0 %v9375_v19  ;;  %v1026_v22 = vld [vmem:[#allocation14 + $0x4f8] sm:$0xff]  ;;  %v9407_v19 = vcombine.low %v1014_v51, %v1018_v30  ;;  %v9431_v51 = vcombine.low %v1038_v33, %v1042_v48 }
 0x329   :  { %2767 = vmatprep.subr.bf16.mxu1 %v9382_v24  ;;  %2913 = vmatprep.subr.bf16.mxu0 %v9384_v28  ;;  %v9414_v24 = vcombine.high %v1021_v16, %v1025_v7  ;;  %v9416_v28 = vcombine.high %v1022_v18, %v1026_v22  ;;  %v1058_v16 = vld [vmem:[#allocation14 + $0x5f8] sm:$0xff] }
 0x32c   :  { %2768 = vmatpush1.bf16.msra.mxu1 %v9381_v15  ;;  %2914 = vmatpush1.bf16.msra.mxu0 %v9383_v38  ;;  %v9415_v15 = vcombine.low %v1022_v18, %v1026_v22 }
 0x32d   :  { %2810 = vmatprep.subr.bf16.mxu1 %v9390_v58  ;;  %2956 = vmatprep.subr.bf16.mxu0 %v9392_v62  ;;  %v9424_v58 = vcombine.high %v1030_v32, %v1034_v61  ;;  %v1037_v62 = vld [vmem:[#allocation14 + $0x550] sm:$0xff] }
 0x32e   :  { %v1069_v61 = vld [vmem:[#allocation14 + $0x650] sm:$0xff] }
 0x32f   :  { %2770 = vmatmul.mubr.bf16.vlgmr.msra.gmra.mrb[32].mxu1 %v11710_v36  ;;  %2916 = vmatmul.mubr.bf16.vlgmr.msra.gmra.mrb[40].mxu0 %v11710_v36  ;;  %v9405_v36 = vcombine.low %v1013_v20, %v1017_v50  ;;  %v1050_v20 = vld [vmem:[#allocation14 + $0x5b8] sm:$0xff]  ;;  %v9429_v50 = vcombine.low %v1037_v62, %v1041_v34 }
 0x330   :  { %2779 = vmatprep.mubr.bf16.mxu1 %v11770_v57  ;;  %2811 = vmatpush1.bf16.msra.mxu1 %v9389_v60  ;;  %v9430_v60 = vcombine.high %v1037_v62, %v1041_v34 }
 0x331   :  { %2925 = vmatprep.mubr.bf16.mxu0 %v11770_v57  ;;  %2957 = vmatpush1.bf16.msra.mxu0 %v9391_v52  ;;  %v1033_v57 = vld [vmem:[#allocation14 + $0x530] sm:$0xff]  ;;  %v9432_v52 = vcombine.high %v1038_v33, %v1042_v48 }
 0x332   :  { %2812 = vmatprep.subr.bf16.mxu1 %v9398_v49  ;;  %2958 = vmatprep.subr.bf16.mxu0 %v9400_v21  ;;  %v9422_v38 = vcombine.high %v1029_v56, %v1033_v57  ;;  %v1045_v49 = vld [vmem:[#allocation14 + $0x590] sm:$0xff]  ;;  %v1046_v21 = vld [vmem:[#allocation14 + $0x598] sm:$0xff] }
 0x333   :  { %v9439_v7 = vcombine.low %v1046_v21, %v1050_v20  ;;  %v1077_v33 = vld [vmem:[#allocation14 + $0x690] sm:$0xff] }
 0x334   :  { %2813 = vmatpush1.bf16.msra.mxu1 %v9397_v31  ;;  %v9440_v31 = vcombine.high %v1046_v21, %v1050_v20  ;;  %v1081_v48 = vld [vmem:[#allocation14 + $0x6b0] sm:$0xff]  ;;  %v1086_v20 = vld [vmem:[#allocation14 + $0x6d8] sm:$0xff] }
 0x335   :  { %2959 = vmatpush1.bf16.msra.mxu0 %v9399_v35  ;;  %2814 = vmatprep.subr.bf16.mxu1 %v9406_v25  ;;  %v1053_v35 = vld [vmem:[#allocation14 + $0x5d0] sm:$0xff] }
 0x336   :  { %2960 = vmatprep.subr.bf16.mxu0 %v9408_v23  ;;  %v1057_v25 = vld [vmem:[#allocation14 + $0x5f0] sm:$0xff]  ;;  %v1054_v23 = vld [vmem:[#allocation14 + $0x5d8] sm:$0xff] }
 0x337   :  { %2780 = vmatmul.mubr.bf16.gmra.mrb[36].mxu1 %v11762_v37  ;;  %2926 = vmatmul.mubr.bf16.gmra.mrb[44].mxu0 %v11762_v37  ;;  %v9421_v37 = vcombine.low %v1029_v56, %v1033_v57  ;;  %v9446_v18 = vcombine.high %v1053_v35, %v1057_v25  ;;  %v9448_v22 = vcombine.high %v1054_v23, %v1058_v16  ;;  %v1089_v21 = vld [vmem:[#allocation14 + $0x6f0] sm:$0xff] }
 0x338   :  { %2789 = vmatprep.mubr.bf16.mxu1 %v11820_v55  ;;  %2815 = vmatpush1.bf16.msra.mxu1 %v9405_v36  ;;  %v1061_v36 = vld [vmem:[#allocation14 + $0x610] sm:$0xff]  ;;  %v9447_v56 = vcombine.low %v1054_v23, %v1058_v16  ;;  %v1094_v16 = vld [vmem:[#allocation14 + $0x718] sm:$0xff] }
 0x339   :  { %2935 = vmatprep.mubr.bf16.mxu0 %v11820_v55  ;;  %2961 = vmatpush1.bf16.msra.mxu0 %v9407_v19  ;;  %v1049_v55 = vld [vmem:[#allocation14 + $0x5b0] sm:$0xff]  ;;  %v1062_v19 = vld [vmem:[#allocation14 + $0x618] sm:$0xff] }
 0x33a   :  { %2816 = vmatprep.subr.bf16.mxu1 %v9414_v24  ;;  %2962 = vmatprep.subr.bf16.mxu0 %v9416_v28  ;;  %v9438_v30 = vcombine.high %v1045_v49, %v1049_v55  ;;  %v1066_v24 = vld [vmem:[#allocation14 + $0x638] sm:$0xff]  ;;  %v9445_v28 = vcombine.low %v1053_v35, %v1057_v25  ;;  %v1093_v25 = vld [vmem:[#allocation14 + $0x710] sm:$0xff] }
 0x33b   :  { %v9456_v32 = vcombine.high %v1062_v19, %v1066_v24  ;;  %v1097_v23 = vld [vmem:[#allocation14 + $0x730] sm:$0xff] }
 0x33c   :  { %2817 = vmatpush1.bf16.msra.mxu1 %v9413_v41  ;;  %v1073_v41 = vld [vmem:[#allocation14 + $0x670] sm:$0xff] }
 0x33d   :  { %2963 = vmatpush1.bf16.msra.mxu0 %v9415_v15  ;;  %2818 = vmatprep.subr.bf16.mxu1 %v9422_v38  ;;  %v1070_v15 = vld [vmem:[#allocation14 + $0x658] sm:$0xff]  ;;  %v9462_v62 = vcombine.high %v1069_v61, %v1073_v41 }
 0x33e   :  { %2964 = vmatprep.subr.bf16.mxu0 %v9424_v58  ;;  %v1074_v38 = vld [vmem:[#allocation14 + $0x678] sm:$0xff]  ;;  %v9455_v58 = vcombine.low %v1062_v19, %v1066_v24  ;;  %v1105_v19 = vld [vmem:[#allocation14 + $0x770] sm:$0xff] }
 0x33f   :  { %2790 = vmatmul.mubr.bf16.gmra.mrb[40].mxu1 %v11812_v54  ;;  %2936 = vmatmul.mubr.bf16.gmra.mrb[48].mxu0 %v11812_v54  ;;  %v9437_v54 = vcombine.low %v1045_v49, %v1049_v55  ;;  %v9464_v34 = vcombine.high %v1070_v15, %v1074_v38  ;;  %v1085_v55 = vld [vmem:[#allocation14 + $0x6d0] sm:$0xff]  ;;  %v1102_v24 = vld [vmem:[#allocation14 + $0x758] sm:$0xff] }
 0x340   :  { %2799 = vmatprep.mubr.bf16.mxu1 %v11844_v59  ;;  %2819 = vmatpush1.bf16.msra.mxu1 %v9421_v37  ;;  %v1082_v37 = vld [vmem:[#allocation14 + $0x6b8] sm:$0xff] }
 0x341   :  { %2945 = vmatprep.mubr.bf16.mxu0 %v11844_v59  ;;  %2965 = vmatpush1.bf16.msra.mxu0 %v9423_v29  ;;  %v1065_v59 = vld [vmem:[#allocation14 + $0x630] sm:$0xff]  ;;  %v9461_v29 = vcombine.low %v1069_v61, %v1073_v41 }
 0x342   :  { %2820 = vmatprep.subr.bf16.mxu1 %v9430_v60  ;;  %2966 = vmatprep.subr.bf16.mxu0 %v9432_v52  ;;  %v9454_v57 = vcombine.high %v1061_v36, %v1065_v59  ;;  %v9463_v60 = vcombine.low %v1070_v15, %v1074_v38  ;;  %v9470_v52 = vcombine.high %v1077_v33, %v1081_v48  ;;  %v1109_v41 = vld [vmem:[#allocation14 + $0x790] sm:$0xff]  ;;  %v1110_v38 = vld [vmem:[#allocation14 + $0x798] sm:$0xff] }
 0x343   :  { %v1113_v15 = vld [vmem:[#allocation14 + $0x7b0] sm:$0xff] }
 0x344   :  { %2821 = vmatpush1.bf16.msra.mxu1 %v9429_v50  ;;  %v1090_v50 = vld [vmem:[#allocation14 + $0x6f8] sm:$0xff] }
 0x345   :  { %2967 = vmatpush1.bf16.msra.mxu0 %v9431_v51  ;;  %2822 = vmatprep.subr.bf16.mxu1 %v9438_v30  ;;  %v9469_v51 = vcombine.low %v1077_v33, %v1081_v48  ;;  %v9480_v35 = vcombine.high %v1086_v20, %v1090_v50  ;;  %v1117_v48 = vld [vmem:[#allocation14 + $0x7d0] sm:$0xff] }
 0x346   :  { %2968 = vmatprep.subr.bf16.mxu0 %v9440_v31  ;;  %v9478_v31 = vcombine.high %v1085_v55, %v1089_v21 }
 0x347   :  { %2800 = vmatmul.mubr.bf16.gmra.mrb[44].mxu1 %v11840_v6  ;;  %2946 = vmatmul.mubr.bf16.gmra.mrb[52].mxu0 %v11840_v6  ;;  %v9453_v6 = vcombine.low %v1061_v36, %v1065_v59  ;;  %v1101_v59 = vld [vmem:[#allocation14 + $0x750] sm:$0xff] }
 0x348   :  { %2823 = vmatpush1.bf16.msra.mxu1 %v9437_v54  ;;  %2842 = vmatprep.mubr.bf16.mxu1 %v11720_v53  ;;  %v1098_v54 = vld [vmem:[#allocation14 + $0x738] sm:$0xff] }
 0x349   :  { %2969 = vmatpush1.bf16.msra.mxu0 %v9439_v7  ;;  %2988 = vmatprep.mubr.bf16.mxu0 %v11720_v53  ;;  %v1078_v53 = vld [vmem:[#allocation14 + $0x698] sm:$0xff]  ;;  %v9477_v7 = vcombine.low %v1085_v55, %v1089_v21  ;;  %v9488_v36 = vcombine.high %v1094_v16, %v1098_v54 }
 0x34a   :  { %2824 = vmatprep.subr.bf16.mxu1 %v9446_v18  ;;  %2970 = vmatprep.subr.bf16.mxu0 %v9448_v22  ;;  %v9472_v49 = vcombine.high %v1078_v53, %v1082_v37  ;;  %v9471_v30 = vcombine.low %v1078_v53, %v1082_v37  ;;  %v9479_v18 = vcombine.low %v1086_v20, %v1090_v50  ;;  %v1121_v53 = vld [vmem:[#allocation14 + $0x7f0] sm:$0xff]  ;;  %v1118_v37 = vld [vmem:[#allocation14 + $0x7d8] sm:$0xff] }
 0x34b   :  { %v9486_v22 = vcombine.high %v1093_v25, %v1097_v23  ;;  %v9509_v21 = vcombine.low %v1117_v48, %v1121_v53  ;;  %v11886_v50 = vld [vmem:[#allocation16 + $0x4] ss:$16 sps:$4 sm:$0xff]  }
 0x34c   :  { %2825 = vmatpush1.bf16.msra.mxu1 %v9445_v28  ;;  %v1106_v28 = vld [vmem:[#allocation14 + $0x778] sm:$0xff] }
 0x34d   :  { %2971 = vmatpush1.bf16.msra.mxu0 %v9447_v56  ;;  %2826 = vmatprep.subr.bf16.mxu1 %v9454_v57  ;;  %v9485_v56 = vcombine.low %v1093_v25, %v1097_v23  ;;  %v9487_v57 = vcombine.low %v1094_v16, %v1098_v54  ;;  %v9496_v61 = vcombine.high %v1102_v24, %v1106_v28  ;;  %v11899_v25 = vld [vmem:[#allocation16 + $0x2c] ss:$16 sps:$4 sm:$0xff]   ;;  %v11905_v23 = vld [vmem:[#allocation16 + $0x20] ss:$16 sps:$4 sm:$0xff]   ;;  %v11909_v16 = vld [vmem:[#allocation16 + $0x28] ss:$16 sps:$4 sm:$0xff]  }
 0x34e   :  { %2972 = vmatprep.subr.bf16.mxu0 %v9456_v32  ;;  %v9494_v32 = vcombine.high %v1101_v59, %v1105_v19  ;;  %v11911_v54 = vld [vmem:[#allocation16 + $0x44] ss:$16 sps:$4 sm:$0xff]  }
 0x350   :  { %2827 = vmatpush1.bf16.msra.mxu1 %v9453_v6  ;;  %v1114_v6 = vld [vmem:[#allocation14 + $0x7b8] sm:$0xff] }
 0x351   :  { %2973 = vmatpush1.bf16.msra.mxu0 %v9455_v58  ;;  %2828 = vmatprep.subr.bf16.mxu1 %v9462_v62  ;;  %v9493_v58 = vcombine.low %v1101_v59, %v1105_v19  ;;  %v9495_v62 = vcombine.low %v1102_v24, %v1106_v28  ;;  %v9504_v33 = vcombine.high %v1110_v38, %v1114_v6  ;;  %v11937_v59 = vld [vmem:[#allocation16 + $0x68] ss:$16 sps:$4 sm:$0xff]   ;;  %v11939_v19 = vld [vmem:[#allocation16 + $0x84] ss:$16 sps:$4 sm:$0xff]   ;;  %v11942_v24 = vld [vmem:[#allocation16 + $0x8c] ss:$16 sps:$4 sm:$0xff]  }
 0x352   :  { %2974 = vmatprep.subr.bf16.mxu0 %v9464_v34  ;;  %v9502_v34 = vcombine.high %v1109_v41, %v1113_v15  ;;  %v11951_v28 = vld [vmem:[#allocation16 + $0xa4] ss:$16 sps:$4 sm:$0xff]  }
 0x354   :  { %2829 = vmatpush1.bf16.msra.mxu1 %v9461_v29  ;;  %v1122_v29 = vld [vmem:[#allocation14 + $0x7f8] sm:$0xff] }
 0x355   :  { %2975 = vmatpush1.bf16.msra.mxu0 %v9463_v60  ;;  %2830 = vmatprep.subr.bf16.mxu1 %v9470_v52  ;;  %v9501_v60 = vcombine.low %v1109_v41, %v1113_v15  ;;  %v9503_v52 = vcombine.low %v1110_v38, %v1114_v6  ;;  %v9512_v55 = vcombine.high %v1118_v37, %v1122_v29  ;;  %v11970_v41 = vld [vmem:[#allocation16 + $0xcc] ss:$16 sps:$4 sm:$0xff]   ;;  %v11979_v15 = vld [vmem:[#allocation16 + $0xe4] ss:$16 sps:$4 sm:$0xff]   ;;  %v14793_v6 = vmov 0  }
 0x356   :  { %2976 = vmatprep.subr.bf16.mxu0 %v9472_v49  ;;  %v9510_v49 = vcombine.high %v1117_v48, %v1121_v53  ;;  %v9511_v20 = vcombine.low %v1118_v37, %v1122_v29  ;;  %v11983_v38 = vld [vmem:[#allocation16 + $0xec] ss:$16 sps:$4 sm:$0xff]   ;;  %v12005_v48 = vld [vmem:[#allocation16 + $0x108] ss:$16 sps:$4 sm:$0xff]   ;;  %v12007_v53 = vld [vmem:[#allocation16 + $0x124] ss:$16 sps:$4 sm:$0xff]  }
 0x357   :  { %v12010_v37 = vld [vmem:[#allocation16 + $0x12c] ss:$16 sps:$4 sm:$0xff]   ;;  %v12013_v29 = vld [vmem:[#allocation16 + $0x120] ss:$16 sps:$4 sm:$0xff]  }
 0x358   :  { %2831 = vmatpush1.bf16.msra.mxu1 %v9469_v51  ;;  %v11888_v51 = vld [vmem:[#allocation16 + $0xc] ss:$16 sps:$4 sm:$0xff]  }
 0x359   :  { %2977 = vmatpush1.bf16.msra.mxu0 %v9471_v30  ;;  %2832 = vmatprep.subr.bf16.mxu1 %v9478_v31  ;;  %v11890_v30 = vld [vmem:[#allocation16] ss:$16 sps:$4 sm:$0xff]   ;;  %v11893_v31 = vld [vmem:[#allocation16 + $0x8] ss:$16 sps:$4 sm:$0xff]  }
 0x35a   :  { %2978 = vmatprep.subr.bf16.mxu0 %v9480_v35  ;;  %v11896_v35 = vld [vmem:[#allocation16 + $0x24] ss:$16 sps:$4 sm:$0xff]  }
 0x35c   :  { %2833 = vmatpush1.bf16.msra.mxu1 %v9477_v7  ;;  %v11914_v7 = vld [vmem:[#allocation16 + $0x4c] ss:$16 sps:$4 sm:$0xff]  }
 0x35d   :  { %2979 = vmatpush1.bf16.msra.mxu0 %v9479_v18  ;;  %2834 = vmatprep.subr.bf16.mxu1 %v9486_v22  ;;  %v11923_v18 = vld [vmem:[#allocation16 + $0x64] ss:$16 sps:$4 sm:$0xff]   ;;  %v11927_v22 = vld [vmem:[#allocation16 + $0x6c] ss:$16 sps:$4 sm:$0xff]  }
 0x35e   :  { %2980 = vmatprep.subr.bf16.mxu0 %v9488_v36  ;;  %v11933_v36 = vld [vmem:[#allocation16 + $0x60] ss:$16 sps:$4 sm:$0xff]  }
 0x360   :  { %2835 = vmatpush1.bf16.msra.mxu1 %v9485_v56  ;;  %v11955_v56 = vld [vmem:[#allocation16 + $0xac] ss:$16 sps:$4 sm:$0xff]  }
 0x361   :  { %2981 = vmatpush1.bf16.msra.mxu0 %v9487_v57  ;;  %2836 = vmatprep.subr.bf16.mxu1 %v9494_v32  ;;  %v11961_v57 = vld [vmem:[#allocation16 + $0xa0] ss:$16 sps:$4 sm:$0xff]   ;;  %v11965_v32 = vld [vmem:[#allocation16 + $0xa8] ss:$16 sps:$4 sm:$0xff]  }
 0x362   :  { %2982 = vmatprep.subr.bf16.mxu0 %v9496_v61  ;;  %v11967_v61 = vld [vmem:[#allocation16 + $0xc4] ss:$16 sps:$4 sm:$0xff]  }
 0x364   :  { %2837 = vmatpush1.bf16.msra.mxu1 %v9493_v58  ;;  %v11988_v58 = vld [vmem:[#allocation16 + $0xe0] ss:$16 sps:$4 sm:$0xff]  }
 0x365   :  { %2983 = vmatpush1.bf16.msra.mxu0 %v9495_v62  ;;  %2838 = vmatprep.subr.bf16.mxu1 %v9502_v34  ;;  %v11993_v62 = vld [vmem:[#allocation16 + $0xe8] ss:$16 sps:$4 sm:$0xff]   ;;  %v11995_v34 = vld [vmem:[#allocation16 + $0x104] ss:$16 sps:$4 sm:$0xff]  }
 0x366   :  { %2984 = vmatprep.subr.bf16.mxu0 %v9504_v33  ;;  %v11998_v33 = vld [vmem:[#allocation16 + $0x10c] ss:$16 sps:$4 sm:$0xff]  }
 0x368   :  { %2839 = vmatpush1.bf16.msra.mxu1 %v9501_v60  ;;  %v12017_v60 = vld [vmem:[#allocation16 + $0x128] ss:$16 sps:$4 sm:$0xff]  }
 0x369   :  { %2985 = vmatpush1.bf16.msra.mxu0 %v9503_v52  ;;  %2840 = vmatprep.subr.bf16.mxu1 %v9510_v49  ;;  %v12019_v52 = vld [vmem:[#allocation16 + $0x144] ss:$16 sps:$4 sm:$0xff]   ;;  %v12022_v49 = vld [vmem:[#allocation16 + $0x14c] ss:$16 sps:$4 sm:$0xff]  }
 0x36a   :  { %2986 = vmatprep.subr.bf16.mxu0 %v9512_v55  ;;  %v12025_v55 = vld [vmem:[#allocation16 + $0x140] ss:$16 sps:$4 sm:$0xff]  }
 0x36c   :  { %2841 = vmatpush1.bf16.msra.mxu1 %v9509_v21  ;;  %v12029_v21 = vld [vmem:[#allocation16 + $0x148] ss:$16 sps:$4 sm:$0xff]  }
 0x36d   :  { %2987 = vmatpush1.bf16.msra.mxu0 %v9511_v20  ;;  %3496 = vmatprep.subr.bf16.mxu1 %v11886_v50  ;;  %v12031_v20 = vld [vmem:[#allocation16 + $0x164] ss:$16 sps:$4 sm:$0xff]  }
 0x36e   :  { %3537 = vmatprep.subr.bf16.mxu0 %v11888_v51 }
 0x36f   :  { %2843 = vmatmul.mubr.bf16.vlgmr.msra.gmra.mrb[32].mxu1 %v11712_v40 }
 0x370   :  { %2989 = vmatmul.mubr.bf16.vlgmr.msra.gmra.mrb[40].mxu0 %v11712_v40  ;;  %2852 = vmatprep.mubr.bf16.mxu1 %v11772_v63  ;;  %v11917_v40 = vld [vmem:[#allocation16 + $0x40] ss:$16 sps:$4 sm:$0xff]  }
 0x371   :  { %2998 = vmatprep.mubr.bf16.mxu0 %v11772_v63  ;;  %3497 = vmatpush1.bf16.msra.mxu1 %v11890_v30  ;;  %v11921_v63 = vld [vmem:[#allocation16 + $0x48] ss:$16 sps:$4 sm:$0xff]  }
 0x372   :  { %3538 = vmatpush1.bf16.msra.mxu0 %v11893_v31  ;;  %3498 = vmatprep.subr.bf16.mxu1 %v11896_v35 }
 0x373   :  { %3539 = vmatprep.subr.bf16.mxu0 %v11899_v25 }
 0x375   :  { %3499 = vmatpush1.bf16.msra.mxu1 %v11905_v23 }
 0x376   :  { %3540 = vmatpush1.bf16.msra.mxu0 %v11909_v16  ;;  %3500 = vmatprep.subr.bf16.mxu1 %v11911_v54 }
 0x377   :  { %2853 = vmatmul.mubr.bf16.gmra.mrb[36].mxu1 %v11764_v39  ;;  %3541 = vmatprep.subr.bf16.mxu0 %v11914_v7 }
 0x378   :  { %2999 = vmatmul.mubr.bf16.gmra.mrb[44].mxu0 %v11764_v39  ;;  %2862 = vmatprep.mubr.bf16.mxu1 %v11824_v27  ;;  %v11945_v39 = vld [vmem:[#allocation16 + $0x80] ss:$16 sps:$4 sm:$0xff]  }
 0x379   :  { %3008 = vmatprep.mubr.bf16.mxu0 %v11824_v27  ;;  %3501 = vmatpush1.bf16.msra.mxu1 %v11917_v40  ;;  %v11949_v27 = vld [vmem:[#allocation16 + $0x88] ss:$16 sps:$4 sm:$0xff]  }
 0x37a   :  { %3542 = vmatpush1.bf16.msra.mxu0 %v11921_v63  ;;  %3502 = vmatprep.subr.bf16.mxu1 %v11923_v18 }
 0x37b   :  { %3543 = vmatprep.subr.bf16.mxu0 %v11927_v22 }
 0x37d   :  { %3503 = vmatpush1.bf16.msra.mxu1 %v11933_v36 }
 0x37e   :  { %3544 = vmatpush1.bf16.msra.mxu0 %v11937_v59  ;;  %3504 = vmatprep.subr.bf16.mxu1 %v11939_v19 }
 0x37f   :  { %2863 = vmatmul.mubr.bf16.gmra.mrb[40].mxu1 %v11818_v45  ;;  %3545 = vmatprep.subr.bf16.mxu0 %v11942_v24 }
 0x380   :  { %3009 = vmatmul.mubr.bf16.gmra.mrb[48].mxu0 %v11818_v45  ;;  %2872 = vmatprep.mubr.bf16.mxu1 %v11846_v17  ;;  %v11973_v45 = vld [vmem:[#allocation16 + $0xc0] ss:$16 sps:$4 sm:$0xff]  }
 0x381   :  { %3018 = vmatprep.mubr.bf16.mxu0 %v11846_v17  ;;  %3505 = vmatpush1.bf16.msra.mxu1 %v11945_v39  ;;  %v11977_v17 = vld [vmem:[#allocation16 + $0xc8] ss:$16 sps:$4 sm:$0xff]  }
 0x382   :  { %3546 = vmatpush1.bf16.msra.mxu0 %v11949_v27  ;;  %3506 = vmatprep.subr.bf16.mxu1 %v11951_v28 }
 0x383   :  { %3547 = vmatprep.subr.bf16.mxu0 %v11955_v56 }
 0x385   :  { %3507 = vmatpush1.bf16.msra.mxu1 %v11961_v57 }
 0x386   :  { %3548 = vmatpush1.bf16.msra.mxu0 %v11965_v32  ;;  %3508 = vmatprep.subr.bf16.mxu1 %v11967_v61 }
 0x387   :  { %2873 = vmatmul.mubr.bf16.gmra.mrb[44].mxu1 %v11842_v26  ;;  %3549 = vmatprep.subr.bf16.mxu0 %v11970_v41 }
 0x388   :  { %3019 = vmatmul.mubr.bf16.gmra.mrb[52].mxu0 %v11842_v26  ;;  %3528 = vmatprep.mubr.bf16.mxu1 %v14793_v6  ;;  %v12001_v26 = vld [vmem:[#allocation16 + $0x100] ss:$16 sps:$4 sm:$0xff]  }
 0x389   :  { %3509 = vmatpush1.bf16.msra.mxu1 %v11973_v45  ;;  %3569 = vmatprep.mubr.bf16.mxu0 %v14793_v6 }
 0x38a   :  { %3550 = vmatpush1.bf16.msra.mxu0 %v11977_v17  ;;  %3510 = vmatprep.subr.bf16.mxu1 %v11979_v15 }
 0x38b   :  { %3551 = vmatprep.subr.bf16.mxu0 %v11983_v38 }
 0x38d   :  { %3511 = vmatpush1.bf16.msra.mxu1 %v11988_v58 }
 0x38e   :  { %3552 = vmatpush1.bf16.msra.mxu0 %v11993_v62  ;;  %3512 = vmatprep.subr.bf16.mxu1 %v11995_v34 }
 0x38f   :  { %3553 = vmatprep.subr.bf16.mxu0 %v11998_v33 }
 0x391   :  { %3513 = vmatpush1.bf16.msra.mxu1 %v12001_v26 }
 0x392   :  { %3554 = vmatpush1.bf16.msra.mxu0 %v12005_v48  ;;  %3514 = vmatprep.subr.bf16.mxu1 %v12007_v53 }
 0x393   :  { %3555 = vmatprep.subr.bf16.mxu0 %v12010_v37 }
 0x395   :  { %3515 = vmatpush1.bf16.msra.mxu1 %v12013_v29 }
 0x396   :  { %3556 = vmatpush1.bf16.msra.mxu0 %v12017_v60  ;;  %3516 = vmatprep.subr.bf16.mxu1 %v12019_v52 }
 0x397   :  { %3557 = vmatprep.subr.bf16.mxu0 %v12022_v49 }
 0x399   :  { %3517 = vmatpush1.bf16.msra.mxu1 %v12025_v55 }
 0x39a   :  { %3558 = vmatpush1.bf16.msra.mxu0 %v12029_v21  ;;  %3518 = vmatprep.subr.bf16.mxu1 %v12031_v20 }
 0x39b   :  { %3559 = vmatprep.subr.bf16.mxu0 %v12034_v14 }
 0x39d   :  { %3519 = vmatpush1.bf16.msra.mxu1 %v12037_v5 }
 0x39e   :  { %3560 = vmatpush1.bf16.msra.mxu0 %v12041_v13  ;;  %3520 = vmatprep.subr.bf16.mxu1 %v12043_v4 }
 0x39f   :  { %3561 = vmatprep.subr.bf16.mxu0 %v12046_v12 }
 0x3a1   :  { %3521 = vmatpush1.bf16.msra.mxu1 %v12049_v3  ;;  %v12077_v3 = vld [vmem:[#allocation16 + $0x1c8] ss:$16 sps:$4 sm:$0xff]  }
 0x3a2   :  { %3562 = vmatpush1.bf16.msra.mxu0 %v12053_v11  ;;  %3522 = vmatprep.subr.bf16.mxu1 %v12055_v2  ;;  %v12079_v11 = vld [vmem:[#allocation16 + $0x1e4] ss:$16 sps:$4 sm:$0xff]   ;;  %v12082_v2 = vld [vmem:[#allocation16 + $0x1ec] ss:$16 sps:$4 sm:$0xff]  }
 0x3a3   :  { %3563 = vmatprep.subr.bf16.mxu0 %v12058_v10  ;;  %v12085_v10 = vld [vmem:[#allocation16 + $0x1e0] ss:$16 sps:$4 sm:$0xff]  }
 0x3a5   :  { %3523 = vmatpush1.bf16.msra.mxu1 %v12061_v1  ;;  %v12089_v1 = vld [vmem:[#allocation16 + $0x1e8] ss:$16 sps:$4 sm:$0xff]  }
 0x3a6   :  { %3564 = vmatpush1.bf16.msra.mxu0 %v12065_v9  ;;  %3524 = vmatprep.subr.bf16.mxu1 %v12067_v0 }
 0x3a7   :  { %3565 = vmatprep.subr.bf16.mxu0 %v12070_v8 }
 0x3a9   :  { %3525 = vmatpush1.bf16.msra.mxu1 %v12073_v42 }
 0x3aa   :  { %3566 = vmatpush1.bf16.msra.mxu0 %v12077_v3  ;;  %3526 = vmatprep.subr.bf16.mxu1 %v12079_v11 }
 0x3ab   :  { %3567 = vmatprep.subr.bf16.mxu0 %v12082_v2 }
 0x3ad   :  { %3527 = vmatpush1.bf16.msra.mxu1 %v12085_v10 }
 0x3ae   :  { %3568 = vmatpush1.bf16.msra.mxu0 %v12089_v1  ;;  %4013 = vmatprep.subr.bf16.mxu1 %v11886_v50  ;;  %v12116_v50 = vld [vmem:[%s14530_s7] sm:$0xff] }
 0x3af   :  { %4054 = vmatprep.subr.bf16.mxu0 %v11888_v51 }
 0x3b0   :  { %3529 = vmatmul.mubr.bf16.vlgmr.msra.gmra.mrb[48].mxu1 %v14793_v6 }
 0x3b1   :  { %3570 = vmatmul.mubr.bf16.vlgmr.msra.gmra.mrb[56].mxu0 %v14793_v6  ;;  %4014 = vmatpush1.bf16.msra.mxu1 %v11890_v30 }
 0x3b2   :  { %4055 = vmatpush1.bf16.msra.mxu0 %v11893_v31  ;;  %4015 = vmatprep.subr.bf16.mxu1 %v11896_v35  ;;  %v12126_v31 = vrot.slane %v12116_v50, %v11675_v43  ;;  %v12130_v35 = vrot.slane %v12116_v50, %v11678_v44  ;;  %v12583_v44 = vld [vmem:[#allocation16 + $0xe8] ss:$16 sps:$4 sm:$0xff]   ;;  %v12589_v43 = vld [vmem:[#allocation16 + $0x104] ss:$16 sps:$4 sm:$0xff]  }
 0x3b3   :  { %4056 = vmatprep.subr.bf16.mxu0 %v11899_v25 }
 0x3b5   :  { %4016 = vmatpush1.bf16.msra.mxu1 %v11905_v23 }
 0x3b6   :  { %4057 = vmatpush1.bf16.msra.mxu0 %v11909_v16  ;;  %4017 = vmatprep.subr.bf16.mxu1 %v11911_v54  ;;  %v12140_v16 = vrot.slane %v12116_v50, %v11681_v46  ;;  %v12144_v54 = vrot.slane %v12116_v50, %v11684_v47 }
 0x3b7   :  { %4058 = vmatprep.subr.bf16.mxu0 %v11914_v7 }
 0x3b9   :  { %4018 = vmatpush1.bf16.msra.mxu1 %v11917_v40 }
 0x3ba   :  { %4059 = vmatpush1.bf16.msra.mxu0 %v11921_v63  ;;  %4019 = vmatprep.subr.bf16.mxu1 %v11923_v18 }
 0x3bb   :  { %4060 = vmatprep.subr.bf16.mxu0 %v11927_v22 }
 0x3bd   :  { %4020 = vmatpush1.bf16.msra.mxu1 %v11933_v36 }
 0x3be   :  { %4061 = vmatpush1.bf16.msra.mxu0 %v11937_v59  ;;  %4021 = vmatprep.subr.bf16.mxu1 %v11939_v19 }
 0x3bf   :  { %4062 = vmatprep.subr.bf16.mxu0 %v11942_v24 }
 0x3c1   :  { %v12119_v51 = vpop.f32.mrb[16].mxu1  ;;  %v12121_v30 = vpop.f32.mrb[24].mxu0  ;;  %4022 = vmatpush1.bf16.msra.mxu1 %v11945_v39 }
 0x3c2   :  { %v12132_v25 = vpop.f32.mrb[17].mxu1  ;;  %v12134_v23 = vpop.f32.mrb[25].mxu0  ;;  %4063 = vmatpush1.bf16.msra.mxu0 %v11949_v27  ;;  %4023 = vmatprep.subr.bf16.mxu1 %v11951_v28 }
 0x3c3   :  { %v2556_v7 = vpop.f32.mrb[18].mxu1  ;;  %v2702_v40 = vpop.f32.mrb[26].mxu0  ;;  %4064 = vmatprep.subr.bf16.mxu0 %v11955_v56 }
 0x3c4   :  { %v12148_v63 = vadd.f32 %v2556_v7, %v12126_v31  ;;  %v12151_v18 = vadd.f32 %v2702_v40, %v12130_v35  ;;  %v2558_v22 = vpop.f32.mrb[19].mxu1  ;;  %v2704_v36 = vpop.f32.mrb[27].mxu0 }
 0x3c5   :  { %v12154_v59 = vadd.f32 %v2558_v22, %v12140_v16  ;;  %v12157_v19 = vadd.f32 %v2704_v36, %v12144_v54  ;;  %4024 = vmatpush1.bf16.msra.mxu1 %v11961_v57 }
 0x3c6   :  { %4065 = vmatpush1.bf16.msra.mxu0 %v11965_v32  ;;  %4025 = vmatprep.subr.bf16.mxu1 %v11967_v61 }
 0x3c7   :  { %4066 = vmatprep.subr.bf16.mxu0 %v11970_v41 }
 0x3c9   :  { %v2562_v24 = vpop.f32.mrb[20].mxu1  ;;  %v2708_v39 = vpop.f32.mrb[28].mxu0  ;;  %4026 = vmatpush1.bf16.msra.mxu1 %v11973_v45 }
 0x3ca   :  { %v12165_v27 = vadd.f32 %v2562_v24, %v12126_v31  ;;  %v12168_v28 = vadd.f32 %v2708_v39, %v12130_v35  ;;  %v2564_v56 = vpop.f32.mrb[21].mxu1  ;;  %v2710_v7 = vpop.f32.mrb[29].mxu0  ;;  %4067 = vmatpush1.bf16.msra.mxu0 %v11977_v17  ;;  %4027 = vmatprep.subr.bf16.mxu1 %v11979_v15 }
 0x3cb   :  { %v12173_v57 = vadd.f32 %v2564_v56, %v12140_v16  ;;  %v12176_v32 = vadd.f32 %v2710_v7, %v12144_v54  ;;  %v2566_v61 = vpop.f32.mrb[22].mxu1  ;;  %v2712_v41 = vpop.f32.mrb[30].mxu0  ;;  %4068 = vmatprep.subr.bf16.mxu0 %v11983_v38 }
 0x3cc   :  { %v12180_v45 = vadd.f32 %v2566_v61, %v12126_v31  ;;  %v12183_v40 = vadd.f32 %v2712_v41, %v12130_v35  ;;  %v2568_v22 = vpop.f32.mrb[23].mxu1  ;;  %v2714_v17 = vpop.f32.mrb[31].mxu0 }
 0x3cd   :  { %v12186_v15 = vadd.f32 %v2568_v22, %v12140_v16  ;;  %v12189_v36 = vadd.f32 %v2714_v17, %v12144_v54  ;;  %4028 = vmatpush1.bf16.msra.mxu1 %v11988_v58 }
 0x3ce   :  { %4069 = vmatpush1.bf16.msra.mxu0 %v11993_v62  ;;  %4029 = vmatprep.subr.bf16.mxu1 %v11995_v34 }
 0x3cf   :  { %4070 = vmatprep.subr.bf16.mxu0 %v11998_v33 }
 0x3d1   :  { %v2572_v38 = vpop.f32.mrb[24].mxu1  ;;  %v2718_v24 = vpop.f32.mrb[32].mxu0  ;;  %4030 = vmatpush1.bf16.msra.mxu1 %v12001_v26 }
 0x3d2   :  { %v12197_v39 = vadd.f32 %v2572_v38, %v12126_v31  ;;  %v12200_v56 = vadd.f32 %v2718_v24, %v12130_v35  ;;  %v2574_v7 = vpop.f32.mrb[25].mxu1  ;;  %v2720_v61 = vpop.f32.mrb[33].mxu0  ;;  %4071 = vmatpush1.bf16.msra.mxu0 %v12005_v48  ;;  %4031 = vmatprep.subr.bf16.mxu1 %v12007_v53 }
 0x3d3   :  { %v12205_v58 = vadd.f32 %v2574_v7, %v12140_v16  ;;  %v12208_v62 = vadd.f32 %v2720_v61, %v12144_v54  ;;  %v2576_v34 = vpop.f32.mrb[26].mxu1  ;;  %v2722_v33 = vpop.f32.mrb[34].mxu0  ;;  %4072 = vmatprep.subr.bf16.mxu0 %v12010_v37 }
 0x3d4   :  { %v12212_v26 = vadd.f32 %v2576_v34, %v12126_v31  ;;  %v12215_v41 = vadd.f32 %v2722_v33, %v12130_v35  ;;  %v2578_v22 = vpop.f32.mrb[27].mxu1  ;;  %v2724_v48 = vpop.f32.mrb[35].mxu0 }
 0x3d5   :  { %v12218_v53 = vadd.f32 %v2578_v22, %v12140_v16  ;;  %v12221_v17 = vadd.f32 %v2724_v48, %v12144_v54  ;;  %4032 = vmatpush1.bf16.msra.mxu1 %v12013_v29 }
 0x3d6   :  { %4073 = vmatpush1.bf16.msra.mxu0 %v12017_v60  ;;  %4033 = vmatprep.subr.bf16.mxu1 %v12019_v52 }
 0x3d7   :  { %4074 = vmatprep.subr.bf16.mxu0 %v12022_v49 }
 0x3d9   :  { %v2582_v37 = vpop.f32.mrb[28].mxu1  ;;  %v2728_v38 = vpop.f32.mrb[36].mxu0  ;;  %4034 = vmatpush1.bf16.msra.mxu1 %v12025_v55 }
 0x3da   :  { %v12229_v24 = vadd.f32 %v2582_v37, %v12126_v31  ;;  %v12232_v7 = vadd.f32 %v2728_v38, %v12130_v35  ;;  %v2584_v61 = vpop.f32.mrb[29].mxu1  ;;  %v2730_v34 = vpop.f32.mrb[37].mxu0  ;;  %4075 = vmatpush1.bf16.msra.mxu0 %v12029_v21  ;;  %4035 = vmatprep.subr.bf16.mxu1 %v12031_v20  ;;  %v14799_v37 = vld [vmem:[#allocation60_spill] sm:$0xff]  ;;  %v14801_v38 = vld [vmem:[#allocation62_spill] sm:$0xff] }
 0x3db   :  { %v12237_v29 = vadd.f32 %v2584_v61, %v12140_v16  ;;  %v12240_v60 = vadd.f32 %v2730_v34, %v12144_v54  ;;  %v2586_v52 = vpop.f32.mrb[30].mxu1  ;;  %v2732_v49 = vpop.f32.mrb[38].mxu0  ;;  %4076 = vmatprep.subr.bf16.mxu0 %v12034_v14  ;;  %v14800_v14 = vld [vmem:[#allocation61_spill] sm:$0xff]  ;;  %v14802_v61 = vld [vmem:[#allocation63_spill] sm:$0xff]  ;;  %v14803_v34 = vld [vmem:[#allocation64_spill] sm:$0xff] }
 0x3dc   :  { %v10189_v55 = vadd.f32 %v2586_v52, %v12126_v31  ;;  %v10205_v33 = vadd.f32 %v2732_v49, %v12130_v35  ;;  %v2588_v22 = vpop.f32.mrb[31].mxu1  ;;  %v2734_v48 = vpop.f32.mrb[39].mxu0 }
 0x3dd   :  { %v10190_v21 = vadd.f32 %v2588_v22, %v12140_v16  ;;  %v10206_v20 = vadd.f32 %v2734_v48, %v12144_v54  ;;  %4036 = vmatpush1.bf16.msra.mxu1 %v12037_v5  ;;  %v12267_v5 = vld [vmem:[#allocation16 + $0xc] ss:$16 sps:$4 sm:$0xff]  }
 0x3de   :  { %4077 = vmatpush1.bf16.msra.mxu0 %v12041_v13  ;;  %4037 = vmatprep.subr.bf16.mxu1 %v12043_v4  ;;  %v12265_v4 = vld [vmem:[#allocation16 + $0x4] ss:$16 sps:$4 sm:$0xff]   ;;  %14805 = vst [vmem:[#allocation61_spill] sm:$0xff] %v12267_v5 }
 0x3df   :  { %4078 = vmatprep.subr.bf16.mxu0 %v12046_v12  ;;  %14804 = vst [vmem:[#allocation60_spill] sm:$0xff] %v12265_v4 }
 0x3e1   :  { %4038 = vmatpush1.bf16.msra.mxu1 %v14799_v37 }
 0x3e2   :  { %4079 = vmatpush1.bf16.msra.mxu0 %v14800_v14  ;;  %4039 = vmatprep.subr.bf16.mxu1 %v14801_v38 }
 0x3e3   :  { %4080 = vmatprep.subr.bf16.mxu0 %v14802_v61 }
 0x3e5   :  { %4040 = vmatpush1.bf16.msra.mxu1 %v14803_v34 }
 0x3e6   :  { %4081 = vmatpush1.bf16.msra.mxu0 %v12065_v9  ;;  %4041 = vmatprep.subr.bf16.mxu1 %v12067_v0  ;;  %v14806_v0 = vld [vmem:[#allocation55_spill] sm:$0xff] }
 0x3e7   :  { %4082 = vmatprep.subr.bf16.mxu0 %v12070_v8  ;;  %v14561_v8 = vsub.s32 4, %v14806_v0  ;;  %v14559_v9 = vsub.s32 5, %v14806_v0  ;;  %vm3095_vm2 = vcmp.lt.s32.totalorder %v14806_v0, 4 }
 0x3e8   :  { %vm12488_vm3 = vmpackc.low %vm3095_vm2, %vm3095_vm2 }
 0x3e9   :  { %4042 = vmatpush1.bf16.msra.mxu1 %v12073_v42 }
 0x3ea   :  { %4083 = vmatpush1.bf16.msra.mxu0 %v12077_v3  ;;  %4043 = vmatprep.subr.bf16.mxu1 %v12079_v11  ;;  %v14560_v3 = vsub.s32 6, %v14806_v0  ;;  %v12288_v11 = vrot.slane %v12116_v50, %v14559_v9 }
 0x3eb   :  { %4084 = vmatprep.subr.bf16.mxu0 %v12082_v2  ;;  %v14558_v2 = vsub.s32 7, %v14806_v0  ;;  %v12581_v0 = vld [vmem:[#allocation16 + $0xe0] ss:$16 sps:$4 sm:$0xff]  }
 0x3ed   :  { %4044 = vmatpush1.bf16.msra.mxu1 %v12085_v10  ;;  %v12283_v10 = vrot.slane %v12116_v50, %v14560_v3  ;;  %v12293_v12 = vrot.slane %v12116_v50, %v14558_v2 }
 0x3ee   :  { %4085 = vmatpush1.bf16.msra.mxu0 %v12089_v1  ;;  %4529 = vmatprep.subr.bf16.mxu1 %v12265_v4  ;;  %v12278_v1 = vrot.slane %v12116_v50, %v14561_v8 }
 0x3ef   :  { %4570 = vmatprep.subr.bf16.mxu0 %v12267_v5 }
 0x442   :  { %v2844_v13 = vpop.f32.mrb[32].mxu1 }
 0x443   :  { %v10207_v42 = vadd.f32 %v2844_v13, %v12278_v1  ;;  %v2990_v52 = vpop.f32.mrb[40].mxu0  ;;  %v2846_v49 = vpop.f32.mrb[33].mxu1 }
 0x444   :  { %v10223_v22 = vadd.f32 %v2990_v52, %v12283_v10  ;;  %v10208_v48 = vadd.f32 %v2846_v49, %v12288_v11  ;;  %v2992_v37 = vpop.f32.mrb[41].mxu0  ;;  %v2848_v14 = vpop.f32.mrb[34].mxu1 }
 0x445   :  { %v6714_v38 = vrot.slane %v10207_v42, 4  ;;  %v10224_v61 = vadd.f32 %v2992_v37, %v12293_v12  ;;  %v10209_v34 = vadd.f32 %v2848_v14, %v12278_v1  ;;  %v2994_v50 = vpop.f32.mrb[42].mxu0  ;;  %v2850_v2 = vpop.f32.mrb[35].mxu1 }
 0x446   :  { %v6716_v9 = vrot.slane %v10223_v22, 4  ;;  %v6715_v3 = vrot.slane %v10208_v48, 4  ;;  %v10225_v13 = vadd.f32 %v2994_v50, %v12283_v10  ;;  %v10210_v8 = vadd.f32 %v2850_v2, %v12288_v11  ;;  %v2996_v52 = vpop.f32.mrb[43].mxu0 }
 0x447   :  { %v6717_v6 = vrot.slane %v10224_v61, 4  ;;  %v6198_v49 = vrot.slane %v10209_v34, 4  ;;  %v10226_v47 = vadd.f32 %v2996_v52, %v12293_v12  ;;  %v12306_v42 = vsel %vm3095_vm2, %v10189_v55, %v6714_v38 }
 0x448   :  { %14807 = vst [vmem:[#allocation62_spill] sm:$0xff] %v12306_v42  ;;  %v6200_v37 = vrot.slane %v10225_v13, 4  ;;  %v6199_v46 = vrot.slane %v10210_v8, 4  ;;  %v12310_v14 = vsel %vm3095_vm2, %v10205_v33, %v6716_v9  ;;  %v12314_v22 = vsel %vm3095_vm2, %v10190_v21, %v6715_v3  ;;  %v12603_v42 = vld [vmem:[#allocation16 + $0x12c] ss:$16 sps:$4 sm:$0xff]  }
 0x449   :  { %14808 = vst [vmem:[#allocation63_spill] sm:$0xff] %v12310_v14  ;;  %14809 = vst [vmem:[#allocation64_spill] sm:$0xff] %v12314_v22  ;;  %v6201_v2 = vrot.slane %v10226_v47, 4  ;;  %v12319_v48 = vsel %vm3095_vm2, %v12229_v24, %v6198_v49  ;;  %v12323_v55 = vsel %vm3095_vm2, %v10206_v20, %v6717_v6  ;;  %v12595_v22 = vld [vmem:[#allocation16 + $0x108] ss:$16 sps:$4 sm:$0xff]  }
 0x44a   :  { %14810 = vst [vmem:[#allocation65_spill] sm:$0xff] %v12319_v48  ;;  %14811 = vst [vmem:[#allocation66_spill] sm:$0xff] %v12323_v55  ;;  %v2854_v38 = vpop.f32.mrb[36].mxu1  ;;  %v12328_v33 = vsel %vm3095_vm2, %v12232_v7, %v6200_v37  ;;  %v12333_v21 = vsel %vm3095_vm2, %v12237_v29, %v6199_v46  ;;  %v12593_v55 = vld [vmem:[#allocation16 + $0x100] ss:$16 sps:$4 sm:$0xff]  }
 0x44b   :  { %14812 = vst [vmem:[#allocation67_spill] sm:$0xff] %v12328_v33  ;;  %14813 = vst [vmem:[#allocation68_spill] sm:$0xff] %v12333_v21  ;;  %v10211_v47 = vadd.f32 %v2854_v38, %v12278_v1  ;;  %v3000_v8 = vpop.f32.mrb[44].mxu0  ;;  %v2856_v24 = vpop.f32.mrb[37].mxu1  ;;  %v12339_v6 = vsel %vm3095_vm2, %v12240_v60, %v6201_v2  ;;  %v12601_v14 = vld [vmem:[#allocation16 + $0x124] ss:$16 sps:$4 sm:$0xff]  }
 0x44c   :  { %14814 = vst [vmem:[#allocation69_spill] sm:$0xff] %v12339_v6  ;;  %v10227_v20 = vadd.f32 %v3000_v8, %v12283_v10  ;;  %v10212_v3 = vadd.f32 %v2856_v24, %v12288_v11  ;;  %v3002_v7 = vpop.f32.mrb[45].mxu0  ;;  %v2858_v9 = vpop.f32.mrb[38].mxu1  ;;  %v12605_v6 = vld [vmem:[#allocation16 + $0x120] ss:$16 sps:$4 sm:$0xff]  }
 0x44d   :  { %v5682_v61 = vrot.slane %v10211_v47, 4  ;;  %v10228_v34 = vadd.f32 %v3002_v7, %v12293_v12  ;;  %v10213_v46 = vadd.f32 %v2858_v9, %v12278_v1  ;;  %v3004_v29 = vpop.f32.mrb[46].mxu0  ;;  %v2860_v50 = vpop.f32.mrb[39].mxu1  ;;  %v12607_v21 = vld [vmem:[#allocation16 + $0x128] ss:$16 sps:$4 sm:$0xff]  }
 0x44e   :  { %v5684_v13 = vrot.slane %v10227_v20, 4  ;;  %v5683_v52 = vrot.slane %v10212_v3, 4  ;;  %v10229_v49 = vadd.f32 %v3004_v29, %v12283_v10  ;;  %v10214_v60 = vadd.f32 %v2860_v50, %v12288_v11  ;;  %v3006_v37 = vpop.f32.mrb[47].mxu0  ;;  %v12613_v33 = vld [vmem:[#allocation16 + $0x144] ss:$16 sps:$4 sm:$0xff]  }
 0x44f   :  { %v5685_v2 = vrot.slane %v10228_v34, 4  ;;  %v5166_v38 = vrot.slane %v10213_v46, 4  ;;  %v10230_v8 = vadd.f32 %v3006_v37, %v12293_v12  ;;  %v12351_v47 = vsel %vm3095_vm2, %v12212_v26, %v5682_v61  ;;  %v12615_v48 = vld [vmem:[#allocation16 + $0x14c] ss:$16 sps:$4 sm:$0xff]  }
 0x450   :  { %14815 = vst [vmem:[#allocation70_spill] sm:$0xff] %v12351_v47  ;;  %v5168_v24 = vrot.slane %v10229_v49, 4  ;;  %v5167_v7 = vrot.slane %v10214_v60, 4  ;;  %v12356_v20 = vsel %vm3095_vm2, %v12215_v41, %v5684_v13  ;;  %v12361_v3 = vsel %vm3095_vm2, %v12218_v53, %v5683_v52  ;;  %v12627_v47 = vld [vmem:[#allocation16 + $0x16c] ss:$16 sps:$4 sm:$0xff]  }
 0x451   :  { %14816 = vst [vmem:[#allocation71_spill] sm:$0xff] %v12356_v20  ;;  %14817 = vst [vmem:[#allocation72_spill] sm:$0xff] %v12361_v3  ;;  %v5169_v9 = vrot.slane %v10230_v8, 4  ;;  %v12366_v34 = vsel %vm3095_vm2, %v12197_v39, %v5166_v38  ;;  %v12371_v26 = vsel %vm3095_vm2, %v12221_v17, %v5685_v2  ;;  %v12619_v3 = vld [vmem:[#allocation16 + $0x148] ss:$16 sps:$4 sm:$0xff]  }
 0x452   :  { %14818 = vst [vmem:[#allocation73_spill] sm:$0xff] %v12366_v34  ;;  %14819 = vst [vmem:[#allocation74_spill] sm:$0xff] %v12371_v26  ;;  %v2864_v61 = vpop.f32.mrb[40].mxu1  ;;  %v12376_v41 = vsel %vm3095_vm2, %v12200_v56, %v5168_v24  ;;  %v12381_v53 = vsel %vm3095_vm2, %v12205_v58, %v5167_v7  ;;  %v12617_v26 = vld [vmem:[#allocation16 + $0x140] ss:$16 sps:$4 sm:$0xff]  }
 0x453   :  { %14820 = vst [vmem:[#allocation75_spill] sm:$0xff] %v12376_v41  ;;  %14821 = vst [vmem:[#allocation76_spill] sm:$0xff] %v12381_v53  ;;  %v10215_v46 = vadd.f32 %v2864_v61, %v12278_v1  ;;  %v3010_v39 = vpop.f32.mrb[48].mxu0  ;;  %v2866_v29 = vpop.f32.mrb[41].mxu1  ;;  %v12387_v17 = vsel %vm3095_vm2, %v12208_v62, %v5169_v9  ;;  %v12625_v20 = vld [vmem:[#allocation16 + $0x164] ss:$16 sps:$4 sm:$0xff]  }
 0x454   :  { %14822 = vst [vmem:[#allocation77_spill] sm:$0xff] %v12387_v17  ;;  %v10231_v50 = vadd.f32 %v3010_v39, %v12283_v10  ;;  %v10216_v13 = vadd.f32 %v2866_v29, %v12288_v11  ;;  %v3012_v56 = vpop.f32.mrb[49].mxu0  ;;  %v2868_v52 = vpop.f32.mrb[42].mxu1  ;;  %14835 = vst [vmem:[#allocation88_spill] sm:$0xff] %v12619_v3  ;;  %v12629_v17 = vld [vmem:[#allocation16 + $0x160] ss:$16 sps:$4 sm:$0xff]  }
 0x455   :  { %v4650_v49 = vrot.slane %v10215_v46, 4  ;;  %v10232_v60 = vadd.f32 %v3012_v56, %v12293_v12  ;;  %v10217_v58 = vadd.f32 %v2868_v52, %v12278_v1  ;;  %v3014_v37 = vpop.f32.mrb[50].mxu0  ;;  %v2870_v2 = vpop.f32.mrb[43].mxu1  ;;  %14836 = vst [vmem:[#allocation89_spill] sm:$0xff] %v12625_v20  ;;  %14837 = vst [vmem:[#allocation90_spill] sm:$0xff] %v12627_v47 }
 0x456   :  { %v4652_v38 = vrot.slane %v10231_v50, 4  ;;  %v4651_v8 = vrot.slane %v10216_v13, 4  ;;  %v10233_v24 = vadd.f32 %v3014_v37, %v12283_v10  ;;  %v10218_v62 = vadd.f32 %v2870_v2, %v12288_v11  ;;  %v3016_v7 = vpop.f32.mrb[51].mxu0  ;;  %14838 = vst [vmem:[#allocation91_spill] sm:$0xff] %v12629_v17  ;;  %v12631_v53 = vld [vmem:[#allocation16 + $0x168] ss:$16 sps:$4 sm:$0xff]  }
 0x457   :  { %v4653_v9 = vrot.slane %v10232_v60, 4  ;;  %v4134_v61 = vrot.slane %v10217_v58, 4  ;;  %v10234_v39 = vadd.f32 %v3016_v7, %v12293_v12  ;;  %v12399_v46 = vsel %vm3095_vm2, %v12180_v45, %v4650_v49  ;;  %14839 = vst [vmem:[#allocation92_spill] sm:$0xff] %v12631_v53  ;;  %v12635_v41 = vld [vmem:[#allocation16 + $0x184] ss:$16 sps:$4 sm:$0xff]  }
 0x458   :  { %14823 = vst [vmem:[#allocation78_spill] sm:$0xff] %v12399_v46  ;;  %v4136_v29 = vrot.slane %v10233_v24, 4  ;;  %v4135_v56 = vrot.slane %v10218_v62, 4  ;;  %v12404_v50 = vsel %vm3095_vm2, %v12183_v40, %v4652_v38  ;;  %v12409_v13 = vsel %vm3095_vm2, %v12186_v15, %v4651_v8  ;;  %14840 = vst [vmem:[#allocation93_spill] sm:$0xff] %v12635_v41  ;;  %v12639_v34 = vld [vmem:[#allocation16 + $0x180] ss:$16 sps:$4 sm:$0xff]  }
 0x459   :  { %14824 = vst [vmem:[#allocation79_spill] sm:$0xff] %v12404_v50  ;;  %14825 = vst [vmem:[#allocation80_spill] sm:$0xff] %v12409_v13  ;;  %v4137_v52 = vrot.slane %v10234_v39, 4  ;;  %v12414_v60 = vsel %vm3095_vm2, %v12165_v27, %v4134_v61  ;;  %v12419_v45 = vsel %vm3095_vm2, %v12189_v36, %v4653_v9  ;;  %v10175_v2 = vadd.f32 %v12119_v51, %v12126_v31  ;;  %v12643_v13 = vld [vmem:[#allocation16 + $0x18c] ss:$16 sps:$4 sm:$0xff]  }
 0x45a   :  { %14826 = vst [vmem:[#allocation81_spill] sm:$0xff] %v12414_v60  ;;  %14827 = vst [vmem:[#allocation82_spill] sm:$0xff] %v12419_v45  ;;  %v2874_v49 = vpop.f32.mrb[44].mxu1  ;;  %v12424_v40 = vsel %vm3095_vm2, %v12168_v28, %v4136_v29  ;;  %v12429_v15 = vsel %vm3095_vm2, %v12173_v57, %v4135_v56  ;;  %v10191_v28 = vadd.f32 %v12121_v30, %v12130_v35  ;;  %v12641_v45 = vld [vmem:[#allocation16 + $0x188] ss:$16 sps:$4 sm:$0xff]  }
 0x45b   :  { %14828 = vst [vmem:[#allocation83_spill] sm:$0xff] %v12424_v40  ;;  %14829 = vst [vmem:[#allocation84_spill] sm:$0xff] %v12429_v15  ;;  %v10219_v58 = vadd.f32 %v2874_v49, %v12278_v1  ;;  %v3020_v27 = vpop.f32.mrb[52].mxu0  ;;  %v2876_v37 = vpop.f32.mrb[45].mxu1  ;;  %v12435_v36 = vsel %vm3095_vm2, %v12176_v32, %v4137_v52  ;;  %v10176_v62 = vadd.f32 %v12132_v25, %v12140_v16  ;;  %v12646_v50 = vld [vmem:[#allocation16 + $0x1a4] ss:$16 sps:$4 sm:$0xff]  }
 0x45c   :  { %14830 = vst [vmem:[#allocation85_spill] sm:$0xff] %v12435_v36  ;;  %v10235_v38 = vadd.f32 %v3020_v27, %v12283_v10  ;;  %v10220_v57 = vadd.f32 %v2876_v37, %v12288_v11  ;;  %v3022_v8 = vpop.f32.mrb[53].mxu0  ;;  %v2878_v24 = vpop.f32.mrb[46].mxu1  ;;  %14841 = vst [vmem:[#allocation94_spill] sm:$0xff] %v12639_v34  ;;  %v12648_v46 = vld [vmem:[#allocation16 + $0x1ac] ss:$16 sps:$4 sm:$0xff]  }
 0x45d   :  { %v3617_v7 = vrot.slane %v10219_v58, 4  ;;  %v10236_v9 = vadd.f32 %v3022_v8, %v12293_v12  ;;  %v10221_v32 = vadd.f32 %v2878_v24, %v12278_v1  ;;  %v3024_v61 = vpop.f32.mrb[54].mxu0  ;;  %v2880_v39 = vpop.f32.mrb[47].mxu1  ;;  %14842 = vst [vmem:[#allocation95_spill] sm:$0xff] %v12641_v45  ;;  %14843 = vst [vmem:[#allocation96_spill] sm:$0xff] %v12643_v13 }
 0x45e   :  { %v3619_v51 = vrot.slane %v10235_v38, 4  ;;  %v3618_v31 = vrot.slane %v10220_v57, 4  ;;  %v10237_v30 = vadd.f32 %v3024_v61, %v12283_v10  ;;  %v10222_v35 = vadd.f32 %v2880_v39, %v12288_v11  ;;  %v3026_v29 = vpop.f32.mrb[55].mxu0  ;;  %14844 = vst [vmem:[#allocation97_spill] sm:$0xff] %v12646_v50  ;;  %14845 = vst [vmem:[#allocation98_spill] sm:$0xff] %v12648_v46 }
 0x45f   :  { %v3620_v56 = vrot.slane %v10236_v9, 4  ;;  %v3104_v52 = vrot.slane %v10221_v32, 4  ;;  %v10238_v49 = vadd.f32 %v3026_v29, %v12293_v12  ;;  %v12453_v25 = vsel %vm3095_vm2, %v12148_v63, %v3617_v7  ;;  %v12653_v36 = vld [vmem:[#allocation16 + $0x1a0] ss:$16 sps:$4 sm:$0xff]   ;;  %v12655_v15 = vld [vmem:[#allocation16 + $0x1a8] ss:$16 sps:$4 sm:$0xff]  }
 0x460   :  { %v3106_v16 = vrot.slane %v10237_v30, 4  ;;  %v3105_v1 = vrot.slane %v10222_v35, 4  ;;  %v12458_v58 = vsel %vm3095_vm2, %v12151_v18, %v3619_v51  ;;  %v12463_v10 = vsel %vm3095_vm2, %v12154_v59, %v3618_v31  ;;  %14846 = vst [vmem:[#allocation99_spill] sm:$0xff] %v12653_v36  ;;  %14847 = vst [vmem:[#allocation100_spill] sm:$0xff] %v12655_v15  ;;  %v12659_v40 = vld [vmem:[#allocation16 + $0x1c4] ss:$16 sps:$4 sm:$0xff]  }
 0x461   :  { %v10192_v11 = vadd.f32 %v12134_v23, %v12144_v54  ;;  %v3107_v12 = vrot.slane %v10238_v49, 4  ;;  %v3108_v63 = vsel %vm3095_vm2, %v10175_v2, %v3104_v52  ;;  %v12472_v27 = vsel %vm3095_vm2, %v12157_v19, %v3620_v56  ;;  %14848 = vst [vmem:[#allocation101_spill] sm:$0xff] %v12659_v40  ;;  %v12661_v60 = vld [vmem:[#allocation16 + $0x1cc] ss:$16 sps:$4 sm:$0xff]  }
 0x462   :  { %v3110_v18 = vsel %vm3095_vm2, %v10191_v28, %v3106_v16  ;;  %v3109_v37 = vsel %vm3095_vm2, %v10176_v62, %v3105_v1  ;;  %14849 = vst [vmem:[#allocation102_spill] sm:$0xff] %v12661_v60 }
 0x463   :  { %v3111_v59 = vsel %vm3095_vm2, %v10192_v11, %v3107_v12 }
 0x483   :  { %v3530_v38 = vpop.f32.mrb[48].mxu1 }
 0x484   :  { %v3578_v23 = vadd.f32 %v3530_v38, %v3108_v63  ;;  %v3571_v54 = vpop.f32.mrb[56].mxu0  ;;  %v3532_v57 = vpop.f32.mrb[49].mxu1  ;;  %v12579_v38 = vld [vmem:[#allocation16 + $0xec] ss:$16 sps:$4 sm:$0xff]  }
 0x485   :  { %v3580_v8 = vadd.f32 %v3571_v54, %v3110_v18  ;;  %v3579_v2 = vadd.f32 %v3532_v57, %v3109_v37  ;;  %v3573_v24 = vpop.f32.mrb[57].mxu0  ;;  %v3534_v7 = vpop.f32.mrb[50].mxu1  ;;  %v12495_v54 = vld [vmem:[#allocation16] ss:$16 sps:$4 sm:$0xff]   ;;  %v12497_v57 = vld [vmem:[#allocation16 + $0x8] ss:$16 sps:$4 sm:$0xff]  }
 0x486   :  { %v9577_v9 = vmul.f32 -1.442695, %v3578_v23  ;;  %v3581_v19 = vadd.f32 %v3573_v24, %v3111_v59  ;;  %v3535_v32 = vpop.f32.mrb[51].mxu1  ;;  %v3575_v61 = vpop.f32.mrb[58].mxu0  ;;  %v14832_v59 = vmov 0 }
 0x487   :  { %v9578_v39 = vmul.f32 -1.442695, %v3579_v2  ;;  %v3576_v28 = vpop.f32.mrb[59].mxu0  ;;  %v14833_v59 = vsel %vm12488_vm3, 4294967295, %v14832_v59  ;;  %v12503_v24 = vld [vmem:[#allocation16 + $0x24] ss:$16 sps:$4 sm:$0xff]  }
 0x488   :  { %10673 = vpow2.f32 %v9577_v9  ;;  %v9579_v62 = vmul.f32 -1.442695, %v3581_v19  ;;  %14834 = vst [vmem:[#allocation87_spill] sm:$0xff] %v14833_v59  ;;  %v12505_v7 = vld [vmem:[#allocation16 + $0x2c] ss:$16 sps:$4 sm:$0xff]  }
 0x489   :  { %10675 = vpow2.f32 %v9578_v39  ;;  %v12509_v9 = vld [vmem:[#allocation16 + $0x20] ss:$16 sps:$4 sm:$0xff]   ;;  %v12511_v19 = vld [vmem:[#allocation16 + $0x28] ss:$16 sps:$4 sm:$0xff]   ;;  %v12515_v32 = vld [vmem:[#allocation16 + $0x44] ss:$16 sps:$4 sm:$0xff]  }
 0x48a   :  { %10677 = vpow2.f32 %v9579_v62  ;;  %v12517_v61 = vld [vmem:[#allocation16 + $0x4c] ss:$16 sps:$4 sm:$0xff]   ;;  %v12521_v39 = vld [vmem:[#allocation16 + $0x40] ss:$16 sps:$4 sm:$0xff]   ;;  %v12523_v28 = vld [vmem:[#allocation16 + $0x48] ss:$16 sps:$4 sm:$0xff]  }
 0x48b   :  { %10679 = vtanh.f32 %v3580_v8  ;;  %v12527_v62 = vld [vmem:[#allocation16 + $0x64] ss:$16 sps:$4 sm:$0xff]  }
 0x492   :  { %v10674_v51 = vpop.eup %10673 }
 0x493   :  { %v10676_v31 = vpop.eup %10675  ;;  %v3585_v30 = vadd.f32 1.0, %v10674_v51  ;;  %v12529_v51 = vld [vmem:[#allocation16 + $0x6c] ss:$16 sps:$4 sm:$0xff]  }
 0x494   :  { %v3591_v35 = vadd.f32 1.0, %v10676_v31  ;;  %v10678_v29 = vpop.eup %10677  ;;  %v12533_v31 = vld [vmem:[#allocation16 + $0x60] ss:$16 sps:$4 sm:$0xff]  }
 0x495   :  { %10681 = vrcp.f32 %v3585_v30  ;;  %v10680_v56 = vpop.eup %10679  ;;  %v3598_v1 = vadd.f32 1.0, %v10678_v29  ;;  %v12535_v30 = vld [vmem:[#allocation16 + $0x68] ss:$16 sps:$4 sm:$0xff]   ;;  %v12543_v29 = vld [vmem:[#allocation16 + $0x8c] ss:$16 sps:$4 sm:$0xff]  }
 0x496   :  { %10683 = vrcp.f32 %v3591_v35  ;;  %v12541_v35 = vld [vmem:[#allocation16 + $0x84] ss:$16 sps:$4 sm:$0xff]  }
 0x497   :  { %10685 = vrcp.f32 %v3598_v1  ;;  %v12557_v1 = vld [vmem:[#allocation16 + $0xa0] ss:$16 sps:$4 sm:$0xff]  }
 0x49f   :  { %v10682_v52 = vpop.eup %10681 }
 0x4a0   :  { %v10684_v49 = vpop.eup %10683  ;;  %v3602_v16 = vmul.f32 %v10682_v52, %v10680_v56  ;;  %v12545_v56 = vld [vmem:[#allocation16 + $0x80] ss:$16 sps:$4 sm:$0xff]   ;;  %v12547_v52 = vld [vmem:[#allocation16 + $0x88] ss:$16 sps:$4 sm:$0xff]  }
 0x4a1   :  { %v3601_v11 = vmul.f32 0.0, %v10684_v49  ;;  %v10686_v63 = vpop.eup %10685  ;;  %v12553_v49 = vld [vmem:[#allocation16 + $0xa4] ss:$16 sps:$4 sm:$0xff]  }
 0x4a3   :  { %v12480_v12 = vadd.f32 %v3602_v16, %v3601_v11  ;;  %v12555_v16 = vld [vmem:[#allocation16 + $0xac] ss:$16 sps:$4 sm:$0xff]   ;;  %v12559_v11 = vld [vmem:[#allocation16 + $0xa8] ss:$16 sps:$4 sm:$0xff]  }
 0x4a5   :  { %10687 = vtanh.f32 %v12480_v12 }
 0x4af   :  { %v10688_v18 = vpop.eup %10687 }
 0x4b0   :  { %v12483_v37 = vmul.f32 %v10688_v18, %v10686_v63  ;;  %v12565_v63 = vld [vmem:[#allocation16 + $0xc4] ss:$16 sps:$4 sm:$0xff]   ;;  %v12567_v18 = vld [vmem:[#allocation16 + $0xcc] ss:$16 sps:$4 sm:$0xff]  }
 0x4b2   :  { %14831 = vst [vmem:[#allocation86_spill] sm:$0xff] %v12483_v37  ;;  %v3625_v23 = vpack.c.bf16 %v12483_v37, %v12483_v37  ;;  %v12591_v37 = vld [vmem:[#allocation16 + $0x10c] ss:$16 sps:$4 sm:$0xff]  }
 0x4b4   :  { %v3628_v8 = vsel %vm12488_vm3, 0, %v3625_v23  ;;  %v3627_v2 = vsel %vm12488_vm3, %v3625_v23, 0  ;;  %v12569_v23 = vld [vmem:[#allocation16 + $0xc0] ss:$16 sps:$4 sm:$0xff]  }
 0x4b5   :  { %4045 = vmatprep.mubr.bf16.mxu1 %v3628_v8  ;;  %4086 = vmatprep.mubr.bf16.mxu0 %v3628_v8  ;;  %v12571_v8 = vld [vmem:[#allocation16 + $0xc8] ss:$16 sps:$4 sm:$0xff]  }
 0x4b6   :  { %4046 = vmatmul.mubr.bf16.vlgmr.msra.gmra.mrb[52].mxu1 %v3627_v2  ;;  %4087 = vmatmul.mubr.bf16.vlgmr.msra.gmra.mrb[60].mxu0 %v3627_v2  ;;  %v12577_v2 = vld [vmem:[#allocation16 + $0xe4] ss:$16 sps:$4 sm:$0xff]  }
 0x4b7   :  { %4530 = vmatpush1.bf16.msra.mxu1 %v12495_v54  ;;  %4571 = vmatpush1.bf16.msra.mxu0 %v12497_v57 }
 0x4b8   :  { %4531 = vmatprep.subr.bf16.mxu1 %v12503_v24  ;;  %4572 = vmatprep.subr.bf16.mxu0 %v12505_v7 }
 0x4bb   :  { %4532 = vmatpush1.bf16.msra.mxu1 %v12509_v9  ;;  %4573 = vmatpush1.bf16.msra.mxu0 %v12511_v19 }
 0x4bc   :  { %4533 = vmatprep.subr.bf16.mxu1 %v12515_v32  ;;  %4574 = vmatprep.subr.bf16.mxu0 %v12517_v61 }
 0x4bf   :  { %4534 = vmatpush1.bf16.msra.mxu1 %v12521_v39  ;;  %4575 = vmatpush1.bf16.msra.mxu0 %v12523_v28 }
 0x4c0   :  { %4535 = vmatprep.subr.bf16.mxu1 %v12527_v62  ;;  %4576 = vmatprep.subr.bf16.mxu0 %v12529_v51 }
 0x4c3   :  { %4536 = vmatpush1.bf16.msra.mxu1 %v12533_v31  ;;  %4577 = vmatpush1.bf16.msra.mxu0 %v12535_v30 }
 0x4c4   :  { %4537 = vmatprep.subr.bf16.mxu1 %v12541_v35  ;;  %4578 = vmatprep.subr.bf16.mxu0 %v12543_v29 }
 0x4c7   :  { %4538 = vmatpush1.bf16.msra.mxu1 %v12545_v56  ;;  %4579 = vmatpush1.bf16.msra.mxu0 %v12547_v52 }
 0x4c8   :  { %4539 = vmatprep.subr.bf16.mxu1 %v12553_v49  ;;  %4580 = vmatprep.subr.bf16.mxu0 %v12555_v16 }
 0x4cb   :  { %4540 = vmatpush1.bf16.msra.mxu1 %v12557_v1  ;;  %4581 = vmatpush1.bf16.msra.mxu0 %v12559_v11 }
 0x4cc   :  { %4541 = vmatprep.subr.bf16.mxu1 %v12565_v63  ;;  %4582 = vmatprep.subr.bf16.mxu0 %v12567_v18 }
 0x4cf   :  { %4542 = vmatpush1.bf16.msra.mxu1 %v12569_v23  ;;  %4583 = vmatpush1.bf16.msra.mxu0 %v12571_v8 }
 0x4d0   :  { %4543 = vmatprep.subr.bf16.mxu1 %v12577_v2  ;;  %4584 = vmatprep.subr.bf16.mxu0 %v12579_v38 }
 0x4d3   :  { %4544 = vmatpush1.bf16.msra.mxu1 %v12581_v0  ;;  %4585 = vmatpush1.bf16.msra.mxu0 %v12583_v44 }
 0x4d4   :  { %4545 = vmatprep.subr.bf16.mxu1 %v12589_v43  ;;  %4586 = vmatprep.subr.bf16.mxu0 %v12591_v37 }
 0x4d7   :  { %4546 = vmatpush1.bf16.msra.mxu1 %v12593_v55  ;;  %4587 = vmatpush1.bf16.msra.mxu0 %v12595_v22 }
 0x4d8   :  { %4547 = vmatprep.subr.bf16.mxu1 %v12601_v14  ;;  %4588 = vmatprep.subr.bf16.mxu0 %v12603_v42 }
 0x4db   :  { %4548 = vmatpush1.bf16.msra.mxu1 %v12605_v6  ;;  %4589 = vmatpush1.bf16.msra.mxu0 %v12607_v21 }
 0x4dc   :  { %4549 = vmatprep.subr.bf16.mxu1 %v12613_v33  ;;  %4590 = vmatprep.subr.bf16.mxu0 %v12615_v48 }
 0x4df   :  { %4550 = vmatpush1.bf16.msra.mxu1 %v12617_v26  ;;  %4591 = vmatpush1.bf16.msra.mxu0 %v12619_v3 }
 0x4e0   :  { %4551 = vmatprep.subr.bf16.mxu1 %v12625_v20  ;;  %4592 = vmatprep.subr.bf16.mxu0 %v12627_v47 }
 0x4e3   :  { %4552 = vmatpush1.bf16.msra.mxu1 %v12629_v17  ;;  %4593 = vmatpush1.bf16.msra.mxu0 %v12631_v53 }
 0x4e4   :  { %4553 = vmatprep.subr.bf16.mxu1 %v12635_v41  ;;  %4594 = vmatprep.subr.bf16.mxu0 %v12643_v13  ;;  %v12665_v13 = vld [vmem:[#allocation16 + $0x1c0] ss:$16 sps:$4 sm:$0xff]  }
 0x4e5   :  { %14850 = vst [vmem:[#allocation103_spill] sm:$0xff] %v12665_v13 }
 0x4e7   :  { %4554 = vmatpush1.bf16.msra.mxu1 %v12639_v34  ;;  %4595 = vmatpush1.bf16.msra.mxu0 %v12641_v45  ;;  %v12667_v34 = vld [vmem:[#allocation16 + $0x1c8] ss:$16 sps:$4 sm:$0xff]   ;;  %v12671_v45 = vld [vmem:[#allocation16 + $0x1e4] ss:$16 sps:$4 sm:$0xff]  }
 0x4e8   :  { %4555 = vmatprep.subr.bf16.mxu1 %v12646_v50  ;;  %4596 = vmatprep.subr.bf16.mxu0 %v12648_v46  ;;  %14851 = vst [vmem:[#allocation104_spill] sm:$0xff] %v12667_v34  ;;  %14852 = vst [vmem:[#allocation105_spill] sm:$0xff] %v12671_v45  ;;  %v12673_v50 = vld [vmem:[#allocation16 + $0x1ec] ss:$16 sps:$4 sm:$0xff]   ;;  %v12677_v46 = vld [vmem:[#allocation16 + $0x1e0] ss:$16 sps:$4 sm:$0xff]  }
 0x4e9   :  { %14853 = vst [vmem:[#allocation106_spill] sm:$0xff] %v12673_v50  ;;  %14854 = vst [vmem:[#allocation107_spill] sm:$0xff] %v12677_v46 }
 0x4eb   :  { %4556 = vmatpush1.bf16.msra.mxu1 %v12653_v36  ;;  %4597 = vmatpush1.bf16.msra.mxu0 %v12655_v15  ;;  %v12679_v36 = vld [vmem:[#allocation16 + $0x1e8] ss:$16 sps:$4 sm:$0xff]  }
 0x4ec   :  { %4557 = vmatprep.subr.bf16.mxu1 %v12659_v40  ;;  %4598 = vmatprep.subr.bf16.mxu0 %v12661_v60  ;;  %14855 = vst [vmem:[#allocation108_spill] sm:$0xff] %v12679_v36 }
 0x4ef   :  { %4558 = vmatpush1.bf16.msra.mxu1 %v12665_v13  ;;  %4599 = vmatpush1.bf16.msra.mxu0 %v12667_v34 }
 0x4f0   :  { %4559 = vmatprep.subr.bf16.mxu1 %v12671_v45  ;;  %4600 = vmatprep.subr.bf16.mxu0 %v12673_v50 }
 0x4f3   :  { %4560 = vmatpush1.bf16.msra.mxu1 %v12677_v46  ;;  %4601 = vmatpush1.bf16.msra.mxu0 %v12679_v36 }
 0x4f4   :  { %5045 = vmatprep.subr.bf16.mxu1 %v12265_v4  ;;  %5086 = vmatprep.subr.bf16.mxu0 %v12267_v5 }
 0x589   :  { %v4047_v60 = vpop.f32.mrb[52].mxu1  ;;  %v4088_v13 = vpop.f32.mrb[60].mxu0 }
 0x58a   :  { %v4095_v34 = vadd.f32 %v4047_v60, %v12453_v25  ;;  %v4097_v40 = vadd.f32 %v4088_v13, %v12458_v58  ;;  %v4049_v15 = vpop.f32.mrb[53].mxu1  ;;  %v4090_v41 = vpop.f32.mrb[61].mxu0  ;;  %v14858_v58 = vld [vmem:[#allocation89_spill] sm:$0xff] }
 0x58b   :  { %v4096_v45 = vadd.f32 %v4049_v15, %v12463_v10  ;;  %v4098_v50 = vadd.f32 %v4090_v41, %v12472_v27  ;;  %v4051_v53 = vpop.f32.mrb[54].mxu1  ;;  %v4092_v46 = vpop.f32.mrb[62].mxu0  ;;  %v14859_v10 = vld [vmem:[#allocation90_spill] sm:$0xff]  ;;  %v14860_v27 = vld [vmem:[#allocation91_spill] sm:$0xff] }
 0x58c   :  { %v9644_v17 = vmul.f32 -1.442695, %v4095_v34  ;;  %v4052_v36 = vpop.f32.mrb[55].mxu1  ;;  %v4093_v47 = vpop.f32.mrb[63].mxu0 }
 0x58d   :  { %v9645_v4 = vmul.f32 -1.442695, %v4096_v45  ;;  %v9646_v5 = vmul.f32 -1.442695, %v4098_v50  ;;  %v14857_v36 = vld [vmem:[#allocation88_spill] sm:$0xff] }
 0x58e   :  { %10689 = vpow2.f32 %v9644_v17 }
 0x58f   :  { %10691 = vpow2.f32 %v9645_v4 }
 0x590   :  { %10693 = vpow2.f32 %v9646_v5 }
 0x591   :  { %10695 = vtanh.f32 %v4097_v40 }
 0x598   :  { %v10690_v20 = vpop.eup %10689 }
 0x599   :  { %v10692_v3 = vpop.eup %10691  ;;  %v4102_v60 = vadd.f32 1.0, %v10690_v20 }
 0x59a   :  { %v4108_v13 = vadd.f32 1.0, %v10692_v3  ;;  %v10694_v15 = vpop.eup %10693  ;;  %v14876_v3 = vld [vmem:[#allocation107_spill] sm:$0xff] }
 0x59b   :  { %10697 = vrcp.f32 %v4102_v60  ;;  %v10696_v25 = vpop.eup %10695  ;;  %v4115_v34 = vadd.f32 1.0, %v10694_v15  ;;  %v14862_v60 = vld [vmem:[#allocation93_spill] sm:$0xff]  ;;  %v14864_v15 = vld [vmem:[#allocation94_spill] sm:$0xff] }
 0x59c   :  { %10699 = vrcp.f32 %v4108_v13  ;;  %v14863_v13 = vld [vmem:[#allocation96_spill] sm:$0xff] }
 0x59d   :  { %10701 = vrcp.f32 %v4115_v34  ;;  %v14869_v34 = vld [vmem:[#allocation100_spill] sm:$0xff] }
 0x5a5   :  { %v10698_v41 = vpop.eup %10697 }
 0x5a6   :  { %v10700_v53 = vpop.eup %10699  ;;  %v4119_v46 = vmul.f32 %v10698_v41, %v10696_v25  ;;  %v14865_v25 = vld [vmem:[#allocation95_spill] sm:$0xff]  ;;  %v14866_v41 = vld [vmem:[#allocation97_spill] sm:$0xff] }
 0x5a7   :  { %v4118_v47 = vmul.f32 %v10700_v53, %v12480_v12  ;;  %v10702_v4 = vpop.eup %10701  ;;  %v14861_v12 = vld [vmem:[#allocation92_spill] sm:$0xff]  ;;  %v14867_v53 = vld [vmem:[#allocation98_spill] sm:$0xff] }
 0x5a9   :  { %v12692_v45 = vadd.f32 %v4119_v46, %v4118_v47  ;;  %v14868_v46 = vld [vmem:[#allocation99_spill] sm:$0xff]  ;;  %v14870_v47 = vld [vmem:[#allocation101_spill] sm:$0xff] }
 0x5ab   :  { %10703 = vtanh.f32 %v12692_v45 }
 0x5b5   :  { %v10704_v20 = vpop.eup %10703 }
 0x5b6   :  { %v12695_v5 = vmul.f32 %v10704_v20, %v10702_v4  ;;  %v14871_v4 = vld [vmem:[#allocation102_spill] sm:$0xff]  ;;  %v14872_v20 = vld [vmem:[#allocation103_spill] sm:$0xff] }
 0x5b8   :  { %14856 = vst [vmem:[#allocation109_spill] sm:$0xff] %v12695_v5  ;;  %v4142_v17 = vpack.c.bf16 %v12695_v5, %v12695_v5  ;;  %v14877_v5 = vld [vmem:[#allocation108_spill] sm:$0xff] }
 0x5ba   :  { %v4144_v50 = vsel %vm12488_vm3, 0, %v4142_v17  ;;  %v4143_v40 = vsel %vm12488_vm3, %v4142_v17, 0  ;;  %v14873_v17 = vld [vmem:[#allocation104_spill] sm:$0xff] }
 0x5bb   :  { %4561 = vmatprep.mubr.bf16.mxu1 %v4144_v50  ;;  %4602 = vmatprep.mubr.bf16.mxu0 %v4144_v50  ;;  %v14874_v50 = vld [vmem:[#allocation105_spill] sm:$0xff] }
 0x5bc   :  { %4562 = vmatmul.mubr.bf16.vlgmr.msra.gmra.mrb[56].mxu1 %v4143_v40  ;;  %4603 = vmatmul.mubr.bf16.vlgmr.msra.gmra.mrb[64].mxu0 %v4143_v40  ;;  %v14875_v40 = vld [vmem:[#allocation106_spill] sm:$0xff] }
 0x5bd   :  { %5046 = vmatpush1.bf16.msra.mxu1 %v12495_v54  ;;  %5087 = vmatpush1.bf16.msra.mxu0 %v12497_v57 }
 0x5be   :  { %5047 = vmatprep.subr.bf16.mxu1 %v12503_v24  ;;  %5088 = vmatprep.subr.bf16.mxu0 %v12505_v7 }
 0x5c1   :  { %5048 = vmatpush1.bf16.msra.mxu1 %v12509_v9  ;;  %5089 = vmatpush1.bf16.msra.mxu0 %v12511_v19 }
 0x5c2   :  { %5049 = vmatprep.subr.bf16.mxu1 %v12515_v32  ;;  %5090 = vmatprep.subr.bf16.mxu0 %v12517_v61 }
 0x5c5   :  { %5050 = vmatpush1.bf16.msra.mxu1 %v12521_v39  ;;  %5091 = vmatpush1.bf16.msra.mxu0 %v12523_v28 }
 0x5c6   :  { %5051 = vmatprep.subr.bf16.mxu1 %v12527_v62  ;;  %5092 = vmatprep.subr.bf16.mxu0 %v12529_v51 }
 0x5c9   :  { %5052 = vmatpush1.bf16.msra.mxu1 %v12533_v31  ;;  %5093 = vmatpush1.bf16.msra.mxu0 %v12535_v30 }
 0x5ca   :  { %5053 = vmatprep.subr.bf16.mxu1 %v12541_v35  ;;  %5094 = vmatprep.subr.bf16.mxu0 %v12543_v29 }
 0x5cd   :  { %5054 = vmatpush1.bf16.msra.mxu1 %v12545_v56  ;;  %5095 = vmatpush1.bf16.msra.mxu0 %v12547_v52 }
 0x5ce   :  { %5055 = vmatprep.subr.bf16.mxu1 %v12553_v49  ;;  %5096 = vmatprep.subr.bf16.mxu0 %v12555_v16 }
 0x5d1   :  { %5056 = vmatpush1.bf16.msra.mxu1 %v12557_v1  ;;  %5097 = vmatpush1.bf16.msra.mxu0 %v12559_v11 }
 0x5d2   :  { %5057 = vmatprep.subr.bf16.mxu1 %v12565_v63  ;;  %5098 = vmatprep.subr.bf16.mxu0 %v12567_v18 }
 0x5d5   :  { %5058 = vmatpush1.bf16.msra.mxu1 %v12569_v23  ;;  %5099 = vmatpush1.bf16.msra.mxu0 %v12571_v8 }
 0x5d6   :  { %5059 = vmatprep.subr.bf16.mxu1 %v12577_v2  ;;  %5100 = vmatprep.subr.bf16.mxu0 %v12579_v38 }
 0x5d9   :  { %5060 = vmatpush1.bf16.msra.mxu1 %v12581_v0  ;;  %5101 = vmatpush1.bf16.msra.mxu0 %v12583_v44 }
 0x5da   :  { %5061 = vmatprep.subr.bf16.mxu1 %v12589_v43  ;;  %5102 = vmatprep.subr.bf16.mxu0 %v12591_v37 }
 0x5dd   :  { %5062 = vmatpush1.bf16.msra.mxu1 %v12593_v55  ;;  %5103 = vmatpush1.bf16.msra.mxu0 %v12595_v22 }
 0x5de   :  { %5063 = vmatprep.subr.bf16.mxu1 %v12601_v14  ;;  %5104 = vmatprep.subr.bf16.mxu0 %v12603_v42 }
 0x5e1   :  { %5064 = vmatpush1.bf16.msra.mxu1 %v12605_v6  ;;  %5105 = vmatpush1.bf16.msra.mxu0 %v12607_v21 }
 0x5e2   :  { %5065 = vmatprep.subr.bf16.mxu1 %v12613_v33  ;;  %5106 = vmatprep.subr.bf16.mxu0 %v12615_v48 }
 0x5e5   :  { %5066 = vmatpush1.bf16.msra.mxu1 %v12617_v26  ;;  %5107 = vmatpush1.bf16.msra.mxu0 %v14857_v36 }
 0x5e6   :  { %5067 = vmatprep.subr.bf16.mxu1 %v14858_v58  ;;  %5108 = vmatprep.subr.bf16.mxu0 %v14859_v10 }
 0x5e9   :  { %5068 = vmatpush1.bf16.msra.mxu1 %v14860_v27  ;;  %5109 = vmatpush1.bf16.msra.mxu0 %v14861_v12 }
 0x5ea   :  { %5069 = vmatprep.subr.bf16.mxu1 %v14862_v60  ;;  %5110 = vmatprep.subr.bf16.mxu0 %v14863_v13  ;;  %v14882_v13 = vld [vmem:[#allocation84_spill] sm:$0xff]  ;;  %v14883_v60 = vld [vmem:[#allocation85_spill] sm:$0xff] }
 0x5ed   :  { %5070 = vmatpush1.bf16.msra.mxu1 %v14864_v15  ;;  %5111 = vmatpush1.bf16.msra.mxu0 %v14865_v25  ;;  %v14881_v25 = vld [vmem:[#allocation83_spill] sm:$0xff] }
 0x5ee   :  { %5071 = vmatprep.subr.bf16.mxu1 %v14866_v41  ;;  %5112 = vmatprep.subr.bf16.mxu0 %v14867_v53  ;;  %v14878_v53 = vld [vmem:[#allocation60_spill] sm:$0xff]  ;;  %v14880_v41 = vld [vmem:[#allocation81_spill] sm:$0xff] }
 0x5f1   :  { %5072 = vmatpush1.bf16.msra.mxu1 %v14868_v46  ;;  %5113 = vmatpush1.bf16.msra.mxu0 %v14869_v34  ;;  %v14879_v46 = vld [vmem:[#allocation61_spill] sm:$0xff] }
 0x5f2   :  { %5073 = vmatprep.subr.bf16.mxu1 %v14870_v47  ;;  %5114 = vmatprep.subr.bf16.mxu0 %v14871_v4 }
 0x5f5   :  { %5074 = vmatpush1.bf16.msra.mxu1 %v14872_v20  ;;  %5115 = vmatpush1.bf16.msra.mxu0 %v14873_v17 }
 0x5f6   :  { %5075 = vmatprep.subr.bf16.mxu1 %v14874_v50  ;;  %5116 = vmatprep.subr.bf16.mxu0 %v14875_v40 }
 0x5f9   :  { %5076 = vmatpush1.bf16.msra.mxu1 %v14876_v3  ;;  %5117 = vmatpush1.bf16.msra.mxu0 %v14877_v5 }
 0x5fa   :  { %5561 = vmatprep.subr.bf16.mxu1 %v14878_v53  ;;  %5602 = vmatprep.subr.bf16.mxu0 %v14879_v46 }
 0x68f   :  { %v4563_v34 = vpop.f32.mrb[56].mxu1  ;;  %v4604_v47 = vpop.f32.mrb[64].mxu0 }
 0x690   :  { %v4611_v4 = vadd.f32 %v4563_v34, %v14880_v41  ;;  %v4613_v20 = vadd.f32 %v4604_v47, %v14881_v25  ;;  %v4565_v15 = vpop.f32.mrb[57].mxu1  ;;  %v4606_v17 = vpop.f32.mrb[65].mxu0 }
 0x691   :  { %v4612_v50 = vadd.f32 %v4565_v15, %v14882_v13  ;;  %v4614_v40 = vadd.f32 %v4606_v17, %v14883_v60  ;;  %v4567_v12 = vpop.f32.mrb[58].mxu1  ;;  %v4608_v3 = vpop.f32.mrb[66].mxu0 }
 0x692   :  { %v9711_v27 = vmul.f32 -1.442695, %v4611_v4  ;;  %v4568_v5 = vpop.f32.mrb[59].mxu1  ;;  %v4609_v10 = vpop.f32.mrb[67].mxu0 }
 0x693   :  { %v9712_v53 = vmul.f32 -1.442695, %v4612_v50  ;;  %v9713_v46 = vmul.f32 -1.442695, %v4614_v40 }
 0x694   :  { %10705 = vpow2.f32 %v9711_v27 }
 0x695   :  { %10707 = vpow2.f32 %v9712_v53 }
 0x696   :  { %10709 = vpow2.f32 %v9713_v46 }
 0x697   :  { %10711 = vtanh.f32 %v4613_v20 }
 0x69e   :  { %v10706_v58 = vpop.eup %10705 }
 0x69f   :  { %v10708_v36 = vpop.eup %10707  ;;  %v4618_v41 = vadd.f32 1.0, %v10706_v58 }
 0x6a0   :  { %v4624_v25 = vadd.f32 1.0, %v10708_v36  ;;  %v10710_v13 = vpop.eup %10709  ;;  %v13036_v36 = vld [vmem:[#allocation16 + $0x1c0] ss:$16 sps:$4 sm:$0xff]  }
 0x6a1   :  { %10713 = vrcp.f32 %v4618_v41  ;;  %v10712_v15 = vpop.eup %10711  ;;  %v4631_v34 = vadd.f32 1.0, %v10710_v13 }
 0x6a2   :  { %10715 = vrcp.f32 %v4624_v25 }
 0x6a3   :  { %10717 = vrcp.f32 %v4631_v34 }
 0x6ab   :  { %v10714_v60 = vpop.eup %10713 }
 0x6ac   :  { %v10716_v12 = vpop.eup %10715  ;;  %v4635_v3 = vmul.f32 %v10714_v60, %v10712_v15 }
 0x6ad   :  { %v4634_v5 = vmul.f32 %v10716_v12, %v12692_v45  ;;  %v10718_v27 = vpop.eup %10717 }
 0x6af   :  { %v12773_v10 = vadd.f32 %v4635_v3, %v4634_v5 }
 0x6b1   :  { %10719 = vtanh.f32 %v12773_v10 }
 0x6bb   :  { %v10720_v58 = vpop.eup %10719 }
 0x6bc   :  { %v12776_v47 = vmul.f32 %v10720_v58, %v10718_v27 }
 0x6be   :  { %14884 = vst [vmem:[#allocation60_spill] sm:$0xff] %v12776_v47  ;;  %v4658_v4 = vpack.c.bf16 %v12776_v47, %v12776_v47  ;;  %v13044_v47 = vld [vmem:[#allocation16 + $0x1ec] ss:$16 sps:$4 sm:$0xff]  }
 0x6c0   :  { %v4660_v20 = vsel %vm12488_vm3, 0, %v4658_v4  ;;  %v4659_v45 = vsel %vm12488_vm3, %v4658_v4, 0  ;;  %v13038_v4 = vld [vmem:[#allocation16 + $0x1c8] ss:$16 sps:$4 sm:$0xff]  }
 0x6c1   :  { %5077 = vmatprep.mubr.bf16.mxu1 %v4660_v20  ;;  %5118 = vmatprep.mubr.bf16.mxu0 %v4660_v20 }
 0x6c2   :  { %5078 = vmatmul.mubr.bf16.vlgmr.msra.gmra.mrb[60].mxu1 %v4659_v45  ;;  %5119 = vmatmul.mubr.bf16.vlgmr.msra.gmra.mrb[68].mxu0 %v4659_v45  ;;  %v12866_v45 = vld [vmem:[#allocation16] ss:$16 sps:$4 sm:$0xff]  }
 0x6c3   :  { %5562 = vmatpush1.bf16.msra.mxu1 %v12495_v54  ;;  %5603 = vmatpush1.bf16.msra.mxu0 %v12497_v57  ;;  %v14899_v54 = vld [vmem:[#allocation102_spill] sm:$0xff]  ;;  %v14900_v57 = vld [vmem:[#allocation103_spill] sm:$0xff] }
 0x6c4   :  { %5563 = vmatprep.subr.bf16.mxu1 %v12503_v24  ;;  %5604 = vmatprep.subr.bf16.mxu0 %v12505_v7  ;;  %v14901_v24 = vld [vmem:[#allocation104_spill] sm:$0xff]  ;;  %v14902_v7 = vld [vmem:[#allocation105_spill] sm:$0xff]  ;;  %14929 = vst [vmem:[#allocation102_spill] sm:$0xff] %v13038_v4 }
 0x6c5   :  { %14931 = vst [vmem:[#allocation104_spill] sm:$0xff] %v13044_v47 }
 0x6c7   :  { %5564 = vmatpush1.bf16.msra.mxu1 %v12509_v9  ;;  %5605 = vmatpush1.bf16.msra.mxu0 %v12511_v19  ;;  %v14903_v9 = vld [vmem:[#allocation106_spill] sm:$0xff]  ;;  %v14904_v19 = vld [vmem:[#allocation107_spill] sm:$0xff] }
 0x6c8   :  { %5565 = vmatprep.subr.bf16.mxu1 %v12515_v32  ;;  %5606 = vmatprep.subr.bf16.mxu0 %v12517_v61  ;;  %v14905_v32 = vld [vmem:[#allocation108_spill] sm:$0xff] }
 0x6c9   :  { %v12847_v61 = vld [vmem:[#allocation16 + $0x4] ss:$16 sps:$4 sm:$0xff]  }
 0x6ca   :  { %14906 = vst [vmem:[#allocation61_spill] sm:$0xff] %v12847_v61 }
 0x6cb   :  { %5566 = vmatpush1.bf16.msra.mxu1 %v12521_v39  ;;  %5607 = vmatpush1.bf16.msra.mxu0 %v12523_v28  ;;  %v12849_v39 = vld [vmem:[#allocation16 + $0xc] ss:$16 sps:$4 sm:$0xff]  }
 0x6cc   :  { %5567 = vmatprep.subr.bf16.mxu1 %v12527_v62  ;;  %5608 = vmatprep.subr.bf16.mxu0 %v12529_v51  ;;  %14907 = vst [vmem:[#allocation81_spill] sm:$0xff] %v12849_v39  ;;  %v14908_v51 = vld [vmem:[#allocation78_spill] sm:$0xff] }
 0x6cf   :  { %5568 = vmatpush1.bf16.msra.mxu1 %v12533_v31  ;;  %5609 = vmatpush1.bf16.msra.mxu0 %v12535_v30  ;;  %v14909_v30 = vld [vmem:[#allocation79_spill] sm:$0xff] }
 0x6d0   :  { %5569 = vmatprep.subr.bf16.mxu1 %v12541_v35  ;;  %5610 = vmatprep.subr.bf16.mxu0 %v12543_v29 }
 0x6d3   :  { %5570 = vmatpush1.bf16.msra.mxu1 %v12545_v56  ;;  %5611 = vmatpush1.bf16.msra.mxu0 %v12547_v52  ;;  %v14910_v52 = vld [vmem:[#allocation80_spill] sm:$0xff] }
 0x6d4   :  { %5571 = vmatprep.subr.bf16.mxu1 %v12553_v49  ;;  %5612 = vmatprep.subr.bf16.mxu0 %v12555_v16  ;;  %v14911_v16 = vld [vmem:[#allocation82_spill] sm:$0xff] }
 0x6d7   :  { %5572 = vmatpush1.bf16.msra.mxu1 %v12557_v1  ;;  %5613 = vmatpush1.bf16.msra.mxu0 %v12559_v11 }
 0x6d8   :  { %5573 = vmatprep.subr.bf16.mxu1 %v12565_v63  ;;  %5614 = vmatprep.subr.bf16.mxu0 %v12567_v18 }
 0x6db   :  { %5574 = vmatpush1.bf16.msra.mxu1 %v12569_v23  ;;  %5615 = vmatpush1.bf16.msra.mxu0 %v12571_v8 }
 0x6dc   :  { %5575 = vmatprep.subr.bf16.mxu1 %v12577_v2  ;;  %5616 = vmatprep.subr.bf16.mxu0 %v12579_v38  ;;  %v14898_v38 = vld [vmem:[#allocation101_spill] sm:$0xff] }
 0x6dd   :  { %14928 = vst [vmem:[#allocation101_spill] sm:$0xff] %v13036_v36 }
 0x6df   :  { %5576 = vmatpush1.bf16.msra.mxu1 %v12581_v0  ;;  %5617 = vmatpush1.bf16.msra.mxu0 %v12583_v44  ;;  %v14886_v44 = vld [vmem:[#allocation89_spill] sm:$0xff]  ;;  %v14887_v0 = vld [vmem:[#allocation90_spill] sm:$0xff] }
 0x6e0   :  { %5577 = vmatprep.subr.bf16.mxu1 %v12589_v43  ;;  %5618 = vmatprep.subr.bf16.mxu0 %v12591_v37  ;;  %v14885_v43 = vld [vmem:[#allocation88_spill] sm:$0xff] }
 0x6e1   :  { %v14897_v37 = vld [vmem:[#allocation100_spill] sm:$0xff] }
 0x6e3   :  { %5578 = vmatpush1.bf16.msra.mxu1 %v12593_v55  ;;  %5619 = vmatpush1.bf16.msra.mxu0 %v12595_v22  ;;  %v14888_v22 = vld [vmem:[#allocation91_spill] sm:$0xff]  ;;  %v14891_v55 = vld [vmem:[#allocation96_spill] sm:$0xff] }
 0x6e4   :  { %5579 = vmatprep.subr.bf16.mxu1 %v12601_v14  ;;  %5620 = vmatprep.subr.bf16.mxu0 %v12603_v42  ;;  %v14889_v14 = vld [vmem:[#allocation92_spill] sm:$0xff]  ;;  %v14890_v42 = vld [vmem:[#allocation93_spill] sm:$0xff] }
 0x6e7   :  { %5580 = vmatpush1.bf16.msra.mxu1 %v12605_v6  ;;  %5621 = vmatpush1.bf16.msra.mxu0 %v12607_v21  ;;  %v14892_v21 = vld [vmem:[#allocation94_spill] sm:$0xff] }
 0x6e8   :  { %5581 = vmatprep.subr.bf16.mxu1 %v12613_v33  ;;  %5622 = vmatprep.subr.bf16.mxu0 %v12615_v48  ;;  %v14893_v33 = vld [vmem:[#allocation95_spill] sm:$0xff]  ;;  %v14894_v48 = vld [vmem:[#allocation97_spill] sm:$0xff]  ;;  %v14895_v6 = vld [vmem:[#allocation98_spill] sm:$0xff] }
 0x6eb   :  { %5582 = vmatpush1.bf16.msra.mxu1 %v12617_v26  ;;  %5623 = vmatpush1.bf16.msra.mxu0 %v14885_v43  ;;  %v14896_v26 = vld [vmem:[#allocation99_spill] sm:$0xff] }
 0x6ec   :  { %5583 = vmatprep.subr.bf16.mxu1 %v14886_v44  ;;  %5624 = vmatprep.subr.bf16.mxu0 %v14887_v0  ;;  %v12868_v43 = vld [vmem:[#allocation16 + $0x8] ss:$16 sps:$4 sm:$0xff]   ;;  %v12874_v0 = vld [vmem:[#allocation16 + $0x24] ss:$16 sps:$4 sm:$0xff]  }
 0x6ef   :  { %5584 = vmatpush1.bf16.msra.mxu1 %v14888_v22  ;;  %5625 = vmatpush1.bf16.msra.mxu0 %v14889_v14  ;;  %v12876_v22 = vld [vmem:[#allocation16 + $0x2c] ss:$16 sps:$4 sm:$0xff]   ;;  %v12880_v14 = vld [vmem:[#allocation16 + $0x20] ss:$16 sps:$4 sm:$0xff]  }
 0x6f0   :  { %5585 = vmatprep.subr.bf16.mxu1 %v14890_v42  ;;  %5626 = vmatprep.subr.bf16.mxu0 %v14891_v55  ;;  %v12882_v42 = vld [vmem:[#allocation16 + $0x28] ss:$16 sps:$4 sm:$0xff]   ;;  %v12886_v55 = vld [vmem:[#allocation16 + $0x44] ss:$16 sps:$4 sm:$0xff]  }
 0x6f3   :  { %5586 = vmatpush1.bf16.msra.mxu1 %v14892_v21  ;;  %5627 = vmatpush1.bf16.msra.mxu0 %v14893_v33  ;;  %v12888_v21 = vld [vmem:[#allocation16 + $0x4c] ss:$16 sps:$4 sm:$0xff]   ;;  %v12892_v33 = vld [vmem:[#allocation16 + $0x40] ss:$16 sps:$4 sm:$0xff]  }
 0x6f4   :  { %5587 = vmatprep.subr.bf16.mxu1 %v14894_v48  ;;  %5628 = vmatprep.subr.bf16.mxu0 %v14895_v6  ;;  %v12894_v48 = vld [vmem:[#allocation16 + $0x48] ss:$16 sps:$4 sm:$0xff]   ;;  %v12898_v6 = vld [vmem:[#allocation16 + $0x64] ss:$16 sps:$4 sm:$0xff]  }
 0x6f7   :  { %5588 = vmatpush1.bf16.msra.mxu1 %v14896_v26  ;;  %5629 = vmatpush1.bf16.msra.mxu0 %v14897_v37  ;;  %v12900_v26 = vld [vmem:[#allocation16 + $0x6c] ss:$16 sps:$4 sm:$0xff]   ;;  %v12904_v37 = vld [vmem:[#allocation16 + $0x60] ss:$16 sps:$4 sm:$0xff]  }
 0x6f8   :  { %5589 = vmatprep.subr.bf16.mxu1 %v14898_v38  ;;  %5630 = vmatprep.subr.bf16.mxu0 %v14899_v54  ;;  %v12906_v38 = vld [vmem:[#allocation16 + $0x68] ss:$16 sps:$4 sm:$0xff]   ;;  %v12912_v54 = vld [vmem:[#allocation16 + $0x84] ss:$16 sps:$4 sm:$0xff]  }
 0x6fb   :  { %5590 = vmatpush1.bf16.msra.mxu1 %v14900_v57  ;;  %5631 = vmatpush1.bf16.msra.mxu0 %v14901_v24  ;;  %v12914_v57 = vld [vmem:[#allocation16 + $0x8c] ss:$16 sps:$4 sm:$0xff]   ;;  %v12916_v24 = vld [vmem:[#allocation16 + $0x80] ss:$16 sps:$4 sm:$0xff]  }
 0x6fc   :  { %5591 = vmatprep.subr.bf16.mxu1 %v14902_v7  ;;  %5632 = vmatprep.subr.bf16.mxu0 %v14903_v9  ;;  %v12918_v7 = vld [vmem:[#allocation16 + $0x88] ss:$16 sps:$4 sm:$0xff]   ;;  %v12924_v9 = vld [vmem:[#allocation16 + $0xa4] ss:$16 sps:$4 sm:$0xff]  }
 0x6ff   :  { %5592 = vmatpush1.bf16.msra.mxu1 %v14904_v19  ;;  %5633 = vmatpush1.bf16.msra.mxu0 %v14905_v32  ;;  %v12926_v19 = vld [vmem:[#allocation16 + $0xac] ss:$16 sps:$4 sm:$0xff]   ;;  %v12928_v32 = vld [vmem:[#allocation16 + $0xa0] ss:$16 sps:$4 sm:$0xff]  }
 0x700   :  { %6077 = vmatprep.subr.bf16.mxu1 %v12847_v61  ;;  %6118 = vmatprep.subr.bf16.mxu0 %v12849_v39 }
 0x795   :  { %v5079_v28 = vpop.f32.mrb[60].mxu1  ;;  %v5120_v62 = vpop.f32.mrb[68].mxu0 }
 0x796   :  { %v5127_v31 = vadd.f32 %v5079_v28, %v14908_v51  ;;  %v5129_v35 = vadd.f32 %v5120_v62, %v14909_v30  ;;  %v5081_v29 = vpop.f32.mrb[61].mxu1  ;;  %v5122_v56 = vpop.f32.mrb[69].mxu0  ;;  %v12930_v28 = vld [vmem:[#allocation16 + $0xa8] ss:$16 sps:$4 sm:$0xff]   ;;  %v12936_v62 = vld [vmem:[#allocation16 + $0xc4] ss:$16 sps:$4 sm:$0xff]  }
 0x797   :  { %v5128_v49 = vadd.f32 %v5081_v29, %v14910_v52  ;;  %v5130_v1 = vadd.f32 %v5122_v56, %v14911_v16  ;;  %v5083_v11 = vpop.f32.mrb[62].mxu1  ;;  %v5124_v63 = vpop.f32.mrb[70].mxu0  ;;  %v12938_v51 = vld [vmem:[#allocation16 + $0xcc] ss:$16 sps:$4 sm:$0xff]   ;;  %v12942_v30 = vld [vmem:[#allocation16 + $0xc8] ss:$16 sps:$4 sm:$0xff]  }
 0x798   :  { %v9778_v18 = vmul.f32 -1.442695, %v5127_v31  ;;  %v5084_v23 = vpop.f32.mrb[63].mxu1  ;;  %v5125_v8 = vpop.f32.mrb[71].mxu0  ;;  %v12940_v31 = vld [vmem:[#allocation16 + $0xc0] ss:$16 sps:$4 sm:$0xff]  }
 0x799   :  { %v9779_v2 = vmul.f32 -1.442695, %v5128_v49  ;;  %v9780_v17 = vmul.f32 -1.442695, %v5130_v1  ;;  %v12950_v29 = vld [vmem:[#allocation16 + $0xec] ss:$16 sps:$4 sm:$0xff]  }
 0x79a   :  { %10721 = vpow2.f32 %v9778_v18  ;;  %v12952_v56 = vld [vmem:[#allocation16 + $0xe0] ss:$16 sps:$4 sm:$0xff]   ;;  %v12954_v52 = vld [vmem:[#allocation16 + $0xe8] ss:$16 sps:$4 sm:$0xff]   ;;  %v12960_v49 = vld [vmem:[#allocation16 + $0x104] ss:$16 sps:$4 sm:$0xff]  }
 0x79b   :  { %10723 = vpow2.f32 %v9779_v2  ;;  %v12962_v16 = vld [vmem:[#allocation16 + $0x10c] ss:$16 sps:$4 sm:$0xff]   ;;  %v12964_v1 = vld [vmem:[#allocation16 + $0x100] ss:$16 sps:$4 sm:$0xff]   ;;  %v12966_v11 = vld [vmem:[#allocation16 + $0x108] ss:$16 sps:$4 sm:$0xff]  }
 0x79c   :  { %10725 = vpow2.f32 %v9780_v17  ;;  %v12972_v63 = vld [vmem:[#allocation16 + $0x124] ss:$16 sps:$4 sm:$0xff]   ;;  %v12974_v18 = vld [vmem:[#allocation16 + $0x12c] ss:$16 sps:$4 sm:$0xff]   ;;  %v12976_v23 = vld [vmem:[#allocation16 + $0x120] ss:$16 sps:$4 sm:$0xff]  }
 0x79d   :  { %10727 = vtanh.f32 %v5129_v35  ;;  %v12948_v35 = vld [vmem:[#allocation16 + $0xe4] ss:$16 sps:$4 sm:$0xff]   ;;  %v12978_v8 = vld [vmem:[#allocation16 + $0x128] ss:$16 sps:$4 sm:$0xff]   ;;  %v12986_v17 = vld [vmem:[#allocation16 + $0x14c] ss:$16 sps:$4 sm:$0xff]  }
 0x79e   :  { %v12984_v2 = vld [vmem:[#allocation16 + $0x144] ss:$16 sps:$4 sm:$0xff]  }
 0x7a4   :  { %v10722_v50 = vpop.eup %10721 }
 0x7a5   :  { %v10724_v40 = vpop.eup %10723  ;;  %v5134_v53 = vadd.f32 1.0, %v10722_v50  ;;  %v12988_v50 = vld [vmem:[#allocation16 + $0x140] ss:$16 sps:$4 sm:$0xff]  }
 0x7a6   :  { %v5140_v46 = vadd.f32 1.0, %v10724_v40  ;;  %v10726_v41 = vpop.eup %10725  ;;  %v12990_v40 = vld [vmem:[#allocation16 + $0x148] ss:$16 sps:$4 sm:$0xff]  }
 0x7a7   :  { %10729 = vrcp.f32 %v5134_v53  ;;  %v10728_v25 = vpop.eup %10727  ;;  %v5147_v12 = vadd.f32 1.0, %v10726_v41  ;;  %14913 = vst [vmem:[#allocation84_spill] sm:$0xff] %v12990_v40  ;;  %v12996_v53 = vld [vmem:[#allocation16 + $0x164] ss:$16 sps:$4 sm:$0xff]   ;;  %v13000_v41 = vld [vmem:[#allocation16 + $0x160] ss:$16 sps:$4 sm:$0xff]  }
 0x7a8   :  { %10731 = vrcp.f32 %v5140_v46  ;;  %14914 = vst [vmem:[#allocation85_spill] sm:$0xff] %v12996_v53  ;;  %v12998_v46 = vld [vmem:[#allocation16 + $0x16c] ss:$16 sps:$4 sm:$0xff]   ;;  %14916 = vst [vmem:[#allocation89_spill] sm:$0xff] %v13000_v41 }
 0x7a9   :  { %10733 = vrcp.f32 %v5147_v12  ;;  %14915 = vst [vmem:[#allocation88_spill] sm:$0xff] %v12998_v46  ;;  %v13014_v12 = vld [vmem:[#allocation16 + $0x18c] ss:$16 sps:$4 sm:$0xff]  }
 0x7aa   :  { %14921 = vst [vmem:[#allocation96_spill] sm:$0xff] %v13014_v12 }
 0x7b1   :  { %v10730_v13 = vpop.eup %10729 }
 0x7b2   :  { %v10732_v15 = vpop.eup %10731  ;;  %v5151_v60 = vmul.f32 %v10730_v13, %v10728_v25  ;;  %v13002_v25 = vld [vmem:[#allocation16 + $0x168] ss:$16 sps:$4 sm:$0xff]   ;;  %v13006_v13 = vld [vmem:[#allocation16 + $0x184] ss:$16 sps:$4 sm:$0xff]  }
 0x7b3   :  { %v5150_v3 = vmul.f32 %v10732_v15, %v12773_v10  ;;  %v10734_v5 = vpop.eup %10733  ;;  %14917 = vst [vmem:[#allocation90_spill] sm:$0xff] %v13002_v25  ;;  %14918 = vst [vmem:[#allocation91_spill] sm:$0xff] %v13006_v13  ;;  %v13010_v15 = vld [vmem:[#allocation16 + $0x180] ss:$16 sps:$4 sm:$0xff]  }
 0x7b4   :  { %14919 = vst [vmem:[#allocation92_spill] sm:$0xff] %v13010_v15 }
 0x7b5   :  { %v12858_v34 = vadd.f32 %v5151_v60, %v5150_v3  ;;  %v13012_v60 = vld [vmem:[#allocation16 + $0x188] ss:$16 sps:$4 sm:$0xff]   ;;  %v13017_v3 = vld [vmem:[#allocation16 + $0x1a4] ss:$16 sps:$4 sm:$0xff]  }
 0x7b6   :  { %14920 = vst [vmem:[#allocation93_spill] sm:$0xff] %v13012_v60  ;;  %14922 = vst [vmem:[#allocation94_spill] sm:$0xff] %v13017_v3 }
 0x7b7   :  { %10735 = vtanh.f32 %v12858_v34 }
 0x7c1   :  { %v10736_v27 = vpop.eup %10735 }
 0x7c2   :  { %v12861_v58 = vmul.f32 %v10736_v27, %v10734_v5  ;;  %v13019_v5 = vld [vmem:[#allocation16 + $0x1ac] ss:$16 sps:$4 sm:$0xff]   ;;  %v13024_v27 = vld [vmem:[#allocation16 + $0x1a0] ss:$16 sps:$4 sm:$0xff]  }
 0x7c3   :  { %14923 = vst [vmem:[#allocation95_spill] sm:$0xff] %v13019_v5  ;;  %14924 = vst [vmem:[#allocation97_spill] sm:$0xff] %v13024_v27 }
 0x7c4   :  { %14912 = vst [vmem:[#allocation83_spill] sm:$0xff] %v12861_v58  ;;  %v5174_v20 = vpack.c.bf16 %v12861_v58, %v12861_v58  ;;  %v13042_v58 = vld [vmem:[#allocation16 + $0x1e4] ss:$16 sps:$4 sm:$0xff]  }
 0x7c5   :  { %14930 = vst [vmem:[#allocation103_spill] sm:$0xff] %v13042_v58 }
 0x7c6   :  { %v5176_v10 = vsel %vm12488_vm3, 0, %v5174_v20  ;;  %v5175_v44 = vsel %vm12488_vm3, %v5174_v20, 0  ;;  %v13026_v20 = vld [vmem:[#allocation16 + $0x1a8] ss:$16 sps:$4 sm:$0xff]  }
 0x7c7   :  { %5593 = vmatprep.mubr.bf16.mxu1 %v5176_v10  ;;  %5634 = vmatprep.mubr.bf16.mxu0 %v5176_v10  ;;  %14925 = vst [vmem:[#allocation98_spill] sm:$0xff] %v13026_v20  ;;  %v13030_v10 = vld [vmem:[#allocation16 + $0x1c4] ss:$16 sps:$4 sm:$0xff]  }
 0x7c8   :  { %5594 = vmatmul.mubr.bf16.vlgmr.msra.gmra.mrb[64].mxu1 %v5175_v44  ;;  %5635 = vmatmul.mubr.bf16.vlgmr.msra.gmra.mrb[72].mxu0 %v5175_v44  ;;  %14926 = vst [vmem:[#allocation99_spill] sm:$0xff] %v13030_v10  ;;  %v13032_v44 = vld [vmem:[#allocation16 + $0x1cc] ss:$16 sps:$4 sm:$0xff]  }
 0x7c9   :  { %6078 = vmatpush1.bf16.msra.mxu1 %v12866_v45  ;;  %6119 = vmatpush1.bf16.msra.mxu0 %v12868_v43  ;;  %14927 = vst [vmem:[#allocation100_spill] sm:$0xff] %v13032_v44 }
 0x7ca   :  { %6079 = vmatprep.subr.bf16.mxu1 %v12874_v0  ;;  %6120 = vmatprep.subr.bf16.mxu0 %v12876_v22 }
 0x7cd   :  { %6080 = vmatpush1.bf16.msra.mxu1 %v12880_v14  ;;  %6121 = vmatpush1.bf16.msra.mxu0 %v12882_v42 }
 0x7ce   :  { %6081 = vmatprep.subr.bf16.mxu1 %v12886_v55  ;;  %6122 = vmatprep.subr.bf16.mxu0 %v12888_v21 }
 0x7d1   :  { %6082 = vmatpush1.bf16.msra.mxu1 %v12892_v33  ;;  %6123 = vmatpush1.bf16.msra.mxu0 %v12894_v48 }
 0x7d2   :  { %6083 = vmatprep.subr.bf16.mxu1 %v12898_v6  ;;  %6124 = vmatprep.subr.bf16.mxu0 %v12900_v26 }
 0x7d5   :  { %6084 = vmatpush1.bf16.msra.mxu1 %v12904_v37  ;;  %6125 = vmatpush1.bf16.msra.mxu0 %v12906_v38 }
 0x7d6   :  { %6085 = vmatprep.subr.bf16.mxu1 %v12912_v54  ;;  %6126 = vmatprep.subr.bf16.mxu0 %v12914_v57 }
 0x7d9   :  { %6086 = vmatpush1.bf16.msra.mxu1 %v12916_v24  ;;  %6127 = vmatpush1.bf16.msra.mxu0 %v12918_v7 }
 0x7da   :  { %6087 = vmatprep.subr.bf16.mxu1 %v12924_v9  ;;  %6128 = vmatprep.subr.bf16.mxu0 %v12926_v19 }
 0x7dd   :  { %6088 = vmatpush1.bf16.msra.mxu1 %v12928_v32  ;;  %6129 = vmatpush1.bf16.msra.mxu0 %v12930_v28 }
 0x7de   :  { %6089 = vmatprep.subr.bf16.mxu1 %v12936_v62  ;;  %6130 = vmatprep.subr.bf16.mxu0 %v12938_v51 }
 0x7e1   :  { %6090 = vmatpush1.bf16.msra.mxu1 %v12940_v31  ;;  %6131 = vmatpush1.bf16.msra.mxu0 %v12942_v30 }
 0x7e2   :  { %6091 = vmatprep.subr.bf16.mxu1 %v12948_v35  ;;  %6132 = vmatprep.subr.bf16.mxu0 %v12950_v29 }
 0x7e5   :  { %6092 = vmatpush1.bf16.msra.mxu1 %v12952_v56  ;;  %6133 = vmatpush1.bf16.msra.mxu0 %v12954_v52 }
 0x7e6   :  { %6093 = vmatprep.subr.bf16.mxu1 %v12960_v49  ;;  %6134 = vmatprep.subr.bf16.mxu0 %v12962_v16 }
 0x7e9   :  { %6094 = vmatpush1.bf16.msra.mxu1 %v12964_v1  ;;  %6135 = vmatpush1.bf16.msra.mxu0 %v12966_v11 }
 0x7ea   :  { %6095 = vmatprep.subr.bf16.mxu1 %v12972_v63  ;;  %6136 = vmatprep.subr.bf16.mxu0 %v12974_v18 }
 0x7ed   :  { %6096 = vmatpush1.bf16.msra.mxu1 %v12976_v23  ;;  %6137 = vmatpush1.bf16.msra.mxu0 %v12978_v8 }
 0x7ee   :  { %6097 = vmatprep.subr.bf16.mxu1 %v12984_v2  ;;  %6138 = vmatprep.subr.bf16.mxu0 %v12986_v17 }
 0x7f1   :  { %6098 = vmatpush1.bf16.msra.mxu1 %v12988_v50  ;;  %6139 = vmatpush1.bf16.msra.mxu0 %v12990_v40 }
 0x7f2   :  { %6099 = vmatprep.subr.bf16.mxu1 %v12996_v53  ;;  %6140 = vmatprep.subr.bf16.mxu0 %v12998_v46 }
 0x7f5   :  { %6100 = vmatpush1.bf16.msra.mxu1 %v13000_v41  ;;  %6141 = vmatpush1.bf16.msra.mxu0 %v13002_v25 }
 0x7f6   :  { %6101 = vmatprep.subr.bf16.mxu1 %v13006_v13  ;;  %6142 = vmatprep.subr.bf16.mxu0 %v13014_v12  ;;  %v14936_v12 = vld [vmem:[#allocation76_spill] sm:$0xff]  ;;  %v14937_v13 = vld [vmem:[#allocation77_spill] sm:$0xff] }
 0x7f9   :  { %6102 = vmatpush1.bf16.msra.mxu1 %v13010_v15  ;;  %6143 = vmatpush1.bf16.msra.mxu0 %v13012_v60 }
 0x7fa   :  { %6103 = vmatprep.subr.bf16.mxu1 %v13017_v3  ;;  %6144 = vmatprep.subr.bf16.mxu0 %v13019_v5  ;;  %v13048_v5 = vld [vmem:[#allocation16 + $0x1e0] ss:$16 sps:$4 sm:$0xff]  }
 0x7fb   :  { %14932 = vst [vmem:[#allocation105_spill] sm:$0xff] %v13048_v5 }
 0x7fd   :  { %6104 = vmatpush1.bf16.msra.mxu1 %v13024_v27  ;;  %6145 = vmatpush1.bf16.msra.mxu0 %v13026_v20  ;;  %v13050_v27 = vld [vmem:[#allocation16 + $0x1e8] ss:$16 sps:$4 sm:$0xff]  }
 0x7fe   :  { %6105 = vmatprep.subr.bf16.mxu1 %v13030_v10  ;;  %6146 = vmatprep.subr.bf16.mxu0 %v13032_v44  ;;  %14933 = vst [vmem:[#allocation106_spill] sm:$0xff] %v13050_v27  ;;  %v14934_v10 = vld [vmem:[#allocation73_spill] sm:$0xff]  ;;  %v14935_v20 = vld [vmem:[#allocation75_spill] sm:$0xff] }
 0x801   :  { %6106 = vmatpush1.bf16.msra.mxu1 %v13036_v36  ;;  %6147 = vmatpush1.bf16.msra.mxu0 %v13038_v4 }
 0x802   :  { %6107 = vmatprep.subr.bf16.mxu1 %v13042_v58  ;;  %6148 = vmatprep.subr.bf16.mxu0 %v13044_v47 }
 0x805   :  { %6108 = vmatpush1.bf16.msra.mxu1 %v13048_v5  ;;  %6149 = vmatpush1.bf16.msra.mxu0 %v13050_v27 }
 0x806   :  { %6593 = vmatprep.subr.bf16.mxu1 %v12847_v61  ;;  %6634 = vmatprep.subr.bf16.mxu0 %v12849_v39 }
 0x89b   :  { %v5595_v44 = vpop.f32.mrb[64].mxu1  ;;  %v5636_v36 = vpop.f32.mrb[72].mxu0 }
 0x89c   :  { %v5643_v4 = vadd.f32 %v5595_v44, %v14934_v10  ;;  %v5645_v3 = vadd.f32 %v5636_v36, %v14935_v20  ;;  %v5597_v60 = vpop.f32.mrb[65].mxu1  ;;  %v5638_v15 = vpop.f32.mrb[73].mxu0  ;;  %v14942_v20 = vld [vmem:[#allocation89_spill] sm:$0xff]  ;;  %v14943_v44 = vld [vmem:[#allocation90_spill] sm:$0xff] }
 0x89d   :  { %v5644_v58 = vadd.f32 %v5597_v60, %v14936_v12  ;;  %v5646_v47 = vadd.f32 %v5638_v15, %v14937_v13  ;;  %v5599_v25 = vpop.f32.mrb[66].mxu1  ;;  %v5640_v5 = vpop.f32.mrb[74].mxu0 }
 0x89e   :  { %v9845_v41 = vmul.f32 -1.442695, %v5643_v4  ;;  %v5600_v27 = vpop.f32.mrb[67].mxu1  ;;  %v5641_v46 = vpop.f32.mrb[75].mxu0  ;;  %v14940_v5 = vld [vmem:[#allocation85_spill] sm:$0xff] }
 0x89f   :  { %v9846_v61 = vmul.f32 -1.442695, %v5644_v58  ;;  %v9847_v39 = vmul.f32 -1.442695, %v5646_v47  ;;  %v14941_v27 = vld [vmem:[#allocation88_spill] sm:$0xff] }
 0x8a0   :  { %10737 = vpow2.f32 %v9845_v41 }
 0x8a1   :  { %10739 = vpow2.f32 %v9846_v61 }
 0x8a2   :  { %10741 = vpow2.f32 %v9847_v39 }
 0x8a3   :  { %10743 = vtanh.f32 %v5645_v3  ;;  %v14939_v3 = vld [vmem:[#allocation84_spill] sm:$0xff] }
 0x8aa   :  { %v10738_v53 = vpop.eup %10737 }
 0x8ab   :  { %v10740_v40 = vpop.eup %10739  ;;  %v5650_v10 = vadd.f32 1.0, %v10738_v53 }
 0x8ac   :  { %v5656_v36 = vadd.f32 1.0, %v10740_v40  ;;  %v10742_v60 = vpop.eup %10741  ;;  %v14958_v40 = vld [vmem:[#allocation105_spill] sm:$0xff] }
 0x8ad   :  { %10745 = vrcp.f32 %v5650_v10  ;;  %v10744_v12 = vpop.eup %10743  ;;  %v5663_v4 = vadd.f32 1.0, %v10742_v60  ;;  %v14944_v10 = vld [vmem:[#allocation91_spill] sm:$0xff]  ;;  %v14946_v60 = vld [vmem:[#allocation92_spill] sm:$0xff] }
 0x8ae   :  { %10747 = vrcp.f32 %v5656_v36  ;;  %v14945_v36 = vld [vmem:[#allocation96_spill] sm:$0xff] }
 0x8af   :  { %10749 = vrcp.f32 %v5663_v4  ;;  %v14951_v4 = vld [vmem:[#allocation98_spill] sm:$0xff] }
 0x8b7   :  { %v10746_v13 = vpop.eup %10745 }
 0x8b8   :  { %v10748_v25 = vpop.eup %10747  ;;  %v5667_v15 = vmul.f32 %v10746_v13, %v10744_v12  ;;  %v14947_v12 = vld [vmem:[#allocation93_spill] sm:$0xff]  ;;  %v14948_v13 = vld [vmem:[#allocation94_spill] sm:$0xff] }
 0x8b9   :  { %v5666_v46 = vmul.f32 %v10748_v25, %v12858_v34  ;;  %v10750_v47 = vpop.eup %10749  ;;  %v14949_v25 = vld [vmem:[#allocation95_spill] sm:$0xff] }
 0x8bb   :  { %v13063_v58 = vadd.f32 %v5667_v15, %v5666_v46  ;;  %v14950_v15 = vld [vmem:[#allocation97_spill] sm:$0xff]  ;;  %v14952_v46 = vld [vmem:[#allocation99_spill] sm:$0xff] }
 0x8bd   :  { %10751 = vtanh.f32 %v13063_v58 }
 0x8c7   :  { %v10752_v61 = vpop.eup %10751 }
 0x8c8   :  { %v13066_v39 = vmul.f32 %v10752_v61, %v10750_v47  ;;  %v14953_v47 = vld [vmem:[#allocation100_spill] sm:$0xff]  ;;  %v14954_v61 = vld [vmem:[#allocation101_spill] sm:$0xff] }
 0x8ca   :  { %14938 = vst [vmem:[#allocation107_spill] sm:$0xff] %v13066_v39  ;;  %v5690_v53 = vpack.c.bf16 %v13066_v39, %v13066_v39  ;;  %v14959_v39 = vld [vmem:[#allocation106_spill] sm:$0xff] }
 0x8cc   :  { %v5692_v41 = vsel %vm12488_vm3, 0, %v5690_v53  ;;  %v5691_v34 = vsel %vm12488_vm3, %v5690_v53, 0  ;;  %v14955_v53 = vld [vmem:[#allocation102_spill] sm:$0xff] }
 0x8cd   :  { %6109 = vmatprep.mubr.bf16.mxu1 %v5692_v41  ;;  %6150 = vmatprep.mubr.bf16.mxu0 %v5692_v41  ;;  %v14956_v41 = vld [vmem:[#allocation103_spill] sm:$0xff] }
 0x8ce   :  { %6110 = vmatmul.mubr.bf16.vlgmr.msra.gmra.mrb[68].mxu1 %v5691_v34  ;;  %6151 = vmatmul.mubr.bf16.vlgmr.msra.gmra.mrb[76].mxu0 %v5691_v34  ;;  %v14957_v34 = vld [vmem:[#allocation104_spill] sm:$0xff] }
 0x8cf   :  { %6594 = vmatpush1.bf16.msra.mxu1 %v12866_v45  ;;  %6635 = vmatpush1.bf16.msra.mxu0 %v12868_v43 }
 0x8d0   :  { %6595 = vmatprep.subr.bf16.mxu1 %v12874_v0  ;;  %6636 = vmatprep.subr.bf16.mxu0 %v12876_v22 }
 0x8d3   :  { %6596 = vmatpush1.bf16.msra.mxu1 %v12880_v14  ;;  %6637 = vmatpush1.bf16.msra.mxu0 %v12882_v42 }
 0x8d4   :  { %6597 = vmatprep.subr.bf16.mxu1 %v12886_v55  ;;  %6638 = vmatprep.subr.bf16.mxu0 %v12888_v21 }
 0x8d7   :  { %6598 = vmatpush1.bf16.msra.mxu1 %v12892_v33  ;;  %6639 = vmatpush1.bf16.msra.mxu0 %v12894_v48 }
 0x8d8   :  { %6599 = vmatprep.subr.bf16.mxu1 %v12898_v6  ;;  %6640 = vmatprep.subr.bf16.mxu0 %v12900_v26 }
 0x8db   :  { %6600 = vmatpush1.bf16.msra.mxu1 %v12904_v37  ;;  %6641 = vmatpush1.bf16.msra.mxu0 %v12906_v38 }
 0x8dc   :  { %6601 = vmatprep.subr.bf16.mxu1 %v12912_v54  ;;  %6642 = vmatprep.subr.bf16.mxu0 %v12914_v57 }
 0x8df   :  { %6602 = vmatpush1.bf16.msra.mxu1 %v12916_v24  ;;  %6643 = vmatpush1.bf16.msra.mxu0 %v12918_v7 }
 0x8e0   :  { %6603 = vmatprep.subr.bf16.mxu1 %v12924_v9  ;;  %6644 = vmatprep.subr.bf16.mxu0 %v12926_v19 }
 0x8e3   :  { %6604 = vmatpush1.bf16.msra.mxu1 %v12928_v32  ;;  %6645 = vmatpush1.bf16.msra.mxu0 %v12930_v28 }
 0x8e4   :  { %6605 = vmatprep.subr.bf16.mxu1 %v12936_v62  ;;  %6646 = vmatprep.subr.bf16.mxu0 %v12938_v51 }
 0x8e7   :  { %6606 = vmatpush1.bf16.msra.mxu1 %v12940_v31  ;;  %6647 = vmatpush1.bf16.msra.mxu0 %v12942_v30 }
 0x8e8   :  { %6607 = vmatprep.subr.bf16.mxu1 %v12948_v35  ;;  %6648 = vmatprep.subr.bf16.mxu0 %v12950_v29 }
 0x8eb   :  { %6608 = vmatpush1.bf16.msra.mxu1 %v12952_v56  ;;  %6649 = vmatpush1.bf16.msra.mxu0 %v12954_v52 }
 0x8ec   :  { %6609 = vmatprep.subr.bf16.mxu1 %v12960_v49  ;;  %6650 = vmatprep.subr.bf16.mxu0 %v12962_v16 }
 0x8ef   :  { %6610 = vmatpush1.bf16.msra.mxu1 %v12964_v1  ;;  %6651 = vmatpush1.bf16.msra.mxu0 %v12966_v11 }
 0x8f0   :  { %6611 = vmatprep.subr.bf16.mxu1 %v12972_v63  ;;  %6652 = vmatprep.subr.bf16.mxu0 %v12974_v18 }
 0x8f3   :  { %6612 = vmatpush1.bf16.msra.mxu1 %v12976_v23  ;;  %6653 = vmatpush1.bf16.msra.mxu0 %v12978_v8 }
 0x8f4   :  { %6613 = vmatprep.subr.bf16.mxu1 %v12984_v2  ;;  %6654 = vmatprep.subr.bf16.mxu0 %v12986_v17 }
 0x8f7   :  { %6614 = vmatpush1.bf16.msra.mxu1 %v12988_v50  ;;  %6655 = vmatpush1.bf16.msra.mxu0 %v14939_v3 }
 0x8f8   :  { %6615 = vmatprep.subr.bf16.mxu1 %v14940_v5  ;;  %6656 = vmatprep.subr.bf16.mxu0 %v14941_v27 }
 0x8fb   :  { %6616 = vmatpush1.bf16.msra.mxu1 %v14942_v20  ;;  %6657 = vmatpush1.bf16.msra.mxu0 %v14943_v44 }
 0x8fc   :  { %6617 = vmatprep.subr.bf16.mxu1 %v14944_v10  ;;  %6658 = vmatprep.subr.bf16.mxu0 %v14945_v36  ;;  %v14964_v36 = vld [vmem:[#allocation72_spill] sm:$0xff]  ;;  %v14965_v10 = vld [vmem:[#allocation74_spill] sm:$0xff] }
 0x8ff   :  { %6618 = vmatpush1.bf16.msra.mxu1 %v14946_v60  ;;  %6659 = vmatpush1.bf16.msra.mxu0 %v14947_v12  ;;  %v14963_v12 = vld [vmem:[#allocation71_spill] sm:$0xff] }
 0x900   :  { %6619 = vmatprep.subr.bf16.mxu1 %v14948_v13  ;;  %6660 = vmatprep.subr.bf16.mxu0 %v14949_v25  ;;  %v14960_v25 = vld [vmem:[#allocation61_spill] sm:$0xff]  ;;  %v14962_v13 = vld [vmem:[#allocation70_spill] sm:$0xff] }
 0x903   :  { %6620 = vmatpush1.bf16.msra.mxu1 %v14950_v15  ;;  %6661 = vmatpush1.bf16.msra.mxu0 %v14951_v4  ;;  %v14961_v15 = vld [vmem:[#allocation81_spill] sm:$0xff] }
 0x904   :  { %6621 = vmatprep.subr.bf16.mxu1 %v14952_v46  ;;  %6662 = vmatprep.subr.bf16.mxu0 %v14953_v47 }
 0x907   :  { %6622 = vmatpush1.bf16.msra.mxu1 %v14954_v61  ;;  %6663 = vmatpush1.bf16.msra.mxu0 %v14955_v53 }
 0x908   :  { %6623 = vmatprep.subr.bf16.mxu1 %v14956_v41  ;;  %6664 = vmatprep.subr.bf16.mxu0 %v14957_v34 }
 0x90b   :  { %6624 = vmatpush1.bf16.msra.mxu1 %v14958_v40  ;;  %6665 = vmatpush1.bf16.msra.mxu0 %v14959_v39 }
 0x90c   :  { %7109 = vmatprep.subr.bf16.mxu1 %v14960_v25  ;;  %7150 = vmatprep.subr.bf16.mxu0 %v14961_v15 }
 0x9a1   :  { %v6111_v4 = vpop.f32.mrb[68].mxu1  ;;  %v6152_v46 = vpop.f32.mrb[76].mxu0 }
 0x9a2   :  { %v6159_v47 = vadd.f32 %v6111_v4, %v14962_v13  ;;  %v6161_v61 = vadd.f32 %v6152_v46, %v14963_v12  ;;  %v6113_v60 = vpop.f32.mrb[69].mxu1  ;;  %v6154_v53 = vpop.f32.mrb[77].mxu0 }
 0x9a3   :  { %v6160_v41 = vadd.f32 %v6113_v60, %v14964_v36  ;;  %v6162_v34 = vadd.f32 %v6154_v53, %v14965_v10  ;;  %v6115_v44 = vpop.f32.mrb[70].mxu1  ;;  %v6156_v40 = vpop.f32.mrb[78].mxu0 }
 0x9a4   :  { %v9912_v20 = vmul.f32 -1.442695, %v6159_v47  ;;  %v6116_v39 = vpop.f32.mrb[71].mxu1  ;;  %v6157_v27 = vpop.f32.mrb[79].mxu0 }
 0x9a5   :  { %v9913_v25 = vmul.f32 -1.442695, %v6160_v41  ;;  %v9914_v15 = vmul.f32 -1.442695, %v6162_v34 }
 0x9a6   :  { %10753 = vpow2.f32 %v9912_v20 }
 0x9a7   :  { %10755 = vpow2.f32 %v9913_v25 }
 0x9a8   :  { %10757 = vpow2.f32 %v9914_v15 }
 0x9a9   :  { %10759 = vtanh.f32 %v6161_v61 }
 0x9b0   :  { %v10754_v5 = vpop.eup %10753 }
 0x9b1   :  { %v10756_v3 = vpop.eup %10755  ;;  %v6166_v13 = vadd.f32 1.0, %v10754_v5 }
 0x9b2   :  { %v6172_v12 = vadd.f32 1.0, %v10756_v3  ;;  %v10758_v36 = vpop.eup %10757 }
 0x9b3   :  { %10761 = vrcp.f32 %v6166_v13  ;;  %v10760_v60 = vpop.eup %10759  ;;  %v6179_v4 = vadd.f32 1.0, %v10758_v36 }
 0x9b4   :  { %10763 = vrcp.f32 %v6172_v12 }
 0x9b5   :  { %10765 = vrcp.f32 %v6179_v4 }
 0x9bd   :  { %v10762_v10 = vpop.eup %10761 }
 0x9be   :  { %v10764_v44 = vpop.eup %10763  ;;  %v6183_v40 = vmul.f32 %v10762_v10, %v10760_v60 }
 0x9bf   :  { %v6182_v39 = vmul.f32 %v10764_v44, %v13063_v58  ;;  %v10766_v20 = vpop.eup %10765 }
 0x9c1   :  { %v13144_v27 = vadd.f32 %v6183_v40, %v6182_v39 }
 0x9c3   :  { %10767 = vtanh.f32 %v13144_v27 }
 0x9cd   :  { %v10768_v5 = vpop.eup %10767 }
 0x9ce   :  { %v13147_v46 = vmul.f32 %v10768_v5, %v10766_v20 }
 0x9d0   :  { %v6188_v3 = vrot.slane %v13147_v46, 4  ;;  %v6206_v47 = vpack.c.bf16 %v13147_v46, %v13147_v46 }
 0x9d2   :  { %v6208_v61 = vsel %vm12488_vm3, 0, %v6206_v47  ;;  %v6207_v58 = vsel %vm12488_vm3, %v6206_v47, 0 }
 0x9d3   :  { %6625 = vmatprep.mubr.bf16.mxu1 %v6208_v61  ;;  %6666 = vmatprep.mubr.bf16.mxu0 %v6208_v61 }
 0x9d4   :  { %6626 = vmatmul.mubr.bf16.vlgmr.msra.gmra.mrb[72].mxu1 %v6207_v58  ;;  %6667 = vmatmul.mubr.bf16.vlgmr.msra.gmra.mrb[80].mxu0 %v6207_v58 }
 0x9d5   :  { %7110 = vmatpush1.bf16.msra.mxu1 %v12866_v45  ;;  %7151 = vmatpush1.bf16.msra.mxu0 %v12868_v43  ;;  %v14966_v45 = vld [vmem:[#allocation84_spill] sm:$0xff]  ;;  %v14967_v43 = vld [vmem:[#allocation85_spill] sm:$0xff] }
 0x9d6   :  { %7111 = vmatprep.subr.bf16.mxu1 %v12874_v0  ;;  %7152 = vmatprep.subr.bf16.mxu0 %v12876_v22  ;;  %v14968_v0 = vld [vmem:[#allocation88_spill] sm:$0xff]  ;;  %v14969_v22 = vld [vmem:[#allocation89_spill] sm:$0xff] }
 0x9d9   :  { %7112 = vmatpush1.bf16.msra.mxu1 %v12880_v14  ;;  %7153 = vmatpush1.bf16.msra.mxu0 %v12882_v42  ;;  %v14970_v14 = vld [vmem:[#allocation90_spill] sm:$0xff]  ;;  %v14971_v42 = vld [vmem:[#allocation91_spill] sm:$0xff] }
 0x9da   :  { %7113 = vmatprep.subr.bf16.mxu1 %v12886_v55  ;;  %7154 = vmatprep.subr.bf16.mxu0 %v12888_v21  ;;  %v14972_v55 = vld [vmem:[#allocation96_spill] sm:$0xff] }
 0x9db   :  { %v14973_v21 = vld [vmem:[#allocation92_spill] sm:$0xff] }
 0x9dd   :  { %7114 = vmatpush1.bf16.msra.mxu1 %v12892_v33  ;;  %7155 = vmatpush1.bf16.msra.mxu0 %v12894_v48  ;;  %v14974_v33 = vld [vmem:[#allocation93_spill] sm:$0xff]  ;;  %v14975_v48 = vld [vmem:[#allocation94_spill] sm:$0xff] }
 0x9de   :  { %7115 = vmatprep.subr.bf16.mxu1 %v12898_v6  ;;  %7156 = vmatprep.subr.bf16.mxu0 %v12900_v26  ;;  %v14976_v6 = vld [vmem:[#allocation95_spill] sm:$0xff]  ;;  %v14977_v26 = vld [vmem:[#allocation97_spill] sm:$0xff] }
 0x9e1   :  { %7116 = vmatpush1.bf16.msra.mxu1 %v12904_v37  ;;  %7157 = vmatpush1.bf16.msra.mxu0 %v12906_v38  ;;  %v14978_v37 = vld [vmem:[#allocation98_spill] sm:$0xff]  ;;  %v14979_v38 = vld [vmem:[#allocation99_spill] sm:$0xff] }
 0x9e2   :  { %7117 = vmatprep.subr.bf16.mxu1 %v12912_v54  ;;  %7158 = vmatprep.subr.bf16.mxu0 %v12914_v57  ;;  %v14980_v54 = vld [vmem:[#allocation100_spill] sm:$0xff]  ;;  %v14981_v57 = vld [vmem:[#allocation101_spill] sm:$0xff] }
 0x9e5   :  { %7118 = vmatpush1.bf16.msra.mxu1 %v12916_v24  ;;  %7159 = vmatpush1.bf16.msra.mxu0 %v12918_v7  ;;  %v14982_v24 = vld [vmem:[#allocation102_spill] sm:$0xff]  ;;  %v14983_v7 = vld [vmem:[#allocation103_spill] sm:$0xff] }
 0x9e6   :  { %7119 = vmatprep.subr.bf16.mxu1 %v12924_v9  ;;  %7160 = vmatprep.subr.bf16.mxu0 %v12926_v19  ;;  %v14984_v9 = vld [vmem:[#allocation104_spill] sm:$0xff]  ;;  %v14985_v19 = vld [vmem:[#allocation105_spill] sm:$0xff] }
 0x9e9   :  { %7120 = vmatpush1.bf16.msra.mxu1 %v12928_v32  ;;  %7161 = vmatpush1.bf16.msra.mxu0 %v12930_v28  ;;  %v14986_v32 = vld [vmem:[#allocation106_spill] sm:$0xff] }
 0x9ea   :  { %7121 = vmatprep.subr.bf16.mxu1 %v12936_v62  ;;  %7162 = vmatprep.subr.bf16.mxu0 %v12938_v51  ;;  %v14987_v51 = vld [vmem:[#allocation65_spill] sm:$0xff] }
 0x9ed   :  { %7122 = vmatpush1.bf16.msra.mxu1 %v12940_v31  ;;  %7163 = vmatpush1.bf16.msra.mxu0 %v12942_v30  ;;  %v14988_v30 = vld [vmem:[#allocation67_spill] sm:$0xff] }
 0x9ee   :  { %7123 = vmatprep.subr.bf16.mxu1 %v12948_v35  ;;  %7164 = vmatprep.subr.bf16.mxu0 %v12950_v29 }
 0x9f1   :  { %7124 = vmatpush1.bf16.msra.mxu1 %v12952_v56  ;;  %7165 = vmatpush1.bf16.msra.mxu0 %v12954_v52  ;;  %v14989_v52 = vld [vmem:[#allocation68_spill] sm:$0xff] }
 0x9f2   :  { %7125 = vmatprep.subr.bf16.mxu1 %v12960_v49  ;;  %7166 = vmatprep.subr.bf16.mxu0 %v12962_v16  ;;  %v14990_v16 = vld [vmem:[#allocation69_spill] sm:$0xff] }
 0x9f5   :  { %7126 = vmatpush1.bf16.msra.mxu1 %v12964_v1  ;;  %7167 = vmatpush1.bf16.msra.mxu0 %v12966_v11 }
 0x9f6   :  { %7127 = vmatprep.subr.bf16.mxu1 %v12972_v63  ;;  %7168 = vmatprep.subr.bf16.mxu0 %v12974_v18 }
 0x9f9   :  { %7128 = vmatpush1.bf16.msra.mxu1 %v12976_v23  ;;  %7169 = vmatpush1.bf16.msra.mxu0 %v12978_v8 }
 0x9fa   :  { %7129 = vmatprep.subr.bf16.mxu1 %v12984_v2  ;;  %7170 = vmatprep.subr.bf16.mxu0 %v12986_v17 }
 0x9fd   :  { %7130 = vmatpush1.bf16.msra.mxu1 %v12988_v50  ;;  %7171 = vmatpush1.bf16.msra.mxu0 %v14966_v45  ;;  %v14991_v45 = vld [vmem:[#allocation62_spill] sm:$0xff] }
 0x9fe   :  { %7131 = vmatprep.subr.bf16.mxu1 %v14967_v43  ;;  %7172 = vmatprep.subr.bf16.mxu0 %v14968_v0  ;;  %v14992_v0 = vld [vmem:[#allocation63_spill] sm:$0xff] }
 0xa01   :  { %7132 = vmatpush1.bf16.msra.mxu1 %v14969_v22  ;;  %7173 = vmatpush1.bf16.msra.mxu0 %v14970_v14 }
 0xa02   :  { %7133 = vmatprep.subr.bf16.mxu1 %v14971_v42  ;;  %7174 = vmatprep.subr.bf16.mxu0 %v14972_v55  ;;  %v14993_v55 = vld [vmem:[#allocation64_spill] sm:$0xff] }
 0xa05   :  { %7134 = vmatpush1.bf16.msra.mxu1 %v14973_v21  ;;  %7175 = vmatpush1.bf16.msra.mxu0 %v14974_v33  ;;  %v14994_v33 = vld [vmem:[#allocation66_spill] sm:$0xff] }
 0xa06   :  { %7135 = vmatprep.subr.bf16.mxu1 %v14975_v48  ;;  %7176 = vmatprep.subr.bf16.mxu0 %v14976_v6 }
 0xa09   :  { %7136 = vmatpush1.bf16.msra.mxu1 %v14977_v26  ;;  %7177 = vmatpush1.bf16.msra.mxu0 %v14978_v37 }
 0xa0a   :  { %7137 = vmatprep.subr.bf16.mxu1 %v14979_v38  ;;  %7178 = vmatprep.subr.bf16.mxu0 %v14980_v54 }
 0xa0d   :  { %7138 = vmatpush1.bf16.msra.mxu1 %v14981_v57  ;;  %7179 = vmatpush1.bf16.msra.mxu0 %v14982_v24 }
 0xa0e   :  { %7139 = vmatprep.subr.bf16.mxu1 %v14983_v7  ;;  %7180 = vmatprep.subr.bf16.mxu0 %v14984_v9 }
 0xa11   :  { %7140 = vmatpush1.bf16.msra.mxu1 %v14985_v19  ;;  %7181 = vmatpush1.bf16.msra.mxu0 %v14986_v32 }
 0xaa7   :  { %v6627_v28 = vpop.f32.mrb[72].mxu1  ;;  %v6668_v62 = vpop.f32.mrb[80].mxu0 }
 0xaa8   :  { %v6675_v31 = vadd.f32 %v6627_v28, %v14987_v51  ;;  %v6677_v35 = vadd.f32 %v6668_v62, %v14988_v30  ;;  %v6629_v29 = vpop.f32.mrb[73].mxu1  ;;  %v6670_v56 = vpop.f32.mrb[81].mxu0 }
 0xaa9   :  { %v6676_v49 = vadd.f32 %v6629_v29, %v14989_v52  ;;  %v6678_v1 = vadd.f32 %v6670_v56, %v14990_v16  ;;  %v6631_v11 = vpop.f32.mrb[74].mxu1  ;;  %v6672_v63 = vpop.f32.mrb[82].mxu0 }
 0xaaa   :  { %v9979_v18 = vmul.f32 -1.442695, %v6675_v31  ;;  %v6632_v23 = vpop.f32.mrb[75].mxu1  ;;  %v6673_v8 = vpop.f32.mrb[83].mxu0 }
 0xaab   :  { %v9980_v2 = vmul.f32 -1.442695, %v6676_v49  ;;  %v9981_v17 = vmul.f32 -1.442695, %v6678_v1 }
 0xaac   :  { %10769 = vpow2.f32 %v9979_v18 }
 0xaad   :  { %10771 = vpow2.f32 %v9980_v2 }
 0xaae   :  { %10773 = vpow2.f32 %v9981_v17 }
 0xaaf   :  { %10775 = vtanh.f32 %v6677_v35 }
 0xab6   :  { %v10770_v50 = vpop.eup %10769 }
 0xab7   :  { %v10772_v53 = vpop.eup %10771  ;;  %v6682_v41 = vadd.f32 1.0, %v10770_v50 }
 0xab8   :  { %v6688_v34 = vadd.f32 1.0, %v10772_v53  ;;  %v10774_v25 = vpop.eup %10773 }
 0xab9   :  { %10777 = vrcp.f32 %v6682_v41  ;;  %v10776_v15 = vpop.eup %10775  ;;  %v6695_v60 = vadd.f32 1.0, %v10774_v25 }
 0xaba   :  { %10779 = vrcp.f32 %v6688_v34 }
 0xabb   :  { %10781 = vrcp.f32 %v6695_v60 }
 0xac3   :  { %v10778_v13 = vpop.eup %10777 }
 0xac4   :  { %v10780_v12 = vpop.eup %10779  ;;  %v6699_v36 = vmul.f32 %v10778_v13, %v10776_v15 }
 0xac5   :  { %v6698_v10 = vmul.f32 %v10780_v12, %v13144_v27  ;;  %v10782_v40 = vpop.eup %10781 }
 0xac7   :  { %v6700_v44 = vadd.f32 %v6699_v36, %v6698_v10 }
 0xac9   :  { %10783 = vtanh.f32 %v6700_v44 }
 0xad3   :  { %v10784_v4 = vpop.eup %10783 }
 0xad4   :  { %v13223_v39 = vmul.f32 %v10784_v4, %v10782_v40 }
 0xad6   :  { %v6704_v20 = vrot.slane %v13223_v39, 4  ;;  %v6722_v5 = vpack.c.bf16 %v13223_v39, %v13223_v39 }
 0xad8   :  { %v6724_v47 = vsel %vm12488_vm3, 0, %v6722_v5  ;;  %v6723_v61 = vsel %vm12488_vm3, %v6722_v5, 0 }
 0xad9   :  { %7141 = vmatprep.mubr.bf16.mxu1 %v6724_v47  ;;  %7182 = vmatprep.mubr.bf16.mxu0 %v6724_v47 }
 0xada   :  { %7142 = vmatmul.mubr.bf16.vlgmr.msra.gmra.mrb[76].mxu1 %v6723_v61  ;;  %7183 = vmatmul.mubr.bf16.vlgmr.msra.gmra.mrb[84].mxu0 %v6723_v61 }
 0xbad   :  { %v7143_v27 = vpop.f32.mrb[76].mxu1  ;;  %v7184_v58 = vpop.f32.mrb[84].mxu0 }
 0xbae   :  { %v7191_v43 = vadd.f32 %v7143_v27, %v14991_v45  ;;  %v7193_v22 = vadd.f32 %v7184_v58, %v14992_v0  ;;  %v7145_v14 = vpop.f32.mrb[77].mxu1  ;;  %v7186_v42 = vpop.f32.mrb[85].mxu0 }
 0xbaf   :  { %v7192_v21 = vadd.f32 %v7145_v14, %v14993_v55  ;;  %v7194_v48 = vadd.f32 %v7186_v42, %v14994_v33  ;;  %v7147_v6 = vpop.f32.mrb[78].mxu1  ;;  %v7188_v26 = vpop.f32.mrb[86].mxu0 }
 0xbb0   :  { %v10046_v37 = vmul.f32 -1.442695, %v7191_v43  ;;  %v7148_v38 = vpop.f32.mrb[79].mxu1  ;;  %v7189_v54 = vpop.f32.mrb[87].mxu0 }
 0xbb1   :  { %v10047_v57 = vmul.f32 -1.442695, %v7192_v21  ;;  %v10048_v24 = vmul.f32 -1.442695, %v7194_v48 }
 0xbb2   :  { %10785 = vpow2.f32 %v10046_v37 }
 0xbb3   :  { %10787 = vpow2.f32 %v10047_v57 }
 0xbb4   :  { %10789 = vpow2.f32 %v10048_v24 }
 0xbb5   :  { %10791 = vtanh.f32 %v7193_v22 }
 0xbbc   :  { %v10786_v7 = vpop.eup %10785 }
 0xbbd   :  { %v10788_v9 = vpop.eup %10787  ;;  %v7198_v19 = vadd.f32 1.0, %v10786_v7 }
 0xbbe   :  { %v7204_v32 = vadd.f32 1.0, %v10788_v9  ;;  %v10790_v28 = vpop.eup %10789 }
 0xbbf   :  { %10793 = vrcp.f32 %v7198_v19  ;;  %v10792_v62 = vpop.eup %10791  ;;  %v7211_v35 = vadd.f32 1.0, %v10790_v28 }
 0xbc0   :  { %10795 = vrcp.f32 %v7204_v32 }
 0xbc1   :  { %10797 = vrcp.f32 %v7211_v35 }
 0xbc9   :  { %v10794_v51 = vpop.eup %10793 }
 0xbca   :  { %v10796_v31 = vpop.eup %10795  ;;  %v7215_v30 = vmul.f32 %v10794_v51, %v10792_v62 }
 0xbcb   :  { %v7214_v29 = vmul.f32 %v10796_v31, %v6700_v44  ;;  %v10798_v52 = vpop.eup %10797 }
 0xbcd   :  { %v7216_v56 = vadd.f32 %v7215_v30, %v7214_v29 }
 0xbcf   :  { %10799 = vtanh.f32 %v7216_v56 }
 0xbd9   :  { %v10800_v49 = vpop.eup %10799 }
 0xbda   :  { %v13236_v16 = vmul.f32 %v10800_v49, %v10798_v52 }
 0xbdc   :  { %v7220_v1 = vrot.slane %v13236_v16, 4 }
 0xbdd   :  { %11233 = dma.done.wait [#allocation8], 16384 }
 0xbde   :  { %11234 = vsyncadd [#allocation8], 4294950912  ;;  %v13239_v11 = vpack.c.bf16 %v6704_v20, %v7220_v1  ;;  %v7251_v63 = vld [vmem:[#allocation5 + $0x8] sm:$0xff]  ;;  %v7253_v18 = vld [vmem:[#allocation5 + $0x18] sm:$0xff] }
 0xbdf   :  { %v7250_v23 = vld [vmem:[#allocation5] sm:$0xff]  ;;  %7420 = vmatprep.subr.bf16.mxu1 %v7251_v63  ;;  %7493 = vmatprep.subr.bf16.mxu0 %v7253_v18  ;;  %v7252_v8 = vld [vmem:[#allocation5 + $0x10] sm:$0xff]  ;;  %v7259_v2 = vld [vmem:[#allocation5 + $0x48] sm:$0xff] }
 0xbe0   :  { %7452 = vmatprep.mubr.bf16.mxu1 %v13239_v11  ;;  %7525 = vmatprep.mubr.bf16.mxu0 %v13239_v11  ;;  %v7261_v17 = vld [vmem:[#allocation5 + $0x58] sm:$0xff]  ;;  %v7258_v50 = vld [vmem:[#allocation5 + $0x40] sm:$0xff]  ;;  %v7260_v53 = vld [vmem:[#allocation5 + $0x50] sm:$0xff] }
 0xbe1   :  { %7421 = vmatpush1.bf16.msra.mxu1 %v7250_v23  ;;  %7494 = vmatpush1.bf16.msra.mxu0 %v7252_v8  ;;  %v7267_v41 = vld [vmem:[#allocation5 + $0x88] sm:$0xff]  ;;  %v7269_v34 = vld [vmem:[#allocation5 + $0x98] sm:$0xff]  ;;  %v7266_v25 = vld [vmem:[#allocation5 + $0x80] sm:$0xff] }
 0xbe2   :  { %7422 = vmatprep.subr.bf16.mxu1 %v7259_v2  ;;  %7495 = vmatprep.subr.bf16.mxu0 %v7261_v17  ;;  %v7268_v15 = vld [vmem:[#allocation5 + $0x90] sm:$0xff]  ;;  %v7275_v13 = vld [vmem:[#allocation5 + $0xc8] sm:$0xff]  ;;  %v7277_v12 = vld [vmem:[#allocation5 + $0xd8] sm:$0xff] }
 0xbe3   :  { %v7274_v36 = vld [vmem:[#allocation5 + $0xc0] sm:$0xff]  ;;  %v7276_v60 = vld [vmem:[#allocation5 + $0xd0] sm:$0xff]  ;;  %v7283_v10 = vld [vmem:[#allocation5 + $0x108] sm:$0xff] }
 0xbe4   :  { %v7285_v44 = vld [vmem:[#allocation5 + $0x118] sm:$0xff]  ;;  %v7282_v40 = vld [vmem:[#allocation5 + $0x100] sm:$0xff]  ;;  %v7284_v4 = vld [vmem:[#allocation5 + $0x110] sm:$0xff] }
 0xbe5   :  { %7423 = vmatpush1.bf16.msra.mxu1 %v7258_v50  ;;  %7496 = vmatpush1.bf16.msra.mxu0 %v7260_v53  ;;  %v7291_v20 = vld [vmem:[#allocation5 + $0x148] sm:$0xff]  ;;  %v7293_v5 = vld [vmem:[#allocation5 + $0x158] sm:$0xff]  ;;  %v7290_v47 = vld [vmem:[#allocation5 + $0x140] sm:$0xff] }
 0xbe6   :  { %7424 = vmatprep.subr.bf16.mxu1 %v7267_v41  ;;  %7497 = vmatprep.subr.bf16.mxu0 %v7269_v34  ;;  %v7292_v61 = vld [vmem:[#allocation5 + $0x150] sm:$0xff]  ;;  %v7299_v27 = vld [vmem:[#allocation5 + $0x188] sm:$0xff]  ;;  %v7301_v58 = vld [vmem:[#allocation5 + $0x198] sm:$0xff] }
 0xbe7   :  { %v7298_v45 = vld [vmem:[#allocation5 + $0x180] sm:$0xff]  ;;  %v7300_v43 = vld [vmem:[#allocation5 + $0x190] sm:$0xff]  ;;  %v7307_v0 = vld [vmem:[#allocation5 + $0x1c8] sm:$0xff] }
 0xbe8   :  { %v7309_v22 = vld [vmem:[#allocation5 + $0x1d8] sm:$0xff]  ;;  %v7306_v14 = vld [vmem:[#allocation5 + $0x1c0] sm:$0xff]  ;;  %v7308_v42 = vld [vmem:[#allocation5 + $0x1d0] sm:$0xff] }
 0xbe9   :  { %7425 = vmatpush1.bf16.msra.mxu1 %v7266_v25  ;;  %7498 = vmatpush1.bf16.msra.mxu0 %v7268_v15  ;;  %v7315_v55 = vld [vmem:[#allocation5 + $0x208] sm:$0xff]  ;;  %v7317_v21 = vld [vmem:[#allocation5 + $0x218] sm:$0xff]  ;;  %v7314_v33 = vld [vmem:[#allocation5 + $0x200] sm:$0xff] }
 0xbea   :  { %7426 = vmatprep.subr.bf16.mxu1 %v7275_v13  ;;  %7499 = vmatprep.subr.bf16.mxu0 %v7277_v12  ;;  %v7316_v48 = vld [vmem:[#allocation5 + $0x210] sm:$0xff]  ;;  %v7323_v6 = vld [vmem:[#allocation5 + $0x248] sm:$0xff]  ;;  %v7325_v26 = vld [vmem:[#allocation5 + $0x258] sm:$0xff] }
 0xbeb   :  { %v7322_v37 = vld [vmem:[#allocation5 + $0x240] sm:$0xff]  ;;  %v7324_v38 = vld [vmem:[#allocation5 + $0x250] sm:$0xff]  ;;  %v7331_v54 = vld [vmem:[#allocation5 + $0x288] sm:$0xff] }
 0xbec   :  { %v7333_v57 = vld [vmem:[#allocation5 + $0x298] sm:$0xff]  ;;  %v7330_v24 = vld [vmem:[#allocation5 + $0x280] sm:$0xff]  ;;  %v7332_v7 = vld [vmem:[#allocation5 + $0x290] sm:$0xff] }
 0xbed   :  { %7427 = vmatpush1.bf16.msra.mxu1 %v7274_v36  ;;  %7500 = vmatpush1.bf16.msra.mxu0 %v7276_v60  ;;  %v7339_v9 = vld [vmem:[#allocation5 + $0x2c8] sm:$0xff]  ;;  %v7341_v19 = vld [vmem:[#allocation5 + $0x2d8] sm:$0xff]  ;;  %v7338_v32 = vld [vmem:[#allocation5 + $0x2c0] sm:$0xff] }
 0xbee   :  { %7428 = vmatprep.subr.bf16.mxu1 %v7283_v10  ;;  %7501 = vmatprep.subr.bf16.mxu0 %v7285_v44  ;;  %v7340_v28 = vld [vmem:[#allocation5 + $0x2d0] sm:$0xff]  ;;  %v7347_v62 = vld [vmem:[#allocation5 + $0x308] sm:$0xff]  ;;  %v7349_v51 = vld [vmem:[#allocation5 + $0x318] sm:$0xff] }
 0xbef   :  { %v7346_v31 = vld [vmem:[#allocation5 + $0x300] sm:$0xff]  ;;  %v7348_v30 = vld [vmem:[#allocation5 + $0x310] sm:$0xff]  ;;  %v7355_v35 = vld [vmem:[#allocation5 + $0x348] sm:$0xff] }
 0xbf0   :  { %v7357_v29 = vld [vmem:[#allocation5 + $0x358] sm:$0xff]  ;;  %v7354_v56 = vld [vmem:[#allocation5 + $0x340] sm:$0xff]  ;;  %v7356_v52 = vld [vmem:[#allocation5 + $0x350] sm:$0xff] }
 0xbf1   :  { %7429 = vmatpush1.bf16.msra.mxu1 %v7282_v40  ;;  %7502 = vmatpush1.bf16.msra.mxu0 %v7284_v4  ;;  %v7363_v49 = vld [vmem:[#allocation5 + $0x388] sm:$0xff]  ;;  %v7365_v1 = vld [vmem:[#allocation5 + $0x398] sm:$0xff]  ;;  %v7362_v63 = vld [vmem:[#allocation5 + $0x380] sm:$0xff] }
 0xbf2   :  { %7430 = vmatprep.subr.bf16.mxu1 %v7291_v20  ;;  %7503 = vmatprep.subr.bf16.mxu0 %v7293_v5  ;;  %v7364_v18 = vld [vmem:[#allocation5 + $0x390] sm:$0xff]  ;;  %v7371_v23 = vld [vmem:[#allocation5 + $0x3c8] sm:$0xff]  ;;  %v7373_v8 = vld [vmem:[#allocation5 + $0x3d8] sm:$0xff] }
 0xbf3   :  { %v7370_v2 = vld [vmem:[#allocation5 + $0x3c0] sm:$0xff]  ;;  %v7372_v17 = vld [vmem:[#allocation5 + $0x3d0] sm:$0xff]  ;;  %v7255_v50 = vld [vmem:[#allocation5 + $0x28] sm:$0xff] }
 0xbf4   :  { %v7257_v53 = vld [vmem:[#allocation5 + $0x38] sm:$0xff]  ;;  %v14995_v41 = vld [vmem:[#allocation86_spill] sm:$0xff]  ;;  %v7256_v13 = vld [vmem:[#allocation5 + $0x30] sm:$0xff] }
 0xbf5   :  { %7431 = vmatpush1.bf16.msra.mxu1 %v7290_v47  ;;  %7504 = vmatpush1.bf16.msra.mxu0 %v7292_v61  ;;  %v14996_v34 = vld [vmem:[#allocation109_spill] sm:$0xff]  ;;  %v7263_v12 = vld [vmem:[#allocation5 + $0x68] sm:$0xff]  ;;  %v7264_v4 = vld [vmem:[#allocation5 + $0x70] sm:$0xff] }
 0xbf6   :  { %7432 = vmatprep.subr.bf16.mxu1 %v7299_v27  ;;  %7505 = vmatprep.subr.bf16.mxu0 %v7301_v58  ;;  %v13245_v25 = vpack.c.bf16 %v14996_v34, %v14995_v41  ;;  %v7254_v15 = vld [vmem:[#allocation5 + $0x20] sm:$0xff]  ;;  %v7265_v36 = vld [vmem:[#allocation5 + $0x78] sm:$0xff]  ;;  %v14997_v60 = vld [vmem:[#allocation107_spill] sm:$0xff] }
 0xbf7   :  { %v14998_v10 = vrot.slane %v14997_v60, 4  ;;  %v7262_v40 = vld [vmem:[#allocation5 + $0x60] sm:$0xff]  ;;  %v7271_v20 = vld [vmem:[#allocation5 + $0xa8] sm:$0xff]  ;;  %v7273_v5 = vld [vmem:[#allocation5 + $0xb8] sm:$0xff] }
 0xbf8   :  { %v14999_v47 = vld [vmem:[#allocation60_spill] sm:$0xff]  ;;  %v15000_v61 = vld [vmem:[#allocation83_spill] sm:$0xff]  ;;  %v7270_v27 = vld [vmem:[#allocation5 + $0xa0] sm:$0xff] }
 0xbf9   :  { %7433 = vmatpush1.bf16.msra.mxu1 %v7298_v45  ;;  %7506 = vmatpush1.bf16.msra.mxu0 %v7300_v43  ;;  %v13251_v44 = vpack.c.bf16 %v14998_v10, %v6188_v3  ;;  %v13259_v3 = vpack.c.bf16 %v15000_v61, %v14999_v47  ;;  %v7272_v58 = vld [vmem:[#allocation5 + $0xb0] sm:$0xff]  ;;  %v7279_v45 = vld [vmem:[#allocation5 + $0xe8] sm:$0xff]  ;;  %v7281_v43 = vld [vmem:[#allocation5 + $0xf8] sm:$0xff] }
 0xbfa   :  { %7434 = vmatprep.subr.bf16.mxu1 %v7307_v0  ;;  %7507 = vmatprep.subr.bf16.mxu0 %v7309_v22  ;;  %v15001_v0 = vrot.slane %v15000_v61, 4  ;;  %v15002_v22 = vrot.slane %v14999_v47, 4  ;;  %v7360_v10 = vld [vmem:[#allocation5 + $0x370] sm:$0xff]  ;;  %v7375_v47 = vld [vmem:[#allocation5 + $0x3e8] sm:$0xff]  ;;  %v7377_v61 = vld [vmem:[#allocation5 + $0x3f8] sm:$0xff] }
 0xbfd   :  { %7435 = vmatpush1.bf16.msra.mxu1 %v7306_v14  ;;  %7508 = vmatpush1.bf16.msra.mxu0 %v7308_v42  ;;  %v13265_v14 = vpack.c.bf16 %v15002_v22, %v15001_v0  ;;  %v7278_v42 = vld [vmem:[#allocation5 + $0xe0] sm:$0xff] }
 0xbfe   :  { %7436 = vmatprep.subr.bf16.mxu1 %v7315_v55  ;;  %7509 = vmatprep.subr.bf16.mxu0 %v7317_v21  ;;  %v7280_v55 = vld [vmem:[#allocation5 + $0xf0] sm:$0xff]  ;;  %v7287_v21 = vld [vmem:[#allocation5 + $0x128] sm:$0xff] }
 0xbff   :  { %v15007_v0 = vld [vmem:[#allocation58_spill] sm:$0xff] }
 0xc01   :  { %7437 = vmatpush1.bf16.msra.mxu1 %v7314_v33  ;;  %7510 = vmatpush1.bf16.msra.mxu0 %v7316_v48  ;;  %v7289_v33 = vld [vmem:[#allocation5 + $0x138] sm:$0xff]  ;;  %v13273_v48 = vpack.c.bf16 %v13147_v46, %v14997_v60  ;;  %v7294_v46 = vld [vmem:[#allocation5 + $0x160] sm:$0xff] }
 0xc02   :  { %7438 = vmatprep.subr.bf16.mxu1 %v7323_v6  ;;  %7511 = vmatprep.subr.bf16.mxu0 %v7325_v26  ;;  %v7286_v6 = vld [vmem:[#allocation5 + $0x120] sm:$0xff]  ;;  %v7288_v26 = vld [vmem:[#allocation5 + $0x130] sm:$0xff] }
 0xc03   :  { %v7358_v60 = vld [vmem:[#allocation5 + $0x360] sm:$0xff] }
 0xc05   :  { %7439 = vmatpush1.bf16.msra.mxu1 %v7322_v37  ;;  %7512 = vmatpush1.bf16.msra.mxu0 %v7324_v38  ;;  %v7295_v37 = vld [vmem:[#allocation5 + $0x168] sm:$0xff]  ;;  %v7297_v38 = vld [vmem:[#allocation5 + $0x178] sm:$0xff] }
 0xc06   :  { %7440 = vmatprep.subr.bf16.mxu1 %v7331_v54  ;;  %7513 = vmatprep.subr.bf16.mxu0 %v7333_v57  ;;  %v15003_v54 = vrot.slane %v14996_v34, 4  ;;  %v15004_v57 = vrot.slane %v14995_v41, 4  ;;  %v7351_v41 = vld [vmem:[#allocation5 + $0x328] sm:$0xff]  ;;  %v7353_v34 = vld [vmem:[#allocation5 + $0x338] sm:$0xff] }
 0xc09   :  { %7441 = vmatpush1.bf16.msra.mxu1 %v7330_v24  ;;  %7514 = vmatpush1.bf16.msra.mxu0 %v7332_v7  ;;  %v13279_v24 = vpack.c.bf16 %v15004_v57, %v15003_v54  ;;  %v7296_v7 = vld [vmem:[#allocation5 + $0x170] sm:$0xff] }
 0xc0a   :  { %7442 = vmatprep.subr.bf16.mxu1 %v7339_v9  ;;  %7515 = vmatprep.subr.bf16.mxu0 %v7341_v19  ;;  %v7303_v9 = vld [vmem:[#allocation5 + $0x1a8] sm:$0xff]  ;;  %v7305_v19 = vld [vmem:[#allocation5 + $0x1b8] sm:$0xff] }
 0xc0d   :  { %7443 = vmatpush1.bf16.msra.mxu1 %v7338_v32  ;;  %7516 = vmatpush1.bf16.msra.mxu0 %v7340_v28  ;;  %v13287_v32 = vpack.c.bf16 %v13236_v16, %v13223_v39  ;;  %v7302_v28 = vld [vmem:[#allocation5 + $0x1a0] sm:$0xff]  ;;  %v7319_v39 = vld [vmem:[#allocation5 + $0x228] sm:$0xff]  ;;  %v7321_v16 = vld [vmem:[#allocation5 + $0x238] sm:$0xff] }
 0xc0e   :  { %7444 = vmatprep.subr.bf16.mxu1 %v7347_v62  ;;  %7517 = vmatprep.subr.bf16.mxu0 %v7349_v51  ;;  %v7304_v62 = vld [vmem:[#allocation5 + $0x1b0] sm:$0xff]  ;;  %v7311_v51 = vld [vmem:[#allocation5 + $0x1e8] sm:$0xff] }
 0xc11   :  { %7445 = vmatpush1.bf16.msra.mxu1 %v7346_v31  ;;  %7518 = vmatpush1.bf16.msra.mxu0 %v7348_v30  ;;  %v7313_v31 = vld [vmem:[#allocation5 + $0x1f8] sm:$0xff]  ;;  %v7310_v30 = vld [vmem:[#allocation5 + $0x1e0] sm:$0xff] }
 0xc12   :  { %7446 = vmatprep.subr.bf16.mxu1 %v7355_v35  ;;  %7519 = vmatprep.subr.bf16.mxu0 %v7357_v29  ;;  %v7312_v35 = vld [vmem:[#allocation5 + $0x1f0] sm:$0xff]  ;;  %v7318_v29 = vld [vmem:[#allocation5 + $0x220] sm:$0xff] }
 0xc15   :  { %7447 = vmatpush1.bf16.msra.mxu1 %v7354_v56  ;;  %7520 = vmatpush1.bf16.msra.mxu0 %v7356_v52  ;;  %v7320_v56 = vld [vmem:[#allocation5 + $0x230] sm:$0xff]  ;;  %v7327_v52 = vld [vmem:[#allocation5 + $0x268] sm:$0xff] }
 0xc16   :  { %7448 = vmatprep.subr.bf16.mxu1 %v7363_v49  ;;  %7521 = vmatprep.subr.bf16.mxu0 %v7365_v1  ;;  %v7329_v49 = vld [vmem:[#allocation5 + $0x278] sm:$0xff]  ;;  %v7326_v1 = vld [vmem:[#allocation5 + $0x260] sm:$0xff] }
 0xc19   :  { %7449 = vmatpush1.bf16.msra.mxu1 %v7362_v63  ;;  %7522 = vmatpush1.bf16.msra.mxu0 %v7364_v18  ;;  %v7328_v63 = vld [vmem:[#allocation5 + $0x270] sm:$0xff]  ;;  %v7335_v18 = vld [vmem:[#allocation5 + $0x2a8] sm:$0xff] }
 0xc1a   :  { %7450 = vmatprep.subr.bf16.mxu1 %v7371_v23  ;;  %7523 = vmatprep.subr.bf16.mxu0 %v7373_v8  ;;  %v7337_v23 = vld [vmem:[#allocation5 + $0x2b8] sm:$0xff]  ;;  %v7336_v8 = vld [vmem:[#allocation5 + $0x2b0] sm:$0xff] }
 0xc1d   :  { %7451 = vmatpush1.bf16.msra.mxu1 %v7370_v2  ;;  %7524 = vmatpush1.bf16.msra.mxu0 %v7372_v17  ;;  %v7343_v2 = vld [vmem:[#allocation5 + $0x2e8] sm:$0xff]  ;;  %v7345_v17 = vld [vmem:[#allocation5 + $0x2f8] sm:$0xff] }
 0xc1e   :  { %7566 = vmatprep.subr.bf16.mxu1 %v7255_v50  ;;  %7639 = vmatprep.subr.bf16.mxu0 %v7257_v53  ;;  %v7342_v50 = vld [vmem:[#allocation5 + $0x2e0] sm:$0xff]  ;;  %v7344_v53 = vld [vmem:[#allocation5 + $0x2f0] sm:$0xff] }
 0xc20   :  { %7453 = vmatmul.mubr.bf16.vlgmr.msra.gmra.mrb[80].mxu1 %v13245_v25  ;;  %7526 = vmatmul.mubr.bf16.vlgmr.msra.gmra.mrb[88].mxu0 %v13245_v25 }
 0xc21   :  { %7567 = vmatpush1.bf16.msra.mxu1 %v7254_v15  ;;  %7640 = vmatpush1.bf16.msra.mxu0 %v7256_v13  ;;  %v7350_v15 = vld [vmem:[#allocation5 + $0x320] sm:$0xff]  ;;  %v7352_v13 = vld [vmem:[#allocation5 + $0x330] sm:$0xff] }
 0xc22   :  { %7568 = vmatprep.subr.bf16.mxu1 %v7263_v12  ;;  %7641 = vmatprep.subr.bf16.mxu0 %v7265_v36  ;;  %v7359_v12 = vld [vmem:[#allocation5 + $0x368] sm:$0xff]  ;;  %v7361_v36 = vld [vmem:[#allocation5 + $0x378] sm:$0xff] }
 0xc23   :  { %7462 = vmatprep.mubr.bf16.mxu1 %v13251_v44  ;;  %7535 = vmatprep.mubr.bf16.mxu0 %v13251_v44 }
 0xc25   :  { %7569 = vmatpush1.bf16.msra.mxu1 %v7262_v40  ;;  %7642 = vmatpush1.bf16.msra.mxu0 %v7264_v4  ;;  %v7367_v40 = vld [vmem:[#allocation5 + $0x3a8] sm:$0xff]  ;;  %v7369_v4 = vld [vmem:[#allocation5 + $0x3b8] sm:$0xff] }
 0xc26   :  { %7570 = vmatprep.subr.bf16.mxu1 %v7271_v20  ;;  %7643 = vmatprep.subr.bf16.mxu0 %v7273_v5  ;;  %v7366_v20 = vld [vmem:[#allocation5 + $0x3a0] sm:$0xff]  ;;  %v7368_v5 = vld [vmem:[#allocation5 + $0x3b0] sm:$0xff] }
 0xc28   :  { %7463 = vmatmul.mubr.bf16.gmra.mrb[84].mxu1 %v13259_v3  ;;  %7536 = vmatmul.mubr.bf16.gmra.mrb[92].mxu0 %v13259_v3 }
 0xc29   :  { %7571 = vmatpush1.bf16.msra.mxu1 %v7270_v27  ;;  %7644 = vmatpush1.bf16.msra.mxu0 %v7272_v58  ;;  %v7374_v27 = vld [vmem:[#allocation5 + $0x3e0] sm:$0xff]  ;;  %v7376_v58 = vld [vmem:[#allocation5 + $0x3f0] sm:$0xff] }
 0xc2a   :  { %7572 = vmatprep.subr.bf16.mxu1 %v7279_v45  ;;  %7645 = vmatprep.subr.bf16.mxu0 %v7281_v43  ;;  %v15006_v45 = vld [vmem:[#allocation57_spill] sm:$0xff] }
 0xc2b   :  { %7472 = vmatprep.mubr.bf16.mxu1 %v13265_v14  ;;  %7545 = vmatprep.mubr.bf16.mxu0 %v13265_v14 }
 0xc2d   :  { %7573 = vmatpush1.bf16.msra.mxu1 %v7278_v42  ;;  %7646 = vmatpush1.bf16.msra.mxu0 %v7280_v55 }
 0xc2e   :  { %7574 = vmatprep.subr.bf16.mxu1 %v7287_v21  ;;  %7647 = vmatprep.subr.bf16.mxu0 %v7289_v33 }
 0xc30   :  { %7473 = vmatmul.mubr.bf16.gmra.mrb[88].mxu1 %v13273_v48  ;;  %7546 = vmatmul.mubr.bf16.gmra.mrb[96].mxu0 %v13273_v48 }
 0xc31   :  { %7575 = vmatpush1.bf16.msra.mxu1 %v7286_v6  ;;  %7648 = vmatpush1.bf16.msra.mxu0 %v7288_v26 }
 0xc32   :  { %7576 = vmatprep.subr.bf16.mxu1 %v7295_v37  ;;  %7649 = vmatprep.subr.bf16.mxu0 %v7297_v38 }
 0xc33   :  { %7482 = vmatprep.mubr.bf16.mxu1 %v13279_v24  ;;  %7555 = vmatprep.mubr.bf16.mxu0 %v13279_v24 }
 0xc35   :  { %7577 = vmatpush1.bf16.msra.mxu1 %v7294_v46  ;;  %7650 = vmatpush1.bf16.msra.mxu0 %v7296_v7 }
 0xc36   :  { %7578 = vmatprep.subr.bf16.mxu1 %v7303_v9  ;;  %7651 = vmatprep.subr.bf16.mxu0 %v7305_v19 }
 0xc38   :  { %7483 = vmatmul.mubr.bf16.gmra.mrb[92].mxu1 %v13287_v32  ;;  %7556 = vmatmul.mubr.bf16.gmra.mrb[100].mxu0 %v13287_v32 }
 0xc39   :  { %7579 = vmatpush1.bf16.msra.mxu1 %v7302_v28  ;;  %7652 = vmatpush1.bf16.msra.mxu0 %v7304_v62 }
 0xc3a   :  { %7580 = vmatprep.subr.bf16.mxu1 %v7311_v51  ;;  %7653 = vmatprep.subr.bf16.mxu0 %v7313_v31 }
 0xc3b   :  { %7598 = vmatprep.mubr.bf16.mxu1 %v13239_v11  ;;  %7671 = vmatprep.mubr.bf16.mxu0 %v13239_v11  ;;  %v7334_v11 = vld [vmem:[#allocation5 + $0x2a0] sm:$0xff] }
 0xc3d   :  { %7581 = vmatpush1.bf16.msra.mxu1 %v7310_v30  ;;  %7654 = vmatpush1.bf16.msra.mxu0 %v7312_v35 }
 0xc3e   :  { %7582 = vmatprep.subr.bf16.mxu1 %v7319_v39  ;;  %7655 = vmatprep.subr.bf16.mxu0 %v7321_v16 }
 0xc41   :  { %7583 = vmatpush1.bf16.msra.mxu1 %v7318_v29  ;;  %7656 = vmatpush1.bf16.msra.mxu0 %v7320_v56 }
 0xc42   :  { %7584 = vmatprep.subr.bf16.mxu1 %v7327_v52  ;;  %7657 = vmatprep.subr.bf16.mxu0 %v7329_v49 }
 0xc45   :  { %7585 = vmatpush1.bf16.msra.mxu1 %v7326_v1  ;;  %7658 = vmatpush1.bf16.msra.mxu0 %v7328_v63 }
 0xc46   :  { %7586 = vmatprep.subr.bf16.mxu1 %v7335_v18  ;;  %7659 = vmatprep.subr.bf16.mxu0 %v7337_v23 }
 0xc49   :  { %7587 = vmatpush1.bf16.msra.mxu1 %v7334_v11  ;;  %7660 = vmatpush1.bf16.msra.mxu0 %v7336_v8 }
 0xc4a   :  { %7588 = vmatprep.subr.bf16.mxu1 %v7343_v2  ;;  %7661 = vmatprep.subr.bf16.mxu0 %v7345_v17 }
 0xc4d   :  { %7589 = vmatpush1.bf16.msra.mxu1 %v7342_v50  ;;  %7662 = vmatpush1.bf16.msra.mxu0 %v7344_v53 }
 0xc4e   :  { %7590 = vmatprep.subr.bf16.mxu1 %v7351_v41  ;;  %7663 = vmatprep.subr.bf16.mxu0 %v7353_v34 }
 0xc51   :  { %7591 = vmatpush1.bf16.msra.mxu1 %v7350_v15  ;;  %7664 = vmatpush1.bf16.msra.mxu0 %v7352_v13 }
 0xc52   :  { %7592 = vmatprep.subr.bf16.mxu1 %v7359_v12  ;;  %7665 = vmatprep.subr.bf16.mxu0 %v7361_v36 }
 0xc55   :  { %7593 = vmatpush1.bf16.msra.mxu1 %v7358_v60  ;;  %7666 = vmatpush1.bf16.msra.mxu0 %v7360_v10 }
 0xc56   :  { %7594 = vmatprep.subr.bf16.mxu1 %v7367_v40  ;;  %7667 = vmatprep.subr.bf16.mxu0 %v7369_v4 }
 0xc59   :  { %7595 = vmatpush1.bf16.msra.mxu1 %v7366_v20  ;;  %7668 = vmatpush1.bf16.msra.mxu0 %v7368_v5 }
 0xc5a   :  { %7596 = vmatprep.subr.bf16.mxu1 %v7375_v47  ;;  %7669 = vmatprep.subr.bf16.mxu0 %v7377_v61 }
 0xc5d   :  { %7597 = vmatpush1.bf16.msra.mxu1 %v7374_v27  ;;  %7670 = vmatpush1.bf16.msra.mxu0 %v7376_v58 }
 0xc60   :  { %7599 = vmatmul.mubr.bf16.vlgmr.msra.gmra.mrb[96].mxu1 %v13245_v25  ;;  %7672 = vmatmul.mubr.bf16.vlgmr.msra.gmra.mrb[104].mxu0 %v13245_v25  ;;  %v13310_v25 = vld [vmem:[%s14532_s9] sm:$0xff] }
 0xc61   :  { %7608 = vmatprep.mubr.bf16.mxu1 %v13251_v44  ;;  %7681 = vmatprep.mubr.bf16.mxu0 %v13251_v44  ;;  %v15005_v44 = vld [vmem:[#allocation56_spill] sm:$0xff]  ;;  %v7391_v43 = vrot.slane %v13310_v25, %v15006_v45  ;;  %v13318_v22 = vrot.slane %v13310_v25, %v15007_v0 }
 0xc68   :  { %7609 = vmatmul.mubr.bf16.gmra.mrb[100].mxu1 %v13259_v3  ;;  %7682 = vmatmul.mubr.bf16.gmra.mrb[108].mxu0 %v13259_v3  ;;  %v7383_v3 = vrot.slane %v13310_v25, %v15005_v44 }
 0xc69   :  { %7618 = vmatprep.mubr.bf16.mxu1 %v13265_v14  ;;  %7691 = vmatprep.mubr.bf16.mxu0 %v13265_v14  ;;  %v15008_v14 = vld [vmem:[#allocation59_spill] sm:$0xff] }
 0xc6a   :  { %v13322_v42 = vrot.slane %v13310_v25, %v15008_v14 }
 0xc70   :  { %7619 = vmatmul.mubr.bf16.gmra.mrb[104].mxu1 %v13273_v48  ;;  %7692 = vmatmul.mubr.bf16.gmra.mrb[112].mxu0 %v13273_v48 }
 0xc71   :  { %7628 = vmatprep.mubr.bf16.mxu1 %v13279_v24  ;;  %7701 = vmatprep.mubr.bf16.mxu0 %v13279_v24 }
 0xc78   :  { %7629 = vmatmul.mubr.bf16.gmra.mrb[108].mxu1 %v13287_v32  ;;  %7702 = vmatmul.mubr.bf16.gmra.mrb[116].mxu0 %v13287_v32 }
 0xcf3   :  { %v7454_v55 = vpop.f32.mrb[80].mxu1  ;;  %v7527_v21 = vpop.f32.mrb[88].mxu0 }
 0xcf4   :  { %v13324_v33 = vadd.f32 %v7454_v55, %v7383_v3  ;;  %v13326_v48 = vadd.f32 %v7527_v21, %v7391_v43  ;;  %v7456_v6 = vpop.f32.mrb[81].mxu1  ;;  %v7529_v26 = vpop.f32.mrb[89].mxu0 }
 0xcf5   :  { %v13329_v37 = vadd.f32 %v7456_v6, %v13318_v22  ;;  %v13332_v38 = vadd.f32 %v7529_v26, %v13322_v42  ;;  %v7458_v54 = vpop.f32.mrb[82].mxu1  ;;  %v7531_v57 = vpop.f32.mrb[90].mxu0 }
 0xcf6   :  { %15009 = vst [vmem:[#allocation108_spill] sm:$0xff] %v13324_v33  ;;  %15010 = vst [vmem:[#allocation78_spill] sm:$0xff] %v13326_v48  ;;  %v13334_v24 = vadd.f32 %v7458_v54, %v7383_v3  ;;  %v13336_v46 = vadd.f32 %v7531_v57, %v7391_v43  ;;  %v7460_v7 = vpop.f32.mrb[83].mxu1  ;;  %v7533_v9 = vpop.f32.mrb[91].mxu0 }
 0xcf7   :  { %15011 = vst [vmem:[#allocation79_spill] sm:$0xff] %v13329_v37  ;;  %15012 = vst [vmem:[#allocation80_spill] sm:$0xff] %v13332_v38  ;;  %v13339_v19 = vadd.f32 %v7460_v7, %v13318_v22  ;;  %v13342_v32 = vadd.f32 %v7533_v9, %v13322_v42  ;;  %v15041_v7 = vld [vmem:[#allocation55_spill] sm:$0xff] }
 0xcf8   :  { %15013 = vst [vmem:[#allocation82_spill] sm:$0xff] %v13334_v24  ;;  %15014 = vst [vmem:[#allocation73_spill] sm:$0xff] %v13336_v46  ;;  %v15042_v9 = vsub.s32 4, %v15041_v7 }
 0xcf9   :  { %15015 = vst [vmem:[#allocation75_spill] sm:$0xff] %v13339_v19  ;;  %15016 = vst [vmem:[#allocation76_spill] sm:$0xff] %v13342_v32 }
 0xcfb   :  { %v7464_v28 = vpop.f32.mrb[84].mxu1  ;;  %v7537_v62 = vpop.f32.mrb[92].mxu0 }
 0xcfc   :  { %v13344_v51 = vadd.f32 %v7464_v28, %v7383_v3  ;;  %v13346_v31 = vadd.f32 %v7537_v62, %v7391_v43  ;;  %v7466_v30 = vpop.f32.mrb[85].mxu1  ;;  %v7539_v35 = vpop.f32.mrb[93].mxu0  ;;  %v7399_v28 = vrot.slane %v13310_v25, %v15042_v9  ;;  %v15043_v62 = vsub.s32 6, %v15041_v7 }
 0xcfd   :  { %v13349_v39 = vadd.f32 %v7466_v30, %v13318_v22  ;;  %v13352_v16 = vadd.f32 %v7539_v35, %v13322_v42  ;;  %v7468_v29 = vpop.f32.mrb[86].mxu1  ;;  %v7541_v56 = vpop.f32.mrb[94].mxu0  ;;  %v15045_v35 = vsub.s32 7, %v15041_v7 }
 0xcfe   :  { %15017 = vst [vmem:[#allocation77_spill] sm:$0xff] %v13344_v51  ;;  %15018 = vst [vmem:[#allocation61_spill] sm:$0xff] %v13346_v31  ;;  %v13354_v52 = vadd.f32 %v7468_v29, %v7383_v3  ;;  %v13356_v49 = vadd.f32 %v7541_v56, %v7391_v43  ;;  %v7470_v1 = vpop.f32.mrb[87].mxu1  ;;  %v7543_v63 = vpop.f32.mrb[95].mxu0  ;;  %v7407_v30 = vrot.slane %v13310_v25, %v15043_v62 }
 0xcff   :  { %15019 = vst [vmem:[#allocation81_spill] sm:$0xff] %v13349_v39  ;;  %15020 = vst [vmem:[#allocation70_spill] sm:$0xff] %v13352_v16  ;;  %v13359_v18 = vadd.f32 %v7470_v1, %v13318_v22  ;;  %v13362_v23 = vadd.f32 %v7543_v63, %v13322_v42 }
 0xd00   :  { %15021 = vst [vmem:[#allocation71_spill] sm:$0xff] %v13354_v52  ;;  %15022 = vst [vmem:[#allocation72_spill] sm:$0xff] %v13356_v49 }
 0xd01   :  { %15023 = vst [vmem:[#allocation74_spill] sm:$0xff] %v13359_v18  ;;  %15024 = vst [vmem:[#allocation84_spill] sm:$0xff] %v13362_v23 }
 0xd03   :  { %v7474_v11 = vpop.f32.mrb[88].mxu1  ;;  %v7547_v8 = vpop.f32.mrb[96].mxu0 }
 0xd04   :  { %v13364_v2 = vadd.f32 %v7474_v11, %v7383_v3  ;;  %v13366_v17 = vadd.f32 %v7547_v8, %v7391_v43  ;;  %v7476_v50 = vpop.f32.mrb[89].mxu1  ;;  %v7549_v53 = vpop.f32.mrb[97].mxu0 }
 0xd05   :  { %v13369_v41 = vadd.f32 %v7476_v50, %v13318_v22  ;;  %v13372_v34 = vadd.f32 %v7549_v53, %v13322_v42  ;;  %v7478_v15 = vpop.f32.mrb[90].mxu1  ;;  %v7551_v13 = vpop.f32.mrb[98].mxu0 }
 0xd06   :  { %15025 = vst [vmem:[#allocation85_spill] sm:$0xff] %v13364_v2  ;;  %15026 = vst [vmem:[#allocation88_spill] sm:$0xff] %v13366_v17  ;;  %v13374_v12 = vadd.f32 %v7478_v15, %v7383_v3  ;;  %v13376_v36 = vadd.f32 %v7551_v13, %v7391_v43  ;;  %v7480_v60 = vpop.f32.mrb[91].mxu1  ;;  %v7553_v10 = vpop.f32.mrb[99].mxu0 }
 0xd07   :  { %15027 = vst [vmem:[#allocation89_spill] sm:$0xff] %v13369_v41  ;;  %15028 = vst [vmem:[#allocation90_spill] sm:$0xff] %v13372_v34  ;;  %v13379_v40 = vadd.f32 %v7480_v60, %v13318_v22  ;;  %v13382_v4 = vadd.f32 %v7553_v10, %v13322_v42 }
 0xd08   :  { %15029 = vst [vmem:[#allocation91_spill] sm:$0xff] %v13374_v12  ;;  %15030 = vst [vmem:[#allocation96_spill] sm:$0xff] %v13376_v36 }
 0xd09   :  { %15031 = vst [vmem:[#allocation92_spill] sm:$0xff] %v13379_v40  ;;  %15032 = vst [vmem:[#allocation93_spill] sm:$0xff] %v13382_v4 }
 0xd0b   :  { %v7484_v20 = vpop.f32.mrb[92].mxu1  ;;  %v7557_v5 = vpop.f32.mrb[100].mxu0 }
 0xd0c   :  { %v13384_v47 = vadd.f32 %v7484_v20, %v7383_v3  ;;  %v13386_v61 = vadd.f32 %v7557_v5, %v7391_v43  ;;  %v7486_v27 = vpop.f32.mrb[93].mxu1  ;;  %v7559_v58 = vpop.f32.mrb[101].mxu0 }
 0xd0d   :  { %v13389_v44 = vadd.f32 %v7486_v27, %v13318_v22  ;;  %v13392_v45 = vadd.f32 %v7559_v58, %v13322_v42  ;;  %v7488_v0 = vpop.f32.mrb[94].mxu1  ;;  %v7561_v14 = vpop.f32.mrb[102].mxu0 }
 0xd0e   :  { %15033 = vst [vmem:[#allocation94_spill] sm:$0xff] %v13384_v47  ;;  %15034 = vst [vmem:[#allocation95_spill] sm:$0xff] %v13386_v61  ;;  %v13394_v55 = vadd.f32 %v7488_v0, %v7383_v3  ;;  %v13396_v21 = vadd.f32 %v7561_v14, %v7391_v43  ;;  %v7490_v6 = vpop.f32.mrb[95].mxu1  ;;  %v7563_v26 = vpop.f32.mrb[103].mxu0  ;;  %v15044_v3 = vsub.s32 5, %v15041_v7 }
 0xd0f   :  { %15035 = vst [vmem:[#allocation97_spill] sm:$0xff] %v13389_v44  ;;  %15036 = vst [vmem:[#allocation98_spill] sm:$0xff] %v13392_v45  ;;  %v13399_v54 = vadd.f32 %v7490_v6, %v13318_v22  ;;  %v13402_v57 = vadd.f32 %v7563_v26, %v13322_v42  ;;  %v13418_v22 = vrot.slane %v13310_v25, %v15045_v35 }
 0xd10   :  { %15037 = vst [vmem:[#allocation99_spill] sm:$0xff] %v13394_v55  ;;  %15038 = vst [vmem:[#allocation100_spill] sm:$0xff] %v13396_v21  ;;  %v13413_v43 = vrot.slane %v13310_v25, %v15044_v3 }
 0xd11   :  { %15039 = vst [vmem:[#allocation101_spill] sm:$0xff] %v13399_v54  ;;  %15040 = vst [vmem:[#allocation102_spill] sm:$0xff] %v13402_v57 }
 0xd33   :  { %v7600_v42 = vpop.f32.mrb[96].mxu1  ;;  %v7673_v29 = vpop.f32.mrb[104].mxu0 }
 0xd34   :  { %v13420_v56 = vadd.f32 %v7600_v42, %v7399_v28  ;;  %v13422_v1 = vadd.f32 %v7673_v29, %v7407_v30  ;;  %v7602_v63 = vpop.f32.mrb[97].mxu1  ;;  %v7675_v11 = vpop.f32.mrb[105].mxu0 }
 0xd35   :  { %v13425_v8 = vadd.f32 %v7602_v63, %v13413_v43  ;;  %v13428_v50 = vadd.f32 %v7675_v11, %v13418_v22  ;;  %v7604_v53 = vpop.f32.mrb[98].mxu1  ;;  %v7677_v15 = vpop.f32.mrb[106].mxu0 }
 0xd36   :  { %15046 = vst [vmem:[#allocation103_spill] sm:$0xff] %v13420_v56  ;;  %15047 = vst [vmem:[#allocation104_spill] sm:$0xff] %v13422_v1  ;;  %v13430_v13 = vadd.f32 %v7604_v53, %v7399_v28  ;;  %v13432_v25 = vadd.f32 %v7677_v15, %v7407_v30  ;;  %v7606_v60 = vpop.f32.mrb[99].mxu1  ;;  %v7679_v10 = vpop.f32.mrb[107].mxu0 }
 0xd37   :  { %15048 = vst [vmem:[#allocation105_spill] sm:$0xff] %v13425_v8  ;;  %15049 = vst [vmem:[#allocation106_spill] sm:$0xff] %v13428_v50  ;;  %v13435_v20 = vadd.f32 %v7606_v60, %v13413_v43  ;;  %v13438_v5 = vadd.f32 %v7679_v10, %v13418_v22 }
 0xd38   :  { %15050 = vst [vmem:[#allocation65_spill] sm:$0xff] %v13430_v13  ;;  %15051 = vst [vmem:[#allocation67_spill] sm:$0xff] %v13432_v25 }
 0xd39   :  { %15052 = vst [vmem:[#allocation68_spill] sm:$0xff] %v13435_v20  ;;  %15053 = vst [vmem:[#allocation69_spill] sm:$0xff] %v13438_v5 }
 0xd3b   :  { %v7610_v27 = vpop.f32.mrb[100].mxu1  ;;  %v7683_v58 = vpop.f32.mrb[108].mxu0 }
 0xd3c   :  { %v13440_v0 = vadd.f32 %v7610_v27, %v7399_v28  ;;  %v13442_v14 = vadd.f32 %v7683_v58, %v7407_v30  ;;  %v7612_v6 = vpop.f32.mrb[101].mxu1  ;;  %v7685_v26 = vpop.f32.mrb[109].mxu0 }
 0xd3d   :  { %v13445_v9 = vadd.f32 %v7612_v6, %v13413_v43  ;;  %v13448_v62 = vadd.f32 %v7685_v26, %v13418_v22  ;;  %v7614_v3 = vpop.f32.mrb[102].mxu1  ;;  %v7687_v35 = vpop.f32.mrb[110].mxu0 }
 0xd3e   :  { %15054 = vst [vmem:[#allocation62_spill] sm:$0xff] %v13440_v0  ;;  %15055 = vst [vmem:[#allocation63_spill] sm:$0xff] %v13442_v14  ;;  %v13450_v42 = vadd.f32 %v7614_v3, %v7399_v28  ;;  %v13452_v29 = vadd.f32 %v7687_v35, %v7407_v30  ;;  %v7616_v63 = vpop.f32.mrb[103].mxu1  ;;  %v7689_v11 = vpop.f32.mrb[111].mxu0 }
 0xd3f   :  { %15056 = vst [vmem:[#allocation64_spill] sm:$0xff] %v13445_v9  ;;  %15057 = vst [vmem:[#allocation66_spill] sm:$0xff] %v13448_v62  ;;  %v13455_v53 = vadd.f32 %v7616_v63, %v13413_v43  ;;  %v13458_v15 = vadd.f32 %v7689_v11, %v13418_v22 }
 0xd40   :  { %15058 = vst [vmem:[#allocation86_spill] sm:$0xff] %v13450_v42  ;;  %15059 = vst [vmem:[#allocation109_spill] sm:$0xff] %v13452_v29 }
 0xd41   :  { %15060 = vst [vmem:[#allocation107_spill] sm:$0xff] %v13455_v53  ;;  %15061 = vst [vmem:[#allocation60_spill] sm:$0xff] %v13458_v15 }
 0xd43   :  { %v7620_v60 = vpop.f32.mrb[104].mxu1  ;;  %v7693_v10 = vpop.f32.mrb[112].mxu0 }
 0xd44   :  { %v13460_v27 = vadd.f32 %v7620_v60, %v7399_v28  ;;  %v13462_v58 = vadd.f32 %v7693_v10, %v7407_v30  ;;  %v7622_v6 = vpop.f32.mrb[105].mxu1  ;;  %v7695_v26 = vpop.f32.mrb[113].mxu0 }
 0xd45   :  { %v13465_v3 = vadd.f32 %v7622_v6, %v13413_v43  ;;  %v13468_v35 = vadd.f32 %v7695_v26, %v13418_v22  ;;  %v7624_v21 = vpop.f32.mrb[106].mxu1  ;;  %v7697_v63 = vpop.f32.mrb[114].mxu0 }
 0xd46   :  { %15062 = vst [vmem:[#allocation83_spill] sm:$0xff] %v13460_v27  ;;  %15063 = vst [vmem:[#allocation56_spill] sm:$0xff] %v13462_v58  ;;  %v13470_v1 = vadd.f32 %v7624_v21, %v7399_v28  ;;  %v13472_v11 = vadd.f32 %v7697_v63, %v7407_v30  ;;  %v7626_v57 = vpop.f32.mrb[107].mxu1  ;;  %v7699_v50 = vpop.f32.mrb[115].mxu0 }
 0xd47   :  { %15064 = vst [vmem:[#allocation57_spill] sm:$0xff] %v13465_v3  ;;  %15065 = vst [vmem:[#allocation58_spill] sm:$0xff] %v13468_v35  ;;  %v13475_v60 = vadd.f32 %v7626_v57, %v13413_v43  ;;  %v13478_v10 = vadd.f32 %v7699_v50, %v13418_v22 }
 0xd48   :  { %15066 = vst [vmem:[#allocation59_spill] sm:$0xff] %v13470_v1  ;;  %15067 = vst [vmem:[#allocation110_spill] sm:$0xff] %v13472_v11 }
 0xd49   :  { %15068 = vst [vmem:[#allocation111_spill] sm:$0xff] %v13475_v60  ;;  %15069 = vst [vmem:[#allocation112_spill] sm:$0xff] %v13478_v10 }
 0xd4b   :  { %v7630_v54 = vpop.f32.mrb[108].mxu1  ;;  %v7703_v6 = vpop.f32.mrb[116].mxu0 }
 0xd4c   :  { %v13480_v55 = vadd.f32 %v7630_v54, %v7399_v28  ;;  %v13482_v26 = vadd.f32 %v7703_v6, %v7407_v30  ;;  %v7632_v8 = vpop.f32.mrb[109].mxu1  ;;  %v7705_v56 = vpop.f32.mrb[117].mxu0 }
 0xd4d   :  { %v13485_v21 = vadd.f32 %v7632_v8, %v13413_v43  ;;  %v13488_v63 = vadd.f32 %v7705_v56, %v13418_v22  ;;  %v7634_v61 = vpop.f32.mrb[110].mxu1  ;;  %v7707_v57 = vpop.f32.mrb[118].mxu0 }
 0xd4e   :  { %15070 = vst [vmem:[#allocation113_spill] sm:$0xff] %v13480_v55  ;;  %15071 = vst [vmem:[#allocation114_spill] sm:$0xff] %v13482_v26  ;;  %v13490_v25 = vadd.f32 %v7634_v61, %v7399_v28  ;;  %v13492_v50 = vadd.f32 %v7707_v57, %v7407_v30  ;;  %v7636_v45 = vpop.f32.mrb[111].mxu1  ;;  %v7709_v5 = vpop.f32.mrb[119].mxu0 }
 0xd4f   :  { %15072 = vst [vmem:[#allocation115_spill] sm:$0xff] %v13485_v21  ;;  %15073 = vst [vmem:[#allocation116_spill] sm:$0xff] %v13488_v63  ;;  %v13495_v54 = vadd.f32 %v7636_v45, %v13413_v43  ;;  %v13498_v6 = vadd.f32 %v7709_v5, %v13418_v22 }
 0xd50   :  { %15074 = vst [vmem:[#allocation117_spill] sm:$0xff] %v13490_v25  ;;  %15075 = vst [vmem:[#allocation118_spill] sm:$0xff] %v13492_v50 }
 0xd51   :  { %15076 = vst [vmem:[#allocation119_spill] sm:$0xff] %v13495_v54  ;;  %15077 = vst [vmem:[#allocation120_spill] sm:$0xff] %v13498_v6 }
 0xd52   :  { %11235 = dma.done.wait [#allocation8 + $0x1], 8192 }
 0xd53   :  { %11236 = vsyncadd [#allocation8 + $0x1], 4294959104  ;;  %v15078_v8 = vmov 0   ;;  %v13502_v56 = vld [vmem:[#allocation6 + $0x8] sm:$0xff]  ;;  %v13504_v61 = vld [vmem:[#allocation6] sm:$0xff]  ;;  %vm8897_vm4 = vcmask 1041408  }
 0xd54   :  { %7891 = vmatprep.mubr.bf16.mxu1 %v15078_v8  ;;  %7932 = vmatprep.mubr.bf16.mxu0 %v15078_v8  ;;  %15079 = vst [vmem:[#allocation121_spill] sm:$0xff] %v13502_v56  ;;  %v13506_v28 = vld [vmem:[#allocation6 + $0x28] sm:$0xff]  ;;  %v13510_v45 = vld [vmem:[#allocation6 + $0x18] sm:$0xff]  ;;  %v13513_v30 = vld [vmem:[#allocation6 + $0x20] sm:$0xff]  ;;  %vm8898_vm5 = vcmask 1042432   ;;  %vm11268_vm6 = vmmov 0  }
 0xd55   :  { %7859 = vmatprep.subr.bf16.mxu1 %v13502_v56  ;;  %15080 = vst [vmem:[#allocation122_spill] sm:$0xff] %v13510_v45  ;;  %7900 = vmatprep.subr.bf16.mxu0 %v13510_v45  ;;  %v13516_v43 = vld [vmem:[#allocation6 + $0x10] sm:$0xff]  ;;  %v13518_v22 = vld [vmem:[#allocation6 + $0x38] sm:$0xff]  ;;  %v13520_v5 = vld [vmem:[#allocation6 + $0x48] sm:$0xff]  ;;  %s15300_s28 = sld [smem:[#allocation146_spill]]  ;;  %vm8893_vm7 = vcmask 39936  }
 0xd56   :  { %7860 = vmatpush1.bf16.msra.mxu1 %v13504_v61  ;;  %7901 = vmatpush1.bf16.msra.mxu0 %v13516_v43  ;;  %v13524_v57 = vld [vmem:[#allocation6 + $0x30] sm:$0xff]  ;;  %v13527_v44 = vld [vmem:[#allocation6 + $0x58] sm:$0xff]  ;;  %v13530_v47 = vld [vmem:[#allocation6 + $0x40] sm:$0xff]  ;;  %vm8985_vm8 = vcmask 523264  }
 0xd57   :  { %7861 = vmatprep.subr.bf16.mxu1 %v13506_v28  ;;  %7902 = vmatprep.subr.bf16.mxu0 %v13518_v22  ;;  %v13532_v20 = vld [vmem:[#allocation6 + $0x68] sm:$0xff]  ;;  %v13536_v13 = vld [vmem:[#allocation6 + $0x50] sm:$0xff]  ;;  %v13539_v36 = vld [vmem:[#allocation6 + $0x78] sm:$0xff] }
 0xd58   :  { %v13542_v14 = vld [vmem:[#allocation6 + $0x60] sm:$0xff]  ;;  %v13544_v4 = vld [vmem:[#allocation6 + $0x88] sm:$0xff]  ;;  %v13548_v62 = vld [vmem:[#allocation6 + $0x70] sm:$0xff] }
 0xd59   :  { %v13551_v40 = vld [vmem:[#allocation6 + $0x98] sm:$0xff]  ;;  %v13554_v12 = vld [vmem:[#allocation6 + $0x80] sm:$0xff]  ;;  %v13556_v9 = vld [vmem:[#allocation6 + $0xa8] sm:$0xff] }
 0xd5a   :  { %7862 = vmatpush1.bf16.msra.mxu1 %v13513_v30  ;;  %7903 = vmatpush1.bf16.msra.mxu0 %v13524_v57  ;;  %v13560_v0 = vld [vmem:[#allocation6 + $0x90] sm:$0xff]  ;;  %v13563_v17 = vld [vmem:[#allocation6 + $0xb8] sm:$0xff]  ;;  %v13566_v29 = vld [vmem:[#allocation6 + $0xa0] sm:$0xff] }
 0xd5b   :  { %7863 = vmatprep.subr.bf16.mxu1 %v13520_v5  ;;  %7904 = vmatprep.subr.bf16.mxu0 %v13527_v44  ;;  %v13568_v34 = vld [vmem:[#allocation6 + $0xc8] sm:$0xff]  ;;  %v13571_v15 = vld [vmem:[#allocation6 + $0xb0] sm:$0xff]  ;;  %v13573_v41 = vld [vmem:[#allocation6 + $0xc0] sm:$0xff] }
 0xd5c   :  { %v13576_v2 = vld [vmem:[#allocation6 + $0xd8] sm:$0xff]  ;;  %v13580_v53 = vld [vmem:[#allocation6 + $0xe8] sm:$0xff]  ;;  %v13584_v42 = vld [vmem:[#allocation6 + $0xd0] sm:$0xff] }
 0xd5d   :  { %v13587_v49 = vld [vmem:[#allocation6 + $0xf8] sm:$0xff]  ;;  %v13590_v58 = vld [vmem:[#allocation6 + $0xe0] sm:$0xff]  ;;  %v13592_v23 = vld [vmem:[#allocation6 + $0x108] sm:$0xff] }
 0xd5e   :  { %7864 = vmatpush1.bf16.msra.mxu1 %v13530_v47  ;;  %7905 = vmatpush1.bf16.msra.mxu0 %v13536_v13  ;;  %v13596_v35 = vld [vmem:[#allocation6 + $0xf0] sm:$0xff]  ;;  %v13599_v18 = vld [vmem:[#allocation6 + $0x118] sm:$0xff]  ;;  %v13602_v52 = vld [vmem:[#allocation6 + $0x100] sm:$0xff] }
 0xd5f   :  { %7865 = vmatprep.subr.bf16.mxu1 %v13532_v20  ;;  %7906 = vmatprep.subr.bf16.mxu0 %v13539_v36  ;;  %v13604_v3 = vld [vmem:[#allocation6 + $0x128] sm:$0xff]  ;;  %v13608_v27 = vld [vmem:[#allocation6 + $0x110] sm:$0xff]  ;;  %v13611_v31 = vld [vmem:[#allocation6 + $0x138] sm:$0xff] }
 0xd60   :  { %v13614_v11 = vld [vmem:[#allocation6 + $0x120] sm:$0xff]  ;;  %v13616_v16 = vld [vmem:[#allocation6 + $0x148] sm:$0xff]  ;;  %v13620_v10 = vld [vmem:[#allocation6 + $0x130] sm:$0xff] }
 0xd61   :  { %v13623_v39 = vld [vmem:[#allocation6 + $0x158] sm:$0xff]  ;;  %v13626_v51 = vld [vmem:[#allocation6 + $0x140] sm:$0xff]  ;;  %v13628_v60 = vld [vmem:[#allocation6 + $0x168] sm:$0xff] }
 0xd62   :  { %7866 = vmatpush1.bf16.msra.mxu1 %v13542_v14  ;;  %7907 = vmatpush1.bf16.msra.mxu0 %v13548_v62  ;;  %15081 = vst [vmem:[#allocation123_spill] sm:$0xff] %v13626_v51  ;;  %15082 = vst [vmem:[#allocation124_spill] sm:$0xff] %v13628_v60  ;;  %v13632_v1 = vld [vmem:[#allocation6 + $0x150] sm:$0xff]  ;;  %v13635_v46 = vld [vmem:[#allocation6 + $0x178] sm:$0xff] }
 0xd63   :  { %7867 = vmatprep.subr.bf16.mxu1 %v13544_v4  ;;  %7908 = vmatprep.subr.bf16.mxu0 %v13551_v40  ;;  %15083 = vst [vmem:[#allocation125_spill] sm:$0xff] %v13632_v1  ;;  %15084 = vst [vmem:[#allocation126_spill] sm:$0xff] %v13635_v46  ;;  %v13638_v26 = vld [vmem:[#allocation6 + $0x160] sm:$0xff]  ;;  %v13640_v32 = vld [vmem:[#allocation6 + $0x188] sm:$0xff] }
 0xd64   :  { %15085 = vst [vmem:[#allocation127_spill] sm:$0xff] %v13638_v26  ;;  %15086 = vst [vmem:[#allocation128_spill] sm:$0xff] %v13640_v32  ;;  %v13644_v63 = vld [vmem:[#allocation6 + $0x170] sm:$0xff]  ;;  %v13647_v19 = vld [vmem:[#allocation6 + $0x198] sm:$0xff] }
 0xd65   :  { %15087 = vst [vmem:[#allocation129_spill] sm:$0xff] %v13644_v63  ;;  %15088 = vst [vmem:[#allocation130_spill] sm:$0xff] %v13647_v19  ;;  %v13650_v24 = vld [vmem:[#allocation6 + $0x180] sm:$0xff]  ;;  %v13652_v21 = vld [vmem:[#allocation6 + $0x1a8] sm:$0xff] }
 0xd66   :  { %7868 = vmatpush1.bf16.msra.mxu1 %v13554_v12  ;;  %7909 = vmatpush1.bf16.msra.mxu0 %v13560_v0  ;;  %15089 = vst [vmem:[#allocation131_spill] sm:$0xff] %v13650_v24  ;;  %15090 = vst [vmem:[#allocation132_spill] sm:$0xff] %v13652_v21  ;;  %v13656_v55 = vld [vmem:[#allocation6 + $0x190] sm:$0xff]  ;;  %v13659_v59 = vld [vmem:[#allocation6 + $0x1b8] sm:$0xff] }
 0xd67   :  { %7869 = vmatprep.subr.bf16.mxu1 %v13556_v9  ;;  %7910 = vmatprep.subr.bf16.mxu0 %v13563_v17  ;;  %15091 = vst [vmem:[#allocation133_spill] sm:$0xff] %v13656_v55  ;;  %15092 = vst [vmem:[#allocation134_spill] sm:$0xff] %v13659_v59  ;;  %v13662_v48 = vld [vmem:[#allocation6 + $0x1a0] sm:$0xff]  ;;  %v13664_v50 = vld [vmem:[#allocation6 + $0x1c8] sm:$0xff] }
 0xd68   :  { %15093 = vst [vmem:[#allocation135_spill] sm:$0xff] %v13662_v48  ;;  %15094 = vst [vmem:[#allocation136_spill] sm:$0xff] %v13664_v50  ;;  %v13668_v38 = vld [vmem:[#allocation6 + $0x1b0] sm:$0xff]  ;;  %v13671_v6 = vld [vmem:[#allocation6 + $0x1d8] sm:$0xff] }
 0xd69   :  { %15095 = vst [vmem:[#allocation137_spill] sm:$0xff] %v13668_v38  ;;  %15096 = vst [vmem:[#allocation138_spill] sm:$0xff] %v13671_v6  ;;  %v13674_v37 = vld [vmem:[#allocation6 + $0x1c0] sm:$0xff]  ;;  %v13676_v7 = vld [vmem:[#allocation6 + $0x1e8] sm:$0xff] }
 0xd6a   :  { %7870 = vmatpush1.bf16.msra.mxu1 %v13566_v29  ;;  %7911 = vmatpush1.bf16.msra.mxu0 %v13571_v15  ;;  %15097 = vst [vmem:[#allocation139_spill] sm:$0xff] %v13674_v37  ;;  %15098 = vst [vmem:[#allocation140_spill] sm:$0xff] %v13676_v7  ;;  %v13680_v33 = vld [vmem:[#allocation6 + $0x1d0] sm:$0xff]  ;;  %v13683_v54 = vld [vmem:[#allocation6 + $0x1f8] sm:$0xff] }
 0xd6b   :  { %7871 = vmatprep.subr.bf16.mxu1 %v13568_v34  ;;  %7912 = vmatprep.subr.bf16.mxu0 %v13576_v2  ;;  %15099 = vst [vmem:[#allocation141_spill] sm:$0xff] %v13680_v33  ;;  %15100 = vst [vmem:[#allocation142_spill] sm:$0xff] %v13683_v54  ;;  %v13686_v25 = vld [vmem:[#allocation6 + $0x1e0] sm:$0xff] }
 0xd6c   :  { %15101 = vst [vmem:[#allocation143_spill] sm:$0xff] %v13686_v25 }
 0xd6e   :  { %7872 = vmatpush1.bf16.msra.mxu1 %v13573_v41  ;;  %7913 = vmatpush1.bf16.msra.mxu0 %v13584_v42 }
 0xd6f   :  { %7873 = vmatprep.subr.bf16.mxu1 %v13580_v53  ;;  %7914 = vmatprep.subr.bf16.mxu0 %v13587_v49 }
 0xd72   :  { %7874 = vmatpush1.bf16.msra.mxu1 %v13590_v58  ;;  %7915 = vmatpush1.bf16.msra.mxu0 %v13596_v35 }
 0xd73   :  { %7875 = vmatprep.subr.bf16.mxu1 %v13592_v23  ;;  %7916 = vmatprep.subr.bf16.mxu0 %v13599_v18 }
 0xd76   :  { %7876 = vmatpush1.bf16.msra.mxu1 %v13602_v52  ;;  %7917 = vmatpush1.bf16.msra.mxu0 %v13608_v27 }
 0xd77   :  { %7877 = vmatprep.subr.bf16.mxu1 %v13604_v3  ;;  %7918 = vmatprep.subr.bf16.mxu0 %v13611_v31 }
 0xd7a   :  { %7878 = vmatpush1.bf16.msra.mxu1 %v13614_v11  ;;  %7919 = vmatpush1.bf16.msra.mxu0 %v13620_v10 }
 0xd7b   :  { %7879 = vmatprep.subr.bf16.mxu1 %v13616_v16  ;;  %7920 = vmatprep.subr.bf16.mxu0 %v13623_v39 }
 0xd7e   :  { %7880 = vmatpush1.bf16.msra.mxu1 %v13626_v51  ;;  %7921 = vmatpush1.bf16.msra.mxu0 %v13632_v1 }
 0xd7f   :  { %7881 = vmatprep.subr.bf16.mxu1 %v13628_v60  ;;  %7922 = vmatprep.subr.bf16.mxu0 %v13635_v46 }
 0xd82   :  { %7882 = vmatpush1.bf16.msra.mxu1 %v13638_v26  ;;  %7923 = vmatpush1.bf16.msra.mxu0 %v13644_v63 }
 0xd83   :  { %7883 = vmatprep.subr.bf16.mxu1 %v13640_v32  ;;  %7924 = vmatprep.subr.bf16.mxu0 %v13647_v19 }
 0xd86   :  { %7884 = vmatpush1.bf16.msra.mxu1 %v13650_v24  ;;  %7925 = vmatpush1.bf16.msra.mxu0 %v13656_v55 }
 0xd87   :  { %7885 = vmatprep.subr.bf16.mxu1 %v13652_v21  ;;  %7926 = vmatprep.subr.bf16.mxu0 %v13659_v59 }
 0xd8a   :  { %7886 = vmatpush1.bf16.msra.mxu1 %v13662_v48  ;;  %7927 = vmatpush1.bf16.msra.mxu0 %v13668_v38 }
 0xd8b   :  { %7887 = vmatprep.subr.bf16.mxu1 %v13664_v50  ;;  %7928 = vmatprep.subr.bf16.mxu0 %v13671_v6  ;;  %v13690_v50 = vld [vmem:[#allocation6 + $0x1f0] sm:$0xff] }
 0xd8c   :  { %15102 = vst [vmem:[#allocation144_spill] sm:$0xff] %v13690_v50 }
 0xd8e   :  { %7888 = vmatpush1.bf16.msra.mxu1 %v13674_v37  ;;  %7929 = vmatpush1.bf16.msra.mxu0 %v13680_v33 }
 0xd8f   :  { %7889 = vmatprep.subr.bf16.mxu1 %v13676_v7  ;;  %7930 = vmatprep.subr.bf16.mxu0 %v13683_v54 }
 0xd92   :  { %7890 = vmatpush1.bf16.msra.mxu1 %v13686_v25  ;;  %7931 = vmatpush1.bf16.msra.mxu0 %v13690_v50 }
 0xd93   :  { %7989 = vmatprep.subr.bf16.mxu1 %v13502_v56  ;;  %8030 = vmatprep.subr.bf16.mxu0 %v13510_v45 }
 0xd95   :  { %7892 = vmatmul.mubr.bf16.vlgmr.msra.gmra.mrb[112].mxu1 %v15078_v8  ;;  %7933 = vmatmul.mubr.bf16.vlgmr.msra.gmra.mrb[120].mxu0 %v15078_v8  ;;  %v15103_v8 = vld [vmem:[#allocation136_spill] sm:$0xff] }
 0xd96   :  { %7990 = vmatpush1.bf16.msra.mxu1 %v13504_v61  ;;  %8031 = vmatpush1.bf16.msra.mxu0 %v13516_v43 }
 0xd97   :  { %7991 = vmatprep.subr.bf16.mxu1 %v13506_v28  ;;  %8032 = vmatprep.subr.bf16.mxu0 %v13518_v22 }
 0xd9a   :  { %7992 = vmatpush1.bf16.msra.mxu1 %v13513_v30  ;;  %8033 = vmatpush1.bf16.msra.mxu0 %v13524_v57 }
 0xd9b   :  { %7993 = vmatprep.subr.bf16.mxu1 %v13520_v5  ;;  %8034 = vmatprep.subr.bf16.mxu0 %v13527_v44 }
 0xd9e   :  { %7994 = vmatpush1.bf16.msra.mxu1 %v13530_v47  ;;  %8035 = vmatpush1.bf16.msra.mxu0 %v13536_v13 }
 0xd9f   :  { %7995 = vmatprep.subr.bf16.mxu1 %v13532_v20  ;;  %8036 = vmatprep.subr.bf16.mxu0 %v13539_v36 }
 0xda2   :  { %7996 = vmatpush1.bf16.msra.mxu1 %v13542_v14  ;;  %8037 = vmatpush1.bf16.msra.mxu0 %v13548_v62 }
 0xda3   :  { %7997 = vmatprep.subr.bf16.mxu1 %v13544_v4  ;;  %8038 = vmatprep.subr.bf16.mxu0 %v13551_v40 }
 0xda6   :  { %7998 = vmatpush1.bf16.msra.mxu1 %v13554_v12  ;;  %8039 = vmatpush1.bf16.msra.mxu0 %v13560_v0 }
 0xda7   :  { %7999 = vmatprep.subr.bf16.mxu1 %v13556_v9  ;;  %8040 = vmatprep.subr.bf16.mxu0 %v13563_v17 }
 0xdaa   :  { %8000 = vmatpush1.bf16.msra.mxu1 %v13566_v29  ;;  %8041 = vmatpush1.bf16.msra.mxu0 %v13571_v15 }
 0xdab   :  { %8001 = vmatprep.subr.bf16.mxu1 %v13568_v34  ;;  %8042 = vmatprep.subr.bf16.mxu0 %v13576_v2 }
 0xdae   :  { %8002 = vmatpush1.bf16.msra.mxu1 %v13573_v41  ;;  %8043 = vmatpush1.bf16.msra.mxu0 %v13584_v42 }
 0xdaf   :  { %8003 = vmatprep.subr.bf16.mxu1 %v13580_v53  ;;  %8044 = vmatprep.subr.bf16.mxu0 %v13587_v49 }
 0xdb2   :  { %8004 = vmatpush1.bf16.msra.mxu1 %v13590_v58  ;;  %8045 = vmatpush1.bf16.msra.mxu0 %v13596_v35 }
 0xdb3   :  { %8005 = vmatprep.subr.bf16.mxu1 %v13592_v23  ;;  %8046 = vmatprep.subr.bf16.mxu0 %v13599_v18 }
 0xdb6   :  { %8006 = vmatpush1.bf16.msra.mxu1 %v13602_v52  ;;  %8047 = vmatpush1.bf16.msra.mxu0 %v13608_v27 }
 0xdb7   :  { %8007 = vmatprep.subr.bf16.mxu1 %v13604_v3  ;;  %8048 = vmatprep.subr.bf16.mxu0 %v13611_v31 }
 0xdba   :  { %8008 = vmatpush1.bf16.msra.mxu1 %v13614_v11  ;;  %8049 = vmatpush1.bf16.msra.mxu0 %v13620_v10 }
 0xdbb   :  { %8009 = vmatprep.subr.bf16.mxu1 %v13616_v16  ;;  %8050 = vmatprep.subr.bf16.mxu0 %v13623_v39 }
 0xdbe   :  { %8010 = vmatpush1.bf16.msra.mxu1 %v13626_v51  ;;  %8051 = vmatpush1.bf16.msra.mxu0 %v13632_v1 }
 0xdbf   :  { %8011 = vmatprep.subr.bf16.mxu1 %v13628_v60  ;;  %8052 = vmatprep.subr.bf16.mxu0 %v13635_v46  ;;  %v15111_v46 = vld [vmem:[#allocation118_spill] sm:$0xff] }
 0xdc2   :  { %8012 = vmatpush1.bf16.msra.mxu1 %v13638_v26  ;;  %8053 = vmatpush1.bf16.msra.mxu0 %v13644_v63  ;;  %v15110_v26 = vld [vmem:[#allocation80_spill] sm:$0xff] }
 0xdc3   :  { %8013 = vmatprep.subr.bf16.mxu1 %v13640_v32  ;;  %8054 = vmatprep.subr.bf16.mxu0 %v13647_v19 }
 0xdc6   :  { %8014 = vmatpush1.bf16.msra.mxu1 %v13650_v24  ;;  %8055 = vmatpush1.bf16.msra.mxu0 %v13656_v55 }
 0xdc7   :  { %8015 = vmatprep.subr.bf16.mxu1 %v13652_v21  ;;  %8056 = vmatprep.subr.bf16.mxu0 %v13659_v59  ;;  %v15106_v59 = vld [vmem:[#allocation108_spill] sm:$0xff]  ;;  %v15108_v21 = vld [vmem:[#allocation79_spill] sm:$0xff] }
 0xdca   :  { %8016 = vmatpush1.bf16.msra.mxu1 %v13662_v48  ;;  %8057 = vmatpush1.bf16.msra.mxu0 %v13668_v38  ;;  %v15105_v48 = vld [vmem:[#allocation119_spill] sm:$0xff] }
 0xdcb   :  { %8017 = vmatprep.subr.bf16.mxu1 %v15103_v8  ;;  %8058 = vmatprep.subr.bf16.mxu0 %v13671_v6  ;;  %v15104_v8 = vld [vmem:[#allocation117_spill] sm:$0xff]  ;;  %v7788_v6 = vrot.slane %v15105_v48, 4 }
 0xdcc   :  { %v7787_v38 = vrot.slane %v15104_v8, 4 }
 0xdce   :  { %8018 = vmatpush1.bf16.msra.mxu1 %v13674_v37  ;;  %8059 = vmatpush1.bf16.msra.mxu0 %v13680_v33 }
 0xdcf   :  { %8019 = vmatprep.subr.bf16.mxu1 %v13676_v7  ;;  %8060 = vmatprep.subr.bf16.mxu0 %v13683_v54  ;;  %v7791_v7 = vsel %vm3095_vm2, %v15106_v59, %v7787_v38  ;;  %v7792_v54 = vsel %vm3095_vm2, %v15108_v21, %v7788_v6  ;;  %v7789_v21 = vrot.slane %v15111_v46, 4 }
 0xdd2   :  { %8020 = vmatpush1.bf16.msra.mxu1 %v13686_v25  ;;  %8061 = vmatpush1.bf16.msra.mxu0 %v13690_v50  ;;  %v15109_v25 = vld [vmem:[#allocation120_spill] sm:$0xff] }
 0xdd3   :  { %8119 = vmatprep.subr.bf16.mxu1 %v13502_v56  ;;  %8160 = vmatprep.subr.bf16.mxu0 %v13510_v45  ;;  %v7790_v55 = vrot.slane %v15109_v25, 4 }
 0xdd5   :  { %v7794_v59 = vsel %vm3095_vm2, %v15110_v26, %v7790_v55 }
 0xe68   :  { %v7893_v33 = vpop.f32.mrb[112].mxu1  ;;  %v7934_v45 = vpop.f32.mrb[120].mxu0 }
 0xe69   :  { %v7941_v56 = vadd.f32 %v7893_v33, %v7791_v7  ;;  %v7895_v24 = vpop.f32.mrb[113].mxu1  ;;  %v7936_v63 = vpop.f32.mrb[121].mxu0  ;;  %v15112_v33 = vld [vmem:[#allocation78_spill] sm:$0xff] }
 0xe6a   :  { %v7942_v50 = vadd.f32 %v7895_v24, %v7792_v54  ;;  %v7897_v19 = vpop.f32.mrb[114].mxu1  ;;  %v7938_v38 = vpop.f32.mrb[122].mxu0  ;;  %v7944_v25 = vadd.f32 %v7936_v63, %v7794_v59  ;;  %v7793_v24 = vsel %vm3095_vm2, %v15112_v33, %v7789_v21  ;;  %v10801_v33 = vld [vmem:[#allocation19] sm:$0xff]  }
 0xe6b   :  { %v10049_v32 = vmul.f32 -1.442695, %v7941_v56  ;;  %v7898_v8 = vpop.f32.mrb[115].mxu1  ;;  %v7939_v6 = vpop.f32.mrb[123].mxu0  ;;  %v7943_v7 = vadd.f32 %v7934_v45, %v7793_v24 }
 0xe6c   :  { %v10050_v48 = vmul.f32 -1.442695, %v7942_v50  ;;  %v10051_v19 = vmul.f32 -1.442695, %v7944_v25 }
 0xe6d   :  { %10805 = vpow2.f32 %v10049_v32 }
 0xe6e   :  { %10807 = vpow2.f32 %v10050_v48 }
 0xe6f   :  { %10809 = vpow2.f32 %v10051_v19 }
 0xe70   :  { %10811 = vtanh.f32 %v7943_v7  ;;  %v15115_v7 = vld [vmem:[#allocation126_spill] sm:$0xff] }
 0xe77   :  { %v10806_v54 = vpop.eup %10805 }
 0xe78   :  { %v10808_v50 = vpop.eup %10807  ;;  %v7948_v56 = vadd.f32 1.0, %v10806_v54  ;;  %v15116_v54 = vld [vmem:[#allocation127_spill] sm:$0xff] }
 0xe79   :  { %v7954_v8 = vadd.f32 1.0, %v10808_v50  ;;  %v10810_v32 = vpop.eup %10809  ;;  %v15117_v50 = vld [vmem:[#allocation129_spill] sm:$0xff] }
 0xe7a   :  { %10813 = vrcp.f32 %v7948_v56  ;;  %v10812_v55 = vpop.eup %10811  ;;  %v7961_v26 = vadd.f32 1.0, %v10810_v32  ;;  %v15118_v56 = vld [vmem:[#allocation128_spill] sm:$0xff]  ;;  %v15120_v32 = vld [vmem:[#allocation131_spill] sm:$0xff] }
 0xe7b   :  { %10815 = vrcp.f32 %v7954_v8  ;;  %v15119_v8 = vld [vmem:[#allocation130_spill] sm:$0xff] }
 0xe7c   :  { %10817 = vrcp.f32 %v7961_v26  ;;  %v15123_v26 = vld [vmem:[#allocation134_spill] sm:$0xff] }
 0xe84   :  { %v10814_v46 = vpop.eup %10813 }
 0xe85   :  { %v10816_v48 = vpop.eup %10815  ;;  %v7965_v63 = vmul.f32 %v10814_v46, %v10812_v55  ;;  %v15121_v55 = vld [vmem:[#allocation133_spill] sm:$0xff]  ;;  %v15122_v46 = vld [vmem:[#allocation132_spill] sm:$0xff] }
 0xe86   :  { %v7964_v59 = vmul.f32 0.0, %v10816_v48  ;;  %v10818_v45 = vpop.eup %10817  ;;  %v15124_v48 = vld [vmem:[#allocation135_spill] sm:$0xff] }
 0xe88   :  { %v13778_v38 = vadd.f32 %v7965_v63, %v7964_v59  ;;  %v15125_v63 = vld [vmem:[#allocation137_spill] sm:$0xff]  ;;  %v15126_v59 = vld [vmem:[#allocation136_spill] sm:$0xff] }
 0xe8a   :  { %10819 = vtanh.f32 %v13778_v38 }
 0xe94   :  { %v10820_v21 = vpop.eup %10819 }
 0xe95   :  { %v13781_v6 = vmul.f32 %v10820_v21, %v10818_v45  ;;  %v15127_v45 = vld [vmem:[#allocation138_spill] sm:$0xff]  ;;  %v15128_v21 = vld [vmem:[#allocation139_spill] sm:$0xff] }
 0xe97   :  { %15113 = vst [vmem:[#allocation117_spill] sm:$0xff] %v13781_v6  ;;  %v7986_v25 = vpack.c.bf16 %v13781_v6, %v13781_v6  ;;  %v15132_v6 = vld [vmem:[#allocation143_spill] sm:$0xff] }
 0xe99   :  { %v7988_v24 = vsel %vm12488_vm3, 0, %v7986_v25  ;;  %v7987_v19 = vsel %vm12488_vm3, %v7986_v25, 0  ;;  %v15129_v25 = vld [vmem:[#allocation141_spill] sm:$0xff] }
 0xe9a   :  { %8021 = vmatprep.mubr.bf16.mxu1 %v7988_v24  ;;  %8062 = vmatprep.mubr.bf16.mxu0 %v7988_v24  ;;  %v15130_v24 = vld [vmem:[#allocation140_spill] sm:$0xff] }
 0xe9b   :  { %8022 = vmatmul.mubr.bf16.vlgmr.msra.gmra.mrb[116].mxu1 %v7987_v19  ;;  %8063 = vmatmul.mubr.bf16.vlgmr.msra.gmra.mrb[124].mxu0 %v7987_v19  ;;  %v15131_v19 = vld [vmem:[#allocation142_spill] sm:$0xff] }
 0xe9c   :  { %8120 = vmatpush1.bf16.msra.mxu1 %v13504_v61  ;;  %8161 = vmatpush1.bf16.msra.mxu0 %v13516_v43 }
 0xe9d   :  { %8121 = vmatprep.subr.bf16.mxu1 %v13506_v28  ;;  %8162 = vmatprep.subr.bf16.mxu0 %v13518_v22 }
 0xea0   :  { %8122 = vmatpush1.bf16.msra.mxu1 %v13513_v30  ;;  %8163 = vmatpush1.bf16.msra.mxu0 %v13524_v57 }
 0xea1   :  { %8123 = vmatprep.subr.bf16.mxu1 %v13520_v5  ;;  %8164 = vmatprep.subr.bf16.mxu0 %v13527_v44 }
 0xea4   :  { %8124 = vmatpush1.bf16.msra.mxu1 %v13530_v47  ;;  %8165 = vmatpush1.bf16.msra.mxu0 %v13536_v13 }
 0xea5   :  { %8125 = vmatprep.subr.bf16.mxu1 %v13532_v20  ;;  %8166 = vmatprep.subr.bf16.mxu0 %v13539_v36 }
 0xea8   :  { %8126 = vmatpush1.bf16.msra.mxu1 %v13542_v14  ;;  %8167 = vmatpush1.bf16.msra.mxu0 %v13548_v62 }
 0xea9   :  { %8127 = vmatprep.subr.bf16.mxu1 %v13544_v4  ;;  %8168 = vmatprep.subr.bf16.mxu0 %v13551_v40 }
 0xeac   :  { %8128 = vmatpush1.bf16.msra.mxu1 %v13554_v12  ;;  %8169 = vmatpush1.bf16.msra.mxu0 %v13560_v0 }
 0xead   :  { %8129 = vmatprep.subr.bf16.mxu1 %v13556_v9  ;;  %8170 = vmatprep.subr.bf16.mxu0 %v13563_v17 }
 0xeb0   :  { %8130 = vmatpush1.bf16.msra.mxu1 %v13566_v29  ;;  %8171 = vmatpush1.bf16.msra.mxu0 %v13571_v15 }
 0xeb1   :  { %8131 = vmatprep.subr.bf16.mxu1 %v13568_v34  ;;  %8172 = vmatprep.subr.bf16.mxu0 %v13576_v2 }
 0xeb4   :  { %8132 = vmatpush1.bf16.msra.mxu1 %v13573_v41  ;;  %8173 = vmatpush1.bf16.msra.mxu0 %v13584_v42 }
 0xeb5   :  { %8133 = vmatprep.subr.bf16.mxu1 %v13580_v53  ;;  %8174 = vmatprep.subr.bf16.mxu0 %v13587_v49 }
 0xeb8   :  { %8134 = vmatpush1.bf16.msra.mxu1 %v13590_v58  ;;  %8175 = vmatpush1.bf16.msra.mxu0 %v13596_v35 }
 0xeb9   :  { %8135 = vmatprep.subr.bf16.mxu1 %v13592_v23  ;;  %8176 = vmatprep.subr.bf16.mxu0 %v13599_v18 }
 0xebc   :  { %8136 = vmatpush1.bf16.msra.mxu1 %v13602_v52  ;;  %8177 = vmatpush1.bf16.msra.mxu0 %v13608_v27 }
 0xebd   :  { %8137 = vmatprep.subr.bf16.mxu1 %v13604_v3  ;;  %8178 = vmatprep.subr.bf16.mxu0 %v13611_v31 }
 0xec0   :  { %8138 = vmatpush1.bf16.msra.mxu1 %v13614_v11  ;;  %8179 = vmatpush1.bf16.msra.mxu0 %v13620_v10 }
 0xec1   :  { %8139 = vmatprep.subr.bf16.mxu1 %v13616_v16  ;;  %8180 = vmatprep.subr.bf16.mxu0 %v13623_v39 }
 0xec4   :  { %8140 = vmatpush1.bf16.msra.mxu1 %v13626_v51  ;;  %8181 = vmatpush1.bf16.msra.mxu0 %v13632_v1 }
 0xec5   :  { %8141 = vmatprep.subr.bf16.mxu1 %v13628_v60  ;;  %8182 = vmatprep.subr.bf16.mxu0 %v15115_v7 }
 0xec8   :  { %8142 = vmatpush1.bf16.msra.mxu1 %v15116_v54  ;;  %8183 = vmatpush1.bf16.msra.mxu0 %v15117_v50 }
 0xec9   :  { %8143 = vmatprep.subr.bf16.mxu1 %v15118_v56  ;;  %8184 = vmatprep.subr.bf16.mxu0 %v15119_v8  ;;  %v15140_v56 = vld [vmem:[#allocation116_spill] sm:$0xff] }
 0xecc   :  { %8144 = vmatpush1.bf16.msra.mxu1 %v15120_v32  ;;  %8185 = vmatpush1.bf16.msra.mxu0 %v15121_v55  ;;  %v15137_v55 = vld [vmem:[#allocation115_spill] sm:$0xff]  ;;  %v15138_v32 = vld [vmem:[#allocation82_spill] sm:$0xff] }
 0xecd   :  { %8145 = vmatprep.subr.bf16.mxu1 %v15122_v46  ;;  %8186 = vmatprep.subr.bf16.mxu0 %v15123_v26  ;;  %v15133_v46 = vld [vmem:[#allocation144_spill] sm:$0xff]  ;;  %v15134_v26 = vld [vmem:[#allocation121_spill] sm:$0xff] }
 0xed0   :  { %8146 = vmatpush1.bf16.msra.mxu1 %v15124_v48  ;;  %8187 = vmatpush1.bf16.msra.mxu0 %v15125_v63  ;;  %v15135_v48 = vld [vmem:[#allocation122_spill] sm:$0xff]  ;;  %v15136_v63 = vld [vmem:[#allocation113_spill] sm:$0xff] }
 0xed1   :  { %8147 = vmatprep.subr.bf16.mxu1 %v15126_v59  ;;  %8188 = vmatprep.subr.bf16.mxu0 %v15127_v45  ;;  %v7978_v59 = vrot.slane %v15136_v63, 4  ;;  %v7979_v45 = vrot.slane %v15137_v55, 4 }
 0xed4   :  { %8148 = vmatpush1.bf16.msra.mxu1 %v15128_v21  ;;  %8189 = vmatpush1.bf16.msra.mxu0 %v15129_v25  ;;  %v7982_v25 = vsel %vm3095_vm2, %v15138_v32, %v7978_v59  ;;  %v15139_v21 = vld [vmem:[#allocation75_spill] sm:$0xff]  ;;  %v15141_v32 = vld [vmem:[#allocation76_spill] sm:$0xff] }
 0xed5   :  { %8149 = vmatprep.subr.bf16.mxu1 %v15130_v24  ;;  %8190 = vmatprep.subr.bf16.mxu0 %v15131_v19  ;;  %v7983_v19 = vsel %vm3095_vm2, %v15139_v21, %v7979_v45  ;;  %v15142_v45 = vld [vmem:[#allocation114_spill] sm:$0xff] }
 0xed6   :  { %v7980_v21 = vrot.slane %v15142_v45, 4 }
 0xed8   :  { %8150 = vmatpush1.bf16.msra.mxu1 %v15132_v6  ;;  %8191 = vmatpush1.bf16.msra.mxu0 %v15133_v46 }
 0xed9   :  { %8249 = vmatprep.subr.bf16.mxu1 %v15134_v26  ;;  %8290 = vmatprep.subr.bf16.mxu0 %v15135_v48  ;;  %v7981_v26 = vrot.slane %v15140_v56, 4 }
 0xedb   :  { %v7985_v59 = vsel %vm3095_vm2, %v15141_v32, %v7981_v26 }
 0xf6e   :  { %v8023_v24 = vpop.f32.mrb[116].mxu1  ;;  %v8064_v6 = vpop.f32.mrb[124].mxu0 }
 0xf6f   :  { %v8071_v8 = vadd.f32 %v8023_v24, %v7982_v25  ;;  %v8025_v46 = vpop.f32.mrb[117].mxu1  ;;  %v8066_v50 = vpop.f32.mrb[125].mxu0  ;;  %v15143_v24 = vld [vmem:[#allocation73_spill] sm:$0xff] }
 0xf70   :  { %v8072_v48 = vadd.f32 %v8025_v46, %v7983_v19  ;;  %v8027_v54 = vpop.f32.mrb[118].mxu1  ;;  %v8068_v63 = vpop.f32.mrb[126].mxu0  ;;  %v8074_v25 = vadd.f32 %v8066_v50, %v7985_v59  ;;  %v7984_v56 = vsel %vm3095_vm2, %v15143_v24, %v7980_v21 }
 0xf71   :  { %v10052_v7 = vmul.f32 -1.442695, %v8071_v8  ;;  %v8028_v55 = vpop.f32.mrb[119].mxu1  ;;  %v8069_v60 = vpop.f32.mrb[127].mxu0  ;;  %v8073_v54 = vadd.f32 %v8064_v6, %v7984_v56 }
 0xf72   :  { %v10053_v1 = vmul.f32 -1.442695, %v8072_v48  ;;  %v10054_v46 = vmul.f32 -1.442695, %v8074_v25 }
 0xf73   :  { %10821 = vpow2.f32 %v10052_v7 }
 0xf74   :  { %10823 = vpow2.f32 %v10053_v1 }
 0xf75   :  { %10825 = vpow2.f32 %v10054_v46  ;;  %v15145_v46 = vld [vmem:[#allocation124_spill] sm:$0xff] }
 0xf76   :  { %10827 = vtanh.f32 %v8073_v54  ;;  %v15146_v54 = vld [vmem:[#allocation126_spill] sm:$0xff] }
 0xf7d   :  { %v10822_v19 = vpop.eup %10821 }
 0xf7e   :  { %v10824_v8 = vpop.eup %10823  ;;  %v8078_v63 = vadd.f32 1.0, %v10822_v19  ;;  %v15147_v19 = vld [vmem:[#allocation127_spill] sm:$0xff] }
 0xf7f   :  { %v8084_v60 = vadd.f32 1.0, %v10824_v8  ;;  %v10826_v7 = vpop.eup %10825  ;;  %v15148_v8 = vld [vmem:[#allocation129_spill] sm:$0xff] }
 0xf80   :  { %10829 = vrcp.f32 %v8078_v63  ;;  %v10828_v26 = vpop.eup %10827  ;;  %v8091_v50 = vadd.f32 1.0, %v10826_v7  ;;  %v15149_v63 = vld [vmem:[#allocation128_spill] sm:$0xff]  ;;  %v15151_v7 = vld [vmem:[#allocation131_spill] sm:$0xff] }
 0xf81   :  { %10831 = vrcp.f32 %v8084_v60  ;;  %v15150_v60 = vld [vmem:[#allocation130_spill] sm:$0xff] }
 0xf82   :  { %10833 = vrcp.f32 %v8091_v50  ;;  %v15156_v50 = vld [vmem:[#allocation137_spill] sm:$0xff] }
 0xf8a   :  { %v10830_v48 = vpop.eup %10829 }
 0xf8b   :  { %v10832_v55 = vpop.eup %10831  ;;  %v8095_v1 = vmul.f32 %v10830_v48, %v10828_v26  ;;  %v15152_v26 = vld [vmem:[#allocation133_spill] sm:$0xff]  ;;  %v15153_v48 = vld [vmem:[#allocation132_spill] sm:$0xff] }
 0xf8c   :  { %v8094_v32 = vmul.f32 %v10832_v55, %v13778_v38  ;;  %v10834_v6 = vpop.eup %10833  ;;  %v15144_v38 = vld [vmem:[#allocation125_spill] sm:$0xff]  ;;  %v15154_v55 = vld [vmem:[#allocation134_spill] sm:$0xff] }
 0xf8e   :  { %v13870_v59 = vadd.f32 %v8095_v1, %v8094_v32  ;;  %v15155_v1 = vld [vmem:[#allocation135_spill] sm:$0xff]  ;;  %v15157_v32 = vld [vmem:[#allocation136_spill] sm:$0xff] }
 0xf90   :  { %10835 = vtanh.f32 %v13870_v59 }
 0xf9a   :  { %v10836_v45 = vpop.eup %10835 }
 0xf9b   :  { %v13873_v21 = vmul.f32 %v10836_v45, %v10834_v6  ;;  %v15158_v6 = vld [vmem:[#allocation138_spill] sm:$0xff]  ;;  %v15159_v45 = vld [vmem:[#allocation139_spill] sm:$0xff] }
 0xf9d   :  { %v8116_v25 = vpack.c.bf16 %v13873_v21, %v13873_v21 }
 0xf9f   :  { %v8118_v24 = vsel %vm12488_vm3, 0, %v8116_v25  ;;  %v8117_v56 = vsel %vm12488_vm3, %v8116_v25, 0  ;;  %v15160_v25 = vld [vmem:[#allocation141_spill] sm:$0xff] }
 0xfa0   :  { %8151 = vmatprep.mubr.bf16.mxu1 %v8118_v24  ;;  %8192 = vmatprep.mubr.bf16.mxu0 %v8118_v24  ;;  %v15161_v24 = vld [vmem:[#allocation140_spill] sm:$0xff] }
 0xfa1   :  { %8152 = vmatmul.mubr.bf16.vlgmr.msra.gmra.mrb[120].mxu1 %v8117_v56  ;;  %8193 = vmatmul.mubr.bf16.vlgmr.msra.gmra.mrb[128].mxu0 %v8117_v56  ;;  %v15162_v56 = vld [vmem:[#allocation142_spill] sm:$0xff] }
 0xfa2   :  { %8250 = vmatpush1.bf16.msra.mxu1 %v13504_v61  ;;  %8291 = vmatpush1.bf16.msra.mxu0 %v13516_v43 }
 0xfa3   :  { %8251 = vmatprep.subr.bf16.mxu1 %v13506_v28  ;;  %8292 = vmatprep.subr.bf16.mxu0 %v13518_v22 }
 0xfa6   :  { %8252 = vmatpush1.bf16.msra.mxu1 %v13513_v30  ;;  %8293 = vmatpush1.bf16.msra.mxu0 %v13524_v57 }
 0xfa7   :  { %8253 = vmatprep.subr.bf16.mxu1 %v13520_v5  ;;  %8294 = vmatprep.subr.bf16.mxu0 %v13527_v44 }
 0xfaa   :  { %8254 = vmatpush1.bf16.msra.mxu1 %v13530_v47  ;;  %8295 = vmatpush1.bf16.msra.mxu0 %v13536_v13 }
 0xfab   :  { %8255 = vmatprep.subr.bf16.mxu1 %v13532_v20  ;;  %8296 = vmatprep.subr.bf16.mxu0 %v13539_v36 }
 0xfae   :  { %8256 = vmatpush1.bf16.msra.mxu1 %v13542_v14  ;;  %8297 = vmatpush1.bf16.msra.mxu0 %v13548_v62 }
 0xfaf   :  { %8257 = vmatprep.subr.bf16.mxu1 %v13544_v4  ;;  %8298 = vmatprep.subr.bf16.mxu0 %v13551_v40 }
 0xfb2   :  { %8258 = vmatpush1.bf16.msra.mxu1 %v13554_v12  ;;  %8299 = vmatpush1.bf16.msra.mxu0 %v13560_v0 }
 0xfb3   :  { %8259 = vmatprep.subr.bf16.mxu1 %v13556_v9  ;;  %8300 = vmatprep.subr.bf16.mxu0 %v13563_v17 }
 0xfb6   :  { %8260 = vmatpush1.bf16.msra.mxu1 %v13566_v29  ;;  %8301 = vmatpush1.bf16.msra.mxu0 %v13571_v15 }
 0xfb7   :  { %8261 = vmatprep.subr.bf16.mxu1 %v13568_v34  ;;  %8302 = vmatprep.subr.bf16.mxu0 %v13576_v2 }
 0xfba   :  { %8262 = vmatpush1.bf16.msra.mxu1 %v13573_v41  ;;  %8303 = vmatpush1.bf16.msra.mxu0 %v13584_v42 }
 0xfbb   :  { %8263 = vmatprep.subr.bf16.mxu1 %v13580_v53  ;;  %8304 = vmatprep.subr.bf16.mxu0 %v13587_v49 }
 0xfbe   :  { %8264 = vmatpush1.bf16.msra.mxu1 %v13590_v58  ;;  %8305 = vmatpush1.bf16.msra.mxu0 %v13596_v35 }
 0xfbf   :  { %8265 = vmatprep.subr.bf16.mxu1 %v13592_v23  ;;  %8306 = vmatprep.subr.bf16.mxu0 %v13599_v18 }
 0xfc2   :  { %8266 = vmatpush1.bf16.msra.mxu1 %v13602_v52  ;;  %8307 = vmatpush1.bf16.msra.mxu0 %v13608_v27 }
 0xfc3   :  { %8267 = vmatprep.subr.bf16.mxu1 %v13604_v3  ;;  %8308 = vmatprep.subr.bf16.mxu0 %v13611_v31 }
 0xfc6   :  { %8268 = vmatpush1.bf16.msra.mxu1 %v13614_v11  ;;  %8309 = vmatpush1.bf16.msra.mxu0 %v13620_v10 }
 0xfc7   :  { %8269 = vmatprep.subr.bf16.mxu1 %v13616_v16  ;;  %8310 = vmatprep.subr.bf16.mxu0 %v13623_v39 }
 0xfca   :  { %8270 = vmatpush1.bf16.msra.mxu1 %v13626_v51  ;;  %8311 = vmatpush1.bf16.msra.mxu0 %v15144_v38 }
 0xfcb   :  { %8271 = vmatprep.subr.bf16.mxu1 %v15145_v46  ;;  %8312 = vmatprep.subr.bf16.mxu0 %v15146_v54 }
 0xfce   :  { %8272 = vmatpush1.bf16.msra.mxu1 %v15147_v19  ;;  %8313 = vmatpush1.bf16.msra.mxu0 %v15148_v8  ;;  %v15171_v8 = vld [vmem:[#allocation112_spill] sm:$0xff] }
 0xfcf   :  { %8273 = vmatprep.subr.bf16.mxu1 %v15149_v63  ;;  %8314 = vmatprep.subr.bf16.mxu0 %v15150_v60  ;;  %v15169_v60 = vld [vmem:[#allocation77_spill] sm:$0xff] }
 0xfd2   :  { %8274 = vmatpush1.bf16.msra.mxu1 %v15151_v7  ;;  %8315 = vmatpush1.bf16.msra.mxu0 %v15152_v26  ;;  %v15163_v26 = vld [vmem:[#allocation143_spill] sm:$0xff] }
 0xfd3   :  { %8275 = vmatprep.subr.bf16.mxu1 %v15153_v48  ;;  %8316 = vmatprep.subr.bf16.mxu0 %v15154_v55  ;;  %v15164_v48 = vld [vmem:[#allocation144_spill] sm:$0xff]  ;;  %v15165_v55 = vld [vmem:[#allocation121_spill] sm:$0xff]  ;;  %v15168_v7 = vld [vmem:[#allocation111_spill] sm:$0xff] }
 0xfd6   :  { %8276 = vmatpush1.bf16.msra.mxu1 %v15155_v1  ;;  %8317 = vmatpush1.bf16.msra.mxu0 %v15156_v50  ;;  %v15166_v1 = vld [vmem:[#allocation122_spill] sm:$0xff]  ;;  %v15167_v50 = vld [vmem:[#allocation59_spill] sm:$0xff] }
 0xfd7   :  { %8277 = vmatprep.subr.bf16.mxu1 %v15157_v32  ;;  %8318 = vmatprep.subr.bf16.mxu0 %v15158_v6  ;;  %v8108_v32 = vrot.slane %v15167_v50, 4  ;;  %v8109_v6 = vrot.slane %v15168_v7, 4 }
 0xfda   :  { %8278 = vmatpush1.bf16.msra.mxu1 %v15159_v45  ;;  %8319 = vmatpush1.bf16.msra.mxu0 %v15160_v25  ;;  %v8112_v25 = vsel %vm3095_vm2, %v15169_v60, %v8108_v32  ;;  %v15170_v45 = vld [vmem:[#allocation81_spill] sm:$0xff]  ;;  %v15172_v60 = vld [vmem:[#allocation70_spill] sm:$0xff] }
 0xfdb   :  { %8279 = vmatprep.subr.bf16.mxu1 %v15161_v24  ;;  %8320 = vmatprep.subr.bf16.mxu0 %v15162_v56  ;;  %v8113_v56 = vsel %vm3095_vm2, %v15170_v45, %v8109_v6  ;;  %v15173_v6 = vld [vmem:[#allocation110_spill] sm:$0xff] }
 0xfdc   :  { %v8110_v45 = vrot.slane %v15173_v6, 4 }
 0xfde   :  { %8280 = vmatpush1.bf16.msra.mxu1 %v15163_v26  ;;  %8321 = vmatpush1.bf16.msra.mxu0 %v15164_v48 }
 0xfdf   :  { %8379 = vmatprep.subr.bf16.mxu1 %v15165_v55  ;;  %8420 = vmatprep.subr.bf16.mxu0 %v15166_v1  ;;  %v8111_v55 = vrot.slane %v15171_v8, 4 }
 0xfe1   :  { %v8115_v32 = vsel %vm3095_vm2, %v15172_v60, %v8111_v55 }
0x1074   :  { %v8153_v24 = vpop.f32.mrb[120].mxu1  ;;  %v8194_v26 = vpop.f32.mrb[128].mxu0 }
0x1075   :  { %v8201_v63 = vadd.f32 %v8153_v24, %v8112_v25  ;;  %v8155_v48 = vpop.f32.mrb[121].mxu1  ;;  %v8196_v19 = vpop.f32.mrb[129].mxu0  ;;  %v15174_v24 = vld [vmem:[#allocation61_spill] sm:$0xff] }
0x1076   :  { %v8202_v1 = vadd.f32 %v8155_v48, %v8113_v56  ;;  %v8157_v54 = vpop.f32.mrb[122].mxu1  ;;  %v8198_v50 = vpop.f32.mrb[130].mxu0  ;;  %v8204_v25 = vadd.f32 %v8196_v19, %v8115_v32  ;;  %v8114_v8 = vsel %vm3095_vm2, %v15174_v24, %v8110_v45  ;;  %v15175_v45 = vld [vmem:[#allocation117_spill] sm:$0xff] }
0x1077   :  { %v10055_v46 = vmul.f32 -1.442695, %v8201_v63  ;;  %v8158_v7 = vpop.f32.mrb[123].mxu1  ;;  %v8199_v38 = vpop.f32.mrb[131].mxu0  ;;  %v8203_v54 = vadd.f32 %v8194_v26, %v8114_v8 }
0x1078   :  { %v10056_v51 = vmul.f32 -1.442695, %v8202_v1  ;;  %v10057_v48 = vmul.f32 -1.442695, %v8204_v25  ;;  %v8099_v25 = vadd.f32 %v13873_v21, %v15175_v45 }
0x1079   :  { %10837 = vpow2.f32 %v10055_v46 }
0x107a   :  { %10839 = vpow2.f32 %v10056_v51 }
0x107b   :  { %10841 = vpow2.f32 %v10057_v48 }
0x107c   :  { %10843 = vtanh.f32 %v8203_v54 }
0x1083   :  { %v10838_v56 = vpop.eup %10837 }
0x1084   :  { %v10840_v63 = vpop.eup %10839  ;;  %v8208_v50 = vadd.f32 1.0, %v10838_v56 }
0x1085   :  { %v8214_v38 = vadd.f32 1.0, %v10840_v63  ;;  %v10842_v46 = vpop.eup %10841 }
0x1086   :  { %10845 = vrcp.f32 %v8208_v50  ;;  %v10844_v55 = vpop.eup %10843  ;;  %v8221_v19 = vadd.f32 1.0, %v10842_v46 }
0x1087   :  { %10847 = vrcp.f32 %v8214_v38 }
0x1088   :  { %10849 = vrcp.f32 %v8221_v19 }
0x1090   :  { %v10846_v1 = vpop.eup %10845 }
0x1091   :  { %v10848_v7 = vpop.eup %10847  ;;  %v8225_v51 = vmul.f32 %v10846_v1, %v10844_v55  ;;  %v15205_v55 = vld [vmem:[#allocation84_spill] sm:$0xff] }
0x1092   :  { %v8224_v60 = vmul.f32 %v10848_v7, %v13870_v59  ;;  %v10850_v26 = vpop.eup %10849  ;;  %v15206_v7 = vld [vmem:[#allocation56_spill] sm:$0xff] }
0x1094   :  { %v13962_v32 = vadd.f32 %v8225_v51, %v8224_v60  ;;  %v8240_v51 = vrot.slane %v15206_v7, 4  ;;  %v15207_v60 = vld [vmem:[#allocation72_spill] sm:$0xff]  ;;  %v14170_v7 = vld [vmem:[#allocation6 + $0x128] sm:$0xff] }
0x1096   :  { %10851 = vtanh.f32 %v13962_v32 }
0x10a0   :  { %v10852_v6 = vpop.eup %10851 }
0x10a1   :  { %v8228_v24 = vmul.f32 %v10852_v6, %v10850_v26  ;;  %v8244_v26 = vsel %vm3095_vm2, %v15207_v60, %v8240_v51  ;;  %v14173_v51 = vld [vmem:[#allocation6 + $0x138] sm:$0xff]  ;;  %v14179_v60 = vld [vmem:[#allocation6 + $0x130] sm:$0xff] }
0x10a3   :  { %v13967_v8 = vadd.f32 %v8228_v24, %v8099_v25  ;;  %v8246_v48 = vpack.c.bf16 %v8228_v24, %v8228_v24 }
0x10a5   :  { %v8248_v54 = vsel %vm12488_vm3, 0, %v8246_v48  ;;  %v8247_v59 = vsel %vm12488_vm3, %v8246_v48, 0 }
0x10a6   :  { %8281 = vmatprep.mubr.bf16.mxu1 %v8248_v54  ;;  %8322 = vmatprep.mubr.bf16.mxu0 %v8248_v54 }
0x10a7   :  { %8282 = vmatmul.mubr.bf16.vlgmr.msra.gmra.mrb[124].mxu1 %v8247_v59  ;;  %8323 = vmatmul.mubr.bf16.vlgmr.msra.gmra.mrb[132].mxu0 %v8247_v59 }
0x10a8   :  { %8380 = vmatpush1.bf16.msra.mxu1 %v13504_v61  ;;  %8421 = vmatpush1.bf16.msra.mxu0 %v13516_v43  ;;  %v15204_v43 = vld [vmem:[#allocation58_spill] sm:$0xff] }
0x10a9   :  { %8381 = vmatprep.subr.bf16.mxu1 %v13506_v28  ;;  %8422 = vmatprep.subr.bf16.mxu0 %v13518_v22  ;;  %v8241_v22 = vrot.slane %v15204_v43, 4  ;;  %v14134_v43 = vld [vmem:[#allocation6 + $0xc8] sm:$0xff] }
0x10ab   :  { %v8245_v1 = vsel %vm3095_vm2, %v15205_v55, %v8241_v22  ;;  %v14137_v22 = vld [vmem:[#allocation6 + $0xd8] sm:$0xff]  ;;  %v14164_v55 = vld [vmem:[#allocation6 + $0x100] sm:$0xff] }
0x10ac   :  { %8382 = vmatpush1.bf16.msra.mxu1 %v13513_v30  ;;  %8423 = vmatpush1.bf16.msra.mxu0 %v13524_v57 }
0x10ad   :  { %8383 = vmatprep.subr.bf16.mxu1 %v13520_v5  ;;  %8424 = vmatprep.subr.bf16.mxu0 %v13527_v44  ;;  %v15192_v44 = vld [vmem:[#allocation139_spill] sm:$0xff] }
0x10b0   :  { %8384 = vmatpush1.bf16.msra.mxu1 %v13530_v47  ;;  %8425 = vmatpush1.bf16.msra.mxu0 %v13536_v13  ;;  %v15191_v47 = vld [vmem:[#allocation138_spill] sm:$0xff]  ;;  %v15193_v13 = vld [vmem:[#allocation141_spill] sm:$0xff] }
0x10b1   :  { %8385 = vmatprep.subr.bf16.mxu1 %v13532_v20  ;;  %8426 = vmatprep.subr.bf16.mxu0 %v13539_v36  ;;  %v15188_v36 = vld [vmem:[#allocation135_spill] sm:$0xff]  ;;  %v15194_v20 = vld [vmem:[#allocation140_spill] sm:$0xff] }
0x10b4   :  { %8386 = vmatpush1.bf16.msra.mxu1 %v13542_v14  ;;  %8427 = vmatpush1.bf16.msra.mxu0 %v13548_v62  ;;  %v15196_v14 = vld [vmem:[#allocation143_spill] sm:$0xff] }
0x10b5   :  { %8387 = vmatprep.subr.bf16.mxu1 %v13544_v4  ;;  %8428 = vmatprep.subr.bf16.mxu0 %v13551_v40  ;;  %v15189_v40 = vld [vmem:[#allocation137_spill] sm:$0xff]  ;;  %v15190_v4 = vld [vmem:[#allocation136_spill] sm:$0xff]  ;;  %v14035_v62 = vld [vmem:[#allocation6 + $0x8] sm:$0xff] }
0x10b6   :  { %15198 = vst [vmem:[#allocation119_spill] sm:$0xff] %v14035_v62 }
0x10b8   :  { %8388 = vmatpush1.bf16.msra.mxu1 %v13554_v12  ;;  %8429 = vmatpush1.bf16.msra.mxu0 %v13560_v0  ;;  %v15187_v12 = vld [vmem:[#allocation134_spill] sm:$0xff] }
0x10b9   :  { %8389 = vmatprep.subr.bf16.mxu1 %v13556_v9  ;;  %8430 = vmatprep.subr.bf16.mxu0 %v13563_v17  ;;  %v15181_v17 = vld [vmem:[#allocation129_spill] sm:$0xff]  ;;  %v15195_v0 = vld [vmem:[#allocation142_spill] sm:$0xff]  ;;  %v15197_v9 = vld [vmem:[#allocation144_spill] sm:$0xff] }
0x10bc   :  { %8390 = vmatpush1.bf16.msra.mxu1 %v13566_v29  ;;  %8431 = vmatpush1.bf16.msra.mxu0 %v13571_v15  ;;  %v15200_v29 = vld [vmem:[#allocation83_spill] sm:$0xff]  ;;  %v15201_v15 = vld [vmem:[#allocation57_spill] sm:$0xff] }
0x10bd   :  { %8391 = vmatprep.subr.bf16.mxu1 %v13568_v34  ;;  %8432 = vmatprep.subr.bf16.mxu0 %v13576_v2  ;;  %v15180_v2 = vld [vmem:[#allocation127_spill] sm:$0xff] }
0x10be   :  { %v15184_v34 = vld [vmem:[#allocation131_spill] sm:$0xff] }
0x10c0   :  { %8392 = vmatpush1.bf16.msra.mxu1 %v13573_v41  ;;  %8433 = vmatpush1.bf16.msra.mxu0 %v13584_v42  ;;  %v15183_v41 = vld [vmem:[#allocation130_spill] sm:$0xff]  ;;  %v14038_v42 = vld [vmem:[#allocation6 + $0x18] sm:$0xff] }
0x10c1   :  { %8393 = vmatprep.subr.bf16.mxu1 %v13580_v53  ;;  %8434 = vmatprep.subr.bf16.mxu0 %v13587_v49  ;;  %v15176_v49 = vld [vmem:[#allocation123_spill] sm:$0xff]  ;;  %15199 = vst [vmem:[#allocation108_spill] sm:$0xff] %v14038_v42  ;;  %v8238_v53 = vrot.slane %v15200_v29, 4 }
0x10c2   :  { %v14098_v29 = vld [vmem:[#allocation6 + $0x68] sm:$0xff] }
0x10c4   :  { %8394 = vmatpush1.bf16.msra.mxu1 %v13590_v58  ;;  %8435 = vmatpush1.bf16.msra.mxu0 %v13596_v35  ;;  %v15202_v58 = vld [vmem:[#allocation71_spill] sm:$0xff]  ;;  %v15203_v35 = vld [vmem:[#allocation74_spill] sm:$0xff] }
0x10c5   :  { %8395 = vmatprep.subr.bf16.mxu1 %v13592_v23  ;;  %8436 = vmatprep.subr.bf16.mxu0 %v13599_v18  ;;  %v15177_v23 = vld [vmem:[#allocation125_spill] sm:$0xff]  ;;  %v15178_v18 = vld [vmem:[#allocation124_spill] sm:$0xff] }
0x10c8   :  { %8396 = vmatpush1.bf16.msra.mxu1 %v13602_v52  ;;  %8437 = vmatpush1.bf16.msra.mxu0 %v13608_v27  ;;  %v15179_v52 = vld [vmem:[#allocation126_spill] sm:$0xff]  ;;  %v8239_v27 = vrot.slane %v15201_v15, 4 }
0x10c9   :  { %8397 = vmatprep.subr.bf16.mxu1 %v13604_v3  ;;  %8438 = vmatprep.subr.bf16.mxu0 %v13611_v31  ;;  %v15182_v31 = vld [vmem:[#allocation128_spill] sm:$0xff]  ;;  %v8242_v3 = vsel %vm3095_vm2, %v15202_v58, %v8238_v53  ;;  %v14104_v15 = vld [vmem:[#allocation6 + $0x60] sm:$0xff]  ;;  %v14110_v58 = vld [vmem:[#allocation6 + $0x88] sm:$0xff] }
0x10ca   :  { %v14101_v53 = vld [vmem:[#allocation6 + $0x78] sm:$0xff] }
0x10cc   :  { %8398 = vmatpush1.bf16.msra.mxu1 %v13614_v11  ;;  %8439 = vmatpush1.bf16.msra.mxu0 %v13620_v10  ;;  %v8243_v11 = vsel %vm3095_vm2, %v15203_v35, %v8239_v27  ;;  %v14107_v27 = vld [vmem:[#allocation6 + $0x70] sm:$0xff]  ;;  %v14116_v35 = vld [vmem:[#allocation6 + $0x80] sm:$0xff] }
0x10cd   :  { %8399 = vmatprep.subr.bf16.mxu1 %v13616_v16  ;;  %8440 = vmatprep.subr.bf16.mxu0 %v13623_v39  ;;  %v15185_v16 = vld [vmem:[#allocation133_spill] sm:$0xff]  ;;  %v15186_v39 = vld [vmem:[#allocation132_spill] sm:$0xff] }
0x10d0   :  { %8400 = vmatpush1.bf16.msra.mxu1 %v15176_v49  ;;  %8441 = vmatpush1.bf16.msra.mxu0 %v15177_v23 }
0x10d1   :  { %8401 = vmatprep.subr.bf16.mxu1 %v15178_v18  ;;  %8442 = vmatprep.subr.bf16.mxu0 %v15179_v52 }
0x10d4   :  { %8402 = vmatpush1.bf16.msra.mxu1 %v15180_v2  ;;  %8443 = vmatpush1.bf16.msra.mxu0 %v15181_v17 }
0x10d5   :  { %8403 = vmatprep.subr.bf16.mxu1 %v15182_v31  ;;  %8444 = vmatprep.subr.bf16.mxu0 %v15183_v41 }
0x10d8   :  { %8404 = vmatpush1.bf16.msra.mxu1 %v15184_v34  ;;  %8445 = vmatpush1.bf16.msra.mxu0 %v15185_v16 }
0x10d9   :  { %8405 = vmatprep.subr.bf16.mxu1 %v15186_v39  ;;  %8446 = vmatprep.subr.bf16.mxu0 %v15187_v12 }
0x10dc   :  { %8406 = vmatpush1.bf16.msra.mxu1 %v15188_v36  ;;  %8447 = vmatpush1.bf16.msra.mxu0 %v15189_v40 }
0x10dd   :  { %8407 = vmatprep.subr.bf16.mxu1 %v15190_v4  ;;  %8448 = vmatprep.subr.bf16.mxu0 %v15191_v47  ;;  %v14071_v4 = vld [vmem:[#allocation6 + $0x10] sm:$0xff]  ;;  %v14077_v47 = vld [vmem:[#allocation6 + $0x38] sm:$0xff] }
0x10e0   :  { %8408 = vmatpush1.bf16.msra.mxu1 %v15192_v44  ;;  %8449 = vmatpush1.bf16.msra.mxu0 %v15193_v13  ;;  %v14080_v44 = vld [vmem:[#allocation6 + $0x20] sm:$0xff]  ;;  %v14083_v13 = vld [vmem:[#allocation6 + $0x30] sm:$0xff] }
0x10e1   :  { %8409 = vmatprep.subr.bf16.mxu1 %v15194_v20  ;;  %8450 = vmatprep.subr.bf16.mxu0 %v15195_v0  ;;  %v14086_v20 = vld [vmem:[#allocation6 + $0x48] sm:$0xff]  ;;  %v14089_v0 = vld [vmem:[#allocation6 + $0x58] sm:$0xff] }
0x10e4   :  { %8410 = vmatpush1.bf16.msra.mxu1 %v15196_v14  ;;  %8451 = vmatpush1.bf16.msra.mxu0 %v15197_v9  ;;  %v14092_v14 = vld [vmem:[#allocation6 + $0x40] sm:$0xff]  ;;  %v14095_v9 = vld [vmem:[#allocation6 + $0x50] sm:$0xff] }
0x10e5   :  { %8509 = vmatprep.subr.bf16.mxu1 %v14035_v62  ;;  %8550 = vmatprep.subr.bf16.mxu0 %v14038_v42 }
0x117a   :  { %v8283_v10 = vpop.f32.mrb[124].mxu1  ;;  %v8324_v61 = vpop.f32.mrb[132].mxu0 }
0x117b   :  { %v8331_v28 = vadd.f32 %v8283_v10, %v8242_v3  ;;  %v8285_v30 = vpop.f32.mrb[125].mxu1  ;;  %v8326_v5 = vpop.f32.mrb[133].mxu0  ;;  %v8333_v45 = vadd.f32 %v8324_v61, %v8244_v26  ;;  %v14113_v3 = vld [vmem:[#allocation6 + $0x98] sm:$0xff]  ;;  %v14122_v10 = vld [vmem:[#allocation6 + $0xa8] sm:$0xff] }
0x117c   :  { %v8332_v57 = vadd.f32 %v8285_v30, %v8243_v11  ;;  %v8287_v21 = vpop.f32.mrb[126].mxu1  ;;  %v8328_v56 = vpop.f32.mrb[134].mxu0  ;;  %v8334_v19 = vadd.f32 %v8326_v5, %v8245_v1  ;;  %v14119_v11 = vld [vmem:[#allocation6 + $0x90] sm:$0xff]  ;;  %v14125_v61 = vld [vmem:[#allocation6 + $0xb8] sm:$0xff]  ;;  %v14140_v5 = vld [vmem:[#allocation6 + $0xc0] sm:$0xff] }
0x117d   :  { %v10058_v63 = vmul.f32 -1.442695, %v8331_v28  ;;  %v8288_v50 = vpop.f32.mrb[127].mxu1  ;;  %v8329_v38 = vpop.f32.mrb[135].mxu0  ;;  %v14128_v28 = vld [vmem:[#allocation6 + $0xa0] sm:$0xff]  ;;  %v14131_v30 = vld [vmem:[#allocation6 + $0xb0] sm:$0xff] }
0x117e   :  { %v10059_v46 = vmul.f32 -1.442695, %v8332_v57  ;;  %v10060_v6 = vmul.f32 -1.442695, %v8334_v19  ;;  %v14143_v57 = vld [vmem:[#allocation6 + $0xd0] sm:$0xff]  ;;  %v14146_v21 = vld [vmem:[#allocation6 + $0xe8] sm:$0xff] }
0x117f   :  { %10853 = vpow2.f32 %v10058_v63  ;;  %v14149_v56 = vld [vmem:[#allocation6 + $0xf8] sm:$0xff]  ;;  %v14152_v63 = vld [vmem:[#allocation6 + $0xe0] sm:$0xff]  ;;  %v14155_v50 = vld [vmem:[#allocation6 + $0xf0] sm:$0xff] }
0x1180   :  { %10855 = vpow2.f32 %v10059_v46  ;;  %v14158_v38 = vld [vmem:[#allocation6 + $0x108] sm:$0xff]  ;;  %v14161_v46 = vld [vmem:[#allocation6 + $0x118] sm:$0xff]  ;;  %v14167_v1 = vld [vmem:[#allocation6 + $0x110] sm:$0xff] }
0x1181   :  { %10857 = vpow2.f32 %v10060_v6  ;;  %v14176_v19 = vld [vmem:[#allocation6 + $0x120] sm:$0xff]  ;;  %v14182_v26 = vld [vmem:[#allocation6 + $0x148] sm:$0xff]  ;;  %v14185_v6 = vld [vmem:[#allocation6 + $0x158] sm:$0xff] }
0x1182   :  { %10859 = vtanh.f32 %v8333_v45  ;;  %v14188_v45 = vld [vmem:[#allocation6 + $0x140] sm:$0xff] }
0x1183   :  { %15208 = vst [vmem:[#allocation55_spill] sm:$0xff] %v14188_v45 }
0x1189   :  { %v10854_v25 = vpop.eup %10853 }
0x118a   :  { %v10856_v24 = vpop.eup %10855  ;;  %v8338_v48 = vadd.f32 1.0, %v10854_v25  ;;  %v14191_v25 = vld [vmem:[#allocation6 + $0x150] sm:$0xff] }
0x118b   :  { %v8344_v54 = vadd.f32 1.0, %v10856_v24  ;;  %v10858_v59 = vpop.eup %10857  ;;  %15209 = vst [vmem:[#allocation79_spill] sm:$0xff] %v14191_v25  ;;  %v14194_v24 = vld [vmem:[#allocation6 + $0x168] sm:$0xff] }
0x118c   :  { %10861 = vrcp.f32 %v8338_v48  ;;  %v10860_v49 = vpop.eup %10859  ;;  %v8351_v2 = vadd.f32 1.0, %v10858_v59  ;;  %15210 = vst [vmem:[#allocation120_spill] sm:$0xff] %v14194_v24  ;;  %v14197_v48 = vld [vmem:[#allocation6 + $0x178] sm:$0xff]  ;;  %v14203_v59 = vld [vmem:[#allocation6 + $0x170] sm:$0xff] }
0x118d   :  { %10863 = vrcp.f32 %v8344_v54  ;;  %15211 = vst [vmem:[#allocation80_spill] sm:$0xff] %v14197_v48  ;;  %v14200_v54 = vld [vmem:[#allocation6 + $0x160] sm:$0xff]  ;;  %15213 = vst [vmem:[#allocation78_spill] sm:$0xff] %v14203_v59 }
0x118e   :  { %10865 = vrcp.f32 %v8351_v2  ;;  %15212 = vst [vmem:[#allocation118_spill] sm:$0xff] %v14200_v54  ;;  %v14218_v2 = vld [vmem:[#allocation6 + $0x1a8] sm:$0xff] }
0x118f   :  { %15218 = vst [vmem:[#allocation75_spill] sm:$0xff] %v14218_v2 }
0x1196   :  { %v10862_v23 = vpop.eup %10861 }
0x1197   :  { %v10864_v18 = vpop.eup %10863  ;;  %v8355_v52 = vmul.f32 %v10862_v23, %v10860_v49  ;;  %v14206_v49 = vld [vmem:[#allocation6 + $0x188] sm:$0xff]  ;;  %v14209_v23 = vld [vmem:[#allocation6 + $0x198] sm:$0xff] }
0x1198   :  { %v8354_v17 = vmul.f32 %v10864_v18, %v13962_v32  ;;  %v10866_v41 = vpop.eup %10865  ;;  %v14068_v32 = vld [vmem:[#allocation6] sm:$0xff]  ;;  %15214 = vst [vmem:[#allocation87_spill] sm:$0xff] %v14206_v49  ;;  %15215 = vst [vmem:[#allocation113_spill] sm:$0xff] %v14209_v23 }
0x1199   :  { %v14212_v18 = vld [vmem:[#allocation6 + $0x180] sm:$0xff] }
0x119a   :  { %v14058_v31 = vadd.f32 %v8355_v52, %v8354_v17  ;;  %15216 = vst [vmem:[#allocation115_spill] sm:$0xff] %v14212_v18  ;;  %v14215_v52 = vld [vmem:[#allocation6 + $0x190] sm:$0xff]  ;;  %v14221_v17 = vld [vmem:[#allocation6 + $0x1b8] sm:$0xff] }
0x119b   :  { %15217 = vst [vmem:[#allocation82_spill] sm:$0xff] %v14215_v52  ;;  %15219 = vst [vmem:[#allocation116_spill] sm:$0xff] %v14221_v17 }
0x119c   :  { %10867 = vtanh.f32 %v14058_v31 }
0x11a6   :  { %v10868_v34 = vpop.eup %10867 }
0x11a7   :  { %v8358_v16 = vmul.f32 %v10868_v34, %v10866_v41  ;;  %v14224_v41 = vld [vmem:[#allocation6 + $0x1a0] sm:$0xff]  ;;  %v14227_v34 = vld [vmem:[#allocation6 + $0x1b0] sm:$0xff] }
0x11a8   :  { %15220 = vst [vmem:[#allocation76_spill] sm:$0xff] %v14224_v41  ;;  %15221 = vst [vmem:[#allocation114_spill] sm:$0xff] %v14227_v34 }
0x11a9   :  { %v14062_v39 = vadd.f32 %v8358_v16, %v13967_v8  ;;  %v8376_v12 = vpack.c.bf16 %v8358_v16, %v8358_v16  ;;  %v14074_v8 = vld [vmem:[#allocation6 + $0x28] sm:$0xff] }
0x11aa   :  { %v14230_v16 = vld [vmem:[#allocation6 + $0x1c8] sm:$0xff] }
0x11ab   :  { %v8378_v36 = vsel %vm12488_vm3, 0, %v8376_v12  ;;  %v8377_v40 = vsel %vm12488_vm3, %v8376_v12, 0  ;;  %15222 = vst [vmem:[#allocation73_spill] sm:$0xff] %v14230_v16  ;;  %v14233_v12 = vld [vmem:[#allocation6 + $0x1d8] sm:$0xff] }
0x11ac   :  { %8411 = vmatprep.mubr.bf16.mxu1 %v8378_v36  ;;  %8452 = vmatprep.mubr.bf16.mxu0 %v8378_v36  ;;  %15223 = vst [vmem:[#allocation121_spill] sm:$0xff] %v14233_v12  ;;  %v14236_v36 = vld [vmem:[#allocation6 + $0x1c0] sm:$0xff] }
0x11ad   :  { %8412 = vmatmul.mubr.bf16.vlgmr.msra.gmra.mrb[128].mxu1 %v8377_v40  ;;  %8453 = vmatmul.mubr.bf16.vlgmr.msra.gmra.mrb[136].mxu0 %v8377_v40  ;;  %15224 = vst [vmem:[#allocation122_spill] sm:$0xff] %v14236_v36  ;;  %v14239_v40 = vld [vmem:[#allocation6 + $0x1d0] sm:$0xff] }
0x11ae   :  { %8510 = vmatpush1.bf16.msra.mxu1 %v14068_v32  ;;  %8551 = vmatpush1.bf16.msra.mxu0 %v14071_v4  ;;  %15225 = vst [vmem:[#allocation59_spill] sm:$0xff] %v14239_v40 }
0x11af   :  { %8511 = vmatprep.subr.bf16.mxu1 %v14074_v8  ;;  %8552 = vmatprep.subr.bf16.mxu0 %v14077_v47 }
0x11b2   :  { %8512 = vmatpush1.bf16.msra.mxu1 %v14080_v44  ;;  %8553 = vmatpush1.bf16.msra.mxu0 %v14083_v13 }
0x11b3   :  { %8513 = vmatprep.subr.bf16.mxu1 %v14086_v20  ;;  %8554 = vmatprep.subr.bf16.mxu0 %v14089_v0 }
0x11b6   :  { %8514 = vmatpush1.bf16.msra.mxu1 %v14092_v14  ;;  %8555 = vmatpush1.bf16.msra.mxu0 %v14095_v9 }
0x11b7   :  { %8515 = vmatprep.subr.bf16.mxu1 %v14098_v29  ;;  %8556 = vmatprep.subr.bf16.mxu0 %v14101_v53 }
0x11ba   :  { %8516 = vmatpush1.bf16.msra.mxu1 %v14104_v15  ;;  %8557 = vmatpush1.bf16.msra.mxu0 %v14107_v27 }
0x11bb   :  { %8517 = vmatprep.subr.bf16.mxu1 %v14110_v58  ;;  %8558 = vmatprep.subr.bf16.mxu0 %v14113_v3 }
0x11be   :  { %8518 = vmatpush1.bf16.msra.mxu1 %v14116_v35  ;;  %8559 = vmatpush1.bf16.msra.mxu0 %v14119_v11 }
0x11bf   :  { %8519 = vmatprep.subr.bf16.mxu1 %v14122_v10  ;;  %8560 = vmatprep.subr.bf16.mxu0 %v14125_v61 }
0x11c2   :  { %8520 = vmatpush1.bf16.msra.mxu1 %v14128_v28  ;;  %8561 = vmatpush1.bf16.msra.mxu0 %v14131_v30 }
0x11c3   :  { %8521 = vmatprep.subr.bf16.mxu1 %v14134_v43  ;;  %8562 = vmatprep.subr.bf16.mxu0 %v14137_v22 }
0x11c6   :  { %8522 = vmatpush1.bf16.msra.mxu1 %v14140_v5  ;;  %8563 = vmatpush1.bf16.msra.mxu0 %v14143_v57 }
0x11c7   :  { %8523 = vmatprep.subr.bf16.mxu1 %v14146_v21  ;;  %8564 = vmatprep.subr.bf16.mxu0 %v14149_v56 }
0x11ca   :  { %8524 = vmatpush1.bf16.msra.mxu1 %v14152_v63  ;;  %8565 = vmatpush1.bf16.msra.mxu0 %v14155_v50 }
0x11cb   :  { %8525 = vmatprep.subr.bf16.mxu1 %v14158_v38  ;;  %8566 = vmatprep.subr.bf16.mxu0 %v14161_v46 }
0x11ce   :  { %8526 = vmatpush1.bf16.msra.mxu1 %v14164_v55  ;;  %8567 = vmatpush1.bf16.msra.mxu0 %v14167_v1 }
0x11cf   :  { %8527 = vmatprep.subr.bf16.mxu1 %v14170_v7  ;;  %8568 = vmatprep.subr.bf16.mxu0 %v14173_v51 }
0x11d2   :  { %8528 = vmatpush1.bf16.msra.mxu1 %v14176_v19  ;;  %8569 = vmatpush1.bf16.msra.mxu0 %v14179_v60 }
0x11d3   :  { %8529 = vmatprep.subr.bf16.mxu1 %v14182_v26  ;;  %8570 = vmatprep.subr.bf16.mxu0 %v14185_v6 }
0x11d6   :  { %8530 = vmatpush1.bf16.msra.mxu1 %v14188_v45  ;;  %8571 = vmatpush1.bf16.msra.mxu0 %v14191_v25 }
0x11d7   :  { %8531 = vmatprep.subr.bf16.mxu1 %v14194_v24  ;;  %8572 = vmatprep.subr.bf16.mxu0 %v14197_v48 }
0x11da   :  { %8532 = vmatpush1.bf16.msra.mxu1 %v14200_v54  ;;  %8573 = vmatpush1.bf16.msra.mxu0 %v14203_v59  ;;  %v15234_v59 = vld [vmem:[#allocation60_spill] sm:$0xff] }
0x11db   :  { %8533 = vmatprep.subr.bf16.mxu1 %v14206_v49  ;;  %8574 = vmatprep.subr.bf16.mxu0 %v14209_v23 }
0x11de   :  { %8534 = vmatpush1.bf16.msra.mxu1 %v14212_v18  ;;  %8575 = vmatpush1.bf16.msra.mxu0 %v14215_v52  ;;  %v15233_v52 = vld [vmem:[#allocation89_spill] sm:$0xff] }
0x11df   :  { %8535 = vmatprep.subr.bf16.mxu1 %v14218_v2  ;;  %8576 = vmatprep.subr.bf16.mxu0 %v14221_v17  ;;  %v15231_v17 = vld [vmem:[#allocation107_spill] sm:$0xff]  ;;  %v15232_v2 = vld [vmem:[#allocation85_spill] sm:$0xff] }
0x11e2   :  { %8536 = vmatpush1.bf16.msra.mxu1 %v14224_v41  ;;  %8577 = vmatpush1.bf16.msra.mxu0 %v14227_v34  ;;  %v14242_v41 = vld [vmem:[#allocation6 + $0x1e8] sm:$0xff]  ;;  %v14245_v34 = vld [vmem:[#allocation6 + $0x1f8] sm:$0xff] }
0x11e3   :  { %8537 = vmatprep.subr.bf16.mxu1 %v14230_v16  ;;  %8578 = vmatprep.subr.bf16.mxu0 %v14233_v12  ;;  %15226 = vst [vmem:[#allocation111_spill] sm:$0xff] %v14242_v41  ;;  %15227 = vst [vmem:[#allocation77_spill] sm:$0xff] %v14245_v34  ;;  %v14248_v16 = vld [vmem:[#allocation6 + $0x1e0] sm:$0xff]  ;;  %v14251_v12 = vld [vmem:[#allocation6 + $0x1f0] sm:$0xff] }
0x11e4   :  { %15228 = vst [vmem:[#allocation81_spill] sm:$0xff] %v14248_v16  ;;  %15229 = vst [vmem:[#allocation112_spill] sm:$0xff] %v14251_v12 }
0x11e6   :  { %8538 = vmatpush1.bf16.msra.mxu1 %v14236_v36  ;;  %8579 = vmatpush1.bf16.msra.mxu0 %v14239_v40  ;;  %v15230_v40 = vld [vmem:[#allocation86_spill] sm:$0xff] }
0x11e7   :  { %8539 = vmatprep.subr.bf16.mxu1 %v14242_v41  ;;  %8580 = vmatprep.subr.bf16.mxu0 %v14245_v34  ;;  %v8368_v36 = vrot.slane %v15230_v40, 4  ;;  %v8369_v41 = vrot.slane %v15231_v17, 4 }
0x11e9   :  { %v8372_v34 = vsel %vm3095_vm2, %v15232_v2, %v8368_v36  ;;  %v15235_v2 = vld [vmem:[#allocation90_spill] sm:$0xff] }
0x11ea   :  { %8540 = vmatpush1.bf16.msra.mxu1 %v14248_v16  ;;  %8581 = vmatpush1.bf16.msra.mxu0 %v14251_v12  ;;  %v8373_v16 = vsel %vm3095_vm2, %v15233_v52, %v8369_v41  ;;  %v15236_v52 = vld [vmem:[#allocation109_spill] sm:$0xff] }
0x11eb   :  { %8639 = vmatprep.subr.bf16.mxu1 %v14035_v62  ;;  %8680 = vmatprep.subr.bf16.mxu0 %v14038_v42  ;;  %v8371_v62 = vrot.slane %v15234_v59, 4  ;;  %v8370_v41 = vrot.slane %v15236_v52, 4 }
0x11ed   :  { %v8375_v36 = vsel %vm3095_vm2, %v15235_v2, %v8371_v62 }
0x1280   :  { %v8413_v18 = vpop.f32.mrb[128].mxu1  ;;  %v8454_v23 = vpop.f32.mrb[136].mxu0 }
0x1281   :  { %v8461_v49 = vadd.f32 %v8413_v18, %v8372_v34  ;;  %v8415_v12 = vpop.f32.mrb[129].mxu1  ;;  %v8456_v54 = vpop.f32.mrb[137].mxu0  ;;  %v15237_v34 = vld [vmem:[#allocation88_spill] sm:$0xff] }
0x1282   :  { %v8462_v42 = vadd.f32 %v8415_v12, %v8373_v16  ;;  %v8417_v48 = vpop.f32.mrb[130].mxu1  ;;  %v8458_v40 = vpop.f32.mrb[138].mxu0  ;;  %v8464_v18 = vadd.f32 %v8456_v54, %v8375_v36  ;;  %v8374_v59 = vsel %vm3095_vm2, %v15237_v34, %v8370_v41 }
0x1283   :  { %v10061_v24 = vmul.f32 -1.442695, %v8461_v49  ;;  %v8418_v17 = vpop.f32.mrb[131].mxu1  ;;  %v8459_v25 = vpop.f32.mrb[139].mxu0  ;;  %v8463_v48 = vadd.f32 %v8454_v23, %v8374_v59 }
0x1284   :  { %v10062_v45 = vmul.f32 -1.442695, %v8462_v42  ;;  %v10063_v16 = vmul.f32 -1.442695, %v8464_v18 }
0x1285   :  { %10869 = vpow2.f32 %v10061_v24 }
0x1286   :  { %10871 = vpow2.f32 %v10062_v45 }
0x1287   :  { %10873 = vpow2.f32 %v10063_v16 }
0x1288   :  { %10875 = vtanh.f32 %v8463_v48  ;;  %v15240_v48 = vld [vmem:[#allocation120_spill] sm:$0xff] }
0x128f   :  { %v10870_v12 = vpop.eup %10869 }
0x1290   :  { %v10872_v49 = vpop.eup %10871  ;;  %v8468_v40 = vadd.f32 1.0, %v10870_v12  ;;  %v15241_v12 = vld [vmem:[#allocation80_spill] sm:$0xff] }
0x1291   :  { %v8474_v42 = vadd.f32 1.0, %v10872_v49  ;;  %v10874_v25 = vpop.eup %10873  ;;  %v15242_v49 = vld [vmem:[#allocation118_spill] sm:$0xff] }
0x1292   :  { %10877 = vrcp.f32 %v8468_v40  ;;  %v10876_v62 = vpop.eup %10875  ;;  %v8481_v54 = vadd.f32 1.0, %v10874_v25  ;;  %v15243_v40 = vld [vmem:[#allocation78_spill] sm:$0xff]  ;;  %v15245_v25 = vld [vmem:[#allocation113_spill] sm:$0xff] }
0x1293   :  { %10879 = vrcp.f32 %v8474_v42  ;;  %v15244_v42 = vld [vmem:[#allocation87_spill] sm:$0xff] }
0x1294   :  { %10881 = vrcp.f32 %v8481_v54  ;;  %v15250_v54 = vld [vmem:[#allocation76_spill] sm:$0xff] }
0x129c   :  { %v10878_v24 = vpop.eup %10877 }
0x129d   :  { %v10880_v17 = vpop.eup %10879  ;;  %v8485_v45 = vmul.f32 %v10878_v24, %v10876_v62  ;;  %v15246_v62 = vld [vmem:[#allocation115_spill] sm:$0xff]  ;;  %v15247_v24 = vld [vmem:[#allocation82_spill] sm:$0xff] }
0x129e   :  { %v8484_v2 = vmul.f32 %v10880_v17, %v14058_v31  ;;  %v10882_v23 = vpop.eup %10881  ;;  %v15238_v31 = vld [vmem:[#allocation55_spill] sm:$0xff] }
0x129f   :  { %v15248_v17 = vld [vmem:[#allocation75_spill] sm:$0xff] }
0x12a0   :  { %v14273_v36 = vadd.f32 %v8485_v45, %v8484_v2  ;;  %v15249_v45 = vld [vmem:[#allocation116_spill] sm:$0xff]  ;;  %v15251_v2 = vld [vmem:[#allocation114_spill] sm:$0xff] }
0x12a2   :  { %10883 = vtanh.f32 %v14273_v36 }
0x12ac   :  { %v10884_v52 = vpop.eup %10883 }
0x12ad   :  { %v8488_v41 = vmul.f32 %v10884_v52, %v10882_v23  ;;  %v15252_v23 = vld [vmem:[#allocation73_spill] sm:$0xff] }
0x12ae   :  { %v15253_v52 = vld [vmem:[#allocation121_spill] sm:$0xff] }
0x12af   :  { %v14277_v18 = vadd.f32 %v8488_v41, %v14062_v39  ;;  %v8506_v34 = vpack.c.bf16 %v8488_v41, %v8488_v41  ;;  %v15239_v39 = vld [vmem:[#allocation79_spill] sm:$0xff]  ;;  %v15254_v41 = vld [vmem:[#allocation122_spill] sm:$0xff] }
0x12b1   :  { %v8508_v59 = vsel %vm12488_vm3, 0, %v8506_v34  ;;  %v8507_v16 = vsel %vm12488_vm3, %v8506_v34, 0  ;;  %v15255_v34 = vld [vmem:[#allocation59_spill] sm:$0xff] }
0x12b2   :  { %8541 = vmatprep.mubr.bf16.mxu1 %v8508_v59  ;;  %8582 = vmatprep.mubr.bf16.mxu0 %v8508_v59  ;;  %v15256_v59 = vld [vmem:[#allocation111_spill] sm:$0xff] }
0x12b3   :  { %8542 = vmatmul.mubr.bf16.vlgmr.msra.gmra.mrb[132].mxu1 %v8507_v16  ;;  %8583 = vmatmul.mubr.bf16.vlgmr.msra.gmra.mrb[140].mxu0 %v8507_v16  ;;  %v15257_v16 = vld [vmem:[#allocation77_spill] sm:$0xff] }
0x12b4   :  { %8640 = vmatpush1.bf16.msra.mxu1 %v14068_v32  ;;  %8681 = vmatpush1.bf16.msra.mxu0 %v14071_v4 }
0x12b5   :  { %8641 = vmatprep.subr.bf16.mxu1 %v14074_v8  ;;  %8682 = vmatprep.subr.bf16.mxu0 %v14077_v47 }
0x12b8   :  { %8642 = vmatpush1.bf16.msra.mxu1 %v14080_v44  ;;  %8683 = vmatpush1.bf16.msra.mxu0 %v14083_v13 }
0x12b9   :  { %8643 = vmatprep.subr.bf16.mxu1 %v14086_v20  ;;  %8684 = vmatprep.subr.bf16.mxu0 %v14089_v0 }
0x12bc   :  { %8644 = vmatpush1.bf16.msra.mxu1 %v14092_v14  ;;  %8685 = vmatpush1.bf16.msra.mxu0 %v14095_v9 }
0x12bd   :  { %8645 = vmatprep.subr.bf16.mxu1 %v14098_v29  ;;  %8686 = vmatprep.subr.bf16.mxu0 %v14101_v53 }
0x12c0   :  { %8646 = vmatpush1.bf16.msra.mxu1 %v14104_v15  ;;  %8687 = vmatpush1.bf16.msra.mxu0 %v14107_v27 }
0x12c1   :  { %8647 = vmatprep.subr.bf16.mxu1 %v14110_v58  ;;  %8688 = vmatprep.subr.bf16.mxu0 %v14113_v3 }
0x12c4   :  { %8648 = vmatpush1.bf16.msra.mxu1 %v14116_v35  ;;  %8689 = vmatpush1.bf16.msra.mxu0 %v14119_v11 }
0x12c5   :  { %8649 = vmatprep.subr.bf16.mxu1 %v14122_v10  ;;  %8690 = vmatprep.subr.bf16.mxu0 %v14125_v61 }
0x12c8   :  { %8650 = vmatpush1.bf16.msra.mxu1 %v14128_v28  ;;  %8691 = vmatpush1.bf16.msra.mxu0 %v14131_v30 }
0x12c9   :  { %8651 = vmatprep.subr.bf16.mxu1 %v14134_v43  ;;  %8692 = vmatprep.subr.bf16.mxu0 %v14137_v22 }
0x12cc   :  { %8652 = vmatpush1.bf16.msra.mxu1 %v14140_v5  ;;  %8693 = vmatpush1.bf16.msra.mxu0 %v14143_v57 }
0x12cd   :  { %8653 = vmatprep.subr.bf16.mxu1 %v14146_v21  ;;  %8694 = vmatprep.subr.bf16.mxu0 %v14149_v56 }
0x12d0   :  { %8654 = vmatpush1.bf16.msra.mxu1 %v14152_v63  ;;  %8695 = vmatpush1.bf16.msra.mxu0 %v14155_v50 }
0x12d1   :  { %8655 = vmatprep.subr.bf16.mxu1 %v14158_v38  ;;  %8696 = vmatprep.subr.bf16.mxu0 %v14161_v46 }
0x12d4   :  { %8656 = vmatpush1.bf16.msra.mxu1 %v14164_v55  ;;  %8697 = vmatpush1.bf16.msra.mxu0 %v14167_v1 }
0x12d5   :  { %8657 = vmatprep.subr.bf16.mxu1 %v14170_v7  ;;  %8698 = vmatprep.subr.bf16.mxu0 %v14173_v51 }
0x12d8   :  { %8658 = vmatpush1.bf16.msra.mxu1 %v14176_v19  ;;  %8699 = vmatpush1.bf16.msra.mxu0 %v14179_v60 }
0x12d9   :  { %8659 = vmatprep.subr.bf16.mxu1 %v14182_v26  ;;  %8700 = vmatprep.subr.bf16.mxu0 %v14185_v6 }
0x12dc   :  { %8660 = vmatpush1.bf16.msra.mxu1 %v15238_v31  ;;  %8701 = vmatpush1.bf16.msra.mxu0 %v15239_v39 }
0x12dd   :  { %8661 = vmatprep.subr.bf16.mxu1 %v15240_v48  ;;  %8702 = vmatprep.subr.bf16.mxu0 %v15241_v12 }
0x12e0   :  { %8662 = vmatpush1.bf16.msra.mxu1 %v15242_v49  ;;  %8703 = vmatpush1.bf16.msra.mxu0 %v15243_v40  ;;  %v15266_v40 = vld [vmem:[#allocation66_spill] sm:$0xff] }
0x12e1   :  { %8663 = vmatprep.subr.bf16.mxu1 %v15244_v42  ;;  %8704 = vmatprep.subr.bf16.mxu0 %v15245_v25  ;;  %v15264_v25 = vld [vmem:[#allocation91_spill] sm:$0xff] }
0x12e4   :  { %8664 = vmatpush1.bf16.msra.mxu1 %v15246_v62  ;;  %8705 = vmatpush1.bf16.msra.mxu0 %v15247_v24  ;;  %v15258_v24 = vld [vmem:[#allocation81_spill] sm:$0xff]  ;;  %v15263_v62 = vld [vmem:[#allocation64_spill] sm:$0xff] }
0x12e5   :  { %8665 = vmatprep.subr.bf16.mxu1 %v15248_v17  ;;  %8706 = vmatprep.subr.bf16.mxu0 %v15249_v45  ;;  %v15259_v17 = vld [vmem:[#allocation112_spill] sm:$0xff]  ;;  %v15260_v45 = vld [vmem:[#allocation119_spill] sm:$0xff] }
0x12e8   :  { %8666 = vmatpush1.bf16.msra.mxu1 %v15250_v54  ;;  %8707 = vmatpush1.bf16.msra.mxu0 %v15251_v2  ;;  %v15261_v54 = vld [vmem:[#allocation108_spill] sm:$0xff]  ;;  %v15262_v2 = vld [vmem:[#allocation62_spill] sm:$0xff] }
0x12e9   :  { %8667 = vmatprep.subr.bf16.mxu1 %v15252_v23  ;;  %8708 = vmatprep.subr.bf16.mxu0 %v15253_v52  ;;  %v8498_v23 = vrot.slane %v15262_v2, 4  ;;  %v8499_v52 = vrot.slane %v15263_v62, 4 }
0x12ec   :  { %8668 = vmatpush1.bf16.msra.mxu1 %v15254_v41  ;;  %8709 = vmatpush1.bf16.msra.mxu0 %v15255_v34  ;;  %v8502_v34 = vsel %vm3095_vm2, %v15264_v25, %v8498_v23  ;;  %v15265_v41 = vld [vmem:[#allocation92_spill] sm:$0xff]  ;;  %v15267_v25 = vld [vmem:[#allocation93_spill] sm:$0xff] }
0x12ed   :  { %8669 = vmatprep.subr.bf16.mxu1 %v15256_v59  ;;  %8710 = vmatprep.subr.bf16.mxu0 %v15257_v16  ;;  %v8503_v16 = vsel %vm3095_vm2, %v15265_v41, %v8499_v52  ;;  %v15268_v52 = vld [vmem:[#allocation63_spill] sm:$0xff] }
0x12ee   :  { %v8500_v41 = vrot.slane %v15268_v52, 4 }
0x12f0   :  { %8670 = vmatpush1.bf16.msra.mxu1 %v15258_v24  ;;  %8711 = vmatpush1.bf16.msra.mxu0 %v15259_v17 }
0x12f1   :  { %8769 = vmatprep.subr.bf16.mxu1 %v15260_v45  ;;  %8810 = vmatprep.subr.bf16.mxu0 %v15261_v54  ;;  %v8501_v45 = vrot.slane %v15266_v40, 4 }
0x12f3   :  { %v8505_v23 = vsel %vm3095_vm2, %v15267_v25, %v8501_v45 }
0x1386   :  { %v8543_v59 = vpop.f32.mrb[132].mxu1  ;;  %v8584_v24 = vpop.f32.mrb[140].mxu0 }
0x1387   :  { %v8591_v42 = vadd.f32 %v8543_v59, %v8502_v34  ;;  %v8545_v17 = vpop.f32.mrb[133].mxu1  ;;  %v8586_v49 = vpop.f32.mrb[141].mxu0  ;;  %v15269_v59 = vld [vmem:[#allocation96_spill] sm:$0xff] }
0x1388   :  { %v8592_v54 = vadd.f32 %v8545_v17, %v8503_v16  ;;  %v8547_v12 = vpop.f32.mrb[134].mxu1  ;;  %v8588_v2 = vpop.f32.mrb[142].mxu0  ;;  %v8594_v34 = vadd.f32 %v8586_v49, %v8505_v23  ;;  %v8504_v40 = vsel %vm3095_vm2, %v15269_v59, %v8500_v41 }
0x1389   :  { %v10064_v48 = vmul.f32 -1.442695, %v8591_v42  ;;  %v8548_v62 = vpop.f32.mrb[135].mxu1  ;;  %v8589_v39 = vpop.f32.mrb[143].mxu0  ;;  %v8593_v12 = vadd.f32 %v8584_v24, %v8504_v40 }
0x138a   :  { %v10065_v31 = vmul.f32 -1.442695, %v8592_v54  ;;  %v10066_v17 = vmul.f32 -1.442695, %v8594_v34 }
0x138b   :  { %10885 = vpow2.f32 %v10064_v48 }
0x138c   :  { %10887 = vpow2.f32 %v10065_v31 }
0x138d   :  { %10889 = vpow2.f32 %v10066_v17 }
0x138e   :  { %10891 = vtanh.f32 %v8593_v12 }
0x1395   :  { %v10886_v16 = vpop.eup %10885 }
0x1396   :  { %v10888_v42 = vpop.eup %10887  ;;  %v8598_v2 = vadd.f32 1.0, %v10886_v16 }
0x1397   :  { %v8604_v39 = vadd.f32 1.0, %v10888_v42  ;;  %v10890_v48 = vpop.eup %10889 }
0x1398   :  { %10893 = vrcp.f32 %v8598_v2  ;;  %v10892_v45 = vpop.eup %10891  ;;  %v8611_v49 = vadd.f32 1.0, %v10890_v48  ;;  %v15297_v2 = vld [vmem:[#allocation98_spill] sm:$0xff]  ;;  %v15298_v48 = vld [vmem:[#allocation67_spill] sm:$0xff] }
0x1399   :  { %10895 = vrcp.f32 %v8604_v39 }
0x139a   :  { %10897 = vrcp.f32 %v8611_v49 }
0x13a2   :  { %v10894_v54 = vpop.eup %10893 }
0x13a3   :  { %v10896_v62 = vpop.eup %10895  ;;  %v8615_v31 = vmul.f32 %v10894_v54, %v10892_v45  ;;  %v8630_v45 = vrot.slane %v15298_v48, 4 }
0x13a4   :  { %v8614_v25 = vmul.f32 %v10896_v62, %v14273_v36  ;;  %v10898_v24 = vpop.eup %10897  ;;  %v15299_v62 = vld [vmem:[#allocation95_spill] sm:$0xff] }
0x13a6   :  { %v14364_v23 = vadd.f32 %v8615_v31, %v8614_v25  ;;  %v8634_v31 = vsel %vm3095_vm2, %v15299_v62, %v8630_v45  ;;  %v10073_v45 = vld [vmem:[%s14534_s11] ss:$0 sm:$0xff] }
0x13a8   :  { %10899 = vtanh.f32 %v14364_v23 }
0x13b2   :  { %v10900_v52 = vpop.eup %10899 }
0x13b3   :  { %v8618_v41 = vmul.f32 %v10900_v52, %v10898_v24 }
0x13b5   :  { %v14368_v34 = vadd.f32 %v8618_v41, %v14277_v18  ;;  %v8636_v59 = vpack.c.bf16 %v8618_v41, %v8618_v41 }
0x13b7   :  { %v8638_v40 = vsel %vm12488_vm3, 0, %v8636_v59  ;;  %v8637_v17 = vsel %vm12488_vm3, %v8636_v59, 0 }
0x13b8   :  { %8671 = vmatprep.mubr.bf16.mxu1 %v8638_v40  ;;  %8712 = vmatprep.mubr.bf16.mxu0 %v8638_v40 }
0x13b9   :  { %8672 = vmatmul.mubr.bf16.vlgmr.msra.gmra.mrb[136].mxu1 %v8637_v17  ;;  %8713 = vmatmul.mubr.bf16.vlgmr.msra.gmra.mrb[144].mxu0 %v8637_v17 }
0x13ba   :  { %8770 = vmatpush1.bf16.msra.mxu1 %v14068_v32  ;;  %8811 = vmatpush1.bf16.msra.mxu0 %v14071_v4  ;;  %v15270_v32 = vld [vmem:[#allocation55_spill] sm:$0xff] }
0x13bb   :  { %8771 = vmatprep.subr.bf16.mxu1 %v14074_v8  ;;  %8812 = vmatprep.subr.bf16.mxu0 %v14077_v47  ;;  %v15271_v4 = vld [vmem:[#allocation79_spill] sm:$0xff]  ;;  %v15272_v8 = vld [vmem:[#allocation120_spill] sm:$0xff] }
0x13bc   :  { %v15273_v47 = vld [vmem:[#allocation80_spill] sm:$0xff] }
0x13be   :  { %8772 = vmatpush1.bf16.msra.mxu1 %v14080_v44  ;;  %8813 = vmatpush1.bf16.msra.mxu0 %v14083_v13  ;;  %v15274_v44 = vld [vmem:[#allocation118_spill] sm:$0xff] }
0x13bf   :  { %8773 = vmatprep.subr.bf16.mxu1 %v14086_v20  ;;  %8814 = vmatprep.subr.bf16.mxu0 %v14089_v0  ;;  %v15275_v13 = vld [vmem:[#allocation78_spill] sm:$0xff]  ;;  %v15276_v20 = vld [vmem:[#allocation87_spill] sm:$0xff]  ;;  %v15277_v0 = vld [vmem:[#allocation113_spill] sm:$0xff] }
0x13c2   :  { %8774 = vmatpush1.bf16.msra.mxu1 %v14092_v14  ;;  %8815 = vmatpush1.bf16.msra.mxu0 %v14095_v9  ;;  %v15278_v14 = vld [vmem:[#allocation115_spill] sm:$0xff]  ;;  %v15279_v9 = vld [vmem:[#allocation82_spill] sm:$0xff] }
0x13c3   :  { %8775 = vmatprep.subr.bf16.mxu1 %v14098_v29  ;;  %8816 = vmatprep.subr.bf16.mxu0 %v14101_v53  ;;  %v15280_v29 = vld [vmem:[#allocation75_spill] sm:$0xff]  ;;  %v15281_v53 = vld [vmem:[#allocation116_spill] sm:$0xff] }
0x13c6   :  { %8776 = vmatpush1.bf16.msra.mxu1 %v14104_v15  ;;  %8817 = vmatpush1.bf16.msra.mxu0 %v14107_v27  ;;  %v15282_v15 = vld [vmem:[#allocation76_spill] sm:$0xff]  ;;  %v15283_v27 = vld [vmem:[#allocation114_spill] sm:$0xff] }
0x13c7   :  { %8777 = vmatprep.subr.bf16.mxu1 %v14110_v58  ;;  %8818 = vmatprep.subr.bf16.mxu0 %v14113_v3  ;;  %v15284_v58 = vld [vmem:[#allocation73_spill] sm:$0xff] }
0x13c8   :  { %v15285_v3 = vld [vmem:[#allocation121_spill] sm:$0xff] }
0x13ca   :  { %8778 = vmatpush1.bf16.msra.mxu1 %v14116_v35  ;;  %8819 = vmatpush1.bf16.msra.mxu0 %v14119_v11  ;;  %v15286_v35 = vld [vmem:[#allocation122_spill] sm:$0xff]  ;;  %v15287_v11 = vld [vmem:[#allocation59_spill] sm:$0xff] }
0x13cb   :  { %8779 = vmatprep.subr.bf16.mxu1 %v14122_v10  ;;  %8820 = vmatprep.subr.bf16.mxu0 %v14125_v61  ;;  %v15288_v10 = vld [vmem:[#allocation111_spill] sm:$0xff]  ;;  %v15289_v61 = vld [vmem:[#allocation77_spill] sm:$0xff] }
0x13ce   :  { %8780 = vmatpush1.bf16.msra.mxu1 %v14128_v28  ;;  %8821 = vmatpush1.bf16.msra.mxu0 %v14131_v30  ;;  %v15290_v28 = vld [vmem:[#allocation81_spill] sm:$0xff]  ;;  %v15291_v30 = vld [vmem:[#allocation112_spill] sm:$0xff] }
0x13cf   :  { %8781 = vmatprep.subr.bf16.mxu1 %v14134_v43  ;;  %8822 = vmatprep.subr.bf16.mxu0 %v14137_v22  ;;  %v11266_v43 = vmov 0.0   ;;  %v15292_v22 = vld [vmem:[#allocation65_spill] sm:$0xff] }
0x13d2   :  { %8782 = vmatpush1.bf16.msra.mxu1 %v14140_v5  ;;  %8823 = vmatpush1.bf16.msra.mxu0 %v14143_v57  ;;  %v8628_v5 = vrot.slane %v15292_v22, 4  ;;  %v15293_v57 = vld [vmem:[#allocation68_spill] sm:$0xff] }
0x13d3   :  { %8783 = vmatprep.subr.bf16.mxu1 %v14146_v21  ;;  %8824 = vmatprep.subr.bf16.mxu0 %v14149_v56  ;;  %v8629_v21 = vrot.slane %v15293_v57, 4  ;;  %v15294_v56 = vld [vmem:[#allocation94_spill] sm:$0xff] }
0x13d6   :  { %8784 = vmatpush1.bf16.msra.mxu1 %v14152_v63  ;;  %8825 = vmatpush1.bf16.msra.mxu0 %v14155_v50  ;;  %v8632_v63 = vsel %vm3095_vm2, %v15294_v56, %v8628_v5  ;;  %v15295_v50 = vld [vmem:[#allocation97_spill] sm:$0xff] }
0x13d7   :  { %8785 = vmatprep.subr.bf16.mxu1 %v14158_v38  ;;  %8826 = vmatprep.subr.bf16.mxu0 %v14161_v46  ;;  %v8633_v38 = vsel %vm3095_vm2, %v15295_v50, %v8629_v21  ;;  %v15302_v5 = vld [vmem:[#allocation105_spill] sm:$0xff]  ;;  %v15303_v21 = vld [vmem:[#allocation99_spill] sm:$0xff] }
0x13d8   :  { %v8759_v57 = vrot.slane %v15302_v5, 4 }
0x13da   :  { %8786 = vmatpush1.bf16.msra.mxu1 %v14164_v55  ;;  %8827 = vmatpush1.bf16.msra.mxu0 %v14167_v1 }
0x13db   :  { %8787 = vmatprep.subr.bf16.mxu1 %v14170_v7  ;;  %8828 = vmatprep.subr.bf16.mxu0 %v14173_v51  ;;  %v15296_v51 = vld [vmem:[#allocation69_spill] sm:$0xff] }
0x13de   :  { %8788 = vmatpush1.bf16.msra.mxu1 %v14176_v19  ;;  %8829 = vmatpush1.bf16.msra.mxu0 %v14179_v60  ;;  %v8631_v19 = vrot.slane %v15296_v51, 4 }
0x13df   :  { %8789 = vmatprep.subr.bf16.mxu1 %v14182_v26  ;;  %8830 = vmatprep.subr.bf16.mxu0 %v14185_v6 }
0x13e0   :  { %v8635_v39 = vsel %vm3095_vm2, %v15297_v2, %v8631_v19 }
0x13e2   :  { %8790 = vmatpush1.bf16.msra.mxu1 %v15270_v32  ;;  %8831 = vmatpush1.bf16.msra.mxu0 %v15271_v4 }
0x13e3   :  { %8791 = vmatprep.subr.bf16.mxu1 %v15272_v8  ;;  %8832 = vmatprep.subr.bf16.mxu0 %v15273_v47 }
0x13e6   :  { %8792 = vmatpush1.bf16.msra.mxu1 %v15274_v44  ;;  %8833 = vmatpush1.bf16.msra.mxu0 %v15275_v13 }
0x13e7   :  { %8793 = vmatprep.subr.bf16.mxu1 %v15276_v20  ;;  %8834 = vmatprep.subr.bf16.mxu0 %v15277_v0  ;;  %v11267_v20 = vmov 65535  }
0x13e8   :  { %v8899_v0 = vsel %vm8897_vm4, 4294967295, %v11267_v20 }
0x13ea   :  { %8794 = vmatpush1.bf16.msra.mxu1 %v15278_v14  ;;  %8835 = vmatpush1.bf16.msra.mxu0 %v15279_v9 }
0x13eb   :  { %8795 = vmatprep.subr.bf16.mxu1 %v15280_v29  ;;  %8836 = vmatprep.subr.bf16.mxu0 %v15281_v53  ;;  %v8885_v53 = vld [vmem:[#allocation17] sm:$0x7] }
0x13ee   :  { %8796 = vmatpush1.bf16.msra.mxu1 %v15282_v15  ;;  %8837 = vmatpush1.bf16.msra.mxu0 %v15283_v27  ;;  %v8900_v15 = vsel %vm8898_vm5, %v8899_v0, 0 }
0x13ef   :  { %8797 = vmatprep.subr.bf16.mxu1 %v15284_v58  ;;  %8838 = vmatprep.subr.bf16.mxu0 %v15285_v3  ;;  %v8902_v3 = vand.u32 %v8900_v15, %v8885_v53 }
0x13f2   :  { %8798 = vmatpush1.bf16.msra.mxu1 %v15286_v35  ;;  %8839 = vmatpush1.bf16.msra.mxu0 %v15287_v11 }
0x13f3   :  { %8799 = vmatprep.subr.bf16.mxu1 %v15288_v10  ;;  %8840 = vmatprep.subr.bf16.mxu0 %v15289_v61  ;;  %v10802_v10 = vld [vmem:[#allocation19 + $0x8] sm:$0xff]   ;;  %v10803_v61 = vld [vmem:[#allocation19 + $0x10] sm:$0xff]  }
0x13f6   :  { %8800 = vmatpush1.bf16.msra.mxu1 %v15290_v28  ;;  %8841 = vmatpush1.bf16.msra.mxu0 %v15291_v30  ;;  %v10804_v28 = vld [vmem:[#allocation19 + $0x18] sm:$0xff]   ;;  %v15301_v30 = vld [vmem:[#allocation103_spill] sm:$0xff] }
0x13f7   :  { %10145 = vmatprep.subr.bf16.mxu1 %v11266_v43  ;;  %10151 = vmatprep.subr.bf16.mxu0 %v11266_v43  ;;  %v8758_v22 = vrot.slane %v15301_v30, 4 }
0x13f9   :  { %v8762_v56 = vsel %vm3095_vm2, %v15303_v21, %v8758_v22 }
0x148c   :  { %v8673_v46 = vpop.f32.mrb[136].mxu1  ;;  %v8714_v55 = vpop.f32.mrb[144].mxu0 }
0x148d   :  { %v8721_v1 = vadd.f32 %v8673_v46, %v8632_v63  ;;  %v8675_v7 = vpop.f32.mrb[137].mxu1  ;;  %v8716_v60 = vpop.f32.mrb[145].mxu0  ;;  %v8723_v25 = vadd.f32 %v8714_v55, %v8634_v31  ;;  %v15304_v63 = vld [vmem:[#allocation101_spill] sm:$0xff] }
0x148e   :  { %v8722_v26 = vadd.f32 %v8675_v7, %v8633_v38  ;;  %v8677_v6 = vpop.f32.mrb[138].mxu1  ;;  %v8718_v36 = vpop.f32.mrb[146].mxu0  ;;  %v8724_v54 = vadd.f32 %v8716_v60, %v8635_v39  ;;  %v8763_v50 = vsel %vm3095_vm2, %v15304_v63, %v8759_v57  ;;  %v15305_v7 = vld [vmem:[#allocation106_spill] sm:$0xff]  ;;  %v15307_v39 = vld [vmem:[#allocation104_spill] sm:$0xff]  ;;  %v15309_v57 = vld [vmem:[#allocation47_spill] sm:$0xff] }
0x148f   :  { %v10067_v18 = vmul.f32 -1.442695, %v8721_v1  ;;  %v8678_v12 = vpop.f32.mrb[139].mxu1  ;;  %v8719_v16 = vpop.f32.mrb[147].mxu0  ;;  %v8761_v51 = vrot.slane %v15305_v7, 4  ;;  %v8760_v48 = vrot.slane %v15307_v39, 4 }
0x1490   :  { %v10068_v42 = vmul.f32 -1.442695, %v8722_v26  ;;  %v10069_v49 = vmul.f32 -1.442695, %v8724_v54 }
0x1491   :  { %10901 = vpow2.f32 %v10067_v18 }
0x1492   :  { %10903 = vpow2.f32 %v10068_v42  ;;  %v15306_v42 = vld [vmem:[#allocation102_spill] sm:$0xff] }
0x1493   :  { %10905 = vpow2.f32 %v10069_v49  ;;  %v8765_v2 = vsel %vm3095_vm2, %v15306_v42, %v8761_v51 }
0x1494   :  { %10907 = vtanh.f32 %v8723_v25  ;;  %v15308_v25 = vld [vmem:[#allocation100_spill] sm:$0xff] }
0x149b   :  { %v10902_v24 = vpop.eup %10901 }
0x149c   :  { %v10904_v52 = vpop.eup %10903  ;;  %v8728_v41 = vadd.f32 1.0, %v10902_v24  ;;  %v8764_v24 = vsel %vm3095_vm2, %v15308_v25, %v8760_v48 }
0x149d   :  { %v8734_v59 = vadd.f32 1.0, %v10904_v52  ;;  %v10906_v40 = vpop.eup %10905 }
0x149e   :  { %10909 = vrcp.f32 %v8728_v41  ;;  %v10908_v17 = vpop.eup %10907  ;;  %v8741_v47 = vadd.f32 1.0, %v10906_v40 }
0x149f   :  { %10911 = vrcp.f32 %v8734_v59 }
0x14a0   :  { %10913 = vrcp.f32 %v8741_v47 }
0x14a8   :  { %v10910_v32 = vpop.eup %10909 }
0x14a9   :  { %v10912_v4 = vpop.eup %10911  ;;  %v8745_v8 = vmul.f32 %v10910_v32, %v10908_v17 }
0x14aa   :  { %v8744_v44 = vmul.f32 %v10912_v4, %v14364_v23  ;;  %v10914_v14 = vpop.eup %10913 }
0x14ac   :  { %v14455_v13 = vadd.f32 %v8745_v8, %v8744_v44 }
0x14ae   :  { %10915 = vtanh.f32 %v14455_v13 }
0x14b8   :  { %v10916_v9 = vpop.eup %10915 }
0x14b9   :  { %v8748_v29 = vmul.f32 %v10916_v9, %v10914_v14 }
0x14bb   :  { %v14459_v27 = vadd.f32 %v8748_v29, %v14368_v34  ;;  %v8766_v58 = vpack.c.bf16 %v8748_v29, %v8748_v29  ;;  %v8883_v34 = vld [vmem:[%s15300_s28] sm:$0xff] }
0x14bc   :  { %v8884_v11 = vpack.c.bf16 %v8883_v34, %v8883_v34 }
0x14bd   :  { %v8768_v23 = vsel %vm12488_vm3, 0, %v8766_v58  ;;  %v8767_v35 = vsel %vm12488_vm3, %v8766_v58, 0 }
0x14be   :  { %8801 = vmatprep.mubr.bf16.mxu1 %v8768_v23  ;;  %8842 = vmatprep.mubr.bf16.mxu0 %v8768_v23 }
0x14bf   :  { %8802 = vmatmul.mubr.bf16.vlgmr.msra.gmra.mrb[140].mxu1 %v8767_v35  ;;  %8843 = vmatmul.mubr.bf16.vlgmr.msra.gmra.mrb[148].mxu0 %v8767_v35 }
0x14c0   :  { %10146 = vmatpush3.bf16.msra.mxu1 %v8902_v3  ;;  %10147 = vmatprep.mubr.msk.bf16.mxu1 %vm11268_vm6, %v11266_v43 }
0x14c1   :  { %10159 = vmatprep.mubr.msk.bf16.mxu0 %vm11268_vm6, %v11266_v43  ;;  %10152 = vmatpush3.bf16.msra.mxu0 %v10801_v33 }
0x14c2   :  { %10153 = vmatprep.subr.bf16.mxu0 %v11266_v43  ;;  %10109 = vmatprep.subr.bf16.mxu1 %v15309_v57 }
0x14c5   :  { %10154 = vmatpush3.bf16.msra.mxu0 %v10802_v10  ;;  %v10075_v10 = vld [vmem:[#allocation20] ss:$0 sm:$0xff] }
0x14c6   :  { %10155 = vmatprep.subr.bf16.mxu0 %v11266_v43 }
0x14c7   :  { %10148 = vmatmul.mubr.msk.bf16.vlgmr.msra.gmra.mrb[144].mxu1 %vm8893_vm7, %v8884_v11 }
0x14c9   :  { %10156 = vmatpush3.bf16.msra.mxu0 %v10803_v61 }
0x14ca   :  { %10157 = vmatprep.subr.bf16.mxu0 %v11266_v43 }
0x14cd   :  { %10158 = vmatpush3.bf16.msra.mxu0 %v10804_v28 }
0x1592   :  { %v8803_v38 = vpop.f32.mrb[140].mxu1  ;;  %v8844_v46 = vpop.f32.mrb[148].mxu0 }
0x1593   :  { %v8851_v55 = vadd.f32 %v8803_v38, %v8762_v56  ;;  %v8805_v1 = vpop.f32.mrb[141].mxu1  ;;  %v8846_v19 = vpop.f32.mrb[149].mxu0  ;;  %v8853_v17 = vadd.f32 %v8844_v46, %v8764_v24 }
0x1594   :  { %v8852_v60 = vadd.f32 %v8805_v1, %v8763_v50  ;;  %v8807_v26 = vpop.f32.mrb[142].mxu1  ;;  %v8848_v6 = vpop.f32.mrb[150].mxu0  ;;  %v8854_v54 = vadd.f32 %v8846_v19, %v8765_v2 }
0x1595   :  { %v10070_v36 = vmul.f32 -1.442695, %v8851_v55  ;;  %v8808_v18 = vpop.f32.mrb[143].mxu1  ;;  %v8849_v12 = vpop.f32.mrb[151].mxu0 }
0x1596   :  { %v10071_v16 = vmul.f32 -1.442695, %v8852_v60  ;;  %v10072_v40 = vmul.f32 -1.442695, %v8854_v54 }
0x1597   :  { %10917 = vpow2.f32 %v10070_v36 }
0x1598   :  { %10919 = vpow2.f32 %v10071_v16 }
0x1599   :  { %10921 = vpow2.f32 %v10072_v40 }
0x159a   :  { %v8938_v62 = vpop.f32.mrb[144].mxu1  ;;  %10923 = vtanh.f32 %v8853_v17 }
0x159b   :  { %v8939_v31 = vadd.f32 %v10073_v45, %v8938_v62  ;;  %v10149_v49 = vpop.f32.mrb[145].mxu1 }
0x159c   :  { %v8941_v52 = vpop.f32.mrb[146].mxu1 }
0x159d   :  { %v8944_v41 = vmax.f32 %v8939_v31, 0.0  ;;  %v10150_v59 = vpop.f32.mrb[147].mxu1 }
0x159f   :  { %v8945_v32 = vpack.c.bf16 %v8944_v41, %v8944_v41 }
0x15a1   :  { %v10918_v4 = vpop.eup %10917  ;;  %10160 = vmatmul.mubr.msk.bf16.vlgmr.msra.gmra.mrb[152].mxu0 %vm8985_vm8, %v8945_v32 }
0x15a2   :  { %v10920_v8 = vpop.eup %10919  ;;  %v8858_v47 = vadd.f32 1.0, %v10918_v4 }
0x15a3   :  { %v8864_v44 = vadd.f32 1.0, %v10920_v8  ;;  %v10922_v20 = vpop.eup %10921 }
0x15a4   :  { %10925 = vrcp.f32 %v8858_v47  ;;  %v10924_v37 = vpop.eup %10923  ;;  %v8871_v29 = vadd.f32 1.0, %v10922_v20 }
0x15a5   :  { %10927 = vrcp.f32 %v8864_v44 }
0x15a6   :  { %10929 = vrcp.f32 %v8871_v29 }
0x15ae   :  { %v10926_v0 = vpop.eup %10925 }
0x15af   :  { %v10928_v14 = vpop.eup %10927  ;;  %v8875_v9 = vmul.f32 %v10926_v0, %v10924_v37 }
0x15b0   :  { %v8874_v53 = vmul.f32 %v10928_v14, %v14455_v13  ;;  %v10930_v58 = vpop.eup %10929 }
0x15b2   :  { %v8876_v15 = vadd.f32 %v8875_v9, %v8874_v53 }
0x15b4   :  { %10931 = vtanh.f32 %v8876_v15 }
0x15be   :  { %v10932_v3 = vpop.eup %10931 }
0x15bf   :  { %v8878_v23 = vmul.f32 %v10932_v3, %v10930_v58 }
0x15c1   :  { %v8879_v35 = vadd.f32 %v8878_v23, %v14459_v27 }
0x15c3   :  { %v8880_v34 = vrot.slane %v8879_v35, 4  ;;  %v8881_v11 = vmul.f32 0.125, %v8879_v35 }
0x15c5   :  { %v8882_v33 = vmul.f32 0.125, %v8880_v34 }
0x1674   :  { %v9023_v61 = vpop.f32.mrb[152].mxu0 }
0x1675   :  { %v9024_v28 = vadd.f32 %v10075_v10, %v9023_v61  ;;  %v10161_v30 = vpop.f32.mrb[153].mxu0 }
0x1676   :  { %v9026_v22 = vpop.f32.mrb[154].mxu0 }
0x1677   :  { %v10162_v5 = vpop.f32.mrb[155].mxu0 }
0x1678   :  { %11237 = dma.done.wait [#allocation8 + $0x2], 2048 }
0x1679   :  { %11238 = vsyncadd [#allocation8 + $0x2], 4294965248  ;;  %10163 = vmatprep.subr.bf16.mxu0 %v11266_v43  ;;  %v9033_v13 = vpack.c.bf16 %v8882_v33, %v8882_v33  ;;  %v15310_v21 = vld [vmem:[#allocation39_spill] sm:$0xff]  ;;  %10171 = vmatprep.mubr.msk.bf16.mxu0 %vm11268_vm6, %v11266_v43  ;;  %v15311_v27 = vld [vmem:[#allocation48_spill] sm:$0xff]  ;;  %v9050_v6 = vpack.c.bf16 %v9024_v28, %v9024_v28  ;;  %v9032_v42 = vpack.c.bf16 %v8881_v11, %v8881_v11 }
0x167a   :  { %10110 = vmatpush3.bf16.msra.mxu1 %v15310_v21  ;;  %v15312_v56 = vld [vmem:[#allocation40_spill] sm:$0xff]  ;;  %v15313_v63 = vld [vmem:[#allocation49_spill] sm:$0xff]  ;;  %v10997_v50 = vld [vmem:[#allocation22] sm:$0xff]  }
0x167b   :  { %10111 = vmatprep.subr.bf16.mxu1 %v15311_v27  ;;  %9158 = vmatprep.mubr.bf16.mxu1 %v9033_v13  ;;  %v15314_v38 = vld [vmem:[#allocation41_spill] sm:$0xff]  ;;  %v10998_v46 = vld [vmem:[#allocation22 + $0x8] sm:$0xff]   ;;  %v15315_v55 = vld [vmem:[#allocation50_spill] sm:$0xff] }
0x167c   :  { %10164 = vmatpush3.bf16.msra.mxu0 %v10997_v50  ;;  %v15316_v1 = vld [vmem:[#allocation42_spill] sm:$0xff]  ;;  %v10999_v7 = vld [vmem:[#allocation22 + $0x10] sm:$0xff]   ;;  %v15317_v51 = vld [vmem:[#allocation51_spill] sm:$0xff] }
0x167d   :  { %10165 = vmatprep.subr.bf16.mxu0 %v11266_v43  ;;  %v15318_v19 = vld [vmem:[#allocation43_spill] sm:$0xff]  ;;  %v11000_v60 = vld [vmem:[#allocation22 + $0x18] sm:$0xff]   ;;  %v15319_v26 = vld [vmem:[#allocation52_spill] sm:$0xff] }
0x167e   :  { %10112 = vmatpush3.bf16.msra.mxu1 %v15312_v56  ;;  %v15320_v36 = vld [vmem:[#allocation44_spill] sm:$0xff]  ;;  %v15321_v18 = vld [vmem:[#allocation53_spill] sm:$0xff]  ;;  %v15323_v16 = vld [vmem:[#allocation54_spill] sm:$0xff] }
0x167f   :  { %10113 = vmatprep.subr.bf16.mxu1 %v15313_v63  ;;  %v15322_v12 = vld [vmem:[#allocation45_spill] sm:$0xff]  ;;  %v15324_v2 = vld [vmem:[#allocation46_spill] sm:$0xff] }
0x1680   :  { %10166 = vmatpush3.bf16.msra.mxu0 %v10998_v46  ;;  %v10086_v25 = vld [vmem:[#allocation23] ss:$0 sm:$0xff] }
0x1681   :  { %10167 = vmatprep.subr.bf16.mxu0 %v11266_v43 }
0x1682   :  { %10114 = vmatpush3.bf16.msra.mxu1 %v15314_v38 }
0x1683   :  { %10115 = vmatprep.subr.bf16.mxu1 %v15315_v55 }
0x1684   :  { %10168 = vmatpush3.bf16.msra.mxu0 %v10999_v7 }
0x1685   :  { %10169 = vmatprep.subr.bf16.mxu0 %v11266_v43 }
0x1686   :  { %10116 = vmatpush3.bf16.msra.mxu1 %v15316_v1 }
0x1687   :  { %10117 = vmatprep.subr.bf16.mxu1 %v15317_v51 }
0x1688   :  { %10170 = vmatpush3.bf16.msra.mxu0 %v11000_v60 }
0x168a   :  { %10118 = vmatpush3.bf16.msra.mxu1 %v15318_v19 }
0x168b   :  { %10119 = vmatprep.subr.bf16.mxu1 %v15319_v26  ;;  %10172 = vmatmul.mubr.msk.bf16.vlgmr.msra.gmra.mrb[156].mxu0 %vm8985_vm8, %v9050_v6 }
0x168e   :  { %10120 = vmatpush3.bf16.msra.mxu1 %v15320_v36 }
0x168f   :  { %10121 = vmatprep.subr.bf16.mxu1 %v15321_v18 }
0x1692   :  { %10122 = vmatpush3.bf16.msra.mxu1 %v15322_v12 }
0x1693   :  { %10123 = vmatprep.subr.bf16.mxu1 %v15323_v16 }
0x1696   :  { %10124 = vmatpush3.bf16.msra.mxu1 %v15324_v2 }
0x1699   :  { %9159 = vmatmul.mubr.bf16.vlgmr.msra.gmra.mrb[148].mxu1 %v9032_v42 }
0x175e   :  { %v9120_v39 = vpop.f32.mrb[156].mxu0 }
0x175f   :  { %v10173_v48 = vpop.f32.mrb[157].mxu0 }
0x1760   :  { %v9123_v45 = vpop.f32.mrb[158].mxu0 }
0x1761   :  { %v10174_v43 = vpop.f32.mrb[159].mxu0 }
0x176c   :  { %v10125_v54 = vpop.f32.mrb[148].mxu1 }
0x176d   :  { %v10126_v62 = vpop.f32.mrb[149].mxu1 }
0x176e   :  { %v10127_v31 = vadd.f32 %v10126_v62, %v10125_v54  ;;  %v10128_v49 = vpop.f32.mrb[150].mxu1 }
0x176f   :  { %v10129_v24 = vpop.f32.mrb[151].mxu1 }
0x1770   :  { %v9161_v52 = vadd.f32 %v10127_v31, %v9120_v39 }
0x1772   :  { %v9173_v41 = vadd.f32 %v10086_v25, %v9161_v52 }
0x1774   :  { %9174 = vst [vmem:[%s14542_s19] sm:$0xff] %v9173_v41 }
0x1775   :  { %9179 = vsyncpa [#allocation10], 1 }
0x1776   :  { %9180 = vsyncpa [#allocation12], 1 }
0x1777   :  { %9181 = vsyncpa [#allocation15], 1 }
0x1778   :  { %9182 = vsyncpa [#allocation18], 1 }
0x1779   :  { %9183 = vsyncpa [#allocation21], 1 }
0x177a   :  { %9184 = vsyncpa [#allocation24], 1 }
0x177b   :  { %9185 = vsyncmov [#allocation8] }
0x177e   :  { %s9186_s15 = vpop.sfrf %9185 }
0x177f   :  { %p10087_p10 = scmp.ne.s32.totalorder %s9186_s15, 0 }
0x1781   :  { %9190 = shalt.err (%p10087_p10)  }
0x1782   :  { %9192 = vsyncmov [#allocation8 + $0x1] }
0x1785   :  { %s9193_s0 = vpop.sfrf %9192 }
0x1786   :  { %p10088_p11 = scmp.ne.s32.totalorder %s9193_s0, 0 }
0x1788   :  { %9197 = shalt.err (%p10088_p11)  }
0x1789   :  { %9199 = vsyncmov [#allocation8 + $0x2] }
0x178c   :  { %s9200_s12 = vpop.sfrf %9199 }
0x178d   :  { %p10089_p12 = scmp.ne.s32.totalorder %s9200_s12, 0 }
0x178f   :  { %9204 = shalt.err (%p10089_p12)  }

</bundles_post_ra>
